<compile_context>
chip_gen: v7x
topology: tpu7x:2x2x1
jax: 0.10.0
libtpu: 0.0.40
codegen_flags: <defaults>
</compile_context>

<pallas_src>
import functools

import jax
import jax.numpy as jnp
from jax.experimental import pallas as pl
from jax.experimental.pallas import tpu as pltpu

_LANE = 128


def _round_up(v, m):
    return (v + m - 1) // m * m


def _fill_taps(tap_ref, get_tap, n_pix, c):
    """Assemble the (n_pix, 9*c) im2col tap matrix for a 3x3 conv."""
    for idx in range(9):
        kh, kw = idx // 3, idx % 3
        tap_ref[:, idx * c:(idx + 1) * c] = get_tap(kh, kw).reshape(n_pix, c)


def _conv1_stats_kernel(x_ref, w1_ref, stats_ref, tap_ref):
    # x_ref    : (1, H+2, W+2, Cin)  bf16  zero-padded input (one image)
    # w1_ref   : (9*Cin, Cmid_p)     bf16  im2col conv1 weights (lane-padded out dim)
    # stats_ref: (1, 2, Cmid_p)      f32   per-image [sum, sum_sq] over H*W
    # tap_ref  : (H*W, 9*Cin)        bf16  VMEM scratch for the im2col tap matrix
    _, hp, wp, cin = x_ref.shape
    h_dim, w_dim = hp - 2, wp - 2

    _fill_taps(tap_ref,
               lambda kh, kw: x_ref[0, kh:kh + h_dim, kw:kw + w_dim, :],
               h_dim * w_dim, cin)

    # Single MXU matmul (K = 9*Cin), f32 accumulation.
    y = jnp.dot(tap_ref[...], w1_ref[...],
                preferred_element_type=jnp.float32)          # (H*W, Cmid_p)

    # Per-image partial BN sums (finalized across N in the wrapper).
    stats_ref[0, 0:1, :] = jnp.sum(y, axis=0, keepdims=True)
    stats_ref[0, 1:2, :] = jnp.sum(y * y, axis=0, keepdims=True)


def _fused_block_kernel(x_ref, w1_ref, scale_ref, shift_ref, w2_ref, out_ref,
                        tap1_ref, hpad_ref, tap2_ref, *, stride):
    # x_ref    : (1, H+2, W+2, Cin)   bf16
    # w1_ref   : (9*Cin, Cmid_p)      bf16
    # scale_ref/shift_ref : (1, Cmid_p) f32  folded BN affine (padded cols zero)
    # w2_ref   : (9*Cmid, Cout_p)     bf16  im2col conv2 weights
    # out_ref  : (1, Ho, Wo, Cout_p)  f32
    # tap1_ref : (H*W, 9*Cin)         bf16 scratch
    # hpad_ref : (H+2, W+2, Cmid)     bf16 scratch (zero-padded normalized act)
    # tap2_ref : (Ho*Wo, 9*Cmid)      bf16 scratch
    _, hp, wp, cin = x_ref.shape
    h_dim, w_dim = hp - 2, wp - 2
    cmid = hpad_ref.shape[-1]
    cout_p = w2_ref.shape[1]
    ho, wo = h_dim // stride, w_dim // stride

    # --- conv1 (recomputed; the activation never touches HBM) ---
    _fill_taps(tap1_ref,
               lambda kh, kw: x_ref[0, kh:kh + h_dim, kw:kw + w_dim, :],
               h_dim * w_dim, cin)
    y = jnp.dot(tap1_ref[...], w1_ref[...],
                preferred_element_type=jnp.float32)          # (H*W, Cmid_p) f32

    # --- fused BN-apply + ReLU, cast to bf16 for the second MXU pass ---
    h = jnp.maximum(y * scale_ref[...] + shift_ref[...], 0.0)
    h = h.astype(jnp.bfloat16)

    # Zero-pad inside VMEM.  Zeroed every step (cheap) so the kernel stays
    # correct when the "parallel" grid axis is sharded across TensorCores.
    hpad_ref[...] = jnp.zeros_like(hpad_ref)
    hpad_ref[1:h_dim + 1, 1:w_dim + 1, :] = (
        h[:, :cmid].reshape(h_dim, w_dim, cmid))

    # --- conv2: im2col over the padded activation (subsampled for stride>1) ---
    def get_tap2(kh, kw):
        tap = hpad_ref[kh:kh + stride * ho, kw:kw + stride * wo, :]
        if stride > 1:
            tap = tap.reshape(ho, stride, stride * wo, cmid)[:, 0]
            tap = tap.reshape(ho, wo, stride, cmid)[:, :, 0]
        return tap

    _fill_taps(tap2_ref, get_tap2, ho * wo, cmid)
    acc = jnp.dot(tap2_ref[...], w2_ref[...],
                  preferred_element_type=jnp.float32)        # (Ho*Wo, Cout_p)
    out_ref[0] = acc.reshape(ho, wo, cout_p).astype(out_ref.dtype)


def basic_block_forward(x_nchw, params, stride=1, eps=1e-5):
    """Pallas implementation of BasicBlock.forward (NCHW in / NCHW out)."""
    w1_oihw, w2_oihw = params["w1"], params["w2"]
    gamma, beta = params["gamma"], params["beta"]

    N, Cin, H, W = x_nchw.shape
    Cmid, Cout = int(w1_oihw.shape[0]), int(w2_oihw.shape[0])
    Cmid_p, Cout_p = _round_up(Cmid, _LANE), _round_up(Cout, _LANE)

    # ---- glue: layout, zero-pad, im2col weight matrices (done once) ----
    x = jnp.transpose(x_nchw, (0, 2, 3, 1)).astype(jnp.bfloat16)        # NHWC bf16
    x_pad = jnp.pad(x, ((0, 0), (1, 1), (1, 1), (0, 0)))                # (N,H+2,W+2,Cin)

    # OIHW -> (kh, kw, ci, co) -> (9*Cin, Cout), zero-padded to lane width on co.
    w1_mat = jnp.transpose(w1_oihw, (2, 3, 1, 0)).reshape(9 * Cin, Cmid)
    w2_mat = jnp.transpose(w2_oihw, (2, 3, 1, 0)).reshape(9 * Cmid, Cout)
    w1p = jnp.zeros((9 * Cin, Cmid_p), jnp.bfloat16).at[:, :Cmid].set(
        w1_mat.astype(jnp.bfloat16))
    w2p = jnp.zeros((9 * Cmid, Cout_p), jnp.bfloat16).at[:, :Cout].set(
        w2_mat.astype(jnp.bfloat16))

    cparams = pltpu.CompilerParams(
        dimension_semantics=("parallel",),          # images shard across TCs
        vmem_limit_bytes=32 * 1024 * 1024)

    # ---- kernel 1: conv1 (im2col matmul) -> per-image BN partial sums ----
    stats = pl.pallas_call(
        _conv1_stats_kernel,
        out_shape=jax.ShapeDtypeStruct((N, 2, Cmid_p), jnp.float32),
        grid=(N,),
        in_specs=[pl.BlockSpec((1, H + 2, W + 2, Cin), lambda n: (n, 0, 0, 0)),
                  pl.BlockSpec((9 * Cin, Cmid_p), lambda n: (0, 0))],
        out_specs=pl.BlockSpec((1, 2, Cmid_p), lambda n: (n, 0, 0)),
        scratch_shapes=[pltpu.VMEM((H * W, 9 * Cin), jnp.bfloat16)],
        compiler_params=cparams,
    )(x_pad, w1p)

    # ---- glue: finalize BN batch statistics (tiny per-channel reduction) ----
    cnt = float(N * H * W)
    ssum = jnp.sum(stats[:, 0, :Cmid], axis=0)
    ssq = jnp.sum(stats[:, 1, :Cmid], axis=0)
    mean = ssum / cnt
    # biased variance (training-mode BN); clamp tiny cancellation negatives.
    var = jnp.maximum(ssq / cnt - mean * mean, 0.0)
    scale = gamma.astype(jnp.float32) * jax.lax.rsqrt(var + eps)
    shift = beta.astype(jnp.float32) - mean * scale
    scale_p = jnp.zeros((1, Cmid_p), jnp.float32).at[0, :Cmid].set(scale)
    shift_p = jnp.zeros((1, Cmid_p), jnp.float32).at[0, :Cmid].set(shift)

    # ---- kernel 2: fused conv1-recompute + BN + ReLU + pad + conv2 ----
    if stride > 1 and H % stride == 0 and W % stride == 0:
        k_stride, kH, kW = stride, H // stride, W // stride
    else:
        # TODO(synk): non-divisible strides fall back to stride-1 conv + XLA subsample.
        k_stride, kH, kW = 1, H, W

    out_p = pl.pallas_call(
        functools.partial(_fused_block_kernel, stride=k_stride),
        out_shape=jax.ShapeDtypeStruct((N, kH, kW, Cout_p), jnp.float32),
        grid=(N,),
        in_specs=[pl.BlockSpec((1, H + 2, W + 2, Cin), lambda n: (n, 0, 0, 0)),
                  pl.BlockSpec((9 * Cin, Cmid_p), lambda n: (0, 0)),
                  pl.BlockSpec((1, Cmid_p), lambda n: (0, 0)),
                  pl.BlockSpec((1, Cmid_p), lambda n: (0, 0)),
                  pl.BlockSpec((9 * Cmid, Cout_p), lambda n: (0, 0))],
        out_specs=pl.BlockSpec((1, kH, kW, Cout_p), lambda n: (n, 0, 0, 0)),
        scratch_shapes=[pltpu.VMEM((H * W, 9 * Cin), jnp.bfloat16),
                        pltpu.VMEM((H + 2, W + 2, Cmid), jnp.bfloat16),
                        pltpu.VMEM((kH * kW, 9 * Cmid), jnp.bfloat16)],
        compiler_params=cparams,
    )(x_pad, w1p, scale_p, shift_p, w2p)

    out = out_p[:, :, :, :Cout]                       # strip lane padding (glue)
    if k_stride == 1 and stride > 1:
        out = out[:, ::stride, ::stride, :]
    return jnp.transpose(out, (0, 3, 1, 2))           # NCHW


def _reference(x_nchw, params, stride=1):
    """Plain-JAX reference of BasicBlock.forward for a sanity check."""
    dn = ("NCHW", "OIHW", "NCHW")
    hp = jax.lax.Precision.HIGHEST
    y = jax.lax.conv_general_dilated(x_nchw, params["w1"], (1, 1),
                                     ((1, 1), (1, 1)), dimension_numbers=dn,
                                     precision=hp)
    mean = jnp.mean(y, axis=(0, 2, 3), keepdims=True)
    var = jnp.var(y, axis=(0, 2, 3), keepdims=True)    # biased, as in BN training
    y = (y - mean) * jax.lax.rsqrt(var + 1e-5)
    y = y * params["gamma"].reshape(1, -1, 1, 1) + params["beta"].reshape(1, -1, 1, 1)
    y = jnp.maximum(y, 0.0)
    return jax.lax.conv_general_dilated(y, params["w2"], (stride, stride),
                                        ((1, 1), (1, 1)), dimension_numbers=dn,
                                        precision=hp)


if __name__ == "__main__":
    key = jax.random.PRNGKey(0)
    k_x, k_w1, k_w2 = jax.random.split(key, 3)

    # small shapes consistent with BasicBlock(inplanes=4, outplanes=8, stride=1)
    N, Cin, H, W = 2, 4, 16, 16
    Cmid = Cout = 8
    stride = 1

    x = jax.random.normal(k_x, (N, Cin, H, W), dtype=jnp.float32)

    # deterministic synthetic params (Conv2d kaiming-uniform-like bound = 1/sqrt(fan_in))
    b1 = 1.0 / (Cin * 9) ** 0.5
    b2 = 1.0 / (Cmid * 9) ** 0.5
    params = {
        "w1": jax.random.uniform(k_w1, (Cmid, Cin, 3, 3), jnp.float32, -b1, b1),
        "w2": jax.random.uniform(k_w2, (Cout, Cmid, 3, 3), jnp.float32, -b2, b2),
        "gamma": jnp.ones((Cmid,), jnp.float32),   # BatchNorm2d default affine init
        "beta": jnp.zeros((Cmid,), jnp.float32),
    }
    # TODO(synk): BatchNorm running-mean/var momentum updates are a training side
    # effect with no functional output; not materialized here.

    fwd = jax.jit(functools.partial(basic_block_forward, stride=stride))
    out = jax.block_until_ready(fwd(x, params))
    ref = jax.block_until_ready(_reference(x, params, stride=stride))

    assert out.shape == (N, Cout, (H - 1) // stride + 1, (W - 1) // stride + 1)
    assert jnp.allclose(out, ref, atol=5e-2, rtol=5e-2)
    print("KERNEL_OK")
</pallas_src>

<mosaic_0001>
module attributes {stable_mosaic.version = 11 : i64} {
  func.func @_conv1_stats_kernel(%arg0: i32, %arg1: memref<1x18x18x4xbf16, #tpu.memory_space<vmem>>, %arg2: memref<36x128xbf16, #tpu.memory_space<vmem>>, %arg3: memref<1x2x128xf32, #tpu.memory_space<vmem>>, %arg4: memref<256x36xbf16, #tpu.memory_space<vmem>>) attributes {dimension_semantics = [#tpu.dimension_semantics<parallel>], iteration_bounds = array<i64: 2>, scalar_prefetch = 0 : i64, scratch_operands = 1 : i64, tpu.core_type = #tpu.core_type<tc>, window_params = [{transform_indices = @transform_0, window_bounds = array<i64: 1, 18, 18, 4>}, {pipeline_mode = #tpu.pipeline_mode<synchronous>, transform_indices = @transform_1, window_bounds = array<i64: 36, 128>}, {transform_indices = @transform_2, window_bounds = array<i64: 1, 2, 128>}]} {
    %c0 = arith.constant 0 : index
    %c0_0 = arith.constant 0 : index
    %c0_1 = arith.constant 0 : index
    %c0_2 = arith.constant 0 : index
    %0 = vector.load %arg1[%c0, %c0_0, %c0_1, %c0_2] : memref<1x18x18x4xbf16, #tpu.memory_space<vmem>>, vector<1x16x16x4xbf16>
    %1 = vector.shape_cast %0 : vector<1x16x16x4xbf16> to vector<16x16x4xbf16>
    %2 = vector.shape_cast %1 : vector<16x16x4xbf16> to vector<256x4xbf16>
    %c0_3 = arith.constant 0 : index
    %c0_4 = arith.constant 0 : index
    %3 = vector.load %arg4[%c0_3, %c0_4] : memref<256x36xbf16, #tpu.memory_space<vmem>>, vector<256x4xbf16>
    tpu.vector_store %arg4[%c0_3, %c0_4], %2 {strides = array<i32>} : memref<256x36xbf16, #tpu.memory_space<vmem>>, vector<256x4xbf16>,
    %c0_5 = arith.constant 0 : index
    %c0_6 = arith.constant 0 : index
    %c1 = arith.constant 1 : index
    %c0_7 = arith.constant 0 : index
    %4 = vector.load %arg1[%c0_5, %c0_6, %c1, %c0_7] : memref<1x18x18x4xbf16, #tpu.memory_space<vmem>>, vector<1x16x16x4xbf16>
    %5 = vector.shape_cast %4 : vector<1x16x16x4xbf16> to vector<16x16x4xbf16>
    %6 = vector.shape_cast %5 : vector<16x16x4xbf16> to vector<256x4xbf16>
    %c0_8 = arith.constant 0 : index
    %c4 = arith.constant 4 : index
    %7 = vector.load %arg4[%c0_8, %c4] : memref<256x36xbf16, #tpu.memory_space<vmem>>, vector<256x4xbf16>
    tpu.vector_store %arg4[%c0_8, %c4], %6 {strides = array<i32>} : memref<256x36xbf16, #tpu.memory_space<vmem>>, vector<256x4xbf16>,
    %c0_9 = arith.constant 0 : index
    %c0_10 = arith.constant 0 : index
    %c2 = arith.constant 2 : index
    %c0_11 = arith.constant 0 : index
    %8 = vector.load %arg1[%c0_9, %c0_10, %c2, %c0_11] : memref<1x18x18x4xbf16, #tpu.memory_space<vmem>>, vector<1x16x16x4xbf16>
    %9 = vector.shape_cast %8 : vector<1x16x16x4xbf16> to vector<16x16x4xbf16>
    %10 = vector.shape_cast %9 : vector<16x16x4xbf16> to vector<256x4xbf16>
    %c0_12 = arith.constant 0 : index
    %c8 = arith.constant 8 : index
    %11 = vector.load %arg4[%c0_12, %c8] : memref<256x36xbf16, #tpu.memory_space<vmem>>, vector<256x4xbf16>
    tpu.vector_store %arg4[%c0_12, %c8], %10 {strides = array<i32>} : memref<256x36xbf16, #tpu.memory_space<vmem>>, vector<256x4xbf16>,
    %c0_13 = arith.constant 0 : index
    %c1_14 = arith.constant 1 : index
    %c0_15 = arith.constant 0 : index
    %c0_16 = arith.constant 0 : index
    %12 = vector.load %arg1[%c0_13, %c1_14, %c0_15, %c0_16] : memref<1x18x18x4xbf16, #tpu.memory_space<vmem>>, vector<1x16x16x4xbf16>
    %13 = vector.shape_cast %12 : vector<1x16x16x4xbf16> to vector<16x16x4xbf16>
    %14 = vector.shape_cast %13 : vector<16x16x4xbf16> to vector<256x4xbf16>
    %c0_17 = arith.constant 0 : index
    %c12 = arith.constant 12 : index
    %15 = vector.load %arg4[%c0_17, %c12] : memref<256x36xbf16, #tpu.memory_space<vmem>>, vector<256x4xbf16>
    tpu.vector_store %arg4[%c0_17, %c12], %14 {strides = array<i32>} : memref<256x36xbf16, #tpu.memory_space<vmem>>, vector<256x4xbf16>,
    %c0_18 = arith.constant 0 : index
    %c1_19 = arith.constant 1 : index
    %c1_20 = arith.constant 1 : index
    %c0_21 = arith.constant 0 : index
    %16 = vector.load %arg1[%c0_18, %c1_19, %c1_20, %c0_21] : memref<1x18x18x4xbf16, #tpu.memory_space<vmem>>, vector<1x16x16x4xbf16>
    %17 = vector.shape_cast %16 : vector<1x16x16x4xbf16> to vector<16x16x4xbf16>
    %18 = vector.shape_cast %17 : vector<16x16x4xbf16> to vector<256x4xbf16>
    %c0_22 = arith.constant 0 : index
    %c16 = arith.constant 16 : index
    %19 = vector.load %arg4[%c0_22, %c16] : memref<256x36xbf16, #tpu.memory_space<vmem>>, vector<256x4xbf16>
    tpu.vector_store %arg4[%c0_22, %c16], %18 {strides = array<i32>} : memref<256x36xbf16, #tpu.memory_space<vmem>>, vector<256x4xbf16>,
    %c0_23 = arith.constant 0 : index
    %c1_24 = arith.constant 1 : index
    %c2_25 = arith.constant 2 : index
    %c0_26 = arith.constant 0 : index
    %20 = vector.load %arg1[%c0_23, %c1_24, %c2_25, %c0_26] : memref<1x18x18x4xbf16, #tpu.memory_space<vmem>>, vector<1x16x16x4xbf16>
    %21 = vector.shape_cast %20 : vector<1x16x16x4xbf16> to vector<16x16x4xbf16>
    %22 = vector.shape_cast %21 : vector<16x16x4xbf16> to vector<256x4xbf16>
    %c0_27 = arith.constant 0 : index
    %c20 = arith.constant 20 : index
    %23 = vector.load %arg4[%c0_27, %c20] : memref<256x36xbf16, #tpu.memory_space<vmem>>, vector<256x4xbf16>
    tpu.vector_store %arg4[%c0_27, %c20], %22 {strides = array<i32>} : memref<256x36xbf16, #tpu.memory_space<vmem>>, vector<256x4xbf16>,
    %c0_28 = arith.constant 0 : index
    %c2_29 = arith.constant 2 : index
    %c0_30 = arith.constant 0 : index
    %c0_31 = arith.constant 0 : index
    %24 = vector.load %arg1[%c0_28, %c2_29, %c0_30, %c0_31] : memref<1x18x18x4xbf16, #tpu.memory_space<vmem>>, vector<1x16x16x4xbf16>
    %25 = vector.shape_cast %24 : vector<1x16x16x4xbf16> to vector<16x16x4xbf16>
    %26 = vector.shape_cast %25 : vector<16x16x4xbf16> to vector<256x4xbf16>
    %c0_32 = arith.constant 0 : index
    %c24 = arith.constant 24 : index
    %27 = vector.load %arg4[%c0_32, %c24] : memref<256x36xbf16, #tpu.memory_space<vmem>>, vector<256x4xbf16>
    tpu.vector_store %arg4[%c0_32, %c24], %26 {strides = array<i32>} : memref<256x36xbf16, #tpu.memory_space<vmem>>, vector<256x4xbf16>,
    %c0_33 = arith.constant 0 : index
    %c2_34 = arith.constant 2 : index
    %c1_35 = arith.constant 1 : index
    %c0_36 = arith.constant 0 : index
    %28 = vector.load %arg1[%c0_33, %c2_34, %c1_35, %c0_36] : memref<1x18x18x4xbf16, #tpu.memory_space<vmem>>, vector<1x16x16x4xbf16>
    %29 = vector.shape_cast %28 : vector<1x16x16x4xbf16> to vector<16x16x4xbf16>
    %30 = vector.shape_cast %29 : vector<16x16x4xbf16> to vector<256x4xbf16>
    %c0_37 = arith.constant 0 : index
    %c28 = arith.constant 28 : index
    %31 = vector.load %arg4[%c0_37, %c28] : memref<256x36xbf16, #tpu.memory_space<vmem>>, vector<256x4xbf16>
    tpu.vector_store %arg4[%c0_37, %c28], %30 {strides = array<i32>} : memref<256x36xbf16, #tpu.memory_space<vmem>>, vector<256x4xbf16>,
    %c0_38 = arith.constant 0 : index
    %c2_39 = arith.constant 2 : index
    %c2_40 = arith.constant 2 : index
    %c0_41 = arith.constant 0 : index
    %32 = vector.load %arg1[%c0_38, %c2_39, %c2_40, %c0_41] : memref<1x18x18x4xbf16, #tpu.memory_space<vmem>>, vector<1x16x16x4xbf16>
    %33 = vector.shape_cast %32 : vector<1x16x16x4xbf16> to vector<16x16x4xbf16>
    %34 = vector.shape_cast %33 : vector<16x16x4xbf16> to vector<256x4xbf16>
    %c0_42 = arith.constant 0 : index
    %c32 = arith.constant 32 : index
    %35 = vector.load %arg4[%c0_42, %c32] : memref<256x36xbf16, #tpu.memory_space<vmem>>, vector<256x4xbf16>
    tpu.vector_store %arg4[%c0_42, %c32], %34 {strides = array<i32>} : memref<256x36xbf16, #tpu.memory_space<vmem>>, vector<256x4xbf16>,
    %c0_43 = arith.constant 0 : index
    %c0_44 = arith.constant 0 : index
    %36 = vector.load %arg4[%c0_43, %c0_44] : memref<256x36xbf16, #tpu.memory_space<vmem>>, vector<256x36xbf16>
    %c0_45 = arith.constant 0 : index
    %c0_46 = arith.constant 0 : index
    %37 = vector.load %arg2[%c0_45, %c0_46] : memref<36x128xbf16, #tpu.memory_space<vmem>>, vector<36x128xbf16>
    %cst = arith.constant dense<0.000000e+00> : vector<256x128xf32>
    %38 = tpu.matmul %36, %37, %cst {dimension_numbers = #tpu.dot_dimension_numbers<[1], [0], [0], [1], [0, 0, 1, 1], [], []>} : vector<256x36xbf16>, vector<36x128xbf16>, vector<256x128xf32> -> vector<256x128xf32>
    %cst_47 = arith.constant dense<0.000000e+00> : vector<128xf32>
    %39 = vector.multi_reduction <add>, %38, %cst_47 [0] : vector<256x128xf32> to vector<128xf32>
    %40 = vector.shape_cast %39 : vector<128xf32> to vector<1x128xf32>
    %c0_48 = arith.constant 0 : index
    %c0_49 = arith.constant 0 : index
    %c0_50 = arith.constant 0 : index
    %41 = vector.load %arg3[%c0_48, %c0_49, %c0_50] : memref<1x2x128xf32, #tpu.memory_space<vmem>>, vector<1x1x128xf32>
    %42 = vector.shape_cast %41 : vector<1x1x128xf32> to vector<1x128xf32>
    %43 = vector.shape_cast %40 : vector<1x128xf32> to vector<1x1x128xf32>
    tpu.vector_store %arg3[%c0_48, %c0_49, %c0_50], %43 {strides = array<i32>} : memref<1x2x128xf32, #tpu.memory_space<vmem>>, vector<1x1x128xf32>,
    %44 = arith.mulf %38, %38 : vector<256x128xf32>
    %cst_51 = arith.constant dense<0.000000e+00> : vector<128xf32>
    %45 = vector.multi_reduction <add>, %44, %cst_51 [0] : vector<256x128xf32> to vector<128xf32>
    %46 = vector.shape_cast %45 : vector<128xf32> to vector<1x128xf32>
    %c0_52 = arith.constant 0 : index
    %c1_53 = arith.constant 1 : index
    %c0_54 = arith.constant 0 : index
    %47 = vector.load %arg3[%c0_52, %c1_53, %c0_54] : memref<1x2x128xf32, #tpu.memory_space<vmem>>, vector<1x1x128xf32>
    %48 = vector.shape_cast %47 : vector<1x1x128xf32> to vector<1x128xf32>
    %49 = vector.shape_cast %46 : vector<1x128xf32> to vector<1x1x128xf32>
    tpu.vector_store %arg3[%c0_52, %c1_53, %c0_54], %49 {strides = array<i32>} : memref<1x2x128xf32, #tpu.memory_space<vmem>>, vector<1x1x128xf32>,
    return
  }
  func.func @transform_0(%arg0: i32) -> (i32, i32, i32, i32) {
    %c0_i32 = arith.constant 0 : i32
    %c0_i32_0 = arith.constant 0 : i32
    %c0_i32_1 = arith.constant 0 : i32
    %c0_i32_2 = arith.constant 0 : i32
    return %arg0, %c0_i32, %c0_i32_0, %c0_i32_1 : i32, i32, i32, i32
  }
  func.func @transform_1(%arg0: i32) -> (i32, i32) {
    %c0_i32 = arith.constant 0 : i32
    %c0_i32_0 = arith.constant 0 : i32
    %c0_i32_1 = arith.constant 0 : i32
    return %c0_i32, %c0_i32_0 : i32, i32
  }
  func.func @transform_2(%arg0: i32) -> (i32, i32, i32) {
    %c0_i32 = arith.constant 0 : i32
    %c0_i32_0 = arith.constant 0 : i32
    %c0_i32_1 = arith.constant 0 : i32
    return %arg0, %c0_i32, %c0_i32_0 : i32, i32, i32
  }
}

module attributes {stable_mosaic.version = 11 : i64} {
  func.func @_fused_block_kernel(%arg0: i32, %arg1: memref<1x18x18x4xbf16, #tpu.memory_space<vmem>>, %arg2: memref<36x128xbf16, #tpu.memory_space<vmem>>, %arg3: memref<1x128xf32, #tpu.memory_space<vmem>>, %arg4: memref<1x128xf32, #tpu.memory_space<vmem>>, %arg5: memref<72x128xbf16, #tpu.memory_space<vmem>>, %arg6: memref<1x16x16x128xf32, #tpu.memory_space<vmem>>, %arg7: memref<256x36xbf16, #tpu.memory_space<vmem>>, %arg8: memref<18x18x8xbf16, #tpu.memory_space<vmem>>, %arg9: memref<256x72xbf16, #tpu.memory_space<vmem>>) attributes {dimension_semantics = [#tpu.dimension_semantics<parallel>], iteration_bounds = array<i64: 2>, scalar_prefetch = 0 : i64, scratch_operands = 3 : i64, tpu.core_type = #tpu.core_type<tc>, window_params = [{transform_indices = @transform_0, window_bounds = array<i64: 1, 18, 18, 4>}, {pipeline_mode = #tpu.pipeline_mode<synchronous>, transform_indices = @transform_1, window_bounds = array<i64: 36, 128>}, {pipeline_mode = #tpu.pipeline_mode<synchronous>, transform_indices = @transform_2, window_bounds = array<i64: 1, 128>}, {pipeline_mode = #tpu.pipeline_mode<synchronous>, transform_indices = @transform_3, window_bounds = array<i64: 1, 128>}, {pipeline_mode = #tpu.pipeline_mode<synchronous>, transform_indices = @transform_4, window_bounds = array<i64: 72, 128>}, {transform_indices = @transform_5, window_bounds = array<i64: 1, 16, 16, 128>}]} {
    %c0 = arith.constant 0 : index
    %c0_0 = arith.constant 0 : index
    %c0_1 = arith.constant 0 : index
    %c0_2 = arith.constant 0 : index
    %0 = vector.load %arg1[%c0, %c0_0, %c0_1, %c0_2] : memref<1x18x18x4xbf16, #tpu.memory_space<vmem>>, vector<1x16x16x4xbf16>
    %1 = vector.shape_cast %0 : vector<1x16x16x4xbf16> to vector<16x16x4xbf16>
    %2 = vector.shape_cast %1 : vector<16x16x4xbf16> to vector<256x4xbf16>
    %c0_3 = arith.constant 0 : index
    %c0_4 = arith.constant 0 : index
    %3 = vector.load %arg7[%c0_3, %c0_4] : memref<256x36xbf16, #tpu.memory_space<vmem>>, vector<256x4xbf16>
    tpu.vector_store %arg7[%c0_3, %c0_4], %2 {strides = array<i32>} : memref<256x36xbf16, #tpu.memory_space<vmem>>, vector<256x4xbf16>,
    %c0_5 = arith.constant 0 : index
    %c0_6 = arith.constant 0 : index
    %c1 = arith.constant 1 : index
    %c0_7 = arith.constant 0 : index
    %4 = vector.load %arg1[%c0_5, %c0_6, %c1, %c0_7] : memref<1x18x18x4xbf16, #tpu.memory_space<vmem>>, vector<1x16x16x4xbf16>
    %5 = vector.shape_cast %4 : vector<1x16x16x4xbf16> to vector<16x16x4xbf16>
    %6 = vector.shape_cast %5 : vector<16x16x4xbf16> to vector<256x4xbf16>
    %c0_8 = arith.constant 0 : index
    %c4 = arith.constant 4 : index
    %7 = vector.load %arg7[%c0_8, %c4] : memref<256x36xbf16, #tpu.memory_space<vmem>>, vector<256x4xbf16>
    tpu.vector_store %arg7[%c0_8, %c4], %6 {strides = array<i32>} : memref<256x36xbf16, #tpu.memory_space<vmem>>, vector<256x4xbf16>,
    %c0_9 = arith.constant 0 : index
    %c0_10 = arith.constant 0 : index
    %c2 = arith.constant 2 : index
    %c0_11 = arith.constant 0 : index
    %8 = vector.load %arg1[%c0_9, %c0_10, %c2, %c0_11] : memref<1x18x18x4xbf16, #tpu.memory_space<vmem>>, vector<1x16x16x4xbf16>
    %9 = vector.shape_cast %8 : vector<1x16x16x4xbf16> to vector<16x16x4xbf16>
    %10 = vector.shape_cast %9 : vector<16x16x4xbf16> to vector<256x4xbf16>
    %c0_12 = arith.constant 0 : index
    %c8 = arith.constant 8 : index
    %11 = vector.load %arg7[%c0_12, %c8] : memref<256x36xbf16, #tpu.memory_space<vmem>>, vector<256x4xbf16>
    tpu.vector_store %arg7[%c0_12, %c8], %10 {strides = array<i32>} : memref<256x36xbf16, #tpu.memory_space<vmem>>, vector<256x4xbf16>,
    %c0_13 = arith.constant 0 : index
    %c1_14 = arith.constant 1 : index
    %c0_15 = arith.constant 0 : index
    %c0_16 = arith.constant 0 : index
    %12 = vector.load %arg1[%c0_13, %c1_14, %c0_15, %c0_16] : memref<1x18x18x4xbf16, #tpu.memory_space<vmem>>, vector<1x16x16x4xbf16>
    %13 = vector.shape_cast %12 : vector<1x16x16x4xbf16> to vector<16x16x4xbf16>
    %14 = vector.shape_cast %13 : vector<16x16x4xbf16> to vector<256x4xbf16>
    %c0_17 = arith.constant 0 : index
    %c12 = arith.constant 12 : index
    %15 = vector.load %arg7[%c0_17, %c12] : memref<256x36xbf16, #tpu.memory_space<vmem>>, vector<256x4xbf16>
    tpu.vector_store %arg7[%c0_17, %c12], %14 {strides = array<i32>} : memref<256x36xbf16, #tpu.memory_space<vmem>>, vector<256x4xbf16>,
    %c0_18 = arith.constant 0 : index
    %c1_19 = arith.constant 1 : index
    %c1_20 = arith.constant 1 : index
    %c0_21 = arith.constant 0 : index
    %16 = vector.load %arg1[%c0_18, %c1_19, %c1_20, %c0_21] : memref<1x18x18x4xbf16, #tpu.memory_space<vmem>>, vector<1x16x16x4xbf16>
    %17 = vector.shape_cast %16 : vector<1x16x16x4xbf16> to vector<16x16x4xbf16>
    %18 = vector.shape_cast %17 : vector<16x16x4xbf16> to vector<256x4xbf16>
    %c0_22 = arith.constant 0 : index
    %c16 = arith.constant 16 : index
    %19 = vector.load %arg7[%c0_22, %c16] : memref<256x36xbf16, #tpu.memory_space<vmem>>, vector<256x4xbf16>
    tpu.vector_store %arg7[%c0_22, %c16], %18 {strides = array<i32>} : memref<256x36xbf16, #tpu.memory_space<vmem>>, vector<256x4xbf16>,
    %c0_23 = arith.constant 0 : index
    %c1_24 = arith.constant 1 : index
    %c2_25 = arith.constant 2 : index
    %c0_26 = arith.constant 0 : index
    %20 = vector.load %arg1[%c0_23, %c1_24, %c2_25, %c0_26] : memref<1x18x18x4xbf16, #tpu.memory_space<vmem>>, vector<1x16x16x4xbf16>
    %21 = vector.shape_cast %20 : vector<1x16x16x4xbf16> to vector<16x16x4xbf16>
    %22 = vector.shape_cast %21 : vector<16x16x4xbf16> to vector<256x4xbf16>
    %c0_27 = arith.constant 0 : index
    %c20 = arith.constant 20 : index
    %23 = vector.load %arg7[%c0_27, %c20] : memref<256x36xbf16, #tpu.memory_space<vmem>>, vector<256x4xbf16>
    tpu.vector_store %arg7[%c0_27, %c20], %22 {strides = array<i32>} : memref<256x36xbf16, #tpu.memory_space<vmem>>, vector<256x4xbf16>,
    %c0_28 = arith.constant 0 : index
    %c2_29 = arith.constant 2 : index
    %c0_30 = arith.constant 0 : index
    %c0_31 = arith.constant 0 : index
    %24 = vector.load %arg1[%c0_28, %c2_29, %c0_30, %c0_31] : memref<1x18x18x4xbf16, #tpu.memory_space<vmem>>, vector<1x16x16x4xbf16>
    %25 = vector.shape_cast %24 : vector<1x16x16x4xbf16> to vector<16x16x4xbf16>
    %26 = vector.shape_cast %25 : vector<16x16x4xbf16> to vector<256x4xbf16>
    %c0_32 = arith.constant 0 : index
    %c24 = arith.constant 24 : index
    %27 = vector.load %arg7[%c0_32, %c24] : memref<256x36xbf16, #tpu.memory_space<vmem>>, vector<256x4xbf16>
    tpu.vector_store %arg7[%c0_32, %c24], %26 {strides = array<i32>} : memref<256x36xbf16, #tpu.memory_space<vmem>>, vector<256x4xbf16>,
    %c0_33 = arith.constant 0 : index
    %c2_34 = arith.constant 2 : index
    %c1_35 = arith.constant 1 : index
    %c0_36 = arith.constant 0 : index
    %28 = vector.load %arg1[%c0_33, %c2_34, %c1_35, %c0_36] : memref<1x18x18x4xbf16, #tpu.memory_space<vmem>>, vector<1x16x16x4xbf16>
    %29 = vector.shape_cast %28 : vector<1x16x16x4xbf16> to vector<16x16x4xbf16>
    %30 = vector.shape_cast %29 : vector<16x16x4xbf16> to vector<256x4xbf16>
    %c0_37 = arith.constant 0 : index
    %c28 = arith.constant 28 : index
    %31 = vector.load %arg7[%c0_37, %c28] : memref<256x36xbf16, #tpu.memory_space<vmem>>, vector<256x4xbf16>
    tpu.vector_store %arg7[%c0_37, %c28], %30 {strides = array<i32>} : memref<256x36xbf16, #tpu.memory_space<vmem>>, vector<256x4xbf16>,
    %c0_38 = arith.constant 0 : index
    %c2_39 = arith.constant 2 : index
    %c2_40 = arith.constant 2 : index
    %c0_41 = arith.constant 0 : index
    %32 = vector.load %arg1[%c0_38, %c2_39, %c2_40, %c0_41] : memref<1x18x18x4xbf16, #tpu.memory_space<vmem>>, vector<1x16x16x4xbf16>
    %33 = vector.shape_cast %32 : vector<1x16x16x4xbf16> to vector<16x16x4xbf16>
    %34 = vector.shape_cast %33 : vector<16x16x4xbf16> to vector<256x4xbf16>
    %c0_42 = arith.constant 0 : index
    %c32 = arith.constant 32 : index
    %35 = vector.load %arg7[%c0_42, %c32] : memref<256x36xbf16, #tpu.memory_space<vmem>>, vector<256x4xbf16>
    tpu.vector_store %arg7[%c0_42, %c32], %34 {strides = array<i32>} : memref<256x36xbf16, #tpu.memory_space<vmem>>, vector<256x4xbf16>,
    %c0_43 = arith.constant 0 : index
    %c0_44 = arith.constant 0 : index
    %36 = vector.load %arg7[%c0_43, %c0_44] : memref<256x36xbf16, #tpu.memory_space<vmem>>, vector<256x36xbf16>
    %c0_45 = arith.constant 0 : index
    %c0_46 = arith.constant 0 : index
    %37 = vector.load %arg2[%c0_45, %c0_46] : memref<36x128xbf16, #tpu.memory_space<vmem>>, vector<36x128xbf16>
    %cst = arith.constant dense<0.000000e+00> : vector<256x128xf32>
    %38 = tpu.matmul %36, %37, %cst {dimension_numbers = #tpu.dot_dimension_numbers<[1], [0], [0], [1], [0, 0, 1, 1], [], []>} : vector<256x36xbf16>, vector<36x128xbf16>, vector<256x128xf32> -> vector<256x128xf32>
    %c0_47 = arith.constant 0 : index
    %c0_48 = arith.constant 0 : index
    %39 = vector.load %arg3[%c0_47, %c0_48] : memref<1x128xf32, #tpu.memory_space<vmem>>, vector<1x128xf32>
    %40 = vector.broadcast %39 : vector<1x128xf32> to vector<256x128xf32>
    %41 = arith.mulf %38, %40 : vector<256x128xf32>
    %c0_49 = arith.constant 0 : index
    %c0_50 = arith.constant 0 : index
    %42 = vector.load %arg4[%c0_49, %c0_50] : memref<1x128xf32, #tpu.memory_space<vmem>>, vector<1x128xf32>
    %43 = vector.broadcast %42 : vector<1x128xf32> to vector<256x128xf32>
    %44 = arith.addf %41, %43 : vector<256x128xf32>
    %cst_51 = arith.constant 0.000000e+00 : f32
    %45 = vector.broadcast %cst_51 : f32 to vector<256x128xf32>
    %46 = arith.maximumf %44, %45 : vector<256x128xf32>
    %47 = arith.truncf %46 : vector<256x128xf32> to vector<256x128xbf16>
    %cst_52 = arith.constant 0.000000e+00 : bf16
    %48 = vector.broadcast %cst_52 : bf16 to vector<18x18x8xbf16>
    %c0_53 = arith.constant 0 : index
    %c0_54 = arith.constant 0 : index
    %c0_55 = arith.constant 0 : index
    %49 = vector.load %arg8[%c0_53, %c0_54, %c0_55] : memref<18x18x8xbf16, #tpu.memory_space<vmem>>, vector<18x18x8xbf16>
    tpu.vector_store %arg8[%c0_53, %c0_54, %c0_55], %48 {strides = array<i32>} : memref<18x18x8xbf16, #tpu.memory_space<vmem>>, vector<18x18x8xbf16>,
    %50 = vector.extract_strided_slice %47 {offsets = [0, 0], sizes = [256, 8], strides = [1, 1]} : vector<256x128xbf16> to vector<256x8xbf16>
    %51 = vector.shape_cast %50 : vector<256x8xbf16> to vector<16x16x8xbf16>
    %c1_56 = arith.constant 1 : index
    %c1_57 = arith.constant 1 : index
    %c0_58 = arith.constant 0 : index
    %52 = vector.load %arg8[%c1_56, %c1_57, %c0_58] : memref<18x18x8xbf16, #tpu.memory_space<vmem>>, vector<16x16x8xbf16>
    tpu.vector_store %arg8[%c1_56, %c1_57, %c0_58], %51 {strides = array<i32>} : memref<18x18x8xbf16, #tpu.memory_space<vmem>>, vector<16x16x8xbf16>,
    %c0_59 = arith.constant 0 : index
    %c0_60 = arith.constant 0 : index
    %c0_61 = arith.constant 0 : index
    %53 = vector.load %arg8[%c0_59, %c0_60, %c0_61] : memref<18x18x8xbf16, #tpu.memory_space<vmem>>, vector<16x16x8xbf16>
    %54 = vector.shape_cast %53 : vector<16x16x8xbf16> to vector<256x8xbf16>
    %c0_62 = arith.constant 0 : index
    %c0_63 = arith.constant 0 : index
    %55 = vector.load %arg9[%c0_62, %c0_63] : memref<256x72xbf16, #tpu.memory_space<vmem>>, vector<256x8xbf16>
    tpu.vector_store %arg9[%c0_62, %c0_63], %54 {strides = array<i32>} : memref<256x72xbf16, #tpu.memory_space<vmem>>, vector<256x8xbf16>,
    %c0_64 = arith.constant 0 : index
    %c1_65 = arith.constant 1 : index
    %c0_66 = arith.constant 0 : index
    %56 = vector.load %arg8[%c0_64, %c1_65, %c0_66] : memref<18x18x8xbf16, #tpu.memory_space<vmem>>, vector<16x16x8xbf16>
    %57 = vector.shape_cast %56 : vector<16x16x8xbf16> to vector<256x8xbf16>
    %c0_67 = arith.constant 0 : index
    %c8_68 = arith.constant 8 : index
    %58 = vector.load %arg9[%c0_67, %c8_68] : memref<256x72xbf16, #tpu.memory_space<vmem>>, vector<256x8xbf16>
    tpu.vector_store %arg9[%c0_67, %c8_68], %57 {strides = array<i32>} : memref<256x72xbf16, #tpu.memory_space<vmem>>, vector<256x8xbf16>,
    %c0_69 = arith.constant 0 : index
    %c2_70 = arith.constant 2 : index
    %c0_71 = arith.constant 0 : index
    %59 = vector.load %arg8[%c0_69, %c2_70, %c0_71] : memref<18x18x8xbf16, #tpu.memory_space<vmem>>, vector<16x16x8xbf16>
    %60 = vector.shape_cast %59 : vector<16x16x8xbf16> to vector<256x8xbf16>
    %c0_72 = arith.constant 0 : index
    %c16_73 = arith.constant 16 : index
    %61 = vector.load %arg9[%c0_72, %c16_73] : memref<256x72xbf16, #tpu.memory_space<vmem>>, vector<256x8xbf16>
    tpu.vector_store %arg9[%c0_72, %c16_73], %60 {strides = array<i32>} : memref<256x72xbf16, #tpu.memory_space<vmem>>, vector<256x8xbf16>,
    %c1_74 = arith.constant 1 : index
    %c0_75 = arith.constant 0 : index
    %c0_76 = arith.constant 0 : index
    %62 = vector.load %arg8[%c1_74, %c0_75, %c0_76] : memref<18x18x8xbf16, #tpu.memory_space<vmem>>, vector<16x16x8xbf16>
    %63 = vector.shape_cast %62 : vector<16x16x8xbf16> to vector<256x8xbf16>
    %c0_77 = arith.constant 0 : index
    %c24_78 = arith.constant 24 : index
    %64 = vector.load %arg9[%c0_77, %c24_78] : memref<256x72xbf16, #tpu.memory_space<vmem>>, vector<256x8xbf16>
    tpu.vector_store %arg9[%c0_77, %c24_78], %63 {strides = array<i32>} : memref<256x72xbf16, #tpu.memory_space<vmem>>, vector<256x8xbf16>,
    %c1_79 = arith.constant 1 : index
    %c1_80 = arith.constant 1 : index
    %c0_81 = arith.constant 0 : index
    %65 = vector.load %arg8[%c1_79, %c1_80, %c0_81] : memref<18x18x8xbf16, #tpu.memory_space<vmem>>, vector<16x16x8xbf16>
    %66 = vector.shape_cast %65 : vector<16x16x8xbf16> to vector<256x8xbf16>
    %c0_82 = arith.constant 0 : index
    %c32_83 = arith.constant 32 : index
    %67 = vector.load %arg9[%c0_82, %c32_83] : memref<256x72xbf16, #tpu.memory_space<vmem>>, vector<256x8xbf16>
    tpu.vector_store %arg9[%c0_82, %c32_83], %66 {strides = array<i32>} : memref<256x72xbf16, #tpu.memory_space<vmem>>, vector<256x8xbf16>,
    %c1_84 = arith.constant 1 : index
    %c2_85 = arith.constant 2 : index
    %c0_86 = arith.constant 0 : index
    %68 = vector.load %arg8[%c1_84, %c2_85, %c0_86] : memref<18x18x8xbf16, #tpu.memory_space<vmem>>, vector<16x16x8xbf16>
    %69 = vector.shape_cast %68 : vector<16x16x8xbf16> to vector<256x8xbf16>
    %c0_87 = arith.constant 0 : index
    %c40 = arith.constant 40 : index
    %70 = vector.load %arg9[%c0_87, %c40] : memref<256x72xbf16, #tpu.memory_space<vmem>>, vector<256x8xbf16>
    tpu.vector_store %arg9[%c0_87, %c40], %69 {strides = array<i32>} : memref<256x72xbf16, #tpu.memory_space<vmem>>, vector<256x8xbf16>,
    %c2_88 = arith.constant 2 : index
    %c0_89 = arith.constant 0 : index
    %c0_90 = arith.constant 0 : index
    %71 = vector.load %arg8[%c2_88, %c0_89, %c0_90] : memref<18x18x8xbf16, #tpu.memory_space<vmem>>, vector<16x16x8xbf16>
    %72 = vector.shape_cast %71 : vector<16x16x8xbf16> to vector<256x8xbf16>
    %c0_91 = arith.constant 0 : index
    %c48 = arith.constant 48 : index
    %73 = vector.load %arg9[%c0_91, %c48] : memref<256x72xbf16, #tpu.memory_space<vmem>>, vector<256x8xbf16>
    tpu.vector_store %arg9[%c0_91, %c48], %72 {strides = array<i32>} : memref<256x72xbf16, #tpu.memory_space<vmem>>, vector<256x8xbf16>,
    %c2_92 = arith.constant 2 : index
    %c1_93 = arith.constant 1 : index
    %c0_94 = arith.constant 0 : index
    %74 = vector.load %arg8[%c2_92, %c1_93, %c0_94] : memref<18x18x8xbf16, #tpu.memory_space<vmem>>, vector<16x16x8xbf16>
    %75 = vector.shape_cast %74 : vector<16x16x8xbf16> to vector<256x8xbf16>
    %c0_95 = arith.constant 0 : index
    %c56 = arith.constant 56 : index
    %76 = vector.load %arg9[%c0_95, %c56] : memref<256x72xbf16, #tpu.memory_space<vmem>>, vector<256x8xbf16>
    tpu.vector_store %arg9[%c0_95, %c56], %75 {strides = array<i32>} : memref<256x72xbf16, #tpu.memory_space<vmem>>, vector<256x8xbf16>,
    %c2_96 = arith.constant 2 : index
    %c2_97 = arith.constant 2 : index
    %c0_98 = arith.constant 0 : index
    %77 = vector.load %arg8[%c2_96, %c2_97, %c0_98] : memref<18x18x8xbf16, #tpu.memory_space<vmem>>, vector<16x16x8xbf16>
    %78 = vector.shape_cast %77 : vector<16x16x8xbf16> to vector<256x8xbf16>
    %c0_99 = arith.constant 0 : index
    %c64 = arith.constant 64 : index
    %79 = vector.load %arg9[%c0_99, %c64] : memref<256x72xbf16, #tpu.memory_space<vmem>>, vector<256x8xbf16>
    tpu.vector_store %arg9[%c0_99, %c64], %78 {strides = array<i32>} : memref<256x72xbf16, #tpu.memory_space<vmem>>, vector<256x8xbf16>,
    %c0_100 = arith.constant 0 : index
    %c0_101 = arith.constant 0 : index
    %80 = vector.load %arg9[%c0_100, %c0_101] : memref<256x72xbf16, #tpu.memory_space<vmem>>, vector<256x72xbf16>
    %c0_102 = arith.constant 0 : index
    %c0_103 = arith.constant 0 : index
    %81 = vector.load %arg5[%c0_102, %c0_103] : memref<72x128xbf16, #tpu.memory_space<vmem>>, vector<72x128xbf16>
    %cst_104 = arith.constant dense<0.000000e+00> : vector<256x128xf32>
    %82 = tpu.matmul %80, %81, %cst_104 {dimension_numbers = #tpu.dot_dimension_numbers<[1], [0], [0], [1], [0, 0, 1, 1], [], []>} : vector<256x72xbf16>, vector<72x128xbf16>, vector<256x128xf32> -> vector<256x128xf32>
    %83 = vector.shape_cast %82 : vector<256x128xf32> to vector<16x16x128xf32>
    %c0_105 = arith.constant 0 : index
    %c0_106 = arith.constant 0 : index
    %c0_107 = arith.constant 0 : index
    %c0_108 = arith.constant 0 : index
    %84 = vector.load %arg6[%c0_105, %c0_106, %c0_107, %c0_108] : memref<1x16x16x128xf32, #tpu.memory_space<vmem>>, vector<1x16x16x128xf32>
    %85 = vector.shape_cast %84 : vector<1x16x16x128xf32> to vector<16x16x128xf32>
    %86 = vector.shape_cast %83 : vector<16x16x128xf32> to vector<1x16x16x128xf32>
    tpu.vector_store %arg6[%c0_105, %c0_106, %c0_107, %c0_108], %86 {strides = array<i32>} : memref<1x16x16x128xf32, #tpu.memory_space<vmem>>, vector<1x16x16x128xf32>,
    return
  }
  func.func @transform_0(%arg0: i32) -> (i32, i32, i32, i32) {
    %c0_i32 = arith.constant 0 : i32
    %c0_i32_0 = arith.constant 0 : i32
    %c0_i32_1 = arith.constant 0 : i32
    %c0_i32_2 = arith.constant 0 : i32
    return %arg0, %c0_i32, %c0_i32_0, %c0_i32_1 : i32, i32, i32, i32
  }
  func.func @transform_1(%arg0: i32) -> (i32, i32) {
    %c0_i32 = arith.constant 0 : i32
    %c0_i32_0 = arith.constant 0 : i32
    %c0_i32_1 = arith.constant 0 : i32
    return %c0_i32, %c0_i32_0 : i32, i32
  }
  func.func @transform_2(%arg0: i32) -> (i32, i32) {
    %c0_i32 = arith.constant 0 : i32
    %c0_i32_0 = arith.constant 0 : i32
    %c0_i32_1 = arith.constant 0 : i32
    return %c0_i32, %c0_i32_0 : i32, i32
  }
  func.func @transform_3(%arg0: i32) -> (i32, i32) {
    %c0_i32 = arith.constant 0 : i32
    %c0_i32_0 = arith.constant 0 : i32
    %c0_i32_1 = arith.constant 0 : i32
    return %c0_i32, %c0_i32_0 : i32, i32
  }
  func.func @transform_4(%arg0: i32) -> (i32, i32) {
    %c0_i32 = arith.constant 0 : i32
    %c0_i32_0 = arith.constant 0 : i32
    %c0_i32_1 = arith.constant 0 : i32
    return %c0_i32, %c0_i32_0 : i32, i32
  }
  func.func @transform_5(%arg0: i32) -> (i32, i32, i32, i32) {
    %c0_i32 = arith.constant 0 : i32
    %c0_i32_0 = arith.constant 0 : i32
    %c0_i32_1 = arith.constant 0 : i32
    %c0_i32_2 = arith.constant 0 : i32
    return %arg0, %c0_i32, %c0_i32_0, %c0_i32_1 : i32, i32, i32, i32
  }
}

</mosaic_0001>

<bundles_post_ra>
// kernel: basic_block_forward.2
= control target key start
LH: loop header
LB: loop body
LE: loop exit
PB: predicated region body
PF: predicated region fallthrough
CT: control target
= control target key end

     0   :  { %s4299_s9 = smov 0   ;;  %s5392_s0 = inlined_call_operand.vmem [shape: bf16[2,18,18,4], index: 0, kind: input, shape index: {}]   ;;  %s5393_s1 = inlined_call_operand.vmem [shape: bf16[36,128], index: 1, kind: input, shape index: {}]   ;;  %s5394_s2 = inlined_call_operand.vmem [shape: f32[2,2,128], index: 2, kind: output, shape index: {}]  }
   0x1 LB: > { %s3659_s10 = sadd.s32 4294967295, %s4274_s9   ;;  %p3663_p0 = scmp.ge.s32.totalorder %s4274_s9, 1  ;;  %s4274_s9 = sphi %s4299_s9, %s12_s9  }
   0x2   : > { %p112_p1 = scmp.lt.s32.totalorder %s4274_s9, 3 }
   0x4   : > { %p113_p2 = pnand %p3663_p0, %p112_p1 }
   0x5   : > { %p133_p3 = scmp.lt.s32.totalorder (!%p113_p2), %s3659_s10, 1  ;;  %vm932_vm0 = vcmask (!%p113_p2), 1042432   ;;  %vm933_vm1 = vcmask (!%p113_p2), 1046532   ;;  %s4276_s15 = smov (!%p113_p2), 12   ;;  %vm336_vm3 = vsmask.f32 (!%p113_p2), 3328 }
   0x6   : > { %116 = sbr.rel (%p113_p2) target bundleno = 674 (0x2a2), region = 28  ;;  %vm4315_vm2 = vmor (!%p113_p2), %vm932_vm0, %vm933_vm1  ;;  %vm337_vm4 = vsmask.f32 (!%p113_p2), 7440  ;;  %s4277_s16 = smov (!%p113_p2), 20   ;;  %vm271_vm6 = vcmask (!%p113_p2), 31744   ;;  %vm819_vm7 = vcmask (!%p113_p2), 64544  }
   0x7   : > { %s4278_s17 = smov (!%p113_p2), 8   ;;  %vm4356_vm5 = vmor (!%p113_p2), %vm336_vm3, %vm337_vm4  ;;  %s4279_s18 = smov (!%p113_p2), 4   ;;  %vm1143_vm8 = vcmask (!%p113_p2), 97344   ;;  %vm1321_vm9 = vcmask (!%p113_p2), 130144   ;;  %vm1866_vm10 = vcmask (!%p113_p2), 162944   ;;  %vm2187_vm11 = vcmask (!%p113_p2), 195744  }
   0x8   : > { %s4280_s19 = smov (!%p113_p2), 16   ;;  %s4281_s20 = smov (!%p113_p2), 24   ;;  %vm2365_vm12 = vcmask (!%p113_p2), 228544   ;;  %vm2910_vm13 = vcmask (!%p113_p2), 261344   ;;  %vm3231_vm14 = vcmask (!%p113_p2), 294144   ;;  %vm3333_vm15 = vcmask (!%p113_p2), 1041408  }
   0x9   : > { %s4282_s21 = smov (!%p113_p2), 28   ;;  %s4283_s22 = smov (!%p113_p2), 32   ;;  %vm3284_vm0 = vcmask (!%p113_p2), 293888  }
   0xd   : > { %s5400_s10 = smov (!%p133_p3, %s3659_s10), 1 }
   0xe   : > { %s4200_s11 = smul.u32 216, %s5400_s10  ;;  %s3665_s29 = sshll.u32 %s5400_s10, 1 }
   0xf   : > { %s141_s4 = scalar_lea.vmem %s5394_s2, %s3665_s29 }
  0x10   : > { %s4313_s14 = scalar_lea.vmem %s5392_s0, %s4200_s11 }
  0x11   : > { %v4217_v1 = vld [vmem:[%s4313_s14 + $0x18] sm:$0xff]   ;;  %v4218_v2 = vld [vmem:[%s4313_s14 + $0xc] sm:$0xff]   ;;  %v3844_v5 = vld [vmem:[%s4313_s14 + $0x14] sm:$0x1] }
  0x12   : > { %1275 = vrot.lane.b32.xlu1 %v4217_v1, %s4276_s15  ;;  %v3842_v3 = vld [vmem:[%s4313_s14 + $0xc] sm:$0xe]  ;;  %v3843_v4 = vld [vmem:[%s4313_s14 + $0x10] sm:$0xf]  ;;  %1273 = vrot.lane.b32.xlu0 %v4218_v2, %s4276_s15  ;;  %v1984_v8 = vrot.slane %v3844_v5, 5 }
  0x13   : > { %v3890_v6 = vrot.slane %v3842_v3, 9  ;;  %v1981_v7 = vrot.slane %v3843_v4, 5  ;;  %v836_v9 = vld [vmem:[%s4313_s14] sm:$0xe]  ;;  %v837_v10 = vld [vmem:[%s4313_s14 + $0x4] sm:$0xf] }
  0x14   : > { %v838_v11 = vld [vmem:[%s4313_s14 + $0x8] sm:$0x1]  ;;  %v3698_v12 = vrot.slane %v836_v9, 9  ;;  %v937_v15 = vrot.slane %v837_v10, 5  ;;  %v839_v17 = vld [vmem:[%s4313_s14 + $0xc] sm:$0xe] }
  0x15   : > { %v1982_v13 = vsel %vm4315_vm2, %v3890_v6, %v1981_v7  ;;  %v1983_v14 = vrot.slane %v1981_v7, 4  ;;  %v940_v16 = vrot.slane %v838_v11, 5  ;;  %v840_v18 = vld [vmem:[%s4313_s14 + $0x10] sm:$0xf]  ;;  %v841_v19 = vld [vmem:[%s4313_s14 + $0x14] sm:$0x1] }
  0x16   : > { %v3699_v20 = vrot.slane %v839_v17, 9  ;;  %v938_v22 = vsel %vm4315_vm2, %v3698_v12, %v937_v15  ;;  %v939_v23 = vrot.slane %v937_v15, 4  ;;  %v944_v24 = vrot.slane %v840_v18, 5  ;;  %v288_v25 = vld [vmem:[%s4313_s14] sm:$0xf] }
  0x17   : > { %v1985_v21 = vsel %vm4315_vm2, %v1983_v14, %v1984_v8  ;;  %v289_v26 = vld [vmem:[%s4313_s14 + $0x4] sm:$0xf]  ;;  %v947_v28 = vrot.slane %v841_v19, 5  ;;  %v290_v29 = vld [vmem:[%s4313_s14 + $0x8] sm:$0x1]  ;;  %v340_v30 = vshrl.u32 %v288_v25, 16 }
  0x18   : > { %v3906_v27 = vcombine.low %v1982_v13, %v1985_v21  ;;  %v343_v31 = vshll.u32 %v288_v25, 16  ;;  %v941_v32 = vsel %vm4315_vm2, %v939_v23, %v940_v16  ;;  %v945_v33 = vsel %vm4315_vm2, %v3699_v20, %v944_v24  ;;  %v3845_v36 = vld [vmem:[%s4313_s14 + $0x18] sm:$0xe]  ;;  %v3846_v37 = vld [vmem:[%s4313_s14 + $0x1c] sm:$0xf] }
  0x19   : > { %v946_v34 = vrot.slane %v944_v24, 4  ;;  %v349_v35 = vshll.u32 %v289_v26, 16  ;;  %v3714_v38 = vcombine.low %v938_v22, %v941_v32  ;;  %v342_v39 = vrot.slane %v340_v30, 4  ;;  %v3847_v42 = vld [vmem:[%s4313_s14 + $0x20] sm:$0x1] }
  0x1a   : > { %2139 = vrot.lane.b32.xlu0 %v3906_v27, %s4277_s16  ;;  %v345_v40 = vrot.slane %v343_v31, 5  ;;  %v353_v41 = vshrl.u32 %v289_v26, 16  ;;  %v359_v45 = vshll.u32 %v290_v29, 16  ;;  %v3891_v46 = vrot.slane %v3845_v36, 9  ;;  %v291_v47 = vld [vmem:[%s4313_s14 + $0xc] sm:$0xf] }
  0x1b   : > { %v948_v43 = vsel %vm4315_vm2, %v946_v34, %v947_v28  ;;  %v351_v44 = vrot.slane %v349_v35, 5  ;;  %1095 = vrot.lane.b32.xlu1 %v3714_v38, %s4278_s17  ;;  %v1988_v51 = vrot.slane %v3846_v37, 5  ;;  %v292_v52 = vld [vmem:[%s4313_s14 + $0x10] sm:$0xf]  ;;  %v1991_v55 = vrot.slane %v3847_v42, 5 }
  0x1c   : > { %v3715_v48 = vcombine.low %v945_v33, %v948_v43  ;;  %v346_v49 = vor.u32 %v345_v40, %v342_v39  ;;  %v355_v50 = vrot.slane %v353_v41, 4  ;;  %v361_v54 = vrot.slane %v359_v45, 5  ;;  %v293_v56 = vld [vmem:[%s4313_s14 + $0x14] sm:$0x1]  ;;  %v3781_v63 = vld [vmem:[%s4313_s14 + $0x18] sm:$0xf] }
  0x1d   : > { %v364_v57 = vshrl.u32 %v291_v47, 16  ;;  %v367_v58 = vshll.u32 %v291_v47, 16  ;;  %v1989_v61 = vsel %vm4315_vm2, %v3891_v46, %v1988_v51  ;;  %v1990_v62 = vrot.slane %v1988_v51, 4  ;;  %v3782_v5 = vld [vmem:[%s4313_s14 + $0x1c] sm:$0xf] }
  0x1e   : > { %v347_v59 = vrot.slane %v346_v49, 4  ;;  %v356_v60 = vor.u32 %v355_v50, %v351_v44  ;;  %v373_v3 = vshll.u32 %v292_v52, 16  ;;  %v377_v4 = vshrl.u32 %v292_v52, 16  ;;  %v3783_v10 = vld [vmem:[%s4313_s14 + $0x20] sm:$0x1] }
  0x1f   : > { %v366_v1 = vrot.slane %v364_v57, 4  ;;  %v369_v2 = vrot.slane %v367_v58, 5  ;;  %1097 = vrot.lane.b32.xlu1 %v3715_v48, %s4278_s17  ;;  %v1992_v8 = vsel %vm4315_vm2, %v1990_v62, %v1991_v55  ;;  %v383_v9 = vshll.u32 %v293_v56, 16  ;;  %v3778_v11 = vld [vmem:[%s4313_s14 + $0xc] sm:$0xf] }
  0x20   : > { %v352_v6 = vsel %vm4356_vm5, %v347_v59, %v351_v44  ;;  %v357_v7 = vrot.slane %v356_v60, 4  ;;  %v3907_v12 = vcombine.low %v1989_v61, %v1992_v8  ;;  %v375_v14 = vrot.slane %v373_v3, 5  ;;  %v3779_v28 = vld [vmem:[%s4313_s14 + $0x10] sm:$0xf]  ;;  %v3780_v32 = vld [vmem:[%s4313_s14 + $0x14] sm:$0x1] }
  0x21   : > { %v370_v13 = vor.u32 %v369_v2, %v366_v1  ;;  %v379_v15 = vrot.slane %v377_v4, 4  ;;  %v385_v17 = vrot.slane %v383_v9, 5  ;;  %v1411_v18 = vshrl.u32 %v3781_v63, 16  ;;  %v3970_v38 = vld [vmem:[%s4313_s14 + $0x18] sm:$0xf] }
  0x22   : > { %v362_v16 = vsel %vm4356_vm5, %v357_v7, %v361_v54  ;;  %v1414_v19 = vshll.u32 %v3781_v63, 16  ;;  %v1420_v23 = vshll.u32 %v3782_v5, 16  ;;  %v1424_v26 = vshrl.u32 %v3782_v5, 16  ;;  %v3971_v47 = vld [vmem:[%s4313_s14 + $0x1c] sm:$0xf] }
  0x23   : > { %v3682_v20 = vcombine.low %v352_v6, %v362_v16  ;;  %v371_v21 = vrot.slane %v370_v13, 4  ;;  %v380_v22 = vor.u32 %v379_v15, %v375_v14  ;;  %2141 = vrot.lane.b32.xlu1 %v3907_v12, %s4277_s16  ;;  %v1413_v24 = vrot.slane %v1411_v18, 4  ;;  %v3972_v56 = vld [vmem:[%s4313_s14 + $0x20] sm:$0x1]  ;;  %v3973_v62 = vld [vmem:[%s4313_s14 + $0x24] sm:$0xf] }
  0x24   : > { %v1416_v25 = vrot.slane %v1414_v19, 5  ;;  %v1430_v27 = vshll.u32 %v3783_v10, 16  ;;  %v1422_v31 = vrot.slane %v1420_v23, 5  ;;  %v1387_v33 = vshrl.u32 %v3778_v11, 16  ;;  %v3974_v4 = vld [vmem:[%s4313_s14 + $0x28] sm:$0xf] }
  0x25   : > { %771 = vrot.lane.b32.xlu0 %v3682_v20, %s4279_s18  ;;  %v376_v29 = vsel %vm4356_vm5, %v371_v21, %v375_v14  ;;  %v381_v30 = vrot.slane %v380_v22, 4  ;;  %v1426_v35 = vrot.slane %v1424_v26, 4  ;;  %v1390_v37 = vshll.u32 %v3778_v11, 16  ;;  %v3975_v12 = vld [vmem:[%s4313_s14 + $0x2c] sm:$0x1]  ;;  %v4220_v16 = vld [vmem:[%s4313_s14 + $0x24] sm:$0xff]  }
  0x26   : > { %v1417_v34 = vor.u32 %v1416_v25, %v1413_v24  ;;  %v1432_v36 = vrot.slane %v1430_v27, 5  ;;  %v1389_v40 = vrot.slane %v1387_v33, 4  ;;  %v1396_v41 = vshll.u32 %v3779_v28, 16  ;;  %v4034_v14 = vld [vmem:[%s4313_s14 + $0x18] sm:$0xe] }
  0x27   : > { %v386_v39 = vsel %vm4356_vm5, %v381_v30, %v385_v17  ;;  %v1400_v42 = vshrl.u32 %v3779_v28, 16  ;;  %v1427_v45 = vor.u32 %v1426_v35, %v1422_v31  ;;  %v1392_v46 = vrot.slane %v1390_v37, 5  ;;  %v4035_v20 = vld [vmem:[%s4313_s14 + $0x1c] sm:$0xf]  ;;  %v4036_v25 = vld [vmem:[%s4313_s14 + $0x20] sm:$0x1] }
  0x28   : > { %v3683_v43 = vcombine.low %v376_v29, %v386_v39  ;;  %v1418_v44 = vrot.slane %v1417_v34, 4  ;;  %v1398_v48 = vrot.slane %v1396_v41, 5  ;;  %v1406_v50 = vshll.u32 %v3780_v32, 16  ;;  %v294_v30 = vld [vmem:[%s4313_s14 + $0x18] sm:$0xf] }
  0x29   : > { %v1402_v49 = vrot.slane %v1400_v42, 4  ;;  %v2431_v51 = vshrl.u32 %v3970_v38, 16  ;;  %v1428_v54 = vrot.slane %v1427_v45, 4  ;;  %v1393_v55 = vor.u32 %v1392_v46, %v1389_v40  ;;  %v296_v41 = vld [vmem:[%s4313_s14 + $0x20] sm:$0x1] }
  0x2a   : > { %773 = vrot.lane.b32.xlu0 %v3683_v43, %s4279_s18  ;;  %v1423_v52 = vsel %vm4356_vm5, %v1418_v44, %v1422_v31  ;;  %v2434_v57 = vshll.u32 %v3970_v38, 16  ;;  %v1408_v59 = vrot.slane %v1406_v50, 5  ;;  %v2440_v61 = vshll.u32 %v3971_v47, 16  ;;  %v4219_v31 = vld [vmem:[%s4313_s14 + $0x18] sm:$0xff]   ;;  %v4037_v42 = vld [vmem:[%s4313_s14 + $0x24] sm:$0xe] }
  0x2b   : > { %v1403_v58 = vor.u32 %v1402_v49, %v1398_v48  ;;  %v2433_v60 = vrot.slane %v2431_v51, 4  ;;  %v1433_v63 = vsel %vm4356_vm5, %v1428_v54, %v1432_v36  ;;  %v1394_v1 = vrot.slane %v1393_v55, 4  ;;  %v295_v36 = vld [vmem:[%s4313_s14 + $0x1c] sm:$0xf]  ;;  %v297_v54 = vld [vmem:[%s4313_s14 + $0x24] sm:$0xf] }
  0x2c   : > { %v2436_v2 = vrot.slane %v2434_v57, 5  ;;  %v2444_v3 = vshrl.u32 %v3971_v47, 16  ;;  %v3827_v5 = vcombine.low %v1423_v52, %v1433_v63  ;;  %v2442_v7 = vrot.slane %v2440_v61, 5  ;;  %v4038_v47 = vld [vmem:[%s4313_s14 + $0x28] sm:$0xf] }
  0x2d   : > { %v1404_v6 = vrot.slane %v1403_v58, 4  ;;  %v2450_v8 = vshll.u32 %v3972_v56, 16  ;;  %v1399_v9 = vsel %vm4356_vm5, %v1394_v1, %v1398_v48  ;;  %v2455_v13 = vshrl.u32 %v3973_v62, 16  ;;  %v4039_v48 = vld [vmem:[%s4313_s14 + $0x2c] sm:$0x1] }
  0x2e   : > { %v2437_v10 = vor.u32 %v2436_v2, %v2433_v60  ;;  %v2446_v11 = vrot.slane %v2444_v3, 4  ;;  %1820 = vrot.lane.b32.xlu1 %v3827_v5, %s4280_s19  ;;  %v2458_v18 = vshll.u32 %v3973_v62, 16  ;;  %v2464_v19 = vshll.u32 %v3974_v4, 16 }
  0x2f   : > { %v1409_v15 = vsel %vm4356_vm5, %v1404_v6, %v1408_v59  ;;  %v2452_v17 = vrot.slane %v2450_v8, 5  ;;  %v2457_v24 = vrot.slane %v2455_v13, 4  ;;  %v2468_v28 = vshrl.u32 %v3974_v4, 16  ;;  %v298_v8 = vld [vmem:[%s4313_s14 + $0x28] sm:$0xf] }
  0x30   : > { %v3826_v21 = vcombine.low %v1399_v9, %v1409_v15  ;;  %v2438_v22 = vrot.slane %v2437_v10, 4  ;;  %v2447_v23 = vor.u32 %v2446_v11, %v2442_v7  ;;  %v2460_v26 = vrot.slane %v2458_v18, 5 }
  0x31   : > { %v2466_v27 = vrot.slane %v2464_v19, 5  ;;  %v2474_v29 = vshll.u32 %v3975_v12, 16  ;;  %v4082_v34 = vrot.slane %v4034_v14, 9  ;;  %v3025_v35 = vrot.slane %v4035_v20, 5  ;;  %v299_v12 = vld [vmem:[%s4313_s14 + $0x2c] sm:$0x1] }
  0x32   : > { %1818 = vrot.lane.b32.xlu0 %v3826_v21, %s4280_s19  ;;  %v2443_v32 = vsel %vm4356_vm5, %v2438_v22, %v2442_v7  ;;  %v2448_v33 = vrot.slane %v2447_v23, 4  ;;  %2319 = vrot.lane.b32.xlu1 %v4220_v16, %s4281_s20  ;;  %v2461_v37 = vor.u32 %v2460_v26, %v2457_v24  ;;  %v2470_v38 = vrot.slane %v2468_v28, 4  ;;  %v842_v14 = vld [vmem:[%s4313_s14 + $0x18] sm:$0xe]  ;;  %v843_v19 = vld [vmem:[%s4313_s14 + $0x1c] sm:$0xf] }
  0x33   : > { %v2476_v39 = vrot.slane %v2474_v29, 5  ;;  %v3028_v40 = vrot.slane %v4036_v25, 5  ;;  %v3026_v44 = vsel %vm4315_vm2, %v4082_v34, %v3025_v35  ;;  %v3027_v45 = vrot.slane %v3025_v35, 4  ;;  %v844_v24 = vld [vmem:[%s4313_s14 + $0x20] sm:$0x1] }
  0x34   : > { %v2453_v43 = vsel %vm4356_vm5, %v2448_v33, %v2452_v17  ;;  %v388_v46 = vshrl.u32 %v294_v30, 16  ;;  %v2462_v50 = vrot.slane %v2461_v37, 4  ;;  %v2471_v51 = vor.u32 %v2470_v38, %v2466_v27  ;;  %v845_v29 = vld [vmem:[%s4313_s14 + $0x24] sm:$0xe]  ;;  %v847_v35 = vld [vmem:[%s4313_s14 + $0x2c] sm:$0x1] }
  0x35   : > { %v4018_v49 = vcombine.low %v2443_v32, %v2453_v43  ;;  %v391_v52 = vshll.u32 %v294_v30, 16  ;;  %v3029_v55 = vsel %vm4315_vm2, %v3027_v45, %v3028_v40  ;;  %v397_v57 = vshll.u32 %v295_v36, 16  ;;  %v846_v30 = vld [vmem:[%s4313_s14 + $0x28] sm:$0xf] }
  0x36   : > { %2317 = vrot.lane.b32.xlu0 %v4219_v31, %s4281_s20  ;;  %v390_v56 = vrot.slane %v388_v46, 4  ;;  %v401_v58 = vshrl.u32 %v295_v36, 16  ;;  %v2467_v59 = vsel %vm4356_vm5, %v2462_v50, %v2466_v27  ;;  %v2472_v60 = vrot.slane %v2471_v51, 4  ;;  %v3784_v36 = vld [vmem:[%s4313_s14 + $0x24] sm:$0xf] }
  0x37   : > { %v4098_v61 = vcombine.low %v3026_v44, %v3029_v55  ;;  %v393_v62 = vrot.slane %v391_v52, 5  ;;  %v399_v63 = vrot.slane %v397_v57, 5  ;;  %v407_v2 = vshll.u32 %v296_v41, 16  ;;  %v3785_v41 = vld [vmem:[%s4313_s14 + $0x28] sm:$0xf]  ;;  %v4237_v55 = vld [vmem:[%s5393_s1] sm:$0xff]  }
  0x38   : > { %v403_v1 = vrot.slane %v401_v58, 4  ;;  %v4083_v3 = vrot.slane %v4037_v42, 9  ;;  %v2477_v4 = vsel %vm4356_vm5, %v2472_v60, %v2476_v39  ;;  %v3032_v6 = vrot.slane %v4038_v47, 5  ;;  %4154 = vmatprep.subr.bf16.mxu0 %v4237_v55  ;;  %4192 = vmatprep.subr.bf16.mxu1 %v4237_v55 }
  0x39   : > { %v394_v5 = vor.u32 %v393_v62, %v390_v56  ;;  %v3035_v7 = vrot.slane %v4039_v48, 5  ;;  %v4019_v9 = vcombine.low %v2467_v59, %v2477_v4  ;;  %v409_v11 = vrot.slane %v407_v2, 5  ;;  %v3786_v59 = vld [vmem:[%s4313_s14 + $0x2c] sm:$0x1]  ;;  %v3787_v2 = vld [vmem:[%s4313_s14 + $0x30] sm:$0xf]  ;;  %4155 = vmatpush3.bf16.msra.mxu0 %v4237_v55  ;;  %4195 = vmatpush3.bf16.msra.mxu1 %v4237_v55 }
  0x3a   : > { %2862 = vrot.lane.b32.xlu0 %v4018_v49, %s4282_s21  ;;  %v404_v10 = vor.u32 %v403_v1, %v399_v63  ;;  %v412_v13 = vshrl.u32 %v297_v54, 16  ;;  %v3033_v16 = vsel %vm4315_vm2, %v4083_v3, %v3032_v6  ;;  %v3034_v17 = vrot.slane %v3032_v6, 4  ;;  %v3788_v3 = vld [vmem:[%s4313_s14 + $0x34] sm:$0xf] }
  0x3b   : > { %v395_v15 = vrot.slane %v394_v5, 4  ;;  %v415_v18 = vshll.u32 %v297_v54, 16  ;;  %2864 = vrot.lane.b32.xlu1 %v4019_v9, %s4282_s21  ;;  %v421_v22 = vshll.u32 %v298_v8, 16  ;;  %v425_v23 = vshrl.u32 %v298_v8, 16  ;;  %v3789_v9 = vld [vmem:[%s4313_s14 + $0x38] sm:$0x1] }
  0x3c   : > { %v405_v20 = vrot.slane %v404_v10, 4  ;;  %v414_v21 = vrot.slane %v412_v13, 4  ;;  %v3036_v26 = vsel %vm4315_vm2, %v3034_v17, %v3035_v7  ;;  %v431_v28 = vshll.u32 %v299_v12, 16  ;;  %v4221_v7 = vld [vmem:[%s4313_s14 + $0x24] sm:$0xff]  }
  0x3d   : > { %v400_v25 = vsel %vm4356_vm5, %v395_v15, %v399_v63  ;;  %v417_v27 = vrot.slane %v415_v18, 5  ;;  %v4099_v32 = vcombine.low %v3033_v16, %v3036_v26  ;;  %v423_v33 = vrot.slane %v421_v22, 5  ;;  %v3848_v10 = vld [vmem:[%s4313_s14 + $0x24] sm:$0xe]  ;;  %v3849_v15 = vld [vmem:[%s4313_s14 + $0x28] sm:$0xf] }
  0x3e   : > { %3183 = vrot.lane.b32.xlu0 %v4098_v61, %s4283_s22  ;;  %v410_v31 = vsel %vm4356_vm5, %v405_v20, %v409_v11  ;;  %v427_v34 = vrot.slane %v425_v23, 4  ;;  %v433_v39 = vrot.slane %v431_v28, 5  ;;  %v3700_v40 = vrot.slane %v842_v14, 9  ;;  %v3850_v16 = vld [vmem:[%s4313_s14 + $0x2c] sm:$0x1] }
  0x3f   : > { %v3684_v37 = vcombine.low %v400_v25, %v410_v31  ;;  %v418_v38 = vor.u32 %v417_v27, %v414_v21  ;;  %v951_v43 = vrot.slane %v843_v19, 5  ;;  %v954_v44 = vrot.slane %v844_v24, 5  ;;  %v3851_v21 = vld [vmem:[%s4313_s14 + $0x30] sm:$0xe]  ;;  %v3852_v26 = vld [vmem:[%s4313_s14 + $0x34] sm:$0xf] }
  0x40   : > { %v428_v42 = vor.u32 %v427_v34, %v423_v33  ;;  %v3701_v45 = vrot.slane %v845_v29, 9  ;;  %v958_v47 = vrot.slane %v846_v30, 5  ;;  %v961_v48 = vrot.slane %v847_v35, 5  ;;  %v3853_v31 = vld [vmem:[%s4313_s14 + $0x38] sm:$0x1] }
  0x41   : > { %775 = vrot.lane.b32.xlu1 %v3684_v37, %s4279_s18  ;;  %v419_v46 = vrot.slane %v418_v38, 4  ;;  %v1435_v49 = vshrl.u32 %v3784_v36, 16  ;;  %v952_v51 = vsel %vm4315_vm2, %v3700_v40, %v951_v43  ;;  %v953_v52 = vrot.slane %v951_v43, 4  ;;  %v4222_v37 = vld [vmem:[%s4313_s14 + $0x30] sm:$0xff]  }
  0x42   : > { %3185 = vrot.lane.b32.xlu0 %v4099_v32, %s4283_s22  ;;  %v429_v50 = vrot.slane %v428_v42, 4  ;;  %v1438_v54 = vshll.u32 %v3784_v36, 16  ;;  %v959_v57 = vsel %vm4315_vm2, %v3701_v45, %v958_v47  ;;  %v960_v58 = vrot.slane %v958_v47, 4  ;;  %v4239_v32 = vld [vmem:[%s5393_s1 + $0x8] sm:$0xff]  }
  0x43   : > { %v424_v56 = vsel %vm4356_vm5, %v419_v46, %v423_v33  ;;  %v1437_v60 = vrot.slane %v1435_v49, 4  ;;  %v955_v62 = vsel %vm4315_vm2, %v953_v52, %v954_v44  ;;  %v1444_v1 = vshll.u32 %v3785_v41, 16  ;;  %v3976_v46 = vld [vmem:[%s4313_s14 + $0x30] sm:$0xf]  ;;  %4156 = vmatprep.subr.bf16.mxu0 %v4239_v32  ;;  %4193 = vmatprep.subr.bf16.mxu1 %v4239_v32 }
  0x44   : > { %v434_v61 = vsel %vm4356_vm5, %v429_v50, %v433_v39  ;;  %v1440_v63 = vrot.slane %v1438_v54, 5  ;;  %v3716_v5 = vcombine.low %v952_v51, %v955_v62  ;;  %v962_v6 = vsel %vm4315_vm2, %v960_v58, %v961_v48  ;;  %v3977_v51 = vld [vmem:[%s4313_s14 + $0x34] sm:$0xf]  ;;  %4157 = vmatpush3.bf16.msra.mxu0 %v4239_v32  ;;  %4196 = vmatpush3.bf16.msra.mxu1 %v4239_v32  ;;  %v3979_v62 = vld [vmem:[%s4313_s14 + $0x3c] sm:$0xf] }
  0x45   : > { %v3685_v4 = vcombine.low %v424_v56, %v434_v61  ;;  %v1448_v8 = vshrl.u32 %v3785_v41, 16  ;;  %v3717_v11 = vcombine.low %v959_v57, %v962_v6  ;;  %v1446_v13 = vrot.slane %v1444_v1, 5 }
  0x46   : > { %v1441_v12 = vor.u32 %v1440_v63, %v1437_v60  ;;  %v1454_v14 = vshll.u32 %v3786_v59, 16  ;;  %1099 = vrot.lane.b32.xlu0 %v3716_v5, %s4278_s17  ;;  %v1459_v18 = vshrl.u32 %v3787_v2, 16  ;;  %v1462_v19 = vshll.u32 %v3787_v2, 16  ;;  %v3978_v59 = vld [vmem:[%s4313_s14 + $0x38] sm:$0x1] }
  0x47   : > { %777 = vrot.lane.b32.xlu1 %v3685_v4, %s4279_s18  ;;  %v1450_v17 = vrot.slane %v1448_v8, 4  ;;  %v1468_v20 = vshll.u32 %v3788_v3, 16  ;;  %v1472_v24 = vshrl.u32 %v3788_v3, 16  ;;  %v1478_v25 = vshll.u32 %v3789_v9, 16  ;;  %v3980_v4 = vld [vmem:[%s4313_s14 + $0x40] sm:$0xf] }
  0x48   : > { %v1442_v22 = vrot.slane %v1441_v12, 4  ;;  %v1456_v23 = vrot.slane %v1454_v14, 5  ;;  %v1461_v28 = vrot.slane %v1459_v18, 4  ;;  %v1464_v29 = vrot.slane %v1462_v19, 5  ;;  %v3981_v5 = vld [vmem:[%s4313_s14 + $0x44] sm:$0x1] }
  0x49   : > { %v1451_v27 = vor.u32 %v1450_v17, %v1446_v13  ;;  %v1470_v30 = vrot.slane %v1468_v20, 5  ;;  %v1474_v34 = vrot.slane %v1472_v24, 4  ;;  %v1480_v35 = vrot.slane %v1478_v25, 5  ;;  %v4223_v17 = vld [vmem:[%s4313_s14 + $0x30] sm:$0xff]  }
  0x4a   : > { %v1447_v33 = vsel %vm4356_vm5, %v1442_v22, %v1446_v13  ;;  %v3892_v36 = vrot.slane %v3848_v10, 9  ;;  %1277 = vrot.lane.b32.xlu0 %v4221_v7, %s4276_s15  ;;  %v1465_v39 = vor.u32 %v1464_v29, %v1461_v28  ;;  %v1995_v40 = vrot.slane %v3849_v15, 5  ;;  %v4040_v10 = vld [vmem:[%s4313_s14 + $0x30] sm:$0xe] }
  0x4b   : > { %1101 = vrot.lane.b32.xlu1 %v3717_v11, %s4278_s17  ;;  %v1452_v38 = vrot.slane %v1451_v27, 4  ;;  %v1998_v41 = vrot.slane %v3850_v16, 5  ;;  %v1475_v42 = vor.u32 %v1474_v34, %v1470_v30  ;;  %v3893_v43 = vrot.slane %v3851_v21, 9  ;;  %v4041_v11 = vld [vmem:[%s4313_s14 + $0x34] sm:$0xf] }
  0x4c   : > { %v2002_v44 = vrot.slane %v3852_v26, 5  ;;  %v2005_v45 = vrot.slane %v3853_v31, 5  ;;  %v1466_v48 = vrot.slane %v1465_v39, 4  ;;  %v1996_v49 = vsel %vm4315_vm2, %v3892_v36, %v1995_v40  ;;  %v4042_v16 = vld [vmem:[%s4313_s14 + $0x38] sm:$0x1]  ;;  %v4224_v36 = vld [vmem:[%s4313_s14 + $0x3c] sm:$0xff]  }
  0x4d   : > { %v1457_v47 = vsel %vm4356_vm5, %v1452_v38, %v1456_v23  ;;  %v1997_v50 = vrot.slane %v1995_v40, 4  ;;  %v1476_v54 = vrot.slane %v1475_v42, 4  ;;  %v2479_v60 = vshrl.u32 %v3976_v46, 16  ;;  %v300_v22 = vld [vmem:[%s4313_s14 + $0x30] sm:$0xf] }
  0x4e   : > { %v3828_v52 = vcombine.low %v1447_v33, %v1457_v47  ;;  %v2003_v55 = vsel %vm4315_vm2, %v3893_v43, %v2002_v44  ;;  %v2004_v56 = vrot.slane %v2002_v44, 4  ;;  %v1471_v57 = vsel %vm4356_vm5, %v1466_v48, %v1470_v30  ;;  %v302_v44 = vld [vmem:[%s4313_s14 + $0x38] sm:$0x1] }
  0x4f   : > { %1279 = vrot.lane.b32.xlu1 %v4222_v37, %s4276_s15  ;;  %v1999_v58 = vsel %vm4315_vm2, %v1997_v50, %v1998_v41  ;;  %v2482_v61 = vshll.u32 %v3976_v46, 16  ;;  %v1481_v63 = vsel %vm4356_vm5, %v1476_v54, %v1480_v35  ;;  %v2488_v3 = vshll.u32 %v3977_v51, 16  ;;  %v301_v35 = vld [vmem:[%s4313_s14 + $0x34] sm:$0xf]  ;;  %v4043_v50 = vld [vmem:[%s4313_s14 + $0x3c] sm:$0xe] }
  0x50   : > { %1822 = vrot.lane.b32.xlu0 %v3828_v52, %s4280_s19  ;;  %v3908_v1 = vcombine.low %v1996_v49, %v1999_v58  ;;  %v2006_v2 = vsel %vm4315_vm2, %v2004_v56, %v2005_v45  ;;  %v3829_v6 = vcombine.low %v1471_v57, %v1481_v63  ;;  %v2481_v8 = vrot.slane %v2479_v60, 4  ;;  %v4044_v56 = vld [vmem:[%s4313_s14 + $0x40] sm:$0xf]  ;;  %v4045_v57 = vld [vmem:[%s4313_s14 + $0x44] sm:$0x1] }
  0x51   : > { %v3909_v7 = vcombine.low %v2003_v55, %v2006_v2  ;;  %v2484_v9 = vrot.slane %v2482_v61, 5  ;;  %v2490_v12 = vrot.slane %v2488_v3, 5  ;;  %v2492_v13 = vshrl.u32 %v3977_v51, 16 }
  0x52   : > { %v2498_v14 = vshll.u32 %v3978_v59, 16  ;;  %v2503_v15 = vshrl.u32 %v3979_v62, 16  ;;  %v2506_v19 = vshll.u32 %v3979_v62, 16  ;;  %v2512_v20 = vshll.u32 %v3980_v4, 16  ;;  %v303_v62 = vld [vmem:[%s4313_s14 + $0x3c] sm:$0xf] }
  0x53   : > { %1824 = vrot.lane.b32.xlu1 %v3829_v6, %s4280_s19  ;;  %v2485_v18 = vor.u32 %v2484_v9, %v2481_v8  ;;  %v2516_v21 = vshrl.u32 %v3980_v4, 16  ;;  %v2494_v23 = vrot.slane %v2492_v13, 4  ;;  %v2522_v26 = vshll.u32 %v3981_v5, 16  ;;  %v304_v4 = vld [vmem:[%s4313_s14 + $0x40] sm:$0xf] }
  0x54   : > { %2143 = vrot.lane.b32.xlu0 %v3908_v1, %s4277_s16  ;;  %v2500_v24 = vrot.slane %v2498_v14, 5  ;;  %v2505_v25 = vrot.slane %v2503_v15, 4  ;;  %v2508_v28 = vrot.slane %v2506_v19, 5  ;;  %v2514_v29 = vrot.slane %v2512_v20, 5  ;;  %v305_v9 = vld [vmem:[%s4313_s14 + $0x44] sm:$0x1] }
  0x55   : > { %v2486_v27 = vrot.slane %v2485_v18, 4  ;;  %v2518_v30 = vrot.slane %v2516_v21, 4  ;;  %v2495_v31 = vor.u32 %v2494_v23, %v2490_v12  ;;  %v2524_v32 = vrot.slane %v2522_v26, 5  ;;  %v848_v14 = vld [vmem:[%s4313_s14 + $0x30] sm:$0xe] }
  0x56   : > { %v4084_v33 = vrot.slane %v4040_v10, 9  ;;  %v3039_v34 = vrot.slane %v4041_v11, 5  ;;  %v2509_v38 = vor.u32 %v2508_v28, %v2505_v25  ;;  %v3042_v40 = vrot.slane %v4042_v16, 5  ;;  %v849_v19 = vld [vmem:[%s4313_s14 + $0x34] sm:$0xf] }
  0x57   : > { %2145 = vrot.lane.b32.xlu1 %v3909_v7, %s4277_s16  ;;  %v2491_v37 = vsel %vm4356_vm5, %v2486_v27, %v2490_v12  ;;  %v2519_v39 = vor.u32 %v2518_v30, %v2514_v29  ;;  %v2496_v41 = vrot.slane %v2495_v31, 4  ;;  %v436_v45 = vshrl.u32 %v300_v22, 16  ;;  %v850_v20 = vld [vmem:[%s4313_s14 + $0x38] sm:$0x1] }
  0x58   : > { %2321 = vrot.lane.b32.xlu0 %v4223_v17, %s4281_s20  ;;  %v3040_v42 = vsel %vm4315_vm2, %v4084_v33, %v3039_v34  ;;  %v3041_v43 = vrot.slane %v3039_v34, 4  ;;  %v2510_v46 = vrot.slane %v2509_v38, 4  ;;  %v439_v48 = vshll.u32 %v300_v22, 16  ;;  %v852_v34 = vld [vmem:[%s4313_s14 + $0x40] sm:$0xf] }
  0x59   : > { %v2520_v47 = vrot.slane %v2519_v39, 4  ;;  %v445_v49 = vshll.u32 %v301_v35, 16  ;;  %v2501_v51 = vsel %vm4356_vm5, %v2496_v41, %v2500_v24  ;;  %v438_v54 = vrot.slane %v436_v45, 4 }
  0x5a   : > { %v3043_v52 = vsel %vm4315_vm2, %v3041_v43, %v3042_v40  ;;  %v449_v55 = vshrl.u32 %v301_v35, 16  ;;  %v4020_v58 = vcombine.low %v2491_v37, %v2501_v51  ;;  %v2515_v59 = vsel %vm4356_vm5, %v2510_v46, %v2514_v29  ;;  %v851_v29 = vld [vmem:[%s4313_s14 + $0x3c] sm:$0xe]  ;;  %v853_v35 = vld [vmem:[%s4313_s14 + $0x44] sm:$0x1] }
  0x5b   : > { %2323 = vrot.lane.b32.xlu1 %v4224_v36, %s4281_s20  ;;  %v2525_v60 = vsel %vm4356_vm5, %v2520_v47, %v2524_v32  ;;  %v4100_v61 = vcombine.low %v3040_v42, %v3043_v52  ;;  %v441_v1 = vrot.slane %v439_v48, 5  ;;  %v447_v2 = vrot.slane %v445_v49, 5  ;;  %v3790_v36 = vld [vmem:[%s4313_s14 + $0x3c] sm:$0xf]  ;;  %v3791_v48 = vld [vmem:[%s4313_s14 + $0x40] sm:$0xf] }
  0x5c   : > { %v4021_v63 = vcombine.low %v2515_v59, %v2525_v60  ;;  %v451_v3 = vrot.slane %v449_v55, 4  ;;  %2866 = vrot.lane.b32.xlu0 %v4020_v58, %s4282_s21  ;;  %v455_v5 = vshll.u32 %v302_v44, 16  ;;  %v4085_v6 = vrot.slane %v4043_v50, 9  ;;  %v3793_v60 = vld [vmem:[%s4313_s14 + $0x48] sm:$0xf] }
  0x5d   : > { %v3046_v7 = vrot.slane %v4044_v56, 5  ;;  %v3049_v8 = vrot.slane %v4045_v57, 5  ;;  %v442_v10 = vor.u32 %v441_v1, %v438_v54  ;;  %v460_v12 = vshrl.u32 %v303_v62, 16  ;;  %v3792_v54 = vld [vmem:[%s4313_s14 + $0x44] sm:$0x1] }
  0x5e   : > { %v452_v11 = vor.u32 %v451_v3, %v447_v2  ;;  %v463_v13 = vshll.u32 %v303_v62, 16  ;;  %v457_v15 = vrot.slane %v455_v5, 5  ;;  %v469_v18 = vshll.u32 %v304_v4, 16 }
  0x5f   : > { %2868 = vrot.lane.b32.xlu1 %v4021_v63, %s4282_s21  ;;  %v3047_v16 = vsel %vm4315_vm2, %v4085_v6, %v3046_v7  ;;  %v3048_v17 = vrot.slane %v3046_v7, 4  ;;  %v443_v21 = vrot.slane %v442_v10, 4  ;;  %v462_v23 = vrot.slane %v460_v12, 4  ;;  %v3795_v7 = vld [vmem:[%s4313_s14 + $0x50] sm:$0x1] }
  0x60   : > { %v453_v22 = vrot.slane %v452_v11, 4  ;;  %v465_v24 = vrot.slane %v463_v13, 5  ;;  %3187 = vrot.lane.b32.xlu0 %v4100_v61, %s4283_s22  ;;  %v471_v26 = vrot.slane %v469_v18, 5  ;;  %v473_v27 = vshrl.u32 %v304_v4, 16  ;;  %v4225_v11 = vld [vmem:[%s4313_s14 + $0x3c] sm:$0xff]  }
  0x61   : > { %v3050_v25 = vsel %vm4315_vm2, %v3048_v17, %v3049_v8  ;;  %v479_v28 = vshll.u32 %v305_v9, 16  ;;  %v448_v30 = vsel %vm4356_vm5, %v443_v21, %v447_v2  ;;  %v3702_v40 = vrot.slane %v848_v14, 9  ;;  %v3794_v2 = vld [vmem:[%s4313_s14 + $0x4c] sm:$0xf]  ;;  %v3854_v8 = vld [vmem:[%s4313_s14 + $0x3c] sm:$0xe] }
  0x62   : > { %v458_v31 = vsel %vm4356_vm5, %v453_v22, %v457_v15  ;;  %v4101_v32 = vcombine.low %v3047_v16, %v3050_v25  ;;  %v466_v33 = vor.u32 %v465_v24, %v462_v23  ;;  %v475_v38 = vrot.slane %v473_v27, 4  ;;  %v3855_v14 = vld [vmem:[%s4313_s14 + $0x40] sm:$0xf]  ;;  %v3856_v15 = vld [vmem:[%s4313_s14 + $0x44] sm:$0x1] }
  0x63   : > { %v3686_v37 = vcombine.low %v448_v30, %v458_v31  ;;  %v481_v39 = vrot.slane %v479_v28, 5  ;;  %v965_v42 = vrot.slane %v849_v19, 5  ;;  %v968_v43 = vrot.slane %v850_v20, 5  ;;  %v3857_v20 = vld [vmem:[%s4313_s14 + $0x48] sm:$0xe] }
  0x64   : > { %v467_v41 = vrot.slane %v466_v33, 4  ;;  %v3703_v44 = vrot.slane %v851_v29, 9  ;;  %3189 = vrot.lane.b32.xlu0 %v4101_v32, %s4283_s22  ;;  %v476_v45 = vor.u32 %v475_v38, %v471_v26  ;;  %v972_v46 = vrot.slane %v852_v34, 5  ;;  %v3858_v25 = vld [vmem:[%s4313_s14 + $0x4c] sm:$0xf] }
  0x65   : > { %779 = vrot.lane.b32.xlu1 %v3686_v37, %s4279_s18  ;;  %v975_v47 = vrot.slane %v853_v35, 5  ;;  %v1483_v49 = vshrl.u32 %v3790_v36, 16  ;;  %v966_v51 = vsel %vm4315_vm2, %v3702_v40, %v965_v42  ;;  %v967_v52 = vrot.slane %v965_v42, 4  ;;  %v3859_v30 = vld [vmem:[%s4313_s14 + $0x50] sm:$0x1] }
  0x66   : > { %v472_v50 = vsel %vm4356_vm5, %v467_v41, %v471_v26  ;;  %v1486_v55 = vshll.u32 %v3790_v36, 16  ;;  %v477_v56 = vrot.slane %v476_v45, 4  ;;  %v973_v57 = vsel %vm4315_vm2, %v3703_v44, %v972_v46  ;;  %v3982_v44 = vld [vmem:[%s4313_s14 + $0x48] sm:$0xf] }
  0x67   : > { %v974_v58 = vrot.slane %v972_v46, 4  ;;  %v1485_v59 = vrot.slane %v1483_v49, 4  ;;  %v969_v61 = vsel %vm4315_vm2, %v967_v52, %v968_v43  ;;  %v1492_v63 = vshll.u32 %v3791_v48, 16  ;;  %v3983_v49 = vld [vmem:[%s4313_s14 + $0x4c] sm:$0xf] }
  0x68   : > { %v1488_v62 = vrot.slane %v1486_v55, 5  ;;  %v1496_v1 = vshrl.u32 %v3791_v48, 16  ;;  %v482_v3 = vsel %vm4356_vm5, %v477_v56, %v481_v39  ;;  %v3718_v4 = vcombine.low %v966_v51, %v969_v61  ;;  %v4226_v39 = vld [vmem:[%s4313_s14 + $0x48] sm:$0xff]   ;;  %v3985_v56 = vld [vmem:[%s4313_s14 + $0x54] sm:$0xf] }
  0x69   : > { %v976_v5 = vsel %vm4315_vm2, %v974_v58, %v975_v47  ;;  %v1502_v6 = vshll.u32 %v3792_v54, 16  ;;  %v3687_v9 = vcombine.low %v472_v50, %v482_v3  ;;  %v1494_v13 = vrot.slane %v1492_v63, 5  ;;  %v3984_v50 = vld [vmem:[%s4313_s14 + $0x50] sm:$0x1] }
  0x6a   : > { %v3719_v10 = vcombine.low %v973_v57, %v976_v5  ;;  %v1489_v12 = vor.u32 %v1488_v62, %v1485_v59  ;;  %1103 = vrot.lane.b32.xlu0 %v3718_v4, %s4278_s17  ;;  %v1498_v16 = vrot.slane %v1496_v1, 4  ;;  %v1507_v18 = vshrl.u32 %v3793_v60, 16 }
  0x6b   : > { %v1504_v17 = vrot.slane %v1502_v6, 5  ;;  %v1510_v19 = vshll.u32 %v3793_v60, 16  ;;  %781 = vrot.lane.b32.xlu1 %v3687_v9, %s4279_s18  ;;  %v1516_v22 = vshll.u32 %v3794_v2, 16  ;;  %v1520_v23 = vshrl.u32 %v3794_v2, 16  ;;  %v3986_v2 = vld [vmem:[%s4313_s14 + $0x58] sm:$0xf] }
  0x6c   : > { %v1490_v21 = vrot.slane %v1489_v12, 4  ;;  %v1526_v24 = vshll.u32 %v3795_v7, 16  ;;  %v1499_v26 = vor.u32 %v1498_v16, %v1494_v13  ;;  %v1509_v27 = vrot.slane %v1507_v18, 4  ;;  %v3987_v7 = vld [vmem:[%s4313_s14 + $0x5c] sm:$0x1] }
  0x6d   : > { %v1512_v28 = vrot.slane %v1510_v19, 5  ;;  %v3894_v29 = vrot.slane %v3854_v8, 9  ;;  %v1518_v32 = vrot.slane %v1516_v22, 5  ;;  %v1522_v33 = vrot.slane %v1520_v23, 4  ;;  %v4046_v12 = vld [vmem:[%s4313_s14 + $0x48] sm:$0xe] }
  0x6e   : > { %v1495_v31 = vsel %vm4356_vm5, %v1490_v21, %v1494_v13  ;;  %v1528_v34 = vrot.slane %v1526_v24, 5  ;;  %1281 = vrot.lane.b32.xlu0 %v4225_v11, %s4276_s15  ;;  %v1500_v35 = vrot.slane %v1499_v26, 4  ;;  %v2009_v37 = vrot.slane %v3855_v14, 5  ;;  %v4227_v13 = vld [vmem:[%s4313_s14 + $0x48] sm:$0xff]   ;;  %v4048_v23 = vld [vmem:[%s4313_s14 + $0x50] sm:$0x1] }
  0x6f   : > { %v1513_v36 = vor.u32 %v1512_v28, %v1509_v27  ;;  %v2012_v38 = vrot.slane %v3856_v15, 5  ;;  %1105 = vrot.lane.b32.xlu1 %v3719_v10, %s4278_s17  ;;  %v1523_v40 = vor.u32 %v1522_v33, %v1518_v32  ;;  %v3895_v41 = vrot.slane %v3857_v20, 9  ;;  %v4047_v18 = vld [vmem:[%s4313_s14 + $0x4c] sm:$0xf]  ;;  %v306_v28 = vld [vmem:[%s4313_s14 + $0x48] sm:$0xf] }
  0x70   : > { %v2016_v42 = vrot.slane %v3858_v25, 5  ;;  %v2019_v43 = vrot.slane %v3859_v30, 5  ;;  %v1505_v45 = vsel %vm4356_vm5, %v1500_v35, %v1504_v17  ;;  %v2010_v47 = vsel %vm4315_vm2, %v3894_v29, %v2009_v37  ;;  %v307_v33 = vld [vmem:[%s4313_s14 + $0x4c] sm:$0xf] }
  0x71   : > { %v1514_v46 = vrot.slane %v1513_v36, 4  ;;  %v2011_v48 = vrot.slane %v2009_v37, 4  ;;  %v3830_v51 = vcombine.low %v1495_v31, %v1505_v45  ;;  %v1524_v52 = vrot.slane %v1523_v40, 4  ;;  %v4050_v45 = vld [vmem:[%s4313_s14 + $0x58] sm:$0xf] }
  0x72   : > { %v2017_v54 = vsel %vm4315_vm2, %v3895_v41, %v2016_v42  ;;  %v2018_v55 = vrot.slane %v2016_v42, 4  ;;  %v2527_v59 = vshrl.u32 %v3982_v44, 16  ;;  %v2530_v60 = vshll.u32 %v3982_v44, 16  ;;  %v308_v42 = vld [vmem:[%s4313_s14 + $0x50] sm:$0x1] }
  0x73   : > { %v1519_v57 = vsel %vm4356_vm5, %v1514_v46, %v1518_v32  ;;  %v2013_v58 = vsel %vm4315_vm2, %v2011_v48, %v2012_v38  ;;  %1283 = vrot.lane.b32.xlu1 %v4226_v39, %s4276_s15  ;;  %1826 = vrot.lane.b32.xlu0 %v3830_v51, %s4280_s19  ;;  %v1529_v61 = vsel %vm4356_vm5, %v1524_v52, %v1528_v34  ;;  %v2536_v1 = vshll.u32 %v3983_v49, 16  ;;  %v4228_v38 = vld [vmem:[%s4313_s14 + $0x54] sm:$0xff]  }
  0x74   : > { %v3910_v62 = vcombine.low %v2010_v47, %v2013_v58  ;;  %v2020_v63 = vsel %vm4315_vm2, %v2018_v55, %v2019_v43  ;;  %v3831_v3 = vcombine.low %v1519_v57, %v1529_v61  ;;  %v2529_v5 = vrot.slane %v2527_v59, 4  ;;  %v4049_v44 = vld [vmem:[%s4313_s14 + $0x54] sm:$0xe] }
  0x75   : > { %v3911_v4 = vcombine.low %v2017_v54, %v2020_v63  ;;  %v2532_v6 = vrot.slane %v2530_v60, 5  ;;  %v2538_v8 = vrot.slane %v2536_v1, 5  ;;  %v2540_v9 = vshrl.u32 %v3983_v49, 16  ;;  %v309_v60 = vld [vmem:[%s4313_s14 + $0x54] sm:$0xf] }
  0x76   : > { %v2546_v10 = vshll.u32 %v3984_v50, 16  ;;  %v2551_v11 = vshrl.u32 %v3985_v56, 16  ;;  %v2554_v15 = vshll.u32 %v3985_v56, 16  ;;  %v2560_v16 = vshll.u32 %v3986_v2, 16  ;;  %v4051_v50 = vld [vmem:[%s4313_s14 + $0x5c] sm:$0x1] }
  0x77   : > { %v2533_v14 = vor.u32 %v2532_v6, %v2529_v5  ;;  %v2564_v17 = vshrl.u32 %v3986_v2, 16  ;;  %1828 = vrot.lane.b32.xlu1 %v3831_v3, %s4280_s19  ;;  %2147 = vrot.lane.b32.xlu0 %v3910_v62, %s4277_s16  ;;  %v2542_v19 = vrot.slane %v2540_v9, 4  ;;  %v2570_v22 = vshll.u32 %v3987_v7, 16  ;;  %v310_v2 = vld [vmem:[%s4313_s14 + $0x58] sm:$0xf] }
  0x78   : > { %v2548_v20 = vrot.slane %v2546_v10, 5  ;;  %v2553_v21 = vrot.slane %v2551_v11, 4  ;;  %v2556_v25 = vrot.slane %v2554_v15, 5  ;;  %v2562_v26 = vrot.slane %v2560_v16, 5  ;;  %v311_v9 = vld [vmem:[%s4313_s14 + $0x5c] sm:$0x1] }
  0x79   : > { %v2534_v24 = vrot.slane %v2533_v14, 4  ;;  %v2566_v27 = vrot.slane %v2564_v17, 4  ;;  %v2543_v29 = vor.u32 %v2542_v19, %v2538_v8  ;;  %v2572_v30 = vrot.slane %v2570_v22, 5  ;;  %v855_v17 = vld [vmem:[%s4313_s14 + $0x4c] sm:$0xf] }
  0x7a   : > { %v4086_v31 = vrot.slane %v4046_v12, 9  ;;  %v3053_v32 = vrot.slane %v4047_v18, 5  ;;  %v2557_v35 = vor.u32 %v2556_v25, %v2553_v21  ;;  %v3056_v37 = vrot.slane %v4048_v23, 5  ;;  %v854_v12 = vld [vmem:[%s4313_s14 + $0x48] sm:$0xe] }
  0x7b   : > { %v2539_v34 = vsel %vm4356_vm5, %v2534_v24, %v2538_v8  ;;  %v2567_v36 = vor.u32 %v2566_v27, %v2562_v26  ;;  %2149 = vrot.lane.b32.xlu1 %v3911_v4, %s4277_s16  ;;  %2325 = vrot.lane.b32.xlu0 %v4227_v13, %s4281_s20  ;;  %v2544_v39 = vrot.slane %v2543_v29, 4  ;;  %v484_v43 = vshrl.u32 %v306_v28, 16  ;;  %v856_v18 = vld [vmem:[%s4313_s14 + $0x50] sm:$0x1]  ;;  %v857_v19 = vld [vmem:[%s4313_s14 + $0x54] sm:$0xe] }
  0x7c   : > { %v3054_v40 = vsel %vm4315_vm2, %v4086_v31, %v3053_v32  ;;  %v3055_v41 = vrot.slane %v3053_v32, 4  ;;  %v2558_v46 = vrot.slane %v2557_v35, 4  ;;  %v487_v48 = vshll.u32 %v306_v28, 16  ;;  %v858_v32 = vld [vmem:[%s4313_s14 + $0x58] sm:$0xf] }
  0x7d   : > { %v2568_v47 = vrot.slane %v2567_v36, 4  ;;  %v493_v49 = vshll.u32 %v307_v33, 16  ;;  %v2549_v51 = vsel %vm4356_vm5, %v2544_v39, %v2548_v20  ;;  %v486_v54 = vrot.slane %v484_v43, 4  ;;  %v3797_v43 = vld [vmem:[%s4313_s14 + $0x58] sm:$0xf] }
  0x7e   : > { %v3057_v52 = vsel %vm4315_vm2, %v3055_v41, %v3056_v37  ;;  %v497_v55 = vshrl.u32 %v307_v33, 16  ;;  %v4022_v56 = vcombine.low %v2539_v34, %v2549_v51  ;;  %v2563_v57 = vsel %vm4356_vm5, %v2558_v46, %v2562_v26  ;;  %v859_v33 = vld [vmem:[%s4313_s14 + $0x5c] sm:$0x1]  ;;  %v3796_v34 = vld [vmem:[%s4313_s14 + $0x54] sm:$0xf] }
  0x7f   : > { %v2573_v58 = vsel %vm4356_vm5, %v2568_v47, %v2572_v30  ;;  %v4102_v59 = vcombine.low %v3054_v40, %v3057_v52  ;;  %2327 = vrot.lane.b32.xlu1 %v4228_v38, %s4281_s20  ;;  %v489_v62 = vrot.slane %v487_v48, 5  ;;  %v495_v63 = vrot.slane %v493_v49, 5  ;;  %v3798_v47 = vld [vmem:[%s4313_s14 + $0x5c] sm:$0x1] }
  0x80   : > { %v4023_v61 = vcombine.low %v2563_v57, %v2573_v58  ;;  %v499_v1 = vrot.slane %v497_v55, 4  ;;  %2870 = vrot.lane.b32.xlu0 %v4022_v56, %s4282_s21  ;;  %v503_v3 = vshll.u32 %v308_v42, 16  ;;  %v4087_v4 = vrot.slane %v4049_v44, 9 }
  0x81   : > { %v3060_v5 = vrot.slane %v4050_v45, 5  ;;  %v3063_v6 = vrot.slane %v4051_v50, 5  ;;  %v490_v7 = vor.u32 %v489_v62, %v486_v54  ;;  %v508_v10 = vshrl.u32 %v309_v60, 16 }
  0x82   : > { %v500_v8 = vor.u32 %v499_v1, %v495_v63  ;;  %v511_v11 = vshll.u32 %v309_v60, 16  ;;  %v505_v13 = vrot.slane %v503_v3, 5  ;;  %v517_v16 = vshll.u32 %v310_v2, 16 }
  0x83   : > { %v3061_v14 = vsel %vm4315_vm2, %v4087_v4, %v3060_v5  ;;  %v3062_v15 = vrot.slane %v3060_v5, 4  ;;  %2872 = vrot.lane.b32.xlu1 %v4023_v61, %s4282_s21  ;;  %v491_v20 = vrot.slane %v490_v7, 4  ;;  %v510_v22 = vrot.slane %v508_v10, 4  ;;  %v3801_v7 = vld [vmem:[%s4313_s14 + $0x68] sm:$0x1] }
  0x84   : > { %v501_v21 = vrot.slane %v500_v8, 4  ;;  %v513_v23 = vrot.slane %v511_v11, 5  ;;  %3191 = vrot.lane.b32.xlu0 %v4102_v59, %s4283_s22  ;;  %v519_v25 = vrot.slane %v517_v16, 5  ;;  %v521_v26 = vshrl.u32 %v310_v2, 16  ;;  %v4667_v54 = vpop.permute.xlu1 %1275  ;;  %v3799_v59 = vld [vmem:[%s4313_s14 + $0x60] sm:$0xf]  ;;  %v4672_v60 = vpop.permute.xlu0 %1273 }
  0x85   : > { %v3064_v24 = vsel %vm4315_vm2, %v3062_v15, %v3063_v6  ;;  %v527_v27 = vshll.u32 %v311_v9, 16  ;;  %v496_v28 = vsel %vm4356_vm5, %v491_v20, %v495_v63  ;;  %v3704_v38 = vrot.slane %v854_v12, 9  ;;  %v3800_v2 = vld [vmem:[%s4313_s14 + $0x64] sm:$0xf]  ;;  %v3860_v8 = vld [vmem:[%s4313_s14 + $0x54] sm:$0xe] }
  0x86   : > { %v506_v29 = vsel %vm4356_vm5, %v501_v21, %v505_v13  ;;  %v4103_v30 = vcombine.low %v3061_v14, %v3064_v24  ;;  %v514_v31 = vor.u32 %v513_v23, %v510_v22  ;;  %v523_v36 = vrot.slane %v521_v26, 4  ;;  %v4229_v11 = vld [vmem:[%s4313_s14 + $0x54] sm:$0xff]   ;;  %v3862_v15 = vld [vmem:[%s4313_s14 + $0x5c] sm:$0x1]  ;;  %v3863_v20 = vld [vmem:[%s4313_s14 + $0x60] sm:$0xe] }
  0x87   : > { %v3688_v35 = vcombine.low %v496_v28, %v506_v29  ;;  %v529_v37 = vrot.slane %v527_v27, 5  ;;  %v979_v40 = vrot.slane %v855_v17, 5  ;;  %v982_v41 = vrot.slane %v856_v18, 5  ;;  %v3861_v14 = vld [vmem:[%s4313_s14 + $0x58] sm:$0xf] }
  0x88   : > { %v515_v39 = vrot.slane %v514_v31, 4  ;;  %v3705_v42 = vrot.slane %v857_v19, 9  ;;  %3193 = vrot.lane.b32.xlu0 %v4103_v30, %s4283_s22  ;;  %v524_v44 = vor.u32 %v523_v36, %v519_v25  ;;  %v986_v45 = vrot.slane %v858_v32, 5  ;;  %v3865_v31 = vld [vmem:[%s4313_s14 + $0x68] sm:$0x1] }
  0x89   : > { %783 = vrot.lane.b32.xlu1 %v3688_v35, %s4279_s18  ;;  %v989_v46 = vrot.slane %v859_v33, 5  ;;  %v1531_v48 = vshrl.u32 %v3796_v34, 16  ;;  %v980_v50 = vsel %vm4315_vm2, %v3704_v38, %v979_v40  ;;  %v981_v51 = vrot.slane %v979_v40, 4 }
  0x8a   : > { %v520_v49 = vsel %vm4356_vm5, %v515_v39, %v519_v25  ;;  %v1534_v52 = vshll.u32 %v3796_v34, 16  ;;  %v525_v55 = vrot.slane %v524_v44, 4  ;;  %v987_v56 = vsel %vm4315_vm2, %v3705_v42, %v986_v45  ;;  %v3864_v25 = vld [vmem:[%s4313_s14 + $0x64] sm:$0xf] }
  0x8b   : > { %v988_v57 = vrot.slane %v986_v45, 4  ;;  %v1533_v58 = vrot.slane %v1531_v48, 4  ;;  %v983_v61 = vsel %vm4315_vm2, %v981_v51, %v982_v41  ;;  %v1540_v63 = vshll.u32 %v3797_v43, 16  ;;  %v3988_v41 = vld [vmem:[%s4313_s14 + $0x60] sm:$0xf] }
  0x8c   : > { %v1536_v62 = vrot.slane %v1534_v52, 5  ;;  %v1544_v1 = vshrl.u32 %v3797_v43, 16  ;;  %v530_v3 = vsel %vm4356_vm5, %v525_v55, %v529_v37  ;;  %v3720_v4 = vcombine.low %v980_v50, %v983_v61  ;;  %v4693_v32 = vpop.permute.xlu0 %2139  ;;  %v4230_v42 = vld [vmem:[%s4313_s14 + $0x60] sm:$0xff]  }
  0x8d   : > { %v990_v5 = vsel %vm4315_vm2, %v988_v57, %v989_v46  ;;  %v1550_v6 = vshll.u32 %v3798_v47, 16  ;;  %v3689_v9 = vcombine.low %v520_v49, %v530_v3  ;;  %v1542_v13 = vrot.slane %v1540_v63, 5  ;;  %v4690_v26 = vpop.permute.xlu1 %1095  ;;  %v3989_v47 = vld [vmem:[%s4313_s14 + $0x64] sm:$0xf] }
  0x8e   : > { %v3721_v10 = vcombine.low %v987_v56, %v990_v5  ;;  %v1537_v12 = vor.u32 %v1536_v62, %v1533_v58  ;;  %1107 = vrot.lane.b32.xlu0 %v3720_v4, %s4278_s17  ;;  %v1546_v16 = vrot.slane %v1544_v1, 4  ;;  %v1555_v18 = vshrl.u32 %v3799_v59, 16  ;;  %v3990_v62 = vld [vmem:[%s4313_s14 + $0x68] sm:$0x1] }
  0x8f   : > { %v1552_v17 = vrot.slane %v1550_v6, 5  ;;  %v1558_v19 = vshll.u32 %v3799_v59, 16  ;;  %785 = vrot.lane.b32.xlu1 %v3689_v9, %s4279_s18  ;;  %v1564_v22 = vshll.u32 %v3800_v2, 16  ;;  %v1568_v23 = vshrl.u32 %v3800_v2, 16  ;;  %v3991_v2 = vld [vmem:[%s4313_s14 + $0x6c] sm:$0xf] }
  0x90   : > { %v1538_v21 = vrot.slane %v1537_v12, 4  ;;  %v1574_v24 = vshll.u32 %v3801_v7, 16  ;;  %v1547_v27 = vor.u32 %v1546_v16, %v1542_v13  ;;  %v1557_v28 = vrot.slane %v1555_v18, 4  ;;  %v4238_v16 = vld [vmem:[%s4313_s14 + $0x18] sm:$0xff]   ;;  %v4246_v18 = vld [vmem:[%s4313_s14 + $0x30] sm:$0xff]  }
  0x91   : > { %v1560_v29 = vrot.slane %v1558_v19, 5  ;;  %v3896_v30 = vrot.slane %v3860_v8, 9  ;;  %v1566_v34 = vrot.slane %v1564_v22, 5  ;;  %v1570_v35 = vrot.slane %v1568_v23, 4  ;;  %v4710_v58 = vpop.permute.xlu1 %1097  ;;  %v3992_v8 = vld [vmem:[%s4313_s14 + $0x70] sm:$0xf] }
  0x92   : > { %v1543_v33 = vsel %vm4356_vm5, %v1538_v21, %v1542_v13  ;;  %v1576_v36 = vrot.slane %v1574_v24, 5  ;;  %1285 = vrot.lane.b32.xlu0 %v4229_v11, %s4276_s15  ;;  %v1548_v37 = vrot.slane %v1547_v27, 4  ;;  %v2023_v39 = vrot.slane %v3861_v14, 5  ;;  %v3993_v13 = vld [vmem:[%s4313_s14 + $0x74] sm:$0x1]  ;;  %v4233_v14 = vld [vmem:[%s4313_s14] sm:$0xff]  }
  0x93   : > { %v1561_v38 = vor.u32 %v1560_v29, %v1557_v28  ;;  %v2026_v40 = vrot.slane %v3862_v15, 5  ;;  %1109 = vrot.lane.b32.xlu1 %v3721_v10, %s4278_s17  ;;  %v1571_v43 = vor.u32 %v1570_v35, %v1566_v34  ;;  %v3897_v44 = vrot.slane %v3863_v20, 9  ;;  %v4234_v15 = vld [vmem:[%s4313_s14 + $0xc] sm:$0xff]   ;;  %v4247_v19 = vld [vmem:[%s4313_s14 + $0x3c] sm:$0xff]   ;;  %272 = vst.msk [vmem:[#allocation2] sm:$0xff] %vm271_vm6, %v4233_v14  ;;  %274 = vst.msk [vmem:[#allocation2 + $0x10] sm:$0xff] %vm271_vm6, %v4238_v16 }
  0x94   : > { %v2030_v45 = vrot.slane %v3864_v25, 5  ;;  %v2033_v46 = vrot.slane %v3865_v31, 5  ;;  %v1553_v48 = vsel %vm4356_vm5, %v1548_v37, %v1552_v17  ;;  %v2024_v50 = vsel %vm4315_vm2, %v3896_v30, %v2023_v39  ;;  %v4240_v17 = vld [vmem:[%s4313_s14 + $0x24] sm:$0xff]   ;;  %v4052_v31 = vld [vmem:[%s4313_s14 + $0x60] sm:$0xe]  ;;  %273 = vst.msk [vmem:[#allocation2 + $0x8] sm:$0xff] %vm271_vm6, %v4234_v15 }
  0x95   : > { %v1562_v49 = vrot.slane %v1561_v38, 4  ;;  %v2025_v51 = vrot.slane %v2023_v39, 4  ;;  %v3832_v52 = vcombine.low %v1543_v33, %v1553_v48  ;;  %v1572_v55 = vrot.slane %v1571_v43, 4  ;;  %v4252_v20 = vld [vmem:[%s4313_s14 + $0x48] sm:$0xff]   ;;  %v4231_v21 = vld [vmem:[%s4313_s14 + $0x60] sm:$0xff]   ;;  %v4253_v33 = vld [vmem:[%s4313_s14 + $0x54] sm:$0xff]   ;;  %v4744_v39 = vpop.permute.xlu1 %2141 }
  0x96   : > { %v4708_v56 = vsel %vm4315_vm2, %v3897_v44, %v2030_v45  ;;  %v2032_v57 = vrot.slane %v2030_v45, 4  ;;  %v2575_v63 = vshrl.u32 %v3988_v41, 16  ;;  %v2578_v1 = vshll.u32 %v3988_v41, 16  ;;  %v4053_v38 = vld [vmem:[%s4313_s14 + $0x64] sm:$0xf]  ;;  %275 = vst.msk [vmem:[#allocation2 + $0x18] sm:$0xff] %vm271_vm6, %v4240_v17 }
  0x97   : > { %v1567_v59 = vsel %vm4356_vm5, %v1562_v49, %v1566_v34  ;;  %v2027_v61 = vsel %vm4315_vm2, %v2025_v51, %v2026_v40  ;;  %v4718_v3 = vpop.permute.xlu0 %771  ;;  %1287 = vrot.lane.b32.xlu1 %v4230_v42, %s4276_s15  ;;  %1830 = vrot.lane.b32.xlu0 %v3832_v52, %s4280_s19  ;;  %v1577_v4 = vsel %vm4356_vm5, %v1572_v55, %v1576_v36  ;;  %v2584_v7 = vshll.u32 %v3989_v47, 16  ;;  %v4054_v44 = vld [vmem:[%s4313_s14 + $0x68] sm:$0x1]  ;;  %v312_v48 = vld [vmem:[%s4313_s14 + $0x60] sm:$0xf] }
  0x98   : > { %v3912_v5 = vcombine.low %v2024_v50, %v2027_v61  ;;  %v2034_v6 = vsel %vm4315_vm2, %v2032_v57, %v2033_v46  ;;  %v3833_v9 = vcombine.low %v1567_v59, %v1577_v4  ;;  %v2577_v11 = vrot.slane %v2575_v63, 4  ;;  %v4232_v49 = vld [vmem:[%s4313_s14 + $0x6c] sm:$0xff]   ;;  %v313_v55 = vld [vmem:[%s4313_s14 + $0x64] sm:$0xf]  ;;  %276 = vst.msk [vmem:[#allocation2 + $0x20] sm:$0xff] %vm271_vm6, %v4246_v18  ;;  %277 = vst.msk [vmem:[#allocation2 + $0x28] sm:$0xff] %vm271_vm6, %v4247_v19 }
  0x99   : > { %v3913_v10 = vcombine.low %v4708_v56, %v2034_v6  ;;  %v2580_v12 = vrot.slane %v2578_v1, 5  ;;  %v4737_v22 = vrot.slane %v2584_v7, 5  ;;  %v2588_v23 = vshrl.u32 %v3989_v47, 16  ;;  %278 = vst.msk [vmem:[#allocation2 + $0x30] sm:$0xff] %vm271_vm6, %v4252_v20  ;;  %279 = vst.msk [vmem:[#allocation2 + $0x38] sm:$0xff] %vm271_vm6, %v4253_v33 }
  0x9a   : > { %v2594_v24 = vshll.u32 %v3990_v62, 16  ;;  %v2599_v25 = vshrl.u32 %v3991_v2, 16  ;;  %v2602_v28 = vshll.u32 %v3991_v2, 16  ;;  %v2608_v29 = vshll.u32 %v3992_v8, 16  ;;  %820 = vst.msk [vmem:[#allocation2] sm:$0xff] %vm819_vm7, %v4718_v3 }
  0x9b   : > { %v2581_v27 = vor.u32 %v2580_v12, %v2577_v11  ;;  %v2612_v30 = vshrl.u32 %v3992_v8, 16  ;;  %1832 = vrot.lane.b32.xlu1 %v3833_v9, %s4280_s19  ;;  %2151 = vrot.lane.b32.xlu0 %v3912_v5, %s4277_s16  ;;  %v2590_v34 = vrot.slane %v2588_v23, 4  ;;  %v2618_v37 = vshll.u32 %v3993_v13, 16  ;;  %v314_v62 = vld [vmem:[%s4313_s14 + $0x68] sm:$0x1]  ;;  %1144 = vst.msk [vmem:[#allocation2] sm:$0xff] %vm1143_vm8, %v4690_v26 }
  0x9c   : > { %v2596_v35 = vrot.slane %v2594_v24, 5  ;;  %v2601_v36 = vrot.slane %v2599_v25, 4  ;;  %v2604_v41 = vrot.slane %v2602_v28, 5  ;;  %v2610_v42 = vrot.slane %v2608_v29, 5  ;;  %v774_v45 = vpop.permute.xlu0 %773  ;;  %v4055_v63 = vld [vmem:[%s4313_s14 + $0x6c] sm:$0xe] }
  0x9d   : > { %v2582_v40 = vrot.slane %v2581_v27, 4  ;;  %v2614_v43 = vrot.slane %v2612_v30, 4  ;;  %v2591_v46 = vor.u32 %v2590_v34, %v4737_v22  ;;  %v2620_v47 = vrot.slane %v2618_v37, 5  ;;  %821 = vst.msk [vmem:[#allocation2 + $0x8] sm:$0xff] %vm819_vm7, %v774_v45  ;;  %v4056_v6 = vld [vmem:[%s4313_s14 + $0x70] sm:$0xf] }
  0x9e   : > { %v2605_v51 = vor.u32 %v2604_v41, %v2601_v36  ;;  %v4088_v57 = vrot.slane %v4052_v31, 9  ;;  %v3067_v59 = vrot.slane %v4053_v38, 5  ;;  %v3070_v61 = vrot.slane %v4054_v44, 5  ;;  %1145 = vst.msk [vmem:[#allocation2 + $0x8] sm:$0xff] %vm1143_vm8, %v4710_v58  ;;  %v4057_v7 = vld [vmem:[%s4313_s14 + $0x74] sm:$0x1] }
  0x9f   : > { %v2587_v50 = vsel %vm4356_vm5, %v2582_v40, %v4737_v22  ;;  %v2615_v52 = vor.u32 %v2614_v43, %v2610_v42  ;;  %2153 = vrot.lane.b32.xlu1 %v3913_v10, %s4277_s16  ;;  %2329 = vrot.lane.b32.xlu0 %v4231_v21, %s4281_s20  ;;  %v2592_v56 = vrot.slane %v2591_v46, 4  ;;  %v532_v4 = vshrl.u32 %v312_v48, 16  ;;  %v315_v3 = vld [vmem:[%s4313_s14 + $0x6c] sm:$0xf]  ;;  %v316_v19 = vld [vmem:[%s4313_s14 + $0x70] sm:$0xf] }
  0xa0   : > { %v2606_v1 = vrot.slane %v2605_v51, 4  ;;  %v535_v5 = vshll.u32 %v312_v48, 16  ;;  %v3068_v9 = vsel %vm4315_vm2, %v4088_v57, %v3067_v59  ;;  %v3069_v10 = vrot.slane %v3067_v59, 4  ;;  %v4780_v12 = vpop.permute.xlu1 %1820  ;;  %v317_v33 = vld [vmem:[%s4313_s14 + $0x74] sm:$0x1]  ;;  %1323 = vst.msk [vmem:[#allocation2 + $0x8] sm:$0xff] %vm1321_vm9, %v4667_v54 }
  0xa1   : > { %v2616_v2 = vrot.slane %v2615_v52, 4  ;;  %v2597_v8 = vsel %vm4356_vm5, %v2592_v56, %v2596_v35  ;;  %v541_v11 = vshll.u32 %v313_v55, 16  ;;  %v534_v14 = vrot.slane %v532_v4, 4  ;;  %v860_v41 = vld [vmem:[%s4313_s14 + $0x60] sm:$0xe]  ;;  %1322 = vst.msk [vmem:[#allocation2] sm:$0xff] %vm1321_vm9, %v4672_v60 }
  0xa2   : > { %v4024_v26 = vcombine.low %v2587_v50, %v2597_v8  ;;  %v2611_v13 = vsel %vm4356_vm5, %v2606_v1, %v2610_v42  ;;  %v3071_v16 = vsel %vm4315_vm2, %v3069_v10, %v3070_v61  ;;  %v537_v17 = vrot.slane %v535_v5, 5  ;;  %v861_v48 = vld [vmem:[%s4313_s14 + $0x64] sm:$0xf]  ;;  %v862_v52 = vld [vmem:[%s4313_s14 + $0x68] sm:$0x1]  ;;  %1868 = vst.msk [vmem:[#allocation2 + $0x8] sm:$0xff] %vm1866_vm10, %v4780_v12 }
  0xa3   : > { %v2621_v58 = vsel %vm4356_vm5, %v2616_v2, %v2620_v47  ;;  %2331 = vrot.lane.b32.xlu1 %v4232_v49, %s4281_s20  ;;  %v543_v18 = vrot.slane %v541_v11, 5  ;;  %v4104_v21 = vcombine.low %v3068_v9, %v3071_v16  ;;  %v545_v22 = vshrl.u32 %v313_v55, 16  ;;  %v863_v61 = vld [vmem:[%s4313_s14 + $0x6c] sm:$0xe]  ;;  %v865_v4 = vld [vmem:[%s4313_s14 + $0x74] sm:$0x1] }
  0xa4   : > { %v4025_v15 = vcombine.low %v2611_v13, %v2621_v58  ;;  %v1819_v20 = vpop.permute.xlu0 %1818  ;;  %2874 = vrot.lane.b32.xlu0 %v4024_v26, %s4282_s21  ;;  %v551_v23 = vshll.u32 %v314_v62, 16  ;;  %v4089_v24 = vrot.slane %v4055_v63, 9  ;;  %v538_v25 = vor.u32 %v537_v17, %v534_v14  ;;  %v4798_v43 = vpop.permute.xlu1 %2319  ;;  %v864_v62 = vld [vmem:[%s4313_s14 + $0x70] sm:$0xf]  ;;  %v3802_v26 = vld [vmem:[%s4313_s14 + $0x6c] sm:$0xf] }
  0xa5   : > { %v3074_v27 = vrot.slane %v4056_v6, 5  ;;  %v3077_v28 = vrot.slane %v4057_v7, 5  ;;  %v556_v29 = vshrl.u32 %v315_v3, 16  ;;  %v547_v30 = vrot.slane %v545_v22, 4  ;;  %1867 = vst.msk [vmem:[#allocation2] sm:$0xff] %vm1866_vm10, %v1819_v20  ;;  %v4258_v17 = vld [vmem:[%s4313_s14 + $0x60] sm:$0xff]  }
  0xa6   : > { %v553_v31 = vrot.slane %v551_v23, 5  ;;  %v559_v34 = vshll.u32 %v315_v3, 16  ;;  %v565_v35 = vshll.u32 %v316_v19, 16  ;;  %v539_v36 = vrot.slane %v538_v25, 4  ;;  %v3803_v13 = vld [vmem:[%s4313_s14 + $0x70] sm:$0xf] }
  0xa7   : > { %2876 = vrot.lane.b32.xlu1 %v4025_v15, %s4282_s21  ;;  %v3075_v37 = vsel %vm4315_vm2, %v4089_v24, %v3074_v27  ;;  %v3076_v38 = vrot.slane %v3074_v27, 4  ;;  %v558_v40 = vrot.slane %v556_v29, 4  ;;  %v548_v44 = vor.u32 %v547_v30, %v543_v18  ;;  %v3804_v12 = vld [vmem:[%s4313_s14 + $0x74] sm:$0x1]  ;;  %2188 = vst.msk [vmem:[#allocation2] sm:$0xff] %vm2187_vm11, %v4693_v32  ;;  %2189 = vst.msk [vmem:[#allocation2 + $0x8] sm:$0xff] %vm2187_vm11, %v4744_v39 }
  0xa8   : > { %v4796_v42 = vpop.permute.xlu0 %2317  ;;  %3195 = vrot.lane.b32.xlu0 %v4104_v21, %s4283_s22  ;;  %v561_v45 = vrot.slane %v559_v34, 5  ;;  %v567_v46 = vrot.slane %v565_v35, 5  ;;  %v569_v47 = vshrl.u32 %v316_v19, 16  ;;  %v544_v49 = vsel %vm4356_vm5, %v539_v36, %v543_v18  ;;  %v3805_v19 = vld [vmem:[%s4313_s14 + $0x78] sm:$0xf]  ;;  %280 = vst.msk [vmem:[#allocation2 + $0x40] sm:$0xff] %vm271_vm6, %v4258_v17 }
  0xa9   : > { %v3078_v50 = vsel %vm4315_vm2, %v3076_v38, %v3077_v28  ;;  %v575_v51 = vshll.u32 %v317_v33, 16  ;;  %v549_v55 = vrot.slane %v548_v44, 4  ;;  %v3706_v1 = vrot.slane %v860_v41, 9  ;;  %v3806_v25 = vld [vmem:[%s4313_s14 + $0x7c] sm:$0xf]  ;;  %2366 = vst.msk [vmem:[#allocation2] sm:$0xff] %vm2365_vm12, %v4796_v42 }
  0xaa   : > { %v4105_v56 = vcombine.low %v3075_v37, %v3078_v50  ;;  %v562_v57 = vor.u32 %v561_v45, %v558_v40  ;;  %v571_v59 = vrot.slane %v569_v47, 4  ;;  %v993_v2 = vrot.slane %v861_v48, 5  ;;  %2367 = vst.msk [vmem:[#allocation2 + $0x8] sm:$0xff] %vm2365_vm12, %v4798_v43  ;;  %v4259_v33 = vld [vmem:[%s4313_s14 + $0x6c] sm:$0xff]   ;;  %v3868_v50 = vld [vmem:[%s4313_s14 + $0x74] sm:$0x1] }
  0xab   : > { %v577_v63 = vrot.slane %v575_v51, 5  ;;  %v554_v6 = vsel %vm4356_vm5, %v549_v55, %v553_v31  ;;  %v996_v60 = vrot.slane %v862_v52, 5  ;;  %v3707_v10 = vrot.slane %v863_v61, 9  ;;  %v3807_v31 = vld [vmem:[%s4313_s14 + $0x80] sm:$0x1]  ;;  %v4235_v39 = vld [vmem:[%s4313_s14 + $0x6c] sm:$0xff]  }
  0xac   : > { %v2863_v5 = vpop.permute.xlu0 %2862  ;;  %3197 = vrot.lane.b32.xlu0 %v4105_v56, %s4283_s22  ;;  %v563_v7 = vrot.slane %v562_v57, 4  ;;  %v572_v54 = vor.u32 %v571_v59, %v567_v46  ;;  %v3690_v3 = vcombine.low %v544_v49, %v554_v6  ;;  %v994_v8 = vsel %vm4315_vm2, %v3706_v1, %v993_v2  ;;  %v3866_v38 = vld [vmem:[%s4313_s14 + $0x6c] sm:$0xe]  ;;  %v3867_v44 = vld [vmem:[%s4313_s14 + $0x70] sm:$0xf]  ;;  %281 = vst.msk [vmem:[#allocation2 + $0x48] sm:$0xff] %vm271_vm6, %v4259_v33 }
  0xad   : > { %v995_v9 = vrot.slane %v993_v2, 4  ;;  %v2865_v11 = vpop.permute.xlu1 %2864  ;;  %v1000_v15 = vrot.slane %v864_v62, 5  ;;  %v1003_v16 = vrot.slane %v865_v4, 5  ;;  %v1579_v28 = vshrl.u32 %v3802_v26, 16  ;;  %2911 = vst.msk [vmem:[#allocation2] sm:$0xff] %vm2910_vm13, %v2863_v5  ;;  %v4236_v59 = vld [vmem:[%s4313_s14 + $0x78] sm:$0xff]  }
  0xae   : > { %v568_v58 = vsel %vm4356_vm5, %v563_v7, %v567_v46  ;;  %v573_v14 = vrot.slane %v572_v54, 4  ;;  %787 = vrot.lane.b32.xlu1 %v3690_v3, %s4279_s18  ;;  %v1582_v29 = vshll.u32 %v3802_v26, 16  ;;  %v1588_v30 = vshll.u32 %v3803_v13, 16  ;;  %2912 = vst.msk [vmem:[#allocation2 + $0x8] sm:$0xff] %vm2910_vm13, %v2865_v11  ;;  %v3869_v57 = vld [vmem:[%s4313_s14 + $0x78] sm:$0xe] }
  0xaf   : > { %v997_v18 = vsel %vm4315_vm2, %v995_v9, %v996_v60  ;;  %v1001_v23 = vsel %vm4315_vm2, %v3707_v10, %v1000_v15  ;;  %v1002_v24 = vrot.slane %v1000_v15, 4  ;;  %v1592_v34 = vshrl.u32 %v3803_v13, 16  ;;  %v3870_v1 = vld [vmem:[%s4313_s14 + $0x7c] sm:$0xf]  ;;  %v3871_v7 = vld [vmem:[%s4313_s14 + $0x80] sm:$0x1] }
  0xb0   : > { %v3184_v20 = vpop.permute.xlu0 %3183  ;;  %v578_v21 = vsel %vm4356_vm5, %v573_v14, %v577_v63  ;;  %v3722_v22 = vcombine.low %v994_v8, %v997_v18  ;;  %v1598_v35 = vshll.u32 %v3804_v12, 16  ;;  %v1603_v36 = vshrl.u32 %v3805_v19, 16  ;;  %v4243_v54 = vld [vmem:[%s5393_s1 + $0x10] ss:$0 sps:$4 sm:$0x33]  }
  0xb1   : > { %v3691_v27 = vcombine.low %v568_v58, %v578_v21  ;;  %v1004_v32 = vsel %vm4315_vm2, %v1002_v24, %v1003_v16  ;;  %v1581_v41 = vrot.slane %v1579_v28, 4  ;;  %v1584_v42 = vrot.slane %v1582_v29, 5  ;;  %3232 = vst.msk [vmem:[#allocation2] sm:$0xff] %vm3231_vm14, %v3184_v20  ;;  %v3994_v18 = vld [vmem:[%s4313_s14 + $0x78] sm:$0xf]  ;;  %4198 = vmatprep.subr.msk.bf16.mxu0 %vm3333_vm15, %v4243_v54  ;;  %4199 = vmatprep.subr.msk.bf16.mxu1 %vm3333_vm15, %v4243_v54 }
  0xb2   : > { %1111 = vrot.lane.b32.xlu0 %v3722_v22, %s4278_s17  ;;  %v3723_v40 = vcombine.low %v1001_v23, %v1004_v32  ;;  %v1590_v43 = vrot.slane %v1588_v30, 5  ;;  %v1594_v46 = vrot.slane %v1592_v34, 4  ;;  %v1600_v47 = vrot.slane %v1598_v35, 5  ;;  %v3995_v23 = vld [vmem:[%s4313_s14 + $0x7c] sm:$0xf] }
  0xb3   : > { %v776_v37 = vpop.permute.xlu1 %775  ;;  %789 = vrot.lane.b32.xlu1 %v3691_v27, %s4279_s18  ;;  %v1605_v48 = vrot.slane %v1603_v36, 4  ;;  %v1606_v49 = vshll.u32 %v3805_v19, 16  ;;  %v1585_v51 = vor.u32 %v1584_v42, %v1581_v41  ;;  %v1612_v52 = vshll.u32 %v3806_v25, 16  ;;  %v3996_v24 = vld [vmem:[%s4313_s14 + $0x80] sm:$0x1] }
  0xb4   : > { %822 = vst.msk [vmem:[#allocation2 + $0x10] sm:$0xff] %vm819_vm7, %v776_v37  ;;  %v3186_v45 = vpop.permute.xlu0 %3185  ;;  %v1616_v55 = vshrl.u32 %v3806_v25, 16  ;;  %v1622_v56 = vshll.u32 %v3807_v31, 16  ;;  %v1595_v61 = vor.u32 %v1594_v46, %v1590_v43  ;;  %v3898_v63 = vrot.slane %v3866_v38, 9  ;;  %v3997_v30 = vld [vmem:[%s4313_s14 + $0x84] sm:$0xf] }
  0xb5   : > { %v1608_v62 = vrot.slane %v1606_v49, 5  ;;  %v1586_v2 = vrot.slane %v1585_v51, 4  ;;  %v1614_v4 = vrot.slane %v1612_v52, 5  ;;  %3233 = vst.msk [vmem:[#allocation2 + $0x8] sm:$0xff] %vm3231_vm14, %v3186_v45  ;;  %v2037_v8 = vrot.slane %v3867_v44, 5  ;;  %v4241_v44 = vld [vmem:[%s4313_s14 + $0x78] sm:$0xff]  }
  0xb6   : > { %1289 = vrot.lane.b32.xlu0 %v4235_v39, %s4276_s15  ;;  %v1618_v5 = vrot.slane %v1616_v55, 4  ;;  %v1624_v6 = vrot.slane %v1622_v56, 5  ;;  %v1596_v60 = vrot.slane %v1595_v61, 4  ;;  %v2040_v9 = vrot.slane %v3868_v50, 5  ;;  %v3998_v31 = vld [vmem:[%s4313_s14 + $0x88] sm:$0xf] }
  0xb7   : > { %1113 = vrot.lane.b32.xlu1 %v3723_v40, %s4278_s17  ;;  %v1609_v3 = vor.u32 %v1608_v62, %v1605_v48  ;;  %v1591_v26 = vsel %vm4356_vm5, %v1586_v2, %v1590_v43  ;;  %v3899_v58 = vrot.slane %v3869_v57, 9  ;;  %v2044_v14 = vrot.slane %v3870_v1, 5  ;;  %v3999_v41 = vld [vmem:[%s4313_s14 + $0x8c] sm:$0x1]  ;;  %v4058_v48 = vld [vmem:[%s4313_s14 + $0x78] sm:$0xe] }
  0xb8   : > { %v1100_v11 = vpop.permute.xlu0 %1099  ;;  %v1619_v13 = vor.u32 %v1618_v5, %v1614_v4  ;;  %v1601_v15 = vsel %vm4356_vm5, %v1596_v60, %v1600_v47  ;;  %v2038_v12 = vsel %vm4315_vm2, %v3898_v63, %v2037_v8  ;;  %v2039_v17 = vrot.slane %v2037_v8, 4  ;;  %v3248_v37 = vld [vmem:[#allocation2] sm:$0xff]  ;;  %v4059_v56 = vld [vmem:[%s4313_s14 + $0x7c] sm:$0xf] }
  0xb9   : > { %v778_v10 = vpop.permute.xlu1 %777  ;;  %1146 = vst.msk [vmem:[#allocation2 + $0x10] sm:$0xff] %vm1143_vm8, %v1100_v11  ;;  %v1610_v16 = vrot.slane %v1609_v3, 4  ;;  %v3834_v19 = vcombine.low %v1591_v26, %v1601_v15  ;;  %v4883_v21 = vsel %vm4315_vm2, %v3899_v58, %v2044_v14  ;;  %v2046_v22 = vrot.slane %v2044_v14, 4  ;;  %4160 = vmatprep.mubr.msk.bf16.mxu0 %vm3284_vm0, %v3248_v37  ;;  %v4060_v63 = vld [vmem:[%s4313_s14 + $0x80] sm:$0x1] }
  0xba   : > { %823 = vst.msk [vmem:[#allocation2 + $0x18] sm:$0xff] %vm819_vm7, %v778_v10  ;;  %v1620_v20 = vrot.slane %v1619_v13, 4  ;;  %v2041_v27 = vsel %vm4315_vm2, %v2039_v17, %v2040_v9  ;;  %v2047_v28 = vrot.slane %v3871_v7, 5  ;;  %v3335_v34 = vsel %vm3333_vm15, %v4243_v54, 0  ;;  %v318_v7 = vld [vmem:[%s4313_s14 + $0x78] sm:$0xf] }
  0xbb   : > { %1291 = vrot.lane.b32.xlu1 %v4236_v59, %s4276_s15  ;;  %v1615_v25 = vsel %vm4356_vm5, %v1610_v16, %v1614_v4  ;;  %1834 = vrot.lane.b32.xlu0 %v3834_v19, %s4280_s19  ;;  %v3914_v39 = vcombine.low %v2038_v12, %v2041_v27  ;;  %v2623_v38 = vshrl.u32 %v3994_v18, 16  ;;  %v2626_v40 = vshll.u32 %v3994_v18, 16  ;;  %v319_v9 = vld [vmem:[%s4313_s14 + $0x7c] sm:$0xf]  ;;  %v4242_v10 = vld [vmem:[%s4313_s14 + $0x84] sm:$0xff]  }
  0xbc   : > { %v1278_v33 = vpop.permute.xlu0 %1277  ;;  %v1625_v32 = vsel %vm4356_vm5, %v1620_v20, %v1624_v6  ;;  %v2048_v36 = vsel %vm4315_vm2, %v2046_v22, %v2047_v28  ;;  %4159 = vmatpush3.bf16.msra.mxu0 %v3335_v34  ;;  %v3249_v42 = vld [vmem:[#allocation2 + $0x8] sm:$0xff]  ;;  %v2632_v45 = vshll.u32 %v3995_v23, 16  ;;  %v2636_v46 = vshrl.u32 %v3995_v23, 16  ;;  %4197 = vmatpush3.bf16.msra.mxu1 %v3335_v34  ;;  %v320_v14 = vld [vmem:[%s4313_s14 + $0x80] sm:$0x1] }
  0xbd   : > { %v1102_v29 = vpop.permute.xlu1 %1101  ;;  %1324 = vst.msk [vmem:[#allocation2 + $0x10] sm:$0xff] %vm1321_vm9, %v1278_v33  ;;  %v3835_v35 = vcombine.low %v1615_v25, %v1625_v32  ;;  %v3915_v43 = vcombine.low %v4883_v21, %v2048_v36  ;;  %v2642_v47 = vshll.u32 %v3996_v24, 16  ;;  %v2625_v49 = vrot.slane %v2623_v38, 4  ;;  %v4061_v19 = vld [vmem:[%s4313_s14 + $0x84] sm:$0xe]  ;;  %v4262_v25 = vld [vmem:[%s4313_s14 + $0x78] sm:$0xff]  }
  0xbe   : > { %1147 = vst.msk [vmem:[#allocation2 + $0x18] sm:$0xff] %vm1143_vm8, %v1102_v29  ;;  %v2628_v50 = vrot.slane %v2626_v40, 5  ;;  %v2647_v51 = vshrl.u32 %v3997_v30, 16  ;;  %v2650_v52 = vshll.u32 %v3997_v30, 16  ;;  %v2634_v57 = vrot.slane %v2632_v45, 5 }
  0xbf   : > { %1836 = vrot.lane.b32.xlu1 %v3835_v35, %s4280_s19  ;;  %2155 = vrot.lane.b32.xlu0 %v3914_v39, %s4277_s16  ;;  %v2638_v59 = vrot.slane %v2636_v46, 4  ;;  %v2644_v61 = vrot.slane %v2642_v47, 5  ;;  %v2656_v62 = vshll.u32 %v3998_v31, 16  ;;  %v2660_v6 = vshrl.u32 %v3998_v31, 16  ;;  %v4062_v31 = vld [vmem:[%s4313_s14 + $0x88] sm:$0xf] }
  0xc0   : > { %4161 = vmatmul.mubr.msk.bf16.vlgmr.msra.gmra.mrb[0].mxu0 %vm3284_vm0, %v3249_v42  ;;  %v2629_v2 = vor.u32 %v2628_v50, %v2625_v49  ;;  %v2649_v4 = vrot.slane %v2647_v51, 4  ;;  %v2652_v5 = vrot.slane %v2650_v52, 5  ;;  %v2666_v3 = vshll.u32 %v3999_v41, 16  ;;  %v4063_v35 = vld [vmem:[%s4313_s14 + $0x8c] sm:$0x1]  ;;  %282 = vst.msk [vmem:[#allocation2 + $0x50] sm:$0xff] %vm271_vm6, %v4262_v25 }
  0xc1   : > { %v1280_v55 = vpop.permute.xlu1 %1279  ;;  %v2639_v54 = vor.u32 %v2638_v59, %v2634_v57  ;;  %v2658_v60 = vrot.slane %v2656_v62, 5  ;;  %v4090_v8 = vrot.slane %v4058_v48, 9  ;;  %v2662_v13 = vrot.slane %v2660_v6, 4  ;;  %v321_v42 = vld [vmem:[%s4313_s14 + $0x84] sm:$0xf] }
  0xc2   : > { %1325 = vst.msk [vmem:[#allocation2 + $0x18] sm:$0xff] %vm1321_vm9, %v1280_v55  ;;  %v1823_v1 = vpop.permute.xlu0 %1822  ;;  %v2630_v11 = vrot.slane %v2629_v2, 4  ;;  %v2653_v26 = vor.u32 %v2652_v5, %v2649_v4  ;;  %v3081_v58 = vrot.slane %v4059_v56, 5  ;;  %v2668_v12 = vrot.slane %v2666_v3, 5  ;;  %v322_v48 = vld [vmem:[%s4313_s14 + $0x88] sm:$0xf] }
  0xc3   : > { %1869 = vst.msk [vmem:[#allocation2 + $0x10] sm:$0xff] %vm1866_vm10, %v1823_v1  ;;  %2157 = vrot.lane.b32.xlu1 %v3915_v43, %s4277_s16  ;;  %2333 = vrot.lane.b32.xlu0 %v4241_v44, %s4281_s20  ;;  %v2640_v16 = vrot.slane %v2639_v54, 4  ;;  %v3084_v17 = vrot.slane %v4060_v63, 5  ;;  %v580_v18 = vshrl.u32 %v318_v7, 16  ;;  %v2663_v23 = vor.u32 %v2662_v13, %v2658_v60  ;;  %v866_v5 = vld [vmem:[%s4313_s14 + $0x78] sm:$0xe] }
  0xc4   : > { %v2635_v21 = vsel %vm4356_vm5, %v2630_v11, %v2634_v57  ;;  %v2654_v22 = vrot.slane %v2653_v26, 4  ;;  %v3082_v24 = vsel %vm4315_vm2, %v4090_v8, %v3081_v58  ;;  %v3083_v28 = vrot.slane %v3081_v58, 4  ;;  %v323_v57 = vld [vmem:[%s4313_s14 + $0x8c] sm:$0x1]  ;;  %v4263_v6 = vld [vmem:[%s4313_s14 + $0x84] sm:$0xff]  }
  0xc5   : > { %v1825_v15 = vpop.permute.xlu1 %1824  ;;  %v2645_v27 = vsel %vm4356_vm5, %v2640_v16, %v2644_v61  ;;  %v582_v29 = vrot.slane %v580_v18, 4  ;;  %v583_v30 = vshll.u32 %v318_v7, 16  ;;  %v2664_v39 = vrot.slane %v2663_v23, 4  ;;  %v867_v8 = vld [vmem:[%s4313_s14 + $0x7c] sm:$0xf]  ;;  %283 = vst.msk [vmem:[#allocation2 + $0x58] sm:$0xff] %vm271_vm6, %v4263_v6 }
  0xc6   : > { %1870 = vst.msk [vmem:[#allocation2 + $0x18] sm:$0xff] %vm1866_vm10, %v1825_v15  ;;  %v2144_v20 = vpop.permute.xlu0 %2143  ;;  %v4026_v33 = vcombine.low %v2635_v21, %v2645_v27  ;;  %v2659_v32 = vsel %vm4356_vm5, %v2654_v22, %v2658_v60  ;;  %v589_v34 = vshll.u32 %v319_v9, 16  ;;  %v3085_v37 = vsel %vm4315_vm2, %v3083_v28, %v3084_v17  ;;  %v868_v58 = vld [vmem:[%s4313_s14 + $0x80] sm:$0x1]  ;;  %v869_v17 = vld [vmem:[%s4313_s14 + $0x84] sm:$0xe] }
  0xc7   : > { %2190 = vst.msk [vmem:[#allocation2 + $0x10] sm:$0xff] %vm2187_vm11, %v2144_v20  ;;  %2335 = vrot.lane.b32.xlu1 %v4242_v10, %s4281_s20  ;;  %v585_v38 = vrot.slane %v583_v30, 5  ;;  %v593_v40 = vshrl.u32 %v319_v9, 16  ;;  %v599_v41 = vshll.u32 %v320_v14, 16  ;;  %v2669_v44 = vsel %vm4356_vm5, %v2664_v39, %v2668_v12  ;;  %v870_v18 = vld [vmem:[%s4313_s14 + $0x88] sm:$0xf] }
  0xc8   : > { %2878 = vrot.lane.b32.xlu0 %v4026_v33, %s4282_s21  ;;  %v4106_v45 = vcombine.low %v3082_v24, %v3085_v37  ;;  %v591_v46 = vrot.slane %v589_v34, 5  ;;  %v4091_v47 = vrot.slane %v4061_v19, 9  ;;  %v4027_v49 = vcombine.low %v2659_v32, %v2669_v44  ;;  %v871_v24 = vld [vmem:[%s4313_s14 + $0x8c] sm:$0x1]  ;;  %v3808_v25 = vld [vmem:[%s4313_s14 + $0x84] sm:$0xf] }
  0xc9   : > { %v2146_v36 = vpop.permute.xlu1 %2145  ;;  %v586_v50 = vor.u32 %v585_v38, %v582_v29  ;;  %v595_v51 = vrot.slane %v593_v40, 4  ;;  %v601_v52 = vrot.slane %v599_v41, 5  ;;  %v3088_v55 = vrot.slane %v4062_v31, 5  ;;  %v3809_v31 = vld [vmem:[%s4313_s14 + $0x88] sm:$0xf] }
  0xca   : > { %2191 = vst.msk [vmem:[#allocation2 + $0x18] sm:$0xff] %vm2187_vm11, %v2146_v36  ;;  %v2322_v43 = vpop.permute.xlu0 %2321  ;;  %v3091_v56 = vrot.slane %v4063_v35, 5  ;;  %v604_v59 = vshrl.u32 %v321_v42, 16  ;;  %v607_v61 = vshll.u32 %v321_v42, 16  ;;  %v613_v2 = vshll.u32 %v322_v48, 16 }
  0xcb   : > { %2368 = vst.msk [vmem:[#allocation2 + $0x10] sm:$0xff] %vm2365_vm12, %v2322_v43  ;;  %2880 = vrot.lane.b32.xlu1 %v4027_v49, %s4282_s21  ;;  %v587_v63 = vrot.slane %v586_v50, 4  ;;  %v596_v1 = vor.u32 %v595_v51, %v591_v46  ;;  %v617_v4 = vshrl.u32 %v322_v48, 16  ;;  %v3089_v7 = vsel %vm4315_vm2, %v4091_v47, %v3088_v55  ;;  %v3810_v43 = vld [vmem:[%s4313_s14 + $0x8c] sm:$0x1] }
  0xcc   : > { %3199 = vrot.lane.b32.xlu0 %v4106_v45, %s4283_s22  ;;  %v3090_v54 = vrot.slane %v3088_v55, 4  ;;  %v606_v60 = vrot.slane %v604_v59, 4  ;;  %v609_v3 = vrot.slane %v607_v61, 5  ;;  %v615_v26 = vrot.slane %v613_v2, 5  ;;  %v3812_v51 = vld [vmem:[%s4313_s14 + $0x94] sm:$0xf] }
  0xcd   : > { %v2324_v62 = vpop.permute.xlu1 %2323  ;;  %v592_v10 = vsel %vm4356_vm5, %v587_v63, %v591_v46  ;;  %v597_v11 = vrot.slane %v596_v1, 4  ;;  %v619_v13 = vrot.slane %v617_v4, 4  ;;  %v623_v16 = vshll.u32 %v323_v57, 16  ;;  %v3811_v46 = vld [vmem:[%s4313_s14 + $0x90] sm:$0xf]  ;;  %v4244_v2 = vld [vmem:[%s4313_s14 + $0x84] sm:$0xff]  }
  0xce   : > { %2369 = vst.msk [vmem:[#allocation2 + $0x18] sm:$0xff] %vm2365_vm12, %v2324_v62  ;;  %v2867_v9 = vpop.permute.xlu0 %2866  ;;  %v3092_v14 = vsel %vm4315_vm2, %v3090_v54, %v3091_v56  ;;  %v610_v15 = vor.u32 %v609_v3, %v606_v60  ;;  %v3708_v12 = vrot.slane %v866_v5, 9  ;;  %v1007_v23 = vrot.slane %v867_v8, 5  ;;  %v3872_v63 = vld [vmem:[%s4313_s14 + $0x84] sm:$0xe] }
  0xcf   : > { %2913 = vst.msk [vmem:[#allocation2 + $0x10] sm:$0xff] %vm2910_vm13, %v2867_v9  ;;  %v602_v20 = vsel %vm4356_vm5, %v597_v11, %v601_v52  ;;  %v4107_v21 = vcombine.low %v3089_v7, %v3092_v14  ;;  %v620_v22 = vor.u32 %v619_v13, %v615_v26  ;;  %v625_v29 = vrot.slane %v623_v16, 5  ;;  %v3813_v52 = vld [vmem:[%s4313_s14 + $0x98] sm:$0x1]  ;;  %v3873_v7 = vld [vmem:[%s4313_s14 + $0x88] sm:$0xf] }
  0xd0   : > { %v3692_v27 = vcombine.low %v592_v10, %v602_v20  ;;  %v611_v28 = vrot.slane %v610_v15, 4  ;;  %v1010_v30 = vrot.slane %v868_v58, 5  ;;  %v1008_v39 = vsel %vm4315_vm2, %v3708_v12, %v1007_v23  ;;  %v3874_v9 = vld [vmem:[%s4313_s14 + $0x8c] sm:$0x1]  ;;  %v3875_v58 = vld [vmem:[%s4313_s14 + $0x90] sm:$0xe] }
  0xd1   : > { %v2869_v19 = vpop.permute.xlu1 %2868  ;;  %3201 = vrot.lane.b32.xlu0 %v4107_v21, %s4283_s22  ;;  %v621_v32 = vrot.slane %v620_v22, 4  ;;  %v1009_v34 = vrot.slane %v1007_v23, 4  ;;  %v3709_v35 = vrot.slane %v869_v17, 9  ;;  %v1014_v37 = vrot.slane %v870_v18, 5  ;;  %v3876_v14 = vld [vmem:[%s4313_s14 + $0x94] sm:$0xf] }
  0xd2   : > { %2914 = vst.msk [vmem:[#allocation2 + $0x18] sm:$0xff] %vm2910_vm13, %v2869_v19  ;;  %v3188_v33 = vpop.permute.xlu0 %3187  ;;  %791 = vrot.lane.b32.xlu1 %v3692_v27, %s4279_s18  ;;  %v616_v36 = vsel %vm4356_vm5, %v611_v28, %v615_v26  ;;  %v1017_v38 = vrot.slane %v871_v24, 5  ;;  %v1627_v40 = vshrl.u32 %v3808_v25, 16  ;;  %v1630_v44 = vshll.u32 %v3808_v25, 16  ;;  %v3877_v15 = vld [vmem:[%s4313_s14 + $0x98] sm:$0x1] }
  0xd3   : > { %3234 = vst.msk [vmem:[#allocation2 + $0x10] sm:$0xff] %vm3231_vm14, %v3188_v33  ;;  %v626_v41 = vsel %vm4356_vm5, %v621_v32, %v625_v29  ;;  %v1011_v42 = vsel %vm4315_vm2, %v1009_v34, %v1010_v30  ;;  %v1636_v45 = vshll.u32 %v3809_v31, 16  ;;  %v1015_v49 = vsel %vm4315_vm2, %v3709_v35, %v1014_v37  ;;  %v4245_v20 = vld [vmem:[%s4313_s14 + $0x90] sm:$0xff]  }
  0xd4   : > { %v3693_v47 = vcombine.low %v616_v36, %v626_v41  ;;  %v3724_v48 = vcombine.low %v1008_v39, %v1011_v42  ;;  %v1016_v50 = vrot.slane %v1014_v37, 4  ;;  %v1629_v57 = vrot.slane %v1627_v40, 4  ;;  %v4000_v35 = vld [vmem:[%s4313_s14 + $0x90] sm:$0xf]  ;;  %v4001_v42 = vld [vmem:[%s4313_s14 + $0x94] sm:$0xf] }
  0xd5   : > { %v1632_v59 = vrot.slane %v1630_v44, 5  ;;  %v1638_v61 = vrot.slane %v1636_v45, 5  ;;  %v1640_v62 = vshrl.u32 %v3809_v31, 16  ;;  %v1646_v4 = vshll.u32 %v3810_v43, 16 }
  0xd6   : > { %v3190_v56 = vpop.permute.xlu0 %3189  ;;  %793 = vrot.lane.b32.xlu1 %v3693_v47, %s4279_s18  ;;  %1115 = vrot.lane.b32.xlu0 %v3724_v48, %s4278_s17  ;;  %v1018_v1 = vsel %vm4315_vm2, %v1016_v50, %v1017_v38  ;;  %v1651_v5 = vshrl.u32 %v3811_v46, 16  ;;  %v1654_v6 = vshll.u32 %v3811_v46, 16  ;;  %v1660_v8 = vshll.u32 %v3812_v51, 16  ;;  %v4002_v47 = vld [vmem:[%s4313_s14 + $0x98] sm:$0x1] }
  0xd7   : > { %v780_v55 = vpop.permute.xlu1 %779  ;;  %3235 = vst.msk [vmem:[#allocation2 + $0x18] sm:$0xff] %vm3231_vm14, %v3190_v56  ;;  %v3725_v54 = vcombine.low %v1015_v49, %v1018_v1  ;;  %v1633_v60 = vor.u32 %v1632_v59, %v1629_v57  ;;  %v1642_v3 = vrot.slane %v1640_v62, 4  ;;  %v1648_v10 = vrot.slane %v1646_v4, 5  ;;  %v4003_v56 = vld [vmem:[%s4313_s14 + $0x9c] sm:$0xf] }
  0xd8   : > { %824 = vst.msk [vmem:[#allocation2 + $0x20] sm:$0xff] %vm819_vm7, %v780_v55  ;;  %v1653_v11 = vrot.slane %v1651_v5, 4  ;;  %v1656_v26 = vrot.slane %v1654_v6, 5  ;;  %v1664_v13 = vshrl.u32 %v3812_v51, 16  ;;  %v1662_v18 = vrot.slane %v1660_v8, 5 }
  0xd9   : > { %v1634_v12 = vrot.slane %v1633_v60, 4  ;;  %v1643_v17 = vor.u32 %v1642_v3, %v1638_v61  ;;  %v1670_v19 = vshll.u32 %v3813_v52, 16  ;;  %v3900_v23 = vrot.slane %v3872_v63, 9  ;;  %v4004_v57 = vld [vmem:[%s4313_s14 + $0xa0] sm:$0xf] }
  0xda   : > { %v3250_v16 = vld [vmem:[#allocation2 + $0x10] sm:$0xff]  ;;  %1117 = vrot.lane.b32.xlu1 %v3725_v54, %s4278_s17  ;;  %1293 = vrot.lane.b32.xlu0 %v4244_v2, %s4276_s15  ;;  %v1657_v21 = vor.u32 %v1656_v26, %v1653_v11  ;;  %v1666_v22 = vrot.slane %v1664_v13, 4  ;;  %v2051_v24 = vrot.slane %v3873_v7, 5  ;;  %v2054_v30 = vrot.slane %v3874_v9, 5  ;;  %v4005_v6 = vld [vmem:[%s4313_s14 + $0xa4] sm:$0x1] }
  0xdb   : > { %4164 = vmatprep.mubr.msk.bf16.mxu0 %vm3284_vm0, %v3250_v16  ;;  %v1639_v27 = vsel %vm4356_vm5, %v1634_v12, %v1638_v61  ;;  %v1644_v28 = vrot.slane %v1643_v17, 4  ;;  %v1672_v29 = vrot.slane %v1670_v19, 5  ;;  %v3901_v38 = vrot.slane %v3875_v58, 9  ;;  %v4248_v54 = vld [vmem:[%s4313_s14 + $0x90] sm:$0xff]   ;;  %v4066_v19 = vld [vmem:[%s4313_s14 + $0x98] sm:$0x1] }
  0xdc   : > { %v1104_v25 = vpop.permute.xlu0 %1103  ;;  %v1658_v33 = vrot.slane %v1657_v21, 4  ;;  %v1667_v32 = vor.u32 %v1666_v22, %v1662_v18  ;;  %v2052_v39 = vsel %vm4315_vm2, %v3900_v23, %v2051_v24  ;;  %v2053_v34 = vrot.slane %v2051_v24, 4  ;;  %v4064_v9 = vld [vmem:[%s4313_s14 + $0x90] sm:$0xe] }
  0xdd   : > { %v782_v31 = vpop.permute.xlu1 %781  ;;  %1148 = vst.msk [vmem:[#allocation2 + $0x20] sm:$0xff] %vm1143_vm8, %v1104_v25  ;;  %v1649_v37 = vsel %vm4356_vm5, %v1644_v28, %v1648_v10  ;;  %v2058_v40 = vrot.slane %v3876_v14, 5  ;;  %v2061_v41 = vrot.slane %v3877_v15, 5  ;;  %v2671_v55 = vshrl.u32 %v4000_v35, 16  ;;  %v4065_v14 = vld [vmem:[%s4313_s14 + $0x94] sm:$0xf] }
  0xde   : > { %825 = vst.msk [vmem:[#allocation2 + $0x28] sm:$0xff] %vm819_vm7, %v782_v31  ;;  %v3251_v36 = vld [vmem:[#allocation2 + $0x18] sm:$0xff]  ;;  %1295 = vrot.lane.b32.xlu1 %v4245_v20, %s4276_s15  ;;  %v3836_v43 = vcombine.low %v1639_v27, %v1649_v37  ;;  %v1663_v44 = vsel %vm4356_vm5, %v1658_v33, %v1662_v18  ;;  %v1668_v45 = vrot.slane %v1667_v32, 4  ;;  %v2055_v46 = vsel %vm4315_vm2, %v2053_v34, %v2054_v30  ;;  %v324_v20 = vld [vmem:[%s4313_s14 + $0x90] sm:$0xf] }
  0xdf   : > { %4165 = vmatmul.mubr.msk.bf16.gmra.mrb[4].mxu0 %vm3284_vm0, %v3251_v36  ;;  %v3916_v49 = vcombine.low %v2052_v39, %v2055_v46  ;;  %v2059_v50 = vsel %vm4315_vm2, %v3901_v38, %v2058_v40  ;;  %v2060_v51 = vrot.slane %v2058_v40, 4  ;;  %v2674_v61 = vshll.u32 %v4000_v35, 16  ;;  %v325_v25 = vld [vmem:[%s4313_s14 + $0x94] sm:$0xf]  ;;  %v326_v31 = vld [vmem:[%s4313_s14 + $0x98] sm:$0x1] }
  0xe0   : > { %v1282_v48 = vpop.permute.xlu0 %1281  ;;  %1838 = vrot.lane.b32.xlu0 %v3836_v43, %s4280_s19  ;;  %v1673_v59 = vsel %vm4356_vm5, %v1668_v45, %v1672_v29  ;;  %v2680_v62 = vshll.u32 %v4001_v42, 16  ;;  %v2684_v63 = vshrl.u32 %v4001_v42, 16  ;;  %v2673_v4 = vrot.slane %v2671_v55, 4  ;;  %v4249_v33 = vld [vmem:[%s4313_s14 + $0x9c] sm:$0xff]  }
  0xe1   : > { %v1106_v52 = vpop.permute.xlu1 %1105  ;;  %1326 = vst.msk [vmem:[#allocation2 + $0x20] sm:$0xff] %vm1321_vm9, %v1282_v48  ;;  %v3837_v1 = vcombine.low %v1663_v44, %v1673_v59  ;;  %v2062_v2 = vsel %vm4315_vm2, %v2060_v51, %v2061_v41  ;;  %v2690_v5 = vshll.u32 %v4002_v47, 16  ;;  %v2676_v60 = vrot.slane %v2674_v61, 5  ;;  %v4067_v43 = vld [vmem:[%s4313_s14 + $0x9c] sm:$0xe]  ;;  %v4264_v44 = vld [vmem:[%s4313_s14 + $0x90] sm:$0xff]  }
  0xe2   : > { %1149 = vst.msk [vmem:[#allocation2 + $0x28] sm:$0xff] %vm1143_vm8, %v1106_v52  ;;  %v3917_v7 = vcombine.low %v2059_v50, %v2062_v2  ;;  %v2682_v3 = vrot.slane %v2680_v62, 5  ;;  %v2686_v8 = vrot.slane %v2684_v63, 4  ;;  %v2695_v11 = vshrl.u32 %v4003_v56, 16  ;;  %v4068_v55 = vld [vmem:[%s4313_s14 + $0xa0] sm:$0xf] }
  0xe3   : > { %1840 = vrot.lane.b32.xlu1 %v3837_v1, %s4280_s19  ;;  %v2692_v10 = vrot.slane %v2690_v5, 5  ;;  %v2698_v26 = vshll.u32 %v4003_v56, 16  ;;  %v2704_v13 = vshll.u32 %v4004_v57, 16  ;;  %v2677_v16 = vor.u32 %v2676_v60, %v2673_v4  ;;  %284 = vst.msk [vmem:[#allocation2 + $0x60] sm:$0xff] %vm271_vm6, %v4264_v44  ;;  %v4069_v62 = vld [vmem:[%s4313_s14 + $0xa4] sm:$0x1] }
  0xe4   : > { %2159 = vrot.lane.b32.xlu0 %v3916_v49, %s4277_s16  ;;  %v2687_v12 = vor.u32 %v2686_v8, %v2682_v3  ;;  %v2708_v17 = vshrl.u32 %v4004_v57, 16  ;;  %v2714_v18 = vshll.u32 %v4005_v6, 16  ;;  %v2697_v21 = vrot.slane %v2695_v11, 4  ;;  %v327_v63 = vld [vmem:[%s4313_s14 + $0x9c] sm:$0xf] }
  0xe5   : > { %v1284_v58 = vpop.permute.xlu1 %1283  ;;  %v1827_v15 = vpop.permute.xlu0 %1826  ;;  %v2700_v22 = vrot.slane %v2698_v26, 5  ;;  %v2706_v23 = vrot.slane %v2704_v13, 5  ;;  %v4092_v24 = vrot.slane %v4064_v9, 9  ;;  %v2678_v27 = vrot.slane %v2677_v16, 4  ;;  %v4265_v60 = vld [vmem:[%s4313_s14 + $0x9c] sm:$0xff]  }
  0xe6   : > { %1327 = vst.msk [vmem:[#allocation2 + $0x28] sm:$0xff] %vm1321_vm9, %v1284_v58  ;;  %v2688_v28 = vrot.slane %v2687_v12, 4  ;;  %v2710_v29 = vrot.slane %v2708_v17, 4  ;;  %v2716_v30 = vrot.slane %v2714_v18, 5  ;;  %v3095_v39 = vrot.slane %v4065_v14, 5 }
  0xe7   : > { %1871 = vst.msk [vmem:[#allocation2 + $0x20] sm:$0xff] %vm1866_vm10, %v1827_v15  ;;  %2161 = vrot.lane.b32.xlu1 %v3917_v7, %s4277_s16  ;;  %v2701_v32 = vor.u32 %v2700_v22, %v2697_v21  ;;  %v3098_v34 = vrot.slane %v4066_v19, 5  ;;  %v628_v35 = vshrl.u32 %v324_v20, 16  ;;  %v2683_v38 = vsel %vm4356_vm5, %v2678_v27, %v2682_v3  ;;  %v329_v11 = vld [vmem:[%s4313_s14 + $0xa4] sm:$0x1] }
  0xe8   : > { %2337 = vrot.lane.b32.xlu0 %v4248_v54, %s4281_s20  ;;  %v2693_v40 = vsel %vm4356_vm5, %v2688_v28, %v2692_v10  ;;  %v2711_v41 = vor.u32 %v2710_v29, %v2706_v23  ;;  %v631_v42 = vshll.u32 %v324_v20, 16  ;;  %v3096_v47 = vsel %vm4315_vm2, %v4092_v24, %v3095_v39  ;;  %v328_v54 = vld [vmem:[%s4313_s14 + $0xa0] sm:$0xf]  ;;  %v872_v15 = vld [vmem:[%s4313_s14 + $0x90] sm:$0xe]  ;;  %285 = vst.msk [vmem:[#allocation2 + $0x68] sm:$0xff] %vm271_vm6, %v4265_v60 }
  0xe9   : > { %v1829_v36 = vpop.permute.xlu1 %1828  ;;  %v2148_v37 = vpop.permute.xlu0 %2147  ;;  %v4028_v45 = vcombine.low %v2683_v38, %v2693_v40  ;;  %v2702_v46 = vrot.slane %v2701_v32, 4  ;;  %v3097_v48 = vrot.slane %v3095_v39, 4  ;;  %v630_v50 = vrot.slane %v628_v35, 4  ;;  %v873_v19 = vld [vmem:[%s4313_s14 + $0x94] sm:$0xf] }
  0xea   : > { %1872 = vst.msk [vmem:[#allocation2 + $0x28] sm:$0xff] %vm1866_vm10, %v1829_v36  ;;  %v2712_v49 = vrot.slane %v2711_v41, 4  ;;  %v633_v51 = vrot.slane %v631_v42, 5  ;;  %v637_v52 = vshll.u32 %v325_v25, 16  ;;  %v641_v59 = vshrl.u32 %v325_v25, 16 }
  0xeb   : > { %2192 = vst.msk [vmem:[#allocation2 + $0x20] sm:$0xff] %vm2187_vm11, %v2148_v37  ;;  %2339 = vrot.lane.b32.xlu1 %v4249_v33, %s4281_s20  ;;  %v2707_v56 = vsel %vm4356_vm5, %v2702_v46, %v2706_v23  ;;  %v3099_v57 = vsel %vm4315_vm2, %v3097_v48, %v3098_v34  ;;  %v647_v61 = vshll.u32 %v326_v31, 16  ;;  %v4093_v10 = vrot.slane %v4067_v43, 9  ;;  %v874_v31 = vld [vmem:[%s4313_s14 + $0x98] sm:$0x1] }
  0xec   : > { %2882 = vrot.lane.b32.xlu0 %v4028_v45, %s4282_s21  ;;  %v2717_v4 = vsel %vm4356_vm5, %v2712_v49, %v2716_v30  ;;  %v4108_v5 = vcombine.low %v3096_v47, %v3099_v57  ;;  %v634_v6 = vor.u32 %v633_v51, %v630_v50  ;;  %v639_v7 = vrot.slane %v637_v52, 5  ;;  %v875_v35 = vld [vmem:[%s4313_s14 + $0x9c] sm:$0xe]  ;;  %v876_v41 = vld [vmem:[%s4313_s14 + $0xa0] sm:$0xf] }
  0xed   : > { %v2150_v1 = vpop.permute.xlu1 %2149  ;;  %v2326_v2 = vpop.permute.xlu0 %2325  ;;  %v4029_v3 = vcombine.low %v2707_v56, %v2717_v4  ;;  %v643_v8 = vrot.slane %v641_v59, 4  ;;  %v649_v9 = vrot.slane %v647_v61, 5  ;;  %v3102_v13 = vrot.slane %v4068_v55, 5  ;;  %v877_v42 = vld [vmem:[%s4313_s14 + $0xa4] sm:$0x1] }
  0xee   : > { %2193 = vst.msk [vmem:[#allocation2 + $0x28] sm:$0xff] %vm2187_vm11, %v2150_v1  ;;  %v635_v26 = vrot.slane %v634_v6, 4  ;;  %v3105_v58 = vrot.slane %v4069_v62, 5  ;;  %v652_v14 = vshrl.u32 %v327_v63, 16  ;;  %v655_v12 = vshll.u32 %v327_v63, 16 }
  0xef   : > { %2370 = vst.msk [vmem:[#allocation2 + $0x20] sm:$0xff] %vm2365_vm12, %v2326_v2  ;;  %2884 = vrot.lane.b32.xlu1 %v4029_v3, %s4282_s21  ;;  %v644_v16 = vor.u32 %v643_v8, %v639_v7  ;;  %v661_v17 = vshll.u32 %v328_v54, 16  ;;  %v665_v18 = vshrl.u32 %v328_v54, 16  ;;  %v3103_v22 = vsel %vm4315_vm2, %v4093_v10, %v3102_v13  ;;  %v3814_v44 = vld [vmem:[%s4313_s14 + $0x9c] sm:$0xf] }
  0xf0   : > { %3203 = vrot.lane.b32.xlu0 %v4108_v5, %s4283_s22  ;;  %v640_v21 = vsel %vm4356_vm5, %v635_v26, %v639_v7  ;;  %v3104_v23 = vrot.slane %v3102_v13, 4  ;;  %v654_v24 = vrot.slane %v652_v14, 4  ;;  %v657_v28 = vrot.slane %v655_v12, 5  ;;  %v3815_v49 = vld [vmem:[%s4313_s14 + $0xa0] sm:$0xf] }
  0xf1   : > { %v2328_v20 = vpop.permute.xlu1 %2327  ;;  %v645_v27 = vrot.slane %v644_v16, 4  ;;  %v663_v29 = vrot.slane %v661_v17, 5  ;;  %v667_v30 = vrot.slane %v665_v18, 4  ;;  %v671_v32 = vshll.u32 %v329_v11, 16  ;;  %v3816_v4 = vld [vmem:[%s4313_s14 + $0xa4] sm:$0x1] }
  0xf2   : > { %2371 = vst.msk [vmem:[#allocation2 + $0x28] sm:$0xff] %vm2365_vm12, %v2328_v20  ;;  %v2871_v25 = vpop.permute.xlu0 %2870  ;;  %v3106_v33 = vsel %vm4315_vm2, %v3104_v23, %v3105_v58  ;;  %v3710_v39 = vrot.slane %v872_v15, 9  ;;  %v1021_v34 = vrot.slane %v873_v19, 5  ;;  %v658_v38 = vor.u32 %v657_v28, %v654_v24  ;;  %v3817_v6 = vld [vmem:[%s4313_s14 + $0xa8] sm:$0xf]  ;;  %v4250_v17 = vld [vmem:[%s4313_s14 + $0x9c] sm:$0xff]  }
  0xf3   : > { %2915 = vst.msk [vmem:[#allocation2 + $0x20] sm:$0xff] %vm2910_vm13, %v2871_v25  ;;  %v650_v36 = vsel %vm4356_vm5, %v645_v27, %v649_v9  ;;  %v4109_v37 = vcombine.low %v3103_v22, %v3106_v33  ;;  %v668_v40 = vor.u32 %v667_v30, %v663_v29  ;;  %v673_v46 = vrot.slane %v671_v32, 5  ;;  %v3818_v8 = vld [vmem:[%s4313_s14 + $0xac] sm:$0xf]  ;;  %v3819_v9 = vld [vmem:[%s4313_s14 + $0xb0] sm:$0x1] }
  0xf4   : > { %v3694_v45 = vcombine.low %v640_v21, %v650_v36  ;;  %v1022_v47 = vsel %vm4315_vm2, %v3710_v39, %v1021_v34  ;;  %v1023_v48 = vrot.slane %v1021_v34, 4  ;;  %v659_v51 = vrot.slane %v658_v38, 4  ;;  %v3878_v15 = vld [vmem:[%s4313_s14 + $0x9c] sm:$0xe]  ;;  %v3879_v16 = vld [vmem:[%s4313_s14 + $0xa0] sm:$0xf] }
  0xf5   : > { %v2873_v43 = vpop.permute.xlu1 %2872  ;;  %3205 = vrot.lane.b32.xlu0 %v4109_v37, %s4283_s22  ;;  %v669_v52 = vrot.slane %v668_v40, 4  ;;  %v1024_v55 = vrot.slane %v874_v31, 5  ;;  %v3711_v56 = vrot.slane %v875_v35, 9  ;;  %v1028_v57 = vrot.slane %v876_v41, 5  ;;  %v3880_v21 = vld [vmem:[%s4313_s14 + $0xa4] sm:$0x1] }
  0xf6   : > { %2916 = vst.msk [vmem:[#allocation2 + $0x28] sm:$0xff] %vm2910_vm13, %v2873_v43  ;;  %v3192_v50 = vpop.permute.xlu0 %3191  ;;  %795 = vrot.lane.b32.xlu1 %v3694_v45, %s4279_s18  ;;  %v1031_v59 = vrot.slane %v877_v42, 5  ;;  %v1675_v61 = vshrl.u32 %v3814_v44, 16  ;;  %v1678_v62 = vshll.u32 %v3814_v44, 16  ;;  %v664_v63 = vsel %vm4356_vm5, %v659_v51, %v663_v29  ;;  %v3881_v31 = vld [vmem:[%s4313_s14 + $0xa8] sm:$0xe] }
  0xf7   : > { %3236 = vst.msk [vmem:[#allocation2 + $0x20] sm:$0xff] %vm3231_vm14, %v3192_v50  ;;  %v674_v1 = vsel %vm4356_vm5, %v669_v52, %v673_v46  ;;  %v1025_v2 = vsel %vm4315_vm2, %v1023_v48, %v1024_v55  ;;  %v1684_v5 = vshll.u32 %v3815_v49, 16  ;;  %v1029_v60 = vsel %vm4315_vm2, %v3711_v56, %v1028_v57  ;;  %v3882_v33 = vld [vmem:[%s4313_s14 + $0xac] sm:$0xf]  ;;  %v3883_v43 = vld [vmem:[%s4313_s14 + $0xb0] sm:$0x1] }
  0xf8   : > { %v3695_v7 = vcombine.low %v664_v63, %v674_v1  ;;  %v3726_v54 = vcombine.low %v1022_v47, %v1025_v2  ;;  %v1030_v3 = vrot.slane %v1028_v57, 4  ;;  %v1677_v26 = vrot.slane %v1675_v61, 4  ;;  %v4251_v37 = vld [vmem:[%s4313_s14 + $0xa8] sm:$0xff]  }
  0xf9   : > { %v1680_v13 = vrot.slane %v1678_v62, 5  ;;  %v1686_v58 = vrot.slane %v1684_v5, 5  ;;  %v1688_v14 = vshrl.u32 %v3815_v49, 16  ;;  %v1694_v18 = vshll.u32 %v3816_v4, 16  ;;  %v4006_v56 = vld [vmem:[%s4313_s14 + $0xa8] sm:$0xf] }
  0xfa   : > { %v3194_v11 = vpop.permute.xlu0 %3193  ;;  %797 = vrot.lane.b32.xlu1 %v3695_v7, %s4279_s18  ;;  %1119 = vrot.lane.b32.xlu0 %v3726_v54, %s4278_s17  ;;  %v1032_v12 = vsel %vm4315_vm2, %v1030_v3, %v1031_v59  ;;  %v1699_v19 = vshrl.u32 %v3817_v6, 16  ;;  %v1702_v20 = vshll.u32 %v3817_v6, 16  ;;  %v1708_v25 = vshll.u32 %v3818_v8, 16  ;;  %v4007_v1 = vld [vmem:[%s4313_s14 + $0xac] sm:$0xf] }
  0xfb   : > { %v784_v10 = vpop.permute.xlu1 %783  ;;  %3237 = vst.msk [vmem:[#allocation2 + $0x28] sm:$0xff] %vm3231_vm14, %v3194_v11  ;;  %v3727_v22 = vcombine.low %v1029_v60, %v1032_v12  ;;  %v1681_v23 = vor.u32 %v1680_v13, %v1677_v26  ;;  %v1690_v24 = vrot.slane %v1688_v14, 4  ;;  %v1696_v27 = vrot.slane %v1694_v18, 5  ;;  %v4008_v7 = vld [vmem:[%s4313_s14 + $0xb0] sm:$0x1] }
  0xfc   : > { %826 = vst.msk [vmem:[#allocation2 + $0x30] sm:$0xff] %vm819_vm7, %v784_v10  ;;  %v1701_v28 = vrot.slane %v1699_v19, 4  ;;  %v1704_v29 = vrot.slane %v1702_v20, 5  ;;  %v1712_v30 = vshrl.u32 %v3818_v8, 16  ;;  %v1710_v35 = vrot.slane %v1708_v25, 5 }
  0xfd   : > { %v1682_v39 = vrot.slane %v1681_v23, 4  ;;  %v1691_v34 = vor.u32 %v1690_v24, %v1686_v58  ;;  %v1718_v36 = vshll.u32 %v3819_v9, 16  ;;  %v3902_v41 = vrot.slane %v3878_v15, 9  ;;  %v4009_v54 = vld [vmem:[%s4313_s14 + $0xb4] sm:$0xf] }
  0xfe   : > { %v3252_v32 = vld [vmem:[#allocation2 + $0x20] sm:$0xff]  ;;  %1121 = vrot.lane.b32.xlu1 %v3727_v22, %s4278_s17  ;;  %1297 = vrot.lane.b32.xlu0 %v4250_v17, %s4276_s15  ;;  %v1705_v38 = vor.u32 %v1704_v29, %v1701_v28  ;;  %v1714_v40 = vrot.slane %v1712_v30, 4  ;;  %v2065_v42 = vrot.slane %v3879_v16, 5  ;;  %v2068_v48 = vrot.slane %v3880_v21, 5  ;;  %v4010_v15 = vld [vmem:[%s4313_s14 + $0xb8] sm:$0xf] }
  0xff   : > { %4168 = vmatprep.mubr.msk.bf16.mxu0 %vm3284_vm0, %v3252_v32  ;;  %v1687_v45 = vsel %vm4356_vm5, %v1682_v39, %v1686_v58  ;;  %v1692_v46 = vrot.slane %v1691_v34, 4  ;;  %v1720_v47 = vrot.slane %v1718_v36, 5  ;;  %v3903_v61 = vrot.slane %v3881_v31, 9  ;;  %v4011_v19 = vld [vmem:[%s4313_s14 + $0xbc] sm:$0x1]  ;;  %v4254_v22 = vld [vmem:[%s4313_s14 + $0xa8] sm:$0xff]  }
 0x100   : > { %v1108_v44 = vpop.permute.xlu0 %1107  ;;  %v1706_v50 = vrot.slane %v1705_v38, 4  ;;  %v1715_v51 = vor.u32 %v1714_v40, %v1710_v35  ;;  %v2066_v52 = vsel %vm4315_vm2, %v3902_v41, %v2065_v42  ;;  %v2067_v55 = vrot.slane %v2065_v42, 4  ;;  %v4070_v20 = vld [vmem:[%s4313_s14 + $0xa8] sm:$0xe]  ;;  %v4072_v32 = vld [vmem:[%s4313_s14 + $0xb0] sm:$0x1] }
 0x101   : > { %v786_v49 = vpop.permute.xlu1 %785  ;;  %1150 = vst.msk [vmem:[#allocation2 + $0x30] sm:$0xff] %vm1143_vm8, %v1108_v44  ;;  %v1697_v59 = vsel %vm4356_vm5, %v1692_v46, %v1696_v27  ;;  %v2072_v62 = vrot.slane %v3882_v33, 5  ;;  %v2075_v63 = vrot.slane %v3883_v43, 5  ;;  %v2719_v11 = vshrl.u32 %v4006_v56, 16  ;;  %v4071_v27 = vld [vmem:[%s4313_s14 + $0xac] sm:$0xf] }
 0x102   : > { %827 = vst.msk [vmem:[#allocation2 + $0x38] sm:$0xff] %vm819_vm7, %v786_v49  ;;  %v3253_v57 = vld [vmem:[#allocation2 + $0x28] sm:$0xff]  ;;  %1299 = vrot.lane.b32.xlu1 %v4251_v37, %s4276_s15  ;;  %v3838_v2 = vcombine.low %v1687_v45, %v1697_v59  ;;  %v1711_v4 = vsel %vm4356_vm5, %v1706_v50, %v1710_v35  ;;  %v1716_v5 = vrot.slane %v1715_v51, 4  ;;  %v2069_v6 = vsel %vm4315_vm2, %v2067_v55, %v2068_v48  ;;  %v4255_v40 = vld [vmem:[%s4313_s14 + $0xb4] sm:$0xff]   ;;  %v332_v50 = vld [vmem:[%s4313_s14 + $0xb0] sm:$0x1] }
 0x103   : > { %4169 = vmatmul.mubr.msk.bf16.gmra.mrb[8].mxu0 %vm3284_vm0, %v3253_v57  ;;  %v3918_v3 = vcombine.low %v2066_v52, %v2069_v6  ;;  %v2073_v8 = vsel %vm4315_vm2, %v3903_v61, %v2072_v62  ;;  %v2074_v9 = vrot.slane %v2072_v62, 4  ;;  %v2722_v13 = vshll.u32 %v4006_v56, 16  ;;  %v330_v38 = vld [vmem:[%s4313_s14 + $0xa8] sm:$0xf]  ;;  %v331_v45 = vld [vmem:[%s4313_s14 + $0xac] sm:$0xf] }
 0x104   : > { %v1286_v60 = vpop.permute.xlu0 %1285  ;;  %1842 = vrot.lane.b32.xlu0 %v3838_v2, %s4280_s19  ;;  %v1721_v26 = vsel %vm4356_vm5, %v1716_v5, %v1720_v47  ;;  %v2728_v58 = vshll.u32 %v4007_v1, 16  ;;  %v2732_v14 = vshrl.u32 %v4007_v1, 16  ;;  %v2721_v17 = vrot.slane %v2719_v11, 4  ;;  %v4266_v61 = vld [vmem:[%s4313_s14 + $0xa8] sm:$0xff]  }
 0x105   : > { %v1110_v10 = vpop.permute.xlu1 %1109  ;;  %1328 = vst.msk [vmem:[#allocation2 + $0x30] sm:$0xff] %vm1321_vm9, %v1286_v60  ;;  %v3839_v16 = vcombine.low %v1711_v4, %v1721_v26  ;;  %v2076_v12 = vsel %vm4315_vm2, %v2074_v9, %v2075_v63  ;;  %v2738_v18 = vshll.u32 %v4008_v7, 16  ;;  %v2724_v23 = vrot.slane %v2722_v13, 5 }
 0x106   : > { %1151 = vst.msk [vmem:[#allocation2 + $0x38] sm:$0xff] %vm1143_vm8, %v1110_v10  ;;  %v3919_v21 = vcombine.low %v2073_v8, %v2076_v12  ;;  %v2730_v24 = vrot.slane %v2728_v58, 5  ;;  %v2734_v25 = vrot.slane %v2732_v14, 4  ;;  %v2743_v29 = vshrl.u32 %v4009_v54, 16  ;;  %v4074_v10 = vld [vmem:[%s4313_s14 + $0xb8] sm:$0xf] }
 0x107   : > { %1844 = vrot.lane.b32.xlu1 %v3839_v16, %s4280_s19  ;;  %v2740_v28 = vrot.slane %v2738_v18, 5  ;;  %v2746_v30 = vshll.u32 %v4009_v54, 16  ;;  %v2752_v31 = vshll.u32 %v4010_v15, 16  ;;  %v2725_v34 = vor.u32 %v2724_v23, %v2721_v17  ;;  %v4073_v54 = vld [vmem:[%s4313_s14 + $0xb4] sm:$0xe]  ;;  %286 = vst.msk [vmem:[#allocation2 + $0x70] sm:$0xff] %vm271_vm6, %v4266_v61 }
 0x108   : > { %2163 = vrot.lane.b32.xlu0 %v3918_v3, %s4277_s16  ;;  %v2735_v35 = vor.u32 %v2734_v25, %v2730_v24  ;;  %v2756_v36 = vshrl.u32 %v4010_v15, 16  ;;  %v2762_v37 = vshll.u32 %v4011_v19, 16  ;;  %v2745_v41 = vrot.slane %v2743_v29, 4  ;;  %v4075_v14 = vld [vmem:[%s4313_s14 + $0xbc] sm:$0x1] }
 0x109   : > { %v1288_v33 = vpop.permute.xlu1 %1287  ;;  %v1831_v39 = vpop.permute.xlu0 %1830  ;;  %v2748_v42 = vrot.slane %v2746_v30, 5  ;;  %v2754_v43 = vrot.slane %v2752_v31, 5  ;;  %v4094_v44 = vrot.slane %v4070_v20, 9  ;;  %v2726_v46 = vrot.slane %v2725_v34, 4  ;;  %v333_v15 = vld [vmem:[%s4313_s14 + $0xb4] sm:$0xf] }
 0x10a   : > { %1329 = vst.msk [vmem:[#allocation2 + $0x38] sm:$0xff] %vm1321_vm9, %v1288_v33  ;;  %v2736_v47 = vrot.slane %v2735_v35, 4  ;;  %v2758_v48 = vrot.slane %v2756_v36, 4  ;;  %v2764_v49 = vrot.slane %v2762_v37, 5  ;;  %v3109_v52 = vrot.slane %v4071_v27, 5 }
 0x10b   : > { %1873 = vst.msk [vmem:[#allocation2 + $0x30] sm:$0xff] %vm1866_vm10, %v1831_v39  ;;  %2165 = vrot.lane.b32.xlu1 %v3919_v21, %s4277_s16  ;;  %v2749_v51 = vor.u32 %v2748_v42, %v2745_v41  ;;  %v3112_v55 = vrot.slane %v4072_v32, 5  ;;  %v676_v56 = vshrl.u32 %v330_v38, 16  ;;  %v2731_v62 = vsel %vm4356_vm5, %v2726_v46, %v2730_v24  ;;  %v334_v21 = vld [vmem:[%s4313_s14 + $0xb8] sm:$0xf] }
 0x10c   : > { %2341 = vrot.lane.b32.xlu0 %v4254_v22, %s4281_s20  ;;  %v2741_v63 = vsel %vm4356_vm5, %v2736_v47, %v2740_v28  ;;  %v2759_v1 = vor.u32 %v2758_v48, %v2754_v43  ;;  %v679_v2 = vshll.u32 %v330_v38, 16  ;;  %v3110_v6 = vsel %vm4315_vm2, %v4094_v44, %v3109_v52  ;;  %v4267_v22 = vld [vmem:[%s4313_s14 + $0xb4] sm:$0xff]   ;;  %v335_v28 = vld [vmem:[%s4313_s14 + $0xbc] sm:$0x1]  ;;  %v878_v32 = vld [vmem:[%s4313_s14 + $0xa8] sm:$0xe] }
 0x10d   : > { %v1833_v57 = vpop.permute.xlu1 %1832  ;;  %v2152_v59 = vpop.permute.xlu0 %2151  ;;  %v4030_v4 = vcombine.low %v2731_v62, %v2741_v63  ;;  %v2750_v5 = vrot.slane %v2749_v51, 4  ;;  %v3111_v7 = vrot.slane %v3109_v52, 4  ;;  %v678_v3 = vrot.slane %v676_v56, 4  ;;  %287 = vst.msk [vmem:[#allocation2 + $0x78] sm:$0xff] %vm271_vm6, %v4267_v22  ;;  %v879_v37 = vld [vmem:[%s4313_s14 + $0xac] sm:$0xf] }
 0x10e   : > { %1874 = vst.msk [vmem:[#allocation2 + $0x38] sm:$0xff] %vm1866_vm10, %v1833_v57  ;;  %v2760_v60 = vrot.slane %v2759_v1, 4  ;;  %v681_v8 = vrot.slane %v679_v2, 5  ;;  %v685_v9 = vshll.u32 %v331_v45, 16  ;;  %v689_v13 = vshrl.u32 %v331_v45, 16 }
 0x10f   : > { %2194 = vst.msk [vmem:[#allocation2 + $0x30] sm:$0xff] %vm2187_vm11, %v2152_v59  ;;  %2343 = vrot.lane.b32.xlu1 %v4255_v40, %s4281_s20  ;;  %v2755_v11 = vsel %vm4356_vm5, %v2750_v5, %v2754_v43  ;;  %v3113_v26 = vsel %vm4315_vm2, %v3111_v7, %v3112_v55  ;;  %v695_v58 = vshll.u32 %v332_v50, 16  ;;  %v4095_v27 = vrot.slane %v4073_v54, 9  ;;  %v880_v44 = vld [vmem:[%s4313_s14 + $0xb0] sm:$0x1] }
 0x110   : > { %2886 = vrot.lane.b32.xlu0 %v4030_v4, %s4282_s21  ;;  %v2765_v17 = vsel %vm4356_vm5, %v2760_v60, %v2764_v49  ;;  %v4110_v18 = vcombine.low %v3110_v6, %v3113_v26  ;;  %v682_v19 = vor.u32 %v681_v8, %v678_v3  ;;  %v687_v20 = vrot.slane %v685_v9, 5  ;;  %v881_v45 = vld [vmem:[%s4313_s14 + $0xb4] sm:$0xe]  ;;  %v882_v51 = vld [vmem:[%s4313_s14 + $0xb8] sm:$0xf] }
 0x111   : > { %v2154_v16 = vpop.permute.xlu1 %2153  ;;  %v2330_v12 = vpop.permute.xlu0 %2329  ;;  %v4031_v23 = vcombine.low %v2755_v11, %v2765_v17  ;;  %v691_v24 = vrot.slane %v689_v13, 4  ;;  %v697_v25 = vrot.slane %v695_v58, 5  ;;  %v3116_v30 = vrot.slane %v4074_v10, 5  ;;  %v883_v52 = vld [vmem:[%s4313_s14 + $0xbc] sm:$0x1] }
 0x112   : > { %2195 = vst.msk [vmem:[#allocation2 + $0x38] sm:$0xff] %vm2187_vm11, %v2154_v16  ;;  %v683_v29 = vrot.slane %v682_v19, 4  ;;  %v3119_v31 = vrot.slane %v4075_v14, 5  ;;  %v700_v33 = vshrl.u32 %v333_v15, 16  ;;  %v703_v34 = vshll.u32 %v333_v15, 16 }
 0x113   : > { %2372 = vst.msk [vmem:[#allocation2 + $0x30] sm:$0xff] %vm2365_vm12, %v2330_v12  ;;  %2888 = vrot.lane.b32.xlu1 %v4031_v23, %s4282_s21  ;;  %v692_v39 = vor.u32 %v691_v24, %v687_v20  ;;  %v709_v35 = vshll.u32 %v334_v21, 16  ;;  %v713_v36 = vshrl.u32 %v334_v21, 16  ;;  %v3117_v41 = vsel %vm4315_vm2, %v4095_v27, %v3116_v30  ;;  %v3820_v55 = vld [vmem:[%s4313_s14 + $0xb4] sm:$0xf] }
 0x114   : > { %3207 = vrot.lane.b32.xlu0 %v4110_v18, %s4283_s22  ;;  %v688_v40 = vsel %vm4356_vm5, %v683_v29, %v687_v20  ;;  %v3118_v42 = vrot.slane %v3116_v30, 4  ;;  %v702_v43 = vrot.slane %v700_v33, 4  ;;  %v705_v48 = vrot.slane %v703_v34, 5  ;;  %v3821_v62 = vld [vmem:[%s4313_s14 + $0xb8] sm:$0xf] }
 0x115   : > { %v2332_v38 = vpop.permute.xlu1 %2331  ;;  %v693_v47 = vrot.slane %v692_v39, 4  ;;  %v711_v49 = vrot.slane %v709_v35, 5  ;;  %v715_v50 = vrot.slane %v713_v36, 4  ;;  %v719_v57 = vshll.u32 %v335_v28, 16  ;;  %v3822_v26 = vld [vmem:[%s4313_s14 + $0xbc] sm:$0x1] }
 0x116   : > { %2373 = vst.msk [vmem:[#allocation2 + $0x38] sm:$0xff] %vm2365_vm12, %v2332_v38  ;;  %v2875_v46 = vpop.permute.xlu0 %2874  ;;  %v3120_v56 = vsel %vm4315_vm2, %v3118_v42, %v3119_v31  ;;  %v3712_v59 = vrot.slane %v878_v32, 9  ;;  %v1035_v61 = vrot.slane %v879_v37, 5  ;;  %v706_v2 = vor.u32 %v705_v48, %v702_v43  ;;  %v3823_v13 = vld [vmem:[%s4313_s14 + $0xc0] sm:$0xf]  ;;  %v4256_v32 = vld [vmem:[%s4313_s14 + $0xb4] sm:$0xff]  }
 0x117   : > { %2917 = vst.msk [vmem:[#allocation2 + $0x30] sm:$0xff] %vm2910_vm13, %v2875_v46  ;;  %v698_v63 = vsel %vm4356_vm5, %v693_v47, %v697_v25  ;;  %v4111_v1 = vcombine.low %v3117_v41, %v3120_v56  ;;  %v716_v4 = vor.u32 %v715_v50, %v711_v49  ;;  %v721_v7 = vrot.slane %v719_v57, 5  ;;  %v3824_v24 = vld [vmem:[%s4313_s14 + $0xc4] sm:$0xf]  ;;  %v3825_v31 = vld [vmem:[%s4313_s14 + $0xc8] sm:$0x1] }
 0x118   : > { %v3696_v6 = vcombine.low %v688_v40, %v698_v63  ;;  %v1036_v54 = vsel %vm4315_vm2, %v3712_v59, %v1035_v61  ;;  %v1037_v60 = vrot.slane %v1035_v61, 4  ;;  %v707_v8 = vrot.slane %v706_v2, 4  ;;  %v3884_v36 = vld [vmem:[%s4313_s14 + $0xb4] sm:$0xe]  ;;  %v3885_v43 = vld [vmem:[%s4313_s14 + $0xb8] sm:$0xf] }
 0x119   : > { %v2877_v5 = vpop.permute.xlu1 %2876  ;;  %3209 = vrot.lane.b32.xlu0 %v4111_v1, %s4283_s22  ;;  %v717_v9 = vrot.slane %v716_v4, 4  ;;  %v1038_v10 = vrot.slane %v880_v44, 5  ;;  %v3713_v11 = vrot.slane %v881_v45, 9  ;;  %v1042_v58 = vrot.slane %v882_v51, 5  ;;  %v3886_v44 = vld [vmem:[%s4313_s14 + $0xbc] sm:$0x1] }
 0x11a   : > { %2918 = vst.msk [vmem:[#allocation2 + $0x38] sm:$0xff] %vm2910_vm13, %v2877_v5  ;;  %v3196_v3 = vpop.permute.xlu0 %3195  ;;  %799 = vrot.lane.b32.xlu1 %v3696_v6, %s4279_s18  ;;  %v1045_v14 = vrot.slane %v883_v52, 5  ;;  %v1723_v15 = vshrl.u32 %v3820_v55, 16  ;;  %v1726_v16 = vshll.u32 %v3820_v55, 16  ;;  %v712_v12 = vsel %vm4356_vm5, %v707_v8, %v711_v49  ;;  %v3887_v49 = vld [vmem:[%s4313_s14 + $0xc0] sm:$0xe] }
 0x11b   : > { %3238 = vst.msk [vmem:[#allocation2 + $0x30] sm:$0xff] %vm3231_vm14, %v3196_v3  ;;  %v722_v17 = vsel %vm4356_vm5, %v717_v9, %v721_v7  ;;  %v1039_v18 = vsel %vm4315_vm2, %v1037_v60, %v1038_v10  ;;  %v1732_v19 = vshll.u32 %v3821_v62, 16  ;;  %v1043_v22 = vsel %vm4315_vm2, %v3713_v11, %v1042_v58  ;;  %v3888_v57 = vld [vmem:[%s4313_s14 + $0xc4] sm:$0xf]  ;;  %v3889_v2 = vld [vmem:[%s4313_s14 + $0xc8] sm:$0x1] }
 0x11c   : > { %v3697_v20 = vcombine.low %v712_v12, %v722_v17  ;;  %v3728_v21 = vcombine.low %v1036_v54, %v1039_v18  ;;  %v1044_v23 = vrot.slane %v1042_v58, 4  ;;  %v1725_v27 = vrot.slane %v1723_v15, 4  ;;  %v4257_v59 = vld [vmem:[%s4313_s14 + $0xc0] sm:$0xff]  }
 0x11d   : > { %v1728_v28 = vrot.slane %v1726_v16, 5  ;;  %v1734_v29 = vrot.slane %v1732_v19, 5  ;;  %v1736_v30 = vshrl.u32 %v3821_v62, 16  ;;  %v1742_v39 = vshll.u32 %v3822_v26, 16  ;;  %v4012_v11 = vld [vmem:[%s4313_s14 + $0xc0] sm:$0xf] }
 0x11e   : > { %v3198_v25 = vpop.permute.xlu0 %3197  ;;  %801 = vrot.lane.b32.xlu1 %v3697_v20, %s4279_s18  ;;  %1123 = vrot.lane.b32.xlu0 %v3728_v21, %s4278_s17  ;;  %v1046_v33 = vsel %vm4315_vm2, %v1044_v23, %v1045_v14  ;;  %v1747_v34 = vshrl.u32 %v3823_v13, 16  ;;  %v1750_v35 = vshll.u32 %v3823_v13, 16  ;;  %v1756_v41 = vshll.u32 %v3824_v24, 16  ;;  %v4013_v16 = vld [vmem:[%s4313_s14 + $0xc4] sm:$0xf] }
 0x11f   : > { %3239 = vst.msk [vmem:[#allocation2 + $0x38] sm:$0xff] %vm3231_vm14, %v3198_v25  ;;  %v3729_v37 = vcombine.low %v1043_v22, %v1046_v33  ;;  %v1729_v38 = vor.u32 %v1728_v28, %v1725_v27  ;;  %v1738_v40 = vrot.slane %v1736_v30, 4  ;;  %v1744_v45 = vrot.slane %v1742_v39, 5  ;;  %v4014_v20 = vld [vmem:[%s4313_s14 + $0xc8] sm:$0x1] }
 0x120   : > { %v788_v42 = vpop.permute.xlu1 %787  ;;  %v1749_v46 = vrot.slane %v1747_v34, 4  ;;  %v1752_v47 = vrot.slane %v1750_v35, 5  ;;  %v1760_v48 = vshrl.u32 %v3824_v24, 16  ;;  %v1758_v55 = vrot.slane %v1756_v41, 5  ;;  %v4015_v28 = vld [vmem:[%s4313_s14 + $0xcc] sm:$0xf] }
 0x121   : > { %828 = vst.msk [vmem:[#allocation2 + $0x40] sm:$0xff] %vm819_vm7, %v788_v42  ;;  %v1730_v51 = vrot.slane %v1729_v38, 4  ;;  %v1739_v52 = vor.u32 %v1738_v40, %v1734_v29  ;;  %v1766_v56 = vshll.u32 %v3825_v31, 16  ;;  %v3904_v63 = vrot.slane %v3884_v36, 9  ;;  %v4260_v40 = vld [vmem:[%s4313_s14 + $0xc0] sm:$0xff]  }
 0x122   : > { %v3254_v50 = vld [vmem:[#allocation2 + $0x30] sm:$0xff]  ;;  %1125 = vrot.lane.b32.xlu1 %v3729_v37, %s4278_s17  ;;  %1301 = vrot.lane.b32.xlu0 %v4256_v32, %s4276_s15  ;;  %v1753_v61 = vor.u32 %v1752_v47, %v1749_v46  ;;  %v1762_v62 = vrot.slane %v1760_v48, 4  ;;  %v2079_v1 = vrot.slane %v3885_v43, 5  ;;  %v2082_v54 = vrot.slane %v3886_v44, 5  ;;  %v4076_v44 = vld [vmem:[%s4313_s14 + $0xc0] sm:$0xe] }
 0x123   : > { %4172 = vmatprep.mubr.msk.bf16.mxu0 %vm3284_vm0, %v3254_v50  ;;  %v1735_v5 = vsel %vm4356_vm5, %v1730_v51, %v1734_v29  ;;  %v1740_v6 = vrot.slane %v1739_v52, 4  ;;  %v1768_v7 = vrot.slane %v1766_v56, 5  ;;  %v3905_v58 = vrot.slane %v3887_v49, 9  ;;  %v4016_v32 = vld [vmem:[%s4313_s14 + $0xd0] sm:$0xf] }
 0x124   : > { %v1112_v4 = vpop.permute.xlu0 %1111  ;;  %v1754_v3 = vrot.slane %v1753_v61, 4  ;;  %v1763_v8 = vor.u32 %v1762_v62, %v1758_v55  ;;  %v2080_v9 = vsel %vm4315_vm2, %v3904_v63, %v2079_v1  ;;  %v2081_v10 = vrot.slane %v2079_v1, 4  ;;  %v4017_v37 = vld [vmem:[%s4313_s14 + $0xd4] sm:$0x1]  ;;  %v4077_v50 = vld [vmem:[%s4313_s14 + $0xc4] sm:$0xf] }
 0x125   : > { %v790_v60 = vpop.permute.xlu1 %789  ;;  %1152 = vst.msk [vmem:[#allocation2 + $0x40] sm:$0xff] %vm1143_vm8, %v1112_v4  ;;  %v1745_v13 = vsel %vm4356_vm5, %v1740_v6, %v1744_v45  ;;  %v2086_v14 = vrot.slane %v3888_v57, 5  ;;  %v2089_v15 = vrot.slane %v3889_v2, 5  ;;  %v2767_v27 = vshrl.u32 %v4012_v11, 16  ;;  %v4078_v57 = vld [vmem:[%s4313_s14 + $0xc8] sm:$0x1] }
 0x126   : > { %829 = vst.msk [vmem:[#allocation2 + $0x48] sm:$0xff] %vm819_vm7, %v790_v60  ;;  %v3255_v26 = vld [vmem:[#allocation2 + $0x38] sm:$0xff]  ;;  %1303 = vrot.lane.b32.xlu1 %v4257_v59, %s4276_s15  ;;  %v3840_v12 = vcombine.low %v1735_v5, %v1745_v13  ;;  %v1759_v17 = vsel %vm4356_vm5, %v1754_v3, %v1758_v55  ;;  %v1764_v18 = vrot.slane %v1763_v8, 4  ;;  %v2083_v19 = vsel %vm4315_vm2, %v2081_v10, %v2082_v54  ;;  %v4079_v59 = vld [vmem:[%s4313_s14 + $0xcc] sm:$0xe] }
 0x127   : > { %4173 = vmatmul.mubr.msk.bf16.gmra.mrb[12].mxu0 %vm3284_vm0, %v3255_v26  ;;  %v3920_v22 = vcombine.low %v2080_v9, %v2083_v19  ;;  %v2087_v23 = vsel %vm4315_vm2, %v3905_v58, %v2086_v14  ;;  %v2088_v24 = vrot.slane %v2086_v14, 4  ;;  %v2770_v30 = vshll.u32 %v4012_v11, 16  ;;  %v4080_v2 = vld [vmem:[%s4313_s14 + $0xd0] sm:$0xf]  ;;  %v4081_v10 = vld [vmem:[%s4313_s14 + $0xd4] sm:$0x1] }
 0x128   : > { %v1290_v21 = vpop.permute.xlu0 %1289  ;;  %1846 = vrot.lane.b32.xlu0 %v3840_v12, %s4280_s19  ;;  %v1769_v29 = vsel %vm4356_vm5, %v1764_v18, %v1768_v7  ;;  %v2776_v31 = vshll.u32 %v4013_v16, 16  ;;  %v2780_v33 = vshrl.u32 %v4013_v16, 16  ;;  %v2769_v35 = vrot.slane %v2767_v27, 4  ;;  %v4261_v60 = vld [vmem:[%s4313_s14 + $0xcc] sm:$0xff]  }
 0x129   : > { %v1114_v25 = vpop.permute.xlu1 %1113  ;;  %1330 = vst.msk [vmem:[#allocation2 + $0x40] sm:$0xff] %vm1321_vm9, %v1290_v21  ;;  %v3841_v39 = vcombine.low %v1759_v17, %v1769_v29  ;;  %v2090_v34 = vsel %vm4315_vm2, %v2088_v24, %v2089_v15  ;;  %v2786_v36 = vshll.u32 %v4014_v20, 16  ;;  %v2772_v41 = vrot.slane %v2770_v30, 5 }
 0x12a   : > { %1153 = vst.msk [vmem:[#allocation2 + $0x48] sm:$0xff] %vm1143_vm8, %v1114_v25  ;;  %v3921_v38 = vcombine.low %v2087_v23, %v2090_v34  ;;  %v2778_v42 = vrot.slane %v2776_v31, 5  ;;  %v2782_v43 = vrot.slane %v2780_v33, 4  ;;  %v2791_v46 = vshrl.u32 %v4015_v28, 16 }
 0x12b   : > { %1848 = vrot.lane.b32.xlu1 %v3841_v39, %s4280_s19  ;;  %v2788_v45 = vrot.slane %v2786_v36, 5  ;;  %v2794_v47 = vshll.u32 %v4015_v28, 16  ;;  %v2800_v48 = vshll.u32 %v4016_v32, 16  ;;  %v2773_v51 = vor.u32 %v2772_v41, %v2769_v35 }
 0x12c   : > { %2167 = vrot.lane.b32.xlu0 %v3920_v22, %s4277_s16  ;;  %v2783_v52 = vor.u32 %v2782_v43, %v2778_v42  ;;  %v2804_v55 = vshrl.u32 %v4016_v32, 16  ;;  %v2810_v56 = vshll.u32 %v4017_v37, 16  ;;  %v2793_v61 = vrot.slane %v2791_v46, 4 }
 0x12d   : > { %v1292_v49 = vpop.permute.xlu1 %1291  ;;  %v2796_v62 = vrot.slane %v2794_v47, 5  ;;  %v2802_v63 = vrot.slane %v2800_v48, 5  ;;  %v4096_v1 = vrot.slane %v4076_v44, 9  ;;  %v1835_v4 = vpop.permute.xlu0 %1834  ;;  %v2774_v5 = vrot.slane %v2773_v51, 4 }
 0x12e   : > { %1331 = vst.msk [vmem:[#allocation2 + $0x48] sm:$0xff] %vm1321_vm9, %v1292_v49  ;;  %v2784_v6 = vrot.slane %v2783_v52, 4  ;;  %v2806_v7 = vrot.slane %v2804_v55, 4  ;;  %v2812_v54 = vrot.slane %v2810_v56, 5  ;;  %v3123_v8 = vrot.slane %v4077_v50, 5 }
 0x12f   : > { %1875 = vst.msk [vmem:[#allocation2 + $0x40] sm:$0xff] %vm1866_vm10, %v1835_v4  ;;  %2169 = vrot.lane.b32.xlu1 %v3921_v38, %s4277_s16  ;;  %v2797_v3 = vor.u32 %v2796_v62, %v2793_v61  ;;  %v3126_v9 = vrot.slane %v4078_v57, 5  ;;  %v4097_v11 = vrot.slane %v4079_v59, 9  ;;  %v2779_v26 = vsel %vm4356_vm5, %v2774_v5, %v2778_v42 }
 0x130   : > { %2345 = vrot.lane.b32.xlu0 %v4260_v40, %s4281_s20  ;;  %v2789_v13 = vsel %vm4356_vm5, %v2784_v6, %v2788_v45  ;;  %v2807_v58 = vor.u32 %v2806_v7, %v2802_v63  ;;  %v3130_v14 = vrot.slane %v4080_v2, 5  ;;  %v3124_v17 = vsel %vm4315_vm2, %v4096_v1, %v3123_v8 }
 0x131   : > { %v1837_v15 = vpop.permute.xlu1 %1836  ;;  %v4032_v16 = vcombine.low %v2779_v26, %v2789_v13  ;;  %v2798_v12 = vrot.slane %v2797_v3, 4  ;;  %v3125_v18 = vrot.slane %v3123_v8, 4  ;;  %v2156_v19 = vpop.permute.xlu0 %2155  ;;  %v3133_v22 = vrot.slane %v4081_v10, 5 }
 0x132   : > { %1876 = vst.msk [vmem:[#allocation2 + $0x48] sm:$0xff] %vm1866_vm10, %v1837_v15  ;;  %v2808_v20 = vrot.slane %v2807_v58, 4  ;;  %v3132_v21 = vrot.slane %v3130_v14, 4  ;;  %v3131_v28 = vsel %vm4315_vm2, %v4097_v11, %v3130_v14 }
 0x133   : > { %2196 = vst.msk [vmem:[#allocation2 + $0x40] sm:$0xff] %vm2187_vm11, %v2156_v19  ;;  %2347 = vrot.lane.b32.xlu1 %v4261_v60, %s4281_s20  ;;  %v2803_v23 = vsel %vm4356_vm5, %v2798_v12, %v2802_v63  ;;  %v3127_v24 = vsel %vm4315_vm2, %v3125_v18, %v3126_v9 }
 0x134   : > { %2890 = vrot.lane.b32.xlu0 %v4032_v16, %s4282_s21  ;;  %v2813_v25 = vsel %vm4356_vm5, %v2808_v20, %v2812_v54  ;;  %v4112_v27 = vcombine.low %v3124_v17, %v3127_v24  ;;  %v3134_v29 = vsel %vm4315_vm2, %v3132_v21, %v3133_v22 }
 0x135   : > { %v2158_v30 = vpop.permute.xlu1 %2157  ;;  %v4033_v31 = vcombine.low %v2803_v23, %v2813_v25  ;;  %v2334_v33 = vpop.permute.xlu0 %2333  ;;  %v4113_v32 = vcombine.low %v3131_v28, %v3134_v29 }
 0x136   : > { %2197 = vst.msk [vmem:[#allocation2 + $0x48] sm:$0xff] %vm2187_vm11, %v2158_v30 }
 0x137   : > { %2374 = vst.msk [vmem:[#allocation2 + $0x40] sm:$0xff] %vm2365_vm12, %v2334_v33  ;;  %2892 = vrot.lane.b32.xlu1 %v4033_v31, %s4282_s21 }
 0x138   : > { %3211 = vrot.lane.b32.xlu0 %v4112_v27, %s4283_s22 }
 0x139   : > { %v2336_v53 = vpop.permute.xlu1 %2335 }
 0x13a   : > { %2375 = vst.msk [vmem:[#allocation2 + $0x48] sm:$0xff] %vm2365_vm12, %v2336_v53  ;;  %v2879_v39 = vpop.permute.xlu0 %2878 }
 0x13b   : > { %3213 = vrot.lane.b32.xlu1 %v4113_v32, %s4283_s22  ;;  %2919 = vst.msk [vmem:[#allocation2 + $0x40] sm:$0xff] %vm2910_vm13, %v2879_v39 }
 0x13d   : > { %v2881_v0 = vpop.permute.xlu1 %2880 }
 0x13e   : > { %2920 = vst.msk [vmem:[#allocation2 + $0x48] sm:$0xff] %vm2910_vm13, %v2881_v0  ;;  %v3200_v34 = vpop.permute.xlu0 %3199 }
 0x13f   : > { %3240 = vst.msk [vmem:[#allocation2 + $0x40] sm:$0xff] %vm3231_vm14, %v3200_v34 }
 0x143   : > { %v3202_v35 = vpop.permute.xlu0 %3201 }
 0x144   : > { %v792_v36 = vpop.permute.xlu1 %791  ;;  %3241 = vst.msk [vmem:[#allocation2 + $0x48] sm:$0xff] %vm3231_vm14, %v3202_v35 }
 0x145   : > { %830 = vst.msk [vmem:[#allocation2 + $0x50] sm:$0xff] %vm819_vm7, %v792_v36 }
 0x146   : > { %v3256_v37 = vld [vmem:[#allocation2 + $0x40] sm:$0xff] }
 0x147   : > { %4176 = vmatprep.mubr.msk.bf16.mxu1 %vm3284_vm0, %v3256_v37 }
 0x148   : > { %v794_v38 = vpop.permute.xlu1 %793  ;;  %v1116_v40 = vpop.permute.xlu0 %1115 }
 0x149   : > { %831 = vst.msk [vmem:[#allocation2 + $0x58] sm:$0xff] %vm819_vm7, %v794_v38 }
 0x14a   : > { %1154 = vst.msk [vmem:[#allocation2 + $0x50] sm:$0xff] %vm1143_vm8, %v1116_v40 }
 0x14b   : > { %v3257_v41 = vld [vmem:[#allocation2 + $0x48] sm:$0xff] }
 0x14c   : > { %v1118_v42 = vpop.permute.xlu1 %1117  ;;  %v1294_v43 = vpop.permute.xlu0 %1293  ;;  %4177 = vmatmul.mubr.msk.bf16.vlgmr.msra.gmra.mrb[0].mxu1 %vm3284_vm0, %v3257_v41 }
 0x14d   : > { %1155 = vst.msk [vmem:[#allocation2 + $0x58] sm:$0xff] %vm1143_vm8, %v1118_v42 }
 0x14e   : > { %1332 = vst.msk [vmem:[#allocation2 + $0x50] sm:$0xff] %vm1321_vm9, %v1294_v43 }
 0x150   : > { %v1296_v44 = vpop.permute.xlu1 %1295 }
 0x151   : > { %1333 = vst.msk [vmem:[#allocation2 + $0x58] sm:$0xff] %vm1321_vm9, %v1296_v44 }
 0x152   : > { %v1839_v45 = vpop.permute.xlu0 %1838 }
 0x153   : > { %1877 = vst.msk [vmem:[#allocation2 + $0x50] sm:$0xff] %vm1866_vm10, %v1839_v45 }
 0x155   : > { %v1841_v46 = vpop.permute.xlu1 %1840 }
 0x156   : > { %1878 = vst.msk [vmem:[#allocation2 + $0x58] sm:$0xff] %vm1866_vm10, %v1841_v46  ;;  %v2160_v47 = vpop.permute.xlu0 %2159 }
 0x157   : > { %2198 = vst.msk [vmem:[#allocation2 + $0x50] sm:$0xff] %vm2187_vm11, %v2160_v47 }
 0x159   : > { %v2162_v48 = vpop.permute.xlu1 %2161 }
 0x15a   : > { %2199 = vst.msk [vmem:[#allocation2 + $0x58] sm:$0xff] %vm2187_vm11, %v2162_v48  ;;  %v2338_v49 = vpop.permute.xlu0 %2337 }
 0x15b   : > { %2376 = vst.msk [vmem:[#allocation2 + $0x50] sm:$0xff] %vm2365_vm12, %v2338_v49 }
 0x15d   : > { %v2340_v50 = vpop.permute.xlu1 %2339 }
 0x15e   : > { %2377 = vst.msk [vmem:[#allocation2 + $0x58] sm:$0xff] %vm2365_vm12, %v2340_v50  ;;  %v2883_v51 = vpop.permute.xlu0 %2882 }
 0x15f   : > { %2921 = vst.msk [vmem:[#allocation2 + $0x50] sm:$0xff] %vm2910_vm13, %v2883_v51 }
 0x161   : > { %v2885_v52 = vpop.permute.xlu1 %2884 }
 0x162   : > { %2922 = vst.msk [vmem:[#allocation2 + $0x58] sm:$0xff] %vm2910_vm13, %v2885_v52  ;;  %v3204_v55 = vpop.permute.xlu0 %3203 }
 0x163   : > { %3242 = vst.msk [vmem:[#allocation2 + $0x50] sm:$0xff] %vm3231_vm14, %v3204_v55 }
 0x167   : > { %v3206_v56 = vpop.permute.xlu0 %3205 }
 0x168   : > { %v796_v57 = vpop.permute.xlu1 %795  ;;  %3243 = vst.msk [vmem:[#allocation2 + $0x58] sm:$0xff] %vm3231_vm14, %v3206_v56 }
 0x169   : > { %832 = vst.msk [vmem:[#allocation2 + $0x60] sm:$0xff] %vm819_vm7, %v796_v57 }
 0x16a   : > { %v3258_v59 = vld [vmem:[#allocation2 + $0x50] sm:$0xff] }
 0x16b   : > { %4180 = vmatprep.mubr.msk.bf16.mxu1 %vm3284_vm0, %v3258_v59 }
 0x16c   : > { %v798_v61 = vpop.permute.xlu1 %797  ;;  %v1120_v62 = vpop.permute.xlu0 %1119 }
 0x16d   : > { %833 = vst.msk [vmem:[#allocation2 + $0x68] sm:$0xff] %vm819_vm7, %v798_v61 }
 0x16e   : > { %1156 = vst.msk [vmem:[#allocation2 + $0x60] sm:$0xff] %vm1143_vm8, %v1120_v62 }
 0x16f   : > { %v3259_v63 = vld [vmem:[#allocation2 + $0x58] sm:$0xff] }
 0x170   : > { %v1122_v1 = vpop.permute.xlu1 %1121  ;;  %v1298_v2 = vpop.permute.xlu0 %1297  ;;  %4181 = vmatmul.mubr.msk.bf16.gmra.mrb[4].mxu1 %vm3284_vm0, %v3259_v63 }
 0x171   : > { %1157 = vst.msk [vmem:[#allocation2 + $0x68] sm:$0xff] %vm1143_vm8, %v1122_v1 }
 0x172   : > { %1334 = vst.msk [vmem:[#allocation2 + $0x60] sm:$0xff] %vm1321_vm9, %v1298_v2 }
 0x174   : > { %v1300_v4 = vpop.permute.xlu1 %1299 }
 0x175   : > { %1335 = vst.msk [vmem:[#allocation2 + $0x68] sm:$0xff] %vm1321_vm9, %v1300_v4 }
 0x176   : > { %v1843_v5 = vpop.permute.xlu0 %1842 }
 0x177   : > { %1879 = vst.msk [vmem:[#allocation2 + $0x60] sm:$0xff] %vm1866_vm10, %v1843_v5 }
 0x179   : > { %v1845_v6 = vpop.permute.xlu1 %1844 }
 0x17a   : > { %1880 = vst.msk [vmem:[#allocation2 + $0x68] sm:$0xff] %vm1866_vm10, %v1845_v6  ;;  %v2164_v7 = vpop.permute.xlu0 %2163 }
 0x17b   : > { %2200 = vst.msk [vmem:[#allocation2 + $0x60] sm:$0xff] %vm2187_vm11, %v2164_v7 }
 0x17d   : > { %v2166_v54 = vpop.permute.xlu1 %2165 }
 0x17e   : > { %2201 = vst.msk [vmem:[#allocation2 + $0x68] sm:$0xff] %vm2187_vm11, %v2166_v54  ;;  %v2342_v60 = vpop.permute.xlu0 %2341 }
 0x17f   : > { %2378 = vst.msk [vmem:[#allocation2 + $0x60] sm:$0xff] %vm2365_vm12, %v2342_v60 }
 0x181   : > { %v2344_v3 = vpop.permute.xlu1 %2343 }
 0x182   : > { %2379 = vst.msk [vmem:[#allocation2 + $0x68] sm:$0xff] %vm2365_vm12, %v2344_v3  ;;  %v2887_v8 = vpop.permute.xlu0 %2886 }
 0x183   : > { %2923 = vst.msk [vmem:[#allocation2 + $0x60] sm:$0xff] %vm2910_vm13, %v2887_v8 }
 0x185   : > { %v2889_v9 = vpop.permute.xlu1 %2888 }
 0x186   : > { %2924 = vst.msk [vmem:[#allocation2 + $0x68] sm:$0xff] %vm2910_vm13, %v2889_v9  ;;  %v3208_v10 = vpop.permute.xlu0 %3207 }
 0x187   : > { %3244 = vst.msk [vmem:[#allocation2 + $0x60] sm:$0xff] %vm3231_vm14, %v3208_v10 }
 0x18b   : > { %v3210_v11 = vpop.permute.xlu0 %3209 }
 0x18c   : > { %v800_v26 = vpop.permute.xlu1 %799  ;;  %3245 = vst.msk [vmem:[#allocation2 + $0x68] sm:$0xff] %vm3231_vm14, %v3210_v11 }
 0x18d   : > { %834 = vst.msk [vmem:[#allocation2 + $0x70] sm:$0xff] %vm819_vm7, %v800_v26 }
 0x18e   : > { %v3260_v13 = vld [vmem:[#allocation2 + $0x60] sm:$0xff] }
 0x18f   : > { %4184 = vmatprep.mubr.msk.bf16.mxu1 %vm3284_vm0, %v3260_v13 }
 0x190   : > { %v802_v58 = vpop.permute.xlu1 %801  ;;  %v1124_v14 = vpop.permute.xlu0 %1123 }
 0x191   : > { %835 = vst.msk [vmem:[#allocation2 + $0x78] sm:$0xff] %vm819_vm7, %v802_v58 }
 0x192   : > { %1158 = vst.msk [vmem:[#allocation2 + $0x70] sm:$0xff] %vm1143_vm8, %v1124_v14 }
 0x193   : > { %v4162_v15 = vpop.f32.mrb[0].mxu0  ;;  %v3261_v16 = vld [vmem:[#allocation2 + $0x68] sm:$0xff] }
 0x194   : > { %v3371_v12 = vpop.f32.mrb[1].mxu0  ;;  %v1126_v17 = vpop.permute.xlu1 %1125  ;;  %4185 = vmatmul.mubr.msk.bf16.gmra.mrb[8].mxu1 %vm3284_vm0, %v3261_v16  ;;  %v3538_v25 = vmul.f32 %v4162_v15, %v4162_v15 }
 0x195   : > { %v1302_v18 = vpop.permute.xlu0 %1301  ;;  %1159 = vst.msk [vmem:[#allocation2 + $0x78] sm:$0xff] %vm1143_vm8, %v1126_v17  ;;  %v4163_v19 = vpop.f32.mrb[2].mxu0  ;;  %v3536_v21 = vmul.f32 %v3371_v12, %v3371_v12 }
 0x196   : > { %1336 = vst.msk [vmem:[#allocation2 + $0x70] sm:$0xff] %vm1321_vm9, %v1302_v18  ;;  %v3374_v20 = vpop.f32.mrb[3].mxu0  ;;  %v3539_v30 = vmul.f32 %v4163_v19, %v4163_v19 }
 0x197   : > { %v3498_v22 = vadd.f32 %v3374_v20, %v3371_v12  ;;  %v3537_v23 = vmul.f32 %v3374_v20, %v3374_v20 }
 0x198   : > { %v1304_v24 = vpop.permute.xlu1 %1303 }
 0x199   : > { %1337 = vst.msk [vmem:[#allocation2 + $0x78] sm:$0xff] %vm1321_vm9, %v1304_v24  ;;  %v3499_v27 = vadd.f32 %v4162_v15, %v3498_v22  ;;  %v3568_v28 = vadd.f32 %v3537_v23, %v3536_v21 }
 0x19a   : > { %v1847_v29 = vpop.permute.xlu0 %1846 }
 0x19b   : > { %1881 = vst.msk [vmem:[#allocation2 + $0x70] sm:$0xff] %vm1866_vm10, %v1847_v29  ;;  %v3569_v31 = vadd.f32 %v3568_v28, %v3538_v25  ;;  %v3500_v33 = vadd.f32 %v4163_v19, %v3499_v27 }
 0x19d   : > { %v1849_v32 = vpop.permute.xlu1 %1848  ;;  %v3570_v53 = vadd.f32 %v3569_v31, %v3539_v30 }
 0x19e   : > { %1882 = vst.msk [vmem:[#allocation2 + $0x78] sm:$0xff] %vm1866_vm10, %v1849_v32  ;;  %v2168_v39 = vpop.permute.xlu0 %2167 }
 0x19f   : > { %2202 = vst.msk [vmem:[#allocation2 + $0x70] sm:$0xff] %vm2187_vm11, %v2168_v39 }
 0x1a1   : > { %v2170_v0 = vpop.permute.xlu1 %2169 }
 0x1a2   : > { %2203 = vst.msk [vmem:[#allocation2 + $0x78] sm:$0xff] %vm2187_vm11, %v2170_v0  ;;  %v2346_v34 = vpop.permute.xlu0 %2345 }
 0x1a3   : > { %2380 = vst.msk [vmem:[#allocation2 + $0x70] sm:$0xff] %vm2365_vm12, %v2346_v34 }
 0x1a5   : > { %v2348_v35 = vpop.permute.xlu1 %2347 }
 0x1a6   : > { %2381 = vst.msk [vmem:[#allocation2 + $0x78] sm:$0xff] %vm2365_vm12, %v2348_v35  ;;  %v2891_v36 = vpop.permute.xlu0 %2890 }
 0x1a7   : > { %2925 = vst.msk [vmem:[#allocation2 + $0x70] sm:$0xff] %vm2910_vm13, %v2891_v36 }
 0x1a9   : > { %v2893_v37 = vpop.permute.xlu1 %2892 }
 0x1aa   : > { %2926 = vst.msk [vmem:[#allocation2 + $0x78] sm:$0xff] %vm2910_vm13, %v2893_v37  ;;  %v3212_v38 = vpop.permute.xlu0 %3211 }
 0x1ab   : > { %3246 = vst.msk [vmem:[#allocation2 + $0x70] sm:$0xff] %vm3231_vm14, %v3212_v38 }
 0x1ad   : > { %v3214_v40 = vpop.permute.xlu1 %3213 }
 0x1ae   : > { %3247 = vst.msk [vmem:[#allocation2 + $0x78] sm:$0xff] %vm3231_vm14, %v3214_v40 }
 0x1b2   : > { %v4166_v41 = vpop.f32.mrb[4].mxu0  ;;  %v3262_v43 = vld [vmem:[#allocation2 + $0x70] sm:$0xff] }
 0x1b3   : > { %v3387_v42 = vpop.f32.mrb[5].mxu0  ;;  %4188 = vmatprep.mubr.msk.bf16.mxu1 %vm3284_vm0, %v3262_v43  ;;  %v3542_v52 = vmul.f32 %v4166_v41, %v4166_v41 }
 0x1b4   : > { %v3501_v44 = vadd.f32 %v3500_v33, %v3387_v42  ;;  %v3540_v45 = vmul.f32 %v3387_v42, %v3387_v42  ;;  %v4167_v46 = vpop.f32.mrb[6].mxu0 }
 0x1b5   : > { %v3390_v47 = vpop.f32.mrb[7].mxu0  ;;  %v3263_v51 = vld [vmem:[#allocation2 + $0x78] sm:$0xff]  ;;  %v3543_v57 = vmul.f32 %v4167_v46, %v4167_v46 }
 0x1b6   : > { %v3571_v48 = vadd.f32 %v3570_v53, %v3540_v45  ;;  %v3502_v49 = vadd.f32 %v3501_v44, %v3390_v47  ;;  %v3541_v50 = vmul.f32 %v3390_v47, %v3390_v47  ;;  %4189 = vmatmul.mubr.msk.bf16.gmra.mrb[12].mxu1 %vm3284_vm0, %v3263_v51 }
 0x1b8   : > { %v3503_v55 = vadd.f32 %v4166_v41, %v3502_v49  ;;  %v3572_v56 = vadd.f32 %v3571_v48, %v3541_v50 }
 0x1ba   : > { %v3573_v59 = vadd.f32 %v3572_v56, %v3542_v52  ;;  %v3504_v61 = vadd.f32 %v4167_v46, %v3503_v55 }
 0x1bc   : > { %v3574_v62 = vadd.f32 %v3573_v59, %v3543_v57 }
 0x1d6   : > { %v4170_v63 = vpop.f32.mrb[8].mxu0 }
 0x1d7   : > { %v3403_v1 = vpop.f32.mrb[9].mxu0  ;;  %v3546_v3 = vmul.f32 %v4170_v63, %v4170_v63 }
 0x1d8   : > { %v3505_v2 = vadd.f32 %v3504_v61, %v3403_v1  ;;  %v3544_v4 = vmul.f32 %v3403_v1, %v3403_v1  ;;  %v4171_v5 = vpop.f32.mrb[10].mxu0 }
 0x1d9   : > { %v3406_v6 = vpop.f32.mrb[11].mxu0  ;;  %v3547_v10 = vmul.f32 %v4171_v5, %v4171_v5 }
 0x1da   : > { %v3575_v7 = vadd.f32 %v3574_v62, %v3544_v4  ;;  %v3506_v54 = vadd.f32 %v3505_v2, %v3406_v6  ;;  %v3545_v60 = vmul.f32 %v3406_v6, %v3406_v6 }
 0x1dc   : > { %v3507_v8 = vadd.f32 %v4170_v63, %v3506_v54  ;;  %v3576_v9 = vadd.f32 %v3575_v7, %v3545_v60 }
 0x1de   : > { %v3577_v11 = vadd.f32 %v3576_v9, %v3546_v3  ;;  %v3508_v26 = vadd.f32 %v4171_v5, %v3507_v8 }
 0x1e0   : > { %v3578_v13 = vadd.f32 %v3577_v11, %v3547_v10 }
 0x1fa   : > { %v4174_v58 = vpop.f32.mrb[12].mxu0 }
 0x1fb   : > { %v3419_v14 = vpop.f32.mrb[13].mxu0  ;;  %v3550_v21 = vmul.f32 %v4174_v58, %v4174_v58 }
 0x1fc   : > { %v3509_v15 = vadd.f32 %v3508_v26, %v3419_v14  ;;  %v3548_v16 = vmul.f32 %v3419_v14, %v3419_v14  ;;  %v4175_v12 = vpop.f32.mrb[14].mxu0 }
 0x1fd   : > { %v3422_v17 = vpop.f32.mrb[15].mxu0  ;;  %v3551_v24 = vmul.f32 %v4175_v12, %v4175_v12 }
 0x1fe   : > { %v3579_v18 = vadd.f32 %v3578_v13, %v3548_v16  ;;  %v3510_v19 = vadd.f32 %v3509_v15, %v3422_v17  ;;  %v3549_v20 = vmul.f32 %v3422_v17, %v3422_v17 }
 0x200   : > { %v3511_v22 = vadd.f32 %v4174_v58, %v3510_v19  ;;  %v3580_v23 = vadd.f32 %v3579_v18, %v3549_v20 }
 0x202   : > { %v3581_v25 = vadd.f32 %v3580_v23, %v3550_v21  ;;  %v3512_v27 = vadd.f32 %v4175_v12, %v3511_v22 }
 0x204   : > { %v3582_v28 = vadd.f32 %v3581_v25, %v3551_v24 }
 0x21f   : > { %v4178_v29 = vpop.f32.mrb[0].mxu1 }
 0x220   : > { %v3435_v30 = vpop.f32.mrb[1].mxu1  ;;  %v3554_v35 = vmul.f32 %v4178_v29, %v4178_v29 }
 0x221   : > { %v3513_v31 = vadd.f32 %v3512_v27, %v3435_v30  ;;  %v3552_v33 = vmul.f32 %v3435_v30, %v3435_v30  ;;  %v4179_v32 = vpop.f32.mrb[2].mxu1 }
 0x222   : > { %v3438_v53 = vpop.f32.mrb[3].mxu1  ;;  %v3555_v38 = vmul.f32 %v4179_v32, %v4179_v32 }
 0x223   : > { %v3583_v39 = vadd.f32 %v3582_v28, %v3552_v33  ;;  %v3514_v0 = vadd.f32 %v3513_v31, %v3438_v53  ;;  %v3553_v34 = vmul.f32 %v3438_v53, %v3438_v53 }
 0x225   : > { %v3515_v36 = vadd.f32 %v4178_v29, %v3514_v0  ;;  %v3584_v37 = vadd.f32 %v3583_v39, %v3553_v34 }
 0x227   : > { %v3585_v40 = vadd.f32 %v3584_v37, %v3554_v35  ;;  %v3516_v41 = vadd.f32 %v4179_v32, %v3515_v36 }
 0x229   : > { %v3586_v42 = vadd.f32 %v3585_v40, %v3555_v38 }
 0x243   : > { %v4182_v43 = vpop.f32.mrb[4].mxu1 }
 0x244   : > { %v3451_v44 = vpop.f32.mrb[5].mxu1  ;;  %v3558_v52 = vmul.f32 %v4182_v43, %v4182_v43 }
 0x245   : > { %v3517_v45 = vadd.f32 %v3516_v41, %v3451_v44  ;;  %v3556_v46 = vmul.f32 %v3451_v44, %v3451_v44  ;;  %v4183_v47 = vpop.f32.mrb[6].mxu1 }
 0x246   : > { %v3454_v48 = vpop.f32.mrb[7].mxu1  ;;  %v3559_v57 = vmul.f32 %v4183_v47, %v4183_v47 }
 0x247   : > { %v3587_v49 = vadd.f32 %v3586_v42, %v3556_v46  ;;  %v3518_v50 = vadd.f32 %v3517_v45, %v3454_v48  ;;  %v3557_v51 = vmul.f32 %v3454_v48, %v3454_v48 }
 0x249   : > { %v3519_v55 = vadd.f32 %v4182_v43, %v3518_v50  ;;  %v3588_v56 = vadd.f32 %v3587_v49, %v3557_v51 }
 0x24b   : > { %v3589_v59 = vadd.f32 %v3588_v56, %v3558_v52  ;;  %v3520_v61 = vadd.f32 %v4183_v47, %v3519_v55 }
 0x24d   : > { %v3590_v62 = vadd.f32 %v3589_v59, %v3559_v57 }
 0x267   : > { %v4186_v63 = vpop.f32.mrb[8].mxu1 }
 0x268   : > { %v3467_v1 = vpop.f32.mrb[9].mxu1  ;;  %v3562_v3 = vmul.f32 %v4186_v63, %v4186_v63 }
 0x269   : > { %v3521_v2 = vadd.f32 %v3520_v61, %v3467_v1  ;;  %v3560_v4 = vmul.f32 %v3467_v1, %v3467_v1  ;;  %v4187_v5 = vpop.f32.mrb[10].mxu1 }
 0x26a   : > { %v3470_v6 = vpop.f32.mrb[11].mxu1  ;;  %v3563_v10 = vmul.f32 %v4187_v5, %v4187_v5 }
 0x26b   : > { %v3591_v7 = vadd.f32 %v3590_v62, %v3560_v4  ;;  %v3522_v54 = vadd.f32 %v3521_v2, %v3470_v6  ;;  %v3561_v60 = vmul.f32 %v3470_v6, %v3470_v6 }
 0x26d   : > { %v3523_v8 = vadd.f32 %v4186_v63, %v3522_v54  ;;  %v3592_v9 = vadd.f32 %v3591_v7, %v3561_v60 }
 0x26f   : > { %v3593_v11 = vadd.f32 %v3592_v9, %v3562_v3  ;;  %v3524_v26 = vadd.f32 %v4187_v5, %v3523_v8 }
 0x271   : > { %v3594_v13 = vadd.f32 %v3593_v11, %v3563_v10 }
 0x289   : > { %v4190_v58 = vpop.f32.mrb[12].mxu1 }
 0x28a   : > { %v3483_v14 = vpop.f32.mrb[13].mxu1  ;;  %v3566_v21 = vmul.f32 %v4190_v58, %v4190_v58 }
 0x28b   : > { %v3525_v15 = vadd.f32 %v3524_v26, %v3483_v14  ;;  %v3564_v16 = vmul.f32 %v3483_v14, %v3483_v14  ;;  %v4191_v12 = vpop.f32.mrb[14].mxu1 }
 0x28c   : > { %v3486_v17 = vpop.f32.mrb[15].mxu1  ;;  %v3567_v24 = vmul.f32 %v4191_v12, %v4191_v12 }
 0x28d   : > { %v3595_v18 = vadd.f32 %v3594_v13, %v3564_v16  ;;  %v3526_v19 = vadd.f32 %v3525_v15, %v3486_v17  ;;  %v3565_v20 = vmul.f32 %v3486_v17, %v3486_v17 }
 0x28f   : > { %v3527_v22 = vadd.f32 %v4190_v58, %v3526_v19  ;;  %v3596_v23 = vadd.f32 %v3595_v18, %v3565_v20 }
 0x291   : > { %v3528_v25 = vadd.f32 %v4191_v12, %v3527_v22  ;;  %v3597_v27 = vadd.f32 %v3596_v23, %v3566_v21 }
 0x293   : > { %v3529_v28 = vrot.slane %v3528_v25, 4  ;;  %v3598_v29 = vadd.f32 %v3597_v27, %v3567_v24 }
 0x295   : > { %v3530_v30 = vadd.f32 %v3529_v28, %v3528_v25  ;;  %v3599_v31 = vrot.slane %v3598_v29, 4 }
 0x297   : > { %v3531_v33 = vrot.slane %v3530_v30, 2  ;;  %v3600_v32 = vadd.f32 %v3599_v31, %v3598_v29 }
 0x299   : > { %v3532_v53 = vadd.f32 %v3531_v33, %v3530_v30  ;;  %v3601_v39 = vrot.slane %v3600_v32, 2 }
 0x29b   : > { %v3533_v0 = vrot.slane %v3532_v53, 1  ;;  %v3602_v34 = vadd.f32 %v3601_v39, %v3600_v32 }
 0x29d   : > { %v3534_v35 = vadd.f32 %v3533_v0, %v3532_v53  ;;  %v3603_v36 = vrot.slane %v3602_v34, 1 }
 0x29f   : > { %3535 = vst [vmem:[%s141_s4] sm:$0x1] %v3534_v35  ;;  %v3604_v37 = vadd.f32 %v3603_v36, %v3602_v34 }
 0x2a1   : > { %3605 = vst [vmem:[%s141_s4 + $0x1] sm:$0x1] %v3604_v37 }
 0x2a2 PF: > { %s12_s9 = sadd.s32 1, %s4274_s9  }
 0x2a3   : > { %p9_p4 = scmp.ge.s32.totalorder %s12_s9, 4  }
 0x2a5   :  { %11 = sbr.rel (!%p9_p4) target bundleno = 1 (0x1), region = 60 }

// kernel: basic_block_forward.3
= control target key start
LH: loop header
LB: loop body
LE: loop exit
PB: predicated region body
PF: predicated region fallthrough
CT: control target
= control target key end

     0   :  { %s8797_s18 = smov 0   ;;  %s11189_s0 = inlined_call_operand.vmem [shape: bf16[2,18,18,4], index: 0, kind: input, shape index: {}]   ;;  %s11190_s1 = inlined_call_operand.vmem [shape: bf16[36,128], index: 1, kind: input, shape index: {}]   ;;  %s11191_s2 = inlined_call_operand.vmem [shape: f32[1,128], index: 2, kind: input, shape index: {}]   ;;  %s11192_s3 = inlined_call_operand.vmem [shape: f32[1,128], index: 3, kind: input, shape index: {}]   ;;  %s11193_s4 = inlined_call_operand.vmem [shape: bf16[72,128], index: 4, kind: input, shape index: {}]   ;;  %s11194_s5 = inlined_call_operand.vmem [shape: f32[2,16,16,128], index: 5, kind: output, shape index: {}]  }
   0x1 LB: > { %s7735_s19 = sadd.s32 4294967295, %s8752_s18   ;;  %p7739_p0 = scmp.ge.s32.totalorder %s8752_s18, 1  ;;  %s8752_s18 = sphi %s8797_s18, %s15_s18  }
   0x2   : > { %p187_p1 = scmp.lt.s32.totalorder %s8752_s18, 3 }
   0x4   : > { %p188_p2 = pnand %p7739_p0, %p187_p1 }
   0x5   : > { %p215_p3 = scmp.lt.s32.totalorder (!%p188_p2), %s7735_s19, 1  ;;  %vm1015_vm0 = vcmask (!%p188_p2), 1042432   ;;  %vm1016_vm1 = vcmask (!%p188_p2), 1046532   ;;  %vm419_vm3 = vsmask.f32 (!%p188_p2), 3328  ;;  %s8754_s24 = smov (!%p188_p2), 12  }
   0x6   : > { %191 = sbr.rel (%p188_p2) target bundleno = 1156 (0x484), region = 40  ;;  %vm8808_vm2 = vmor (!%p188_p2), %vm1015_vm0, %vm1016_vm1  ;;  %vm420_vm4 = vsmask.f32 (!%p188_p2), 7440  ;;  %s8755_s25 = smov (!%p188_p2), 20   ;;  %vm354_vm6 = vcmask (!%p188_p2), 31744   ;;  %vm902_vm7 = vcmask (!%p188_p2), 64544  }
   0x7   : > { %vm8846_vm5 = vmor (!%p188_p2), %vm419_vm3, %vm420_vm4  ;;  %s8756_s26 = smov (!%p188_p2), 8   ;;  %s8757_s27 = smov (!%p188_p2), 4   ;;  %vm1226_vm8 = vcmask (!%p188_p2), 97344   ;;  %vm1404_vm9 = vcmask (!%p188_p2), 130144   ;;  %vm1949_vm10 = vcmask (!%p188_p2), 162944   ;;  %vm2270_vm11 = vcmask (!%p188_p2), 195744  }
   0x8   : > { %s8758_s28 = smov (!%p188_p2), 16   ;;  %s8759_s29 = smov (!%p188_p2), 24   ;;  %vm2448_vm12 = vcmask (!%p188_p2), 228544   ;;  %vm2993_vm13 = vcmask (!%p188_p2), 261344   ;;  %vm3314_vm14 = vcmask (!%p188_p2), 294144   ;;  %vm3416_vm15 = vcmask (!%p188_p2), 1041408  }
   0x9   : > { %s8760_s30 = smov (!%p188_p2), 28   ;;  %s8761_s6 = smov (!%p188_p2), 32   ;;  %vm3367_vm0 = vcmask (!%p188_p2), 293888   ;;  %vm3707_vm1 = vcmask (!%p188_p2), 60416   ;;  %vm3710_vm3 = vcmask (!%p188_p2), 57344  }
   0xa   : > { %vm4168_vm4 = vsmask.f32 (!%p188_p2), 7938  ;;  %s8763_s17 = smov (!%p188_p2), 48   ;;  %s8765_s21 = smov (!%p188_p2), 64  }
   0xb   : > { %s8766_s22 = smov (!%p188_p2), 56  }
   0xd   : > { %s11217_s19 = smov (!%p215_p3, %s7735_s19), 1 }
   0xe   : > { %s8614_s20 = smul.u32 216, %s11217_s19 }
  0x10   : > { %s8815_s23 = scalar_lea.vmem %s11189_s0, %s8614_s20  ;;  %s8764_s20 = smov 40  }
  0x11   : > { %v8636_v1 = vld [vmem:[%s8815_s23 + $0xc] sm:$0xff]   ;;  %v8637_v2 = vld [vmem:[%s8815_s23 + $0x18] sm:$0xff]   ;;  %v7921_v5 = vld [vmem:[%s8815_s23 + $0x14] sm:$0x1] }
  0x12   : > { %1356 = vrot.lane.b32.xlu0 %v8636_v1, %s8754_s24  ;;  %v7919_v3 = vld [vmem:[%s8815_s23 + $0xc] sm:$0xe]  ;;  %v7920_v4 = vld [vmem:[%s8815_s23 + $0x10] sm:$0xf]  ;;  %1358 = vrot.lane.b32.xlu1 %v8637_v2, %s8754_s24  ;;  %v2067_v8 = vrot.slane %v7921_v5, 5 }
  0x13   : > { %v7967_v6 = vrot.slane %v7919_v3, 9  ;;  %v2064_v7 = vrot.slane %v7920_v4, 5  ;;  %v919_v9 = vld [vmem:[%s8815_s23] sm:$0xe]  ;;  %v920_v10 = vld [vmem:[%s8815_s23 + $0x4] sm:$0xf] }
  0x14   : > { %v921_v11 = vld [vmem:[%s8815_s23 + $0x8] sm:$0x1]  ;;  %v7775_v12 = vrot.slane %v919_v9, 9  ;;  %v1020_v15 = vrot.slane %v920_v10, 5  ;;  %v371_v17 = vld [vmem:[%s8815_s23] sm:$0xf] }
  0x15   : > { %v2065_v13 = vsel %vm8808_vm2, %v7967_v6, %v2064_v7  ;;  %v2066_v14 = vrot.slane %v2064_v7, 4  ;;  %v1023_v16 = vrot.slane %v921_v11, 5  ;;  %v372_v18 = vld [vmem:[%s8815_s23 + $0x4] sm:$0xf]  ;;  %v373_v19 = vld [vmem:[%s8815_s23 + $0x8] sm:$0x1] }
  0x16   : > { %v423_v20 = vshrl.u32 %v371_v17, 16  ;;  %v426_v21 = vshll.u32 %v371_v17, 16  ;;  %v1021_v23 = vsel %vm8808_vm2, %v7775_v12, %v1020_v15  ;;  %v1022_v24 = vrot.slane %v1020_v15, 4  ;;  %v922_v26 = vld [vmem:[%s8815_s23 + $0xc] sm:$0xe] }
  0x17   : > { %v2068_v22 = vsel %vm8808_vm2, %v2066_v14, %v2067_v8  ;;  %v432_v25 = vshll.u32 %v372_v18, 16  ;;  %v923_v27 = vld [vmem:[%s8815_s23 + $0x10] sm:$0xf]  ;;  %v436_v31 = vshrl.u32 %v372_v18, 16  ;;  %v924_v32 = vld [vmem:[%s8815_s23 + $0x14] sm:$0x1] }
  0x18   : > { %v7983_v28 = vcombine.low %v2065_v13, %v2068_v22  ;;  %v425_v29 = vrot.slane %v423_v20, 4  ;;  %v428_v30 = vrot.slane %v426_v21, 5  ;;  %v1024_v33 = vsel %vm8808_vm2, %v1022_v24, %v1023_v16  ;;  %v374_v37 = vld [vmem:[%s8815_s23 + $0xc] sm:$0xf]  ;;  %v375_v42 = vld [vmem:[%s8815_s23 + $0x10] sm:$0xf] }
  0x19   : > { %v434_v34 = vrot.slane %v432_v25, 5  ;;  %v442_v35 = vshll.u32 %v373_v19, 16  ;;  %v7776_v36 = vrot.slane %v922_v26, 9  ;;  %v7791_v38 = vcombine.low %v1021_v23, %v1024_v33  ;;  %v376_v46 = vld [vmem:[%s8815_s23 + $0x14] sm:$0x1] }
  0x1a   : > { %2222 = vrot.lane.b32.xlu0 %v7983_v28, %s8755_s25  ;;  %v429_v39 = vor.u32 %v428_v30, %v425_v29  ;;  %v438_v40 = vrot.slane %v436_v31, 4  ;;  %v1027_v41 = vrot.slane %v923_v27, 5  ;;  %v1030_v45 = vrot.slane %v924_v32, 5  ;;  %v7922_v53 = vld [vmem:[%s8815_s23 + $0x18] sm:$0xe] }
  0x1b   : > { %v444_v44 = vrot.slane %v442_v35, 5  ;;  %v447_v47 = vshrl.u32 %v374_v37, 16  ;;  %v450_v48 = vshll.u32 %v374_v37, 16  ;;  %1178 = vrot.lane.b32.xlu1 %v7791_v38, %s8756_s26  ;;  %v456_v56 = vshll.u32 %v375_v42, 16  ;;  %v7923_v58 = vld [vmem:[%s8815_s23 + $0x1c] sm:$0xf] }
  0x1c   : > { %v430_v49 = vrot.slane %v429_v39, 4  ;;  %v439_v50 = vor.u32 %v438_v40, %v434_v34  ;;  %v1028_v51 = vsel %vm8808_vm2, %v7776_v36, %v1027_v41  ;;  %v1029_v52 = vrot.slane %v1027_v41, 4  ;;  %v7924_v63 = vld [vmem:[%s8815_s23 + $0x20] sm:$0x1]  ;;  %v7855_v5 = vld [vmem:[%s8815_s23 + $0xc] sm:$0xf] }
  0x1d   : > { %v449_v54 = vrot.slane %v447_v47, 4  ;;  %v452_v55 = vrot.slane %v450_v48, 5  ;;  %v460_v57 = vshrl.u32 %v375_v42, 16  ;;  %v466_v62 = vshll.u32 %v376_v46, 16  ;;  %v7856_v6 = vld [vmem:[%s8815_s23 + $0x10] sm:$0xf] }
  0x1e   : > { %v435_v59 = vsel %vm8846_vm5, %v430_v49, %v434_v34  ;;  %v440_v60 = vrot.slane %v439_v50, 4  ;;  %v1031_v61 = vsel %vm8808_vm2, %v1029_v52, %v1030_v45  ;;  %v458_v3 = vrot.slane %v456_v56, 5  ;;  %v7857_v11 = vld [vmem:[%s8815_s23 + $0x14] sm:$0x1]  ;;  %v7858_v16 = vld [vmem:[%s8815_s23 + $0x18] sm:$0xf] }
  0x1f   : > { %v7792_v1 = vcombine.low %v1028_v51, %v1031_v61  ;;  %v453_v2 = vor.u32 %v452_v55, %v449_v54  ;;  %v462_v4 = vrot.slane %v460_v57, 4  ;;  %v468_v8 = vrot.slane %v466_v62, 5  ;;  %v7859_v29 = vld [vmem:[%s8815_s23 + $0x1c] sm:$0xf]  ;;  %v7860_v34 = vld [vmem:[%s8815_s23 + $0x20] sm:$0x1] }
  0x20   : > { %v445_v7 = vsel %vm8846_vm5, %v440_v60, %v444_v44  ;;  %v7968_v9 = vrot.slane %v7922_v53, 9  ;;  %v2071_v10 = vrot.slane %v7923_v58, 5  ;;  %v2074_v15 = vrot.slane %v7924_v63, 5  ;;  %v8047_v35 = vld [vmem:[%s8815_s23 + $0x18] sm:$0xf] }
  0x21   : > { %v7759_v12 = vcombine.low %v435_v59, %v445_v7  ;;  %1180 = vrot.lane.b32.xlu1 %v7792_v1, %s8756_s26  ;;  %v454_v13 = vrot.slane %v453_v2, 4  ;;  %v463_v14 = vor.u32 %v462_v4, %v458_v3  ;;  %v1470_v19 = vshrl.u32 %v7855_v5, 16  ;;  %v8048_v48 = vld [vmem:[%s8815_s23 + $0x1c] sm:$0xf]  ;;  %v8049_v54 = vld [vmem:[%s8815_s23 + $0x20] sm:$0x1] }
  0x22   : > { %v2072_v17 = vsel %vm8808_vm2, %v7968_v9, %v2071_v10  ;;  %v2073_v18 = vrot.slane %v2071_v10, 4  ;;  %v1473_v20 = vshll.u32 %v7855_v5, 16  ;;  %v1479_v23 = vshll.u32 %v7856_v6, 16  ;;  %v8050_v59 = vld [vmem:[%s8815_s23 + $0x24] sm:$0xf] }
  0x23   : > { %854 = vrot.lane.b32.xlu0 %v7759_v12, %s8757_s27  ;;  %v459_v21 = vsel %vm8846_vm5, %v454_v13, %v458_v3  ;;  %v464_v22 = vrot.slane %v463_v14, 4  ;;  %v1483_v24 = vshrl.u32 %v7856_v6, 16  ;;  %v1472_v26 = vrot.slane %v1470_v19, 4  ;;  %v8051_v5 = vld [vmem:[%s8815_s23 + $0x28] sm:$0xf] }
  0x24   : > { %v2075_v25 = vsel %vm8808_vm2, %v2073_v18, %v2074_v15  ;;  %v1475_v27 = vrot.slane %v1473_v20, 5  ;;  %v1489_v28 = vshll.u32 %v7857_v11, 16  ;;  %v1481_v32 = vrot.slane %v1479_v23, 5  ;;  %v8052_v9 = vld [vmem:[%s8815_s23 + $0x2c] sm:$0x1]  ;;  %v8638_v11 = vld [vmem:[%s8815_s23 + $0x18] sm:$0xff]  }
  0x25   : > { %v469_v30 = vsel %vm8846_vm5, %v464_v22, %v468_v8  ;;  %v7984_v31 = vcombine.low %v2072_v17, %v2075_v25  ;;  %v1485_v33 = vrot.slane %v1483_v24, 4  ;;  %v1494_v39 = vshrl.u32 %v7858_v16, 16 }
  0x26   : > { %v7760_v36 = vcombine.low %v459_v21, %v469_v30  ;;  %v1476_v37 = vor.u32 %v1475_v27, %v1472_v26  ;;  %v1491_v38 = vrot.slane %v1489_v28, 5  ;;  %v1497_v41 = vshll.u32 %v7858_v16, 16  ;;  %v8111_v16 = vld [vmem:[%s8815_s23 + $0x18] sm:$0xe]  ;;  %v8112_v21 = vld [vmem:[%s8815_s23 + $0x1c] sm:$0xf] }
  0x27   : > { %2224 = vrot.lane.b32.xlu1 %v7984_v31, %s8755_s25  ;;  %v1486_v40 = vor.u32 %v1485_v33, %v1481_v32  ;;  %v1503_v42 = vshll.u32 %v7859_v29, 16  ;;  %v1507_v44 = vshrl.u32 %v7859_v29, 16  ;;  %v1496_v46 = vrot.slane %v1494_v39, 4  ;;  %v8113_v26 = vld [vmem:[%s8815_s23 + $0x20] sm:$0x1]  ;;  %v8639_v28 = vld [vmem:[%s8815_s23 + $0x24] sm:$0xff]  }
  0x28   : > { %856 = vrot.lane.b32.xlu0 %v7760_v36, %s8757_s27  ;;  %v1477_v45 = vrot.slane %v1476_v37, 4  ;;  %v1513_v47 = vshll.u32 %v7860_v34, 16  ;;  %v2514_v49 = vshrl.u32 %v8047_v35, 16  ;;  %v1499_v51 = vrot.slane %v1497_v41, 5  ;;  %v377_v27 = vld [vmem:[%s8815_s23 + $0x18] sm:$0xf] }
  0x29   : > { %v1487_v50 = vrot.slane %v1486_v40, 4  ;;  %v1505_v52 = vrot.slane %v1503_v42, 5  ;;  %v1509_v53 = vrot.slane %v1507_v44, 4  ;;  %v2517_v58 = vshll.u32 %v8047_v35, 16  ;;  %v378_v37 = vld [vmem:[%s8815_s23 + $0x1c] sm:$0xf] }
  0x2a   : > { %v1482_v55 = vsel %vm8846_vm5, %v1477_v45, %v1481_v32  ;;  %v1515_v56 = vrot.slane %v1513_v47, 5  ;;  %v2516_v57 = vrot.slane %v2514_v49, 4  ;;  %v1500_v61 = vor.u32 %v1499_v51, %v1496_v46  ;;  %v8114_v44 = vld [vmem:[%s8815_s23 + $0x24] sm:$0xe]  ;;  %v8115_v49 = vld [vmem:[%s8815_s23 + $0x28] sm:$0xf] }
  0x2b   : > { %v1492_v60 = vsel %vm8846_vm5, %v1487_v50, %v1491_v38  ;;  %v1510_v62 = vor.u32 %v1509_v53, %v1505_v52  ;;  %v2523_v63 = vshll.u32 %v8048_v48, 16  ;;  %v2519_v2 = vrot.slane %v2517_v58, 5  ;;  %v379_v38 = vld [vmem:[%s8815_s23 + $0x20] sm:$0x1]  ;;  %v8116_v50 = vld [vmem:[%s8815_s23 + $0x2c] sm:$0x1] }
  0x2c   : > { %v7903_v1 = vcombine.low %v1482_v55, %v1492_v60  ;;  %v2527_v3 = vshrl.u32 %v8048_v48, 16  ;;  %v2533_v4 = vshll.u32 %v8049_v54, 16  ;;  %v1501_v6 = vrot.slane %v1500_v61, 4 }
  0x2d   : > { %v1511_v7 = vrot.slane %v1510_v62, 4  ;;  %v2525_v8 = vrot.slane %v2523_v63, 5  ;;  %v2538_v10 = vshrl.u32 %v8050_v59, 16  ;;  %v2520_v12 = vor.u32 %v2519_v2, %v2516_v57  ;;  %v380_v63 = vld [vmem:[%s8815_s23 + $0x24] sm:$0xf] }
  0x2e   : > { %1901 = vrot.lane.b32.xlu0 %v7903_v1, %s8758_s28  ;;  %v2529_v13 = vrot.slane %v2527_v3, 4  ;;  %v2535_v14 = vrot.slane %v2533_v4, 5  ;;  %v2541_v15 = vshll.u32 %v8050_v59, 16  ;;  %v1506_v17 = vsel %vm8846_vm5, %v1501_v6, %v1505_v52 }
  0x2f   : > { %v1516_v18 = vsel %vm8846_vm5, %v1511_v7, %v1515_v56  ;;  %v2540_v19 = vrot.slane %v2538_v10, 4  ;;  %v2547_v20 = vshll.u32 %v8051_v5, 16  ;;  %v2521_v23 = vrot.slane %v2520_v12, 4  ;;  %v382_v10 = vld [vmem:[%s8815_s23 + $0x2c] sm:$0x1] }
  0x30   : > { %v7904_v22 = vcombine.low %v1506_v17, %v1516_v18  ;;  %v2530_v24 = vor.u32 %v2529_v13, %v2525_v8  ;;  %v2543_v25 = vrot.slane %v2541_v15, 5  ;;  %v2551_v30 = vshrl.u32 %v8051_v5, 16  ;;  %v381_v5 = vld [vmem:[%s8815_s23 + $0x28] sm:$0xf]  ;;  %v925_v15 = vld [vmem:[%s8815_s23 + $0x18] sm:$0xe] }
  0x31   : > { %v2549_v29 = vrot.slane %v2547_v20, 5  ;;  %v2557_v31 = vshll.u32 %v8052_v9, 16  ;;  %v8159_v32 = vrot.slane %v8111_v16, 9  ;;  %v2526_v33 = vsel %vm8846_vm5, %v2521_v23, %v2525_v8  ;;  %v926_v16 = vld [vmem:[%s8815_s23 + $0x1c] sm:$0xf] }
  0x32   : > { %1903 = vrot.lane.b32.xlu1 %v7904_v22, %s8758_s28  ;;  %2400 = vrot.lane.b32.xlu0 %v8638_v11, %s8759_s29  ;;  %v2531_v34 = vrot.slane %v2530_v24, 4  ;;  %v2544_v35 = vor.u32 %v2543_v25, %v2540_v19  ;;  %v3108_v36 = vrot.slane %v8112_v21, 5  ;;  %v2553_v39 = vrot.slane %v2551_v30, 4  ;;  %v927_v21 = vld [vmem:[%s8815_s23 + $0x20] sm:$0x1] }
  0x33   : > { %v2559_v40 = vrot.slane %v2557_v31, 5  ;;  %v3111_v41 = vrot.slane %v8113_v26, 5  ;;  %v471_v42 = vshrl.u32 %v377_v27, 16  ;;  %v474_v54 = vshll.u32 %v377_v27, 16  ;;  %v928_v26 = vld [vmem:[%s8815_s23 + $0x24] sm:$0xe] }
  0x34   : > { %v2536_v45 = vsel %vm8846_vm5, %v2531_v34, %v2535_v14  ;;  %v2545_v46 = vrot.slane %v2544_v35, 4  ;;  %v3109_v47 = vsel %vm8808_vm2, %v8159_v32, %v3108_v36  ;;  %v3110_v48 = vrot.slane %v3108_v36, 4  ;;  %v929_v31 = vld [vmem:[%s8815_s23 + $0x28] sm:$0xf]  ;;  %v930_v32 = vld [vmem:[%s8815_s23 + $0x2c] sm:$0x1] }
  0x35   : > { %v8095_v51 = vcombine.low %v2526_v33, %v2536_v45  ;;  %v2554_v52 = vor.u32 %v2553_v39, %v2549_v29  ;;  %v473_v53 = vrot.slane %v471_v42, 4  ;;  %v480_v57 = vshll.u32 %v378_v37, 16  ;;  %v7862_v42 = vld [vmem:[%s8815_s23 + $0x28] sm:$0xf] }
  0x36   : > { %2402 = vrot.lane.b32.xlu1 %v8639_v28, %s8759_s29  ;;  %v2550_v55 = vsel %vm8846_vm5, %v2545_v46, %v2549_v29  ;;  %v3112_v56 = vsel %vm8808_vm2, %v3110_v48, %v3111_v41  ;;  %v484_v58 = vshrl.u32 %v378_v37, 16  ;;  %v476_v61 = vrot.slane %v474_v54, 5  ;;  %v7861_v37 = vld [vmem:[%s8815_s23 + $0x24] sm:$0xf] }
  0x37   : > { %2945 = vrot.lane.b32.xlu0 %v8095_v51, %s8760_s30  ;;  %v2555_v59 = vrot.slane %v2554_v52, 4  ;;  %v8175_v60 = vcombine.low %v3109_v47, %v3112_v56  ;;  %v490_v62 = vshll.u32 %v379_v38, 16  ;;  %v482_v1 = vrot.slane %v480_v57, 5  ;;  %v8656_v48 = vld [vmem:[%s11190_s1] sm:$0xff]  }
  0x38   : > { %v486_v2 = vrot.slane %v484_v58, 4  ;;  %v8160_v3 = vrot.slane %v8114_v44, 9  ;;  %v3115_v4 = vrot.slane %v8115_v49, 5  ;;  %v477_v7 = vor.u32 %v476_v61, %v473_v53  ;;  %8532 = vmatprep.subr.bf16.mxu0 %v8656_v48 }
  0x39   : > { %v2560_v6 = vsel %vm8846_vm5, %v2555_v59, %v2559_v40  ;;  %v492_v8 = vrot.slane %v490_v62, 5  ;;  %v3118_v9 = vrot.slane %v8116_v50, 5  ;;  %v495_v18 = vshrl.u32 %v380_v63, 16  ;;  %v7863_v59 = vld [vmem:[%s8815_s23 + $0x2c] sm:$0x1]  ;;  %8533 = vmatpush3.bf16.msra.mxu0 %v8656_v48 }
  0x3a   : > { %v8096_v11 = vcombine.low %v2550_v55, %v2560_v6  ;;  %v487_v12 = vor.u32 %v486_v2, %v482_v1  ;;  %v3116_v13 = vsel %vm8808_vm2, %v8160_v3, %v3115_v4  ;;  %v3117_v14 = vrot.slane %v3115_v4, 4  ;;  %v7864_v62 = vld [vmem:[%s8815_s23 + $0x30] sm:$0xf]  ;;  %v7865_v4 = vld [vmem:[%s8815_s23 + $0x34] sm:$0xf]  ;;  %v8658_v6 = vld [vmem:[%s11190_s1 + $0x8] sm:$0xff]  }
  0x3b   : > { %3266 = vrot.lane.b32.xlu0 %v8175_v60, %s8761_s6  ;;  %v478_v17 = vrot.slane %v477_v7, 4  ;;  %v498_v19 = vshll.u32 %v380_v63, 16  ;;  %v504_v20 = vshll.u32 %v381_v5, 16  ;;  %v508_v24 = vshrl.u32 %v381_v5, 16  ;;  %v7866_v5 = vld [vmem:[%s8815_s23 + $0x38] sm:$0x1]  ;;  %8534 = vmatprep.subr.bf16.mxu0 %v8658_v6 }
  0x3c   : > { %2947 = vrot.lane.b32.xlu1 %v8096_v11, %s8760_s30  ;;  %v488_v22 = vrot.slane %v487_v12, 4  ;;  %v3119_v23 = vsel %vm8808_vm2, %v3117_v14, %v3118_v9  ;;  %v514_v25 = vshll.u32 %v382_v10, 16  ;;  %v497_v29 = vrot.slane %v495_v18, 4  ;;  %v8640_v9 = vld [vmem:[%s8815_s23 + $0x24] sm:$0xff]  }
  0x3d   : > { %v483_v27 = vsel %vm8846_vm5, %v478_v17, %v482_v1  ;;  %v8176_v28 = vcombine.low %v3116_v13, %v3119_v23  ;;  %v500_v30 = vrot.slane %v498_v19, 5  ;;  %v506_v34 = vrot.slane %v504_v20, 5  ;;  %v7925_v12 = vld [vmem:[%s8815_s23 + $0x24] sm:$0xe]  ;;  %v7926_v17 = vld [vmem:[%s8815_s23 + $0x28] sm:$0xf]  ;;  %8535 = vmatpush3.bf16.msra.mxu0 %v8658_v6 }
  0x3e   : > { %v493_v33 = vsel %vm8846_vm5, %v488_v22, %v492_v8  ;;  %v510_v35 = vrot.slane %v508_v24, 4  ;;  %v516_v36 = vrot.slane %v514_v25, 5  ;;  %v7777_v40 = vrot.slane %v925_v15, 9  ;;  %v7927_v22 = vld [vmem:[%s8815_s23 + $0x2c] sm:$0x1] }
  0x3f   : > { %v7761_v38 = vcombine.low %v483_v27, %v493_v33  ;;  %3268 = vrot.lane.b32.xlu0 %v8176_v28, %s8761_s6  ;;  %v501_v39 = vor.u32 %v500_v30, %v497_v29  ;;  %v1034_v41 = vrot.slane %v926_v16, 5  ;;  %v1037_v45 = vrot.slane %v927_v21, 5  ;;  %v7928_v27 = vld [vmem:[%s8815_s23 + $0x30] sm:$0xe]  ;;  %v8058_v6 = vld [vmem:[%s8815_s23 + $0x44] sm:$0x1] }
  0x40   : > { %v511_v44 = vor.u32 %v510_v35, %v506_v34  ;;  %v7778_v46 = vrot.slane %v928_v26, 9  ;;  %v1041_v47 = vrot.slane %v929_v31, 5  ;;  %v1044_v52 = vrot.slane %v930_v32, 5  ;;  %v7929_v32 = vld [vmem:[%s8815_s23 + $0x34] sm:$0xf] }
  0x41   : > { %858 = vrot.lane.b32.xlu1 %v7761_v38, %s8757_s27  ;;  %v502_v49 = vrot.slane %v501_v39, 4  ;;  %v1035_v50 = vsel %vm8808_vm2, %v7777_v40, %v1034_v41  ;;  %v1036_v51 = vrot.slane %v1034_v41, 4  ;;  %v1518_v56 = vshrl.u32 %v7861_v37, 16  ;;  %v8053_v38 = vld [vmem:[%s8815_s23 + $0x30] sm:$0xf] }
  0x42   : > { %v512_v53 = vrot.slane %v511_v44, 4  ;;  %v1042_v54 = vsel %vm8808_vm2, %v7778_v46, %v1041_v47  ;;  %v1043_v55 = vrot.slane %v1041_v47, 4  ;;  %v1521_v60 = vshll.u32 %v7861_v37, 16  ;;  %v7930_v37 = vld [vmem:[%s8815_s23 + $0x38] sm:$0x1]  ;;  %v8641_v39 = vld [vmem:[%s8815_s23 + $0x30] sm:$0xff]  }
  0x43   : > { %v507_v57 = vsel %vm8846_vm5, %v502_v49, %v506_v34  ;;  %v1038_v58 = vsel %vm8808_vm2, %v1036_v51, %v1037_v45  ;;  %v1527_v61 = vshll.u32 %v7862_v42, 16  ;;  %v1520_v3 = vrot.slane %v1518_v56, 4 }
  0x44   : > { %v517_v63 = vsel %vm8846_vm5, %v512_v53, %v516_v36  ;;  %v7793_v1 = vcombine.low %v1035_v50, %v1038_v58  ;;  %v1045_v2 = vsel %vm8808_vm2, %v1043_v55, %v1044_v52  ;;  %v1523_v10 = vrot.slane %v1521_v60, 5  ;;  %v8054_v52 = vld [vmem:[%s8815_s23 + $0x34] sm:$0xf] }
  0x45   : > { %v7762_v7 = vcombine.low %v507_v57, %v517_v63  ;;  %v7794_v8 = vcombine.low %v1042_v54, %v1045_v2  ;;  %v1529_v11 = vrot.slane %v1527_v61, 5  ;;  %v1531_v13 = vshrl.u32 %v7862_v42, 16  ;;  %v8055_v57 = vld [vmem:[%s8815_s23 + $0x38] sm:$0x1] }
  0x46   : > { %1182 = vrot.lane.b32.xlu0 %v7793_v1, %s8756_s26  ;;  %v1537_v14 = vshll.u32 %v7863_v59, 16  ;;  %v1542_v15 = vshrl.u32 %v7864_v62, 16  ;;  %v1545_v16 = vshll.u32 %v7864_v62, 16  ;;  %v1524_v18 = vor.u32 %v1523_v10, %v1520_v3  ;;  %v8056_v59 = vld [vmem:[%s8815_s23 + $0x3c] sm:$0xf] }
  0x47   : > { %860 = vrot.lane.b32.xlu1 %v7762_v7, %s8757_s27  ;;  %v1551_v19 = vshll.u32 %v7865_v4, 16  ;;  %v1555_v20 = vshrl.u32 %v7865_v4, 16  ;;  %v1561_v21 = vshll.u32 %v7866_v5, 16  ;;  %v1533_v23 = vrot.slane %v1531_v13, 4  ;;  %v8057_v1 = vld [vmem:[%s8815_s23 + $0x40] sm:$0xf] }
  0x48   : > { %v1539_v24 = vrot.slane %v1537_v14, 5  ;;  %v1544_v25 = vrot.slane %v1542_v15, 4  ;;  %v1547_v26 = vrot.slane %v1545_v16, 5  ;;  %v1525_v28 = vrot.slane %v1524_v18, 4  ;;  %v8117_v7 = vld [vmem:[%s8815_s23 + $0x30] sm:$0xe] }
  0x49   : > { %v1553_v29 = vrot.slane %v1551_v19, 5  ;;  %v1557_v30 = vrot.slane %v1555_v20, 4  ;;  %v1563_v31 = vrot.slane %v1561_v21, 5  ;;  %v1534_v33 = vor.u32 %v1533_v23, %v1529_v11  ;;  %v8119_v13 = vld [vmem:[%s8815_s23 + $0x38] sm:$0x1] }
  0x4a   : > { %1360 = vrot.lane.b32.xlu0 %v8640_v9, %s8754_s24  ;;  %v1548_v34 = vor.u32 %v1547_v26, %v1544_v25  ;;  %v7969_v35 = vrot.slane %v7925_v12, 9  ;;  %v2078_v36 = vrot.slane %v7926_v17, 5  ;;  %v1530_v40 = vsel %vm8846_vm5, %v1525_v28, %v1529_v11  ;;  %v8118_v12 = vld [vmem:[%s8815_s23 + $0x34] sm:$0xf]  ;;  %v383_v18 = vld [vmem:[%s8815_s23 + $0x30] sm:$0xf] }
  0x4b   : > { %1184 = vrot.lane.b32.xlu1 %v7794_v8, %s8756_s26  ;;  %v1558_v41 = vor.u32 %v1557_v30, %v1553_v29  ;;  %v2081_v42 = vrot.slane %v7927_v22, 5  ;;  %v7970_v44 = vrot.slane %v7928_v27, 9  ;;  %v1535_v45 = vrot.slane %v1534_v33, 4  ;;  %v8642_v27 = vld [vmem:[%s8815_s23 + $0x30] sm:$0xff]  }
  0x4c   : > { %v1549_v46 = vrot.slane %v1548_v34, 4  ;;  %v2079_v47 = vsel %vm8808_vm2, %v7969_v35, %v2078_v36  ;;  %v2080_v48 = vrot.slane %v2078_v36, 4  ;;  %v2085_v50 = vrot.slane %v7929_v32, 5  ;;  %v384_v36 = vld [vmem:[%s8815_s23 + $0x34] sm:$0xf] }
  0x4d   : > { %v1559_v49 = vrot.slane %v1558_v41, 4  ;;  %v2088_v51 = vrot.slane %v7930_v37, 5  ;;  %v2562_v53 = vshrl.u32 %v8053_v38, 16  ;;  %v1540_v54 = vsel %vm8846_vm5, %v1535_v45, %v1539_v24  ;;  %v8643_v37 = vld [vmem:[%s8815_s23 + $0x3c] sm:$0xff]  }
  0x4e   : > { %v1554_v55 = vsel %vm8846_vm5, %v1549_v46, %v1553_v29  ;;  %v2082_v56 = vsel %vm8808_vm2, %v2080_v48, %v2081_v42  ;;  %v2565_v58 = vshll.u32 %v8053_v38, 16  ;;  %v7905_v60 = vcombine.low %v1530_v40, %v1540_v54  ;;  %v385_v46 = vld [vmem:[%s8815_s23 + $0x38] sm:$0x1] }
  0x4f   : > { %1362 = vrot.lane.b32.xlu1 %v8641_v39, %s8754_s24  ;;  %v1564_v61 = vsel %vm8846_vm5, %v1559_v49, %v1563_v31  ;;  %v7985_v62 = vcombine.low %v2079_v47, %v2082_v56  ;;  %v2086_v63 = vsel %vm8808_vm2, %v7970_v44, %v2085_v50  ;;  %v2087_v3 = vrot.slane %v2085_v50, 4 }
  0x50   : > { %v7906_v2 = vcombine.low %v1554_v55, %v1564_v61  ;;  %v2564_v4 = vrot.slane %v2562_v53, 4  ;;  %v2567_v5 = vrot.slane %v2565_v58, 5  ;;  %1905 = vrot.lane.b32.xlu0 %v7905_v60, %s8758_s28  ;;  %v2571_v8 = vshll.u32 %v8054_v52, 16  ;;  %v8121_v53 = vld [vmem:[%s8815_s23 + $0x40] sm:$0xf] }
  0x51   : > { %v2575_v9 = vshrl.u32 %v8054_v52, 16  ;;  %v2581_v10 = vshll.u32 %v8055_v57, 16  ;;  %v2586_v11 = vshrl.u32 %v8056_v59, 16  ;;  %v2089_v14 = vsel %vm8808_vm2, %v2087_v3, %v2088_v51  ;;  %v8120_v52 = vld [vmem:[%s8815_s23 + $0x3c] sm:$0xe] }
  0x52   : > { %v2568_v15 = vor.u32 %v2567_v5, %v2564_v4  ;;  %v2589_v16 = vshll.u32 %v8056_v59, 16  ;;  %v2595_v17 = vshll.u32 %v8057_v1, 16  ;;  %v7986_v19 = vcombine.low %v2086_v63, %v2089_v14  ;;  %v8122_v58 = vld [vmem:[%s8815_s23 + $0x44] sm:$0x1]  ;;  %v386_v59 = vld [vmem:[%s8815_s23 + $0x3c] sm:$0xf] }
  0x53   : > { %1907 = vrot.lane.b32.xlu1 %v7906_v2, %s8758_s28  ;;  %v2573_v20 = vrot.slane %v2571_v8, 5  ;;  %v2577_v21 = vrot.slane %v2575_v9, 4  ;;  %v2583_v22 = vrot.slane %v2581_v10, 5  ;;  %v2588_v24 = vrot.slane %v2586_v11, 4  ;;  %v931_v11 = vld [vmem:[%s8815_s23 + $0x30] sm:$0xe] }
  0x54   : > { %v2569_v23 = vrot.slane %v2568_v15, 4  ;;  %v2591_v25 = vrot.slane %v2589_v16, 5  ;;  %v2597_v26 = vrot.slane %v2595_v17, 5  ;;  %2226 = vrot.lane.b32.xlu0 %v7985_v62, %s8755_s25  ;;  %v2599_v29 = vshrl.u32 %v8057_v1, 16  ;;  %v387_v1 = vld [vmem:[%s8815_s23 + $0x40] sm:$0xf] }
  0x55   : > { %v2578_v28 = vor.u32 %v2577_v21, %v2573_v20  ;;  %v2605_v30 = vshll.u32 %v8058_v6, 16  ;;  %v8161_v31 = vrot.slane %v8117_v7, 9  ;;  %v3122_v34 = vrot.slane %v8118_v12, 5  ;;  %v388_v6 = vld [vmem:[%s8815_s23 + $0x44] sm:$0x1] }
  0x56   : > { %v2574_v32 = vsel %vm8846_vm5, %v2569_v23, %v2573_v20  ;;  %v2592_v33 = vor.u32 %v2591_v25, %v2588_v24  ;;  %v3125_v35 = vrot.slane %v8119_v13, 5  ;;  %v2601_v39 = vrot.slane %v2599_v29, 4  ;;  %v932_v16 = vld [vmem:[%s8815_s23 + $0x34] sm:$0xf]  ;;  %v933_v17 = vld [vmem:[%s8815_s23 + $0x38] sm:$0x1] }
  0x57   : > { %2228 = vrot.lane.b32.xlu1 %v7986_v19, %s8755_s25  ;;  %v2579_v38 = vrot.slane %v2578_v28, 4  ;;  %v2607_v40 = vrot.slane %v2605_v30, 5  ;;  %v519_v41 = vshrl.u32 %v383_v18, 16  ;;  %v3123_v44 = vsel %vm8808_vm2, %v8161_v31, %v3122_v34  ;;  %v935_v23 = vld [vmem:[%s8815_s23 + $0x40] sm:$0xf] }
  0x58   : > { %v2593_v42 = vrot.slane %v2592_v33, 4  ;;  %v3124_v45 = vrot.slane %v3122_v34, 4  ;;  %v522_v47 = vshll.u32 %v383_v18, 16  ;;  %2404 = vrot.lane.b32.xlu0 %v8642_v27, %s8759_s29  ;;  %v2602_v49 = vor.u32 %v2601_v39, %v2597_v26 }
  0x59   : > { %v2584_v48 = vsel %vm8846_vm5, %v2579_v38, %v2583_v22  ;;  %v521_v50 = vrot.slane %v519_v41, 4  ;;  %v528_v51 = vshll.u32 %v384_v36, 16  ;;  %v532_v63 = vshrl.u32 %v384_v36, 16  ;;  %v934_v22 = vld [vmem:[%s8815_s23 + $0x3c] sm:$0xe] }
  0x5a   : > { %v8097_v54 = vcombine.low %v2574_v32, %v2584_v48  ;;  %v2598_v55 = vsel %vm8846_vm5, %v2593_v42, %v2597_v26  ;;  %v3126_v56 = vsel %vm8808_vm2, %v3124_v45, %v3125_v35  ;;  %v524_v57 = vrot.slane %v522_v47, 5  ;;  %v936_v36 = vld [vmem:[%s8815_s23 + $0x44] sm:$0x1]  ;;  %v7867_v41 = vld [vmem:[%s8815_s23 + $0x3c] sm:$0xf] }
  0x5b   : > { %2406 = vrot.lane.b32.xlu1 %v8643_v37, %s8759_s29  ;;  %v2603_v60 = vrot.slane %v2602_v49, 4  ;;  %v8177_v61 = vcombine.low %v3123_v44, %v3126_v56  ;;  %v530_v62 = vrot.slane %v528_v51, 5  ;;  %v538_v3 = vshll.u32 %v385_v46, 16  ;;  %v7868_v47 = vld [vmem:[%s8815_s23 + $0x40] sm:$0xf] }
  0x5c   : > { %v525_v2 = vor.u32 %v524_v57, %v521_v50  ;;  %v8162_v4 = vrot.slane %v8120_v52, 9  ;;  %v3129_v5 = vrot.slane %v8121_v53, 5  ;;  %2949 = vrot.lane.b32.xlu0 %v8097_v54, %s8760_s30  ;;  %v534_v8 = vrot.slane %v532_v63, 4 }
  0x5d   : > { %v2608_v7 = vsel %vm8846_vm5, %v2603_v60, %v2607_v40  ;;  %v3132_v9 = vrot.slane %v8122_v58, 5  ;;  %v543_v10 = vshrl.u32 %v386_v59, 16  ;;  %v540_v14 = vrot.slane %v538_v3, 5  ;;  %v7869_v58 = vld [vmem:[%s8815_s23 + $0x44] sm:$0x1] }
  0x5e   : > { %v8098_v12 = vcombine.low %v2598_v55, %v2608_v7  ;;  %v526_v13 = vrot.slane %v525_v2, 4  ;;  %v3130_v15 = vsel %vm8808_vm2, %v8162_v4, %v3129_v5  ;;  %v535_v18 = vor.u32 %v534_v8, %v530_v62  ;;  %v7871_v3 = vld [vmem:[%s8815_s23 + $0x4c] sm:$0xf]  ;;  %v7872_v4 = vld [vmem:[%s8815_s23 + $0x50] sm:$0x1]  ;;  %v8644_v7 = vld [vmem:[%s8815_s23 + $0x3c] sm:$0xff]  }
  0x5f   : > { %v3131_v19 = vrot.slane %v3129_v5, 4  ;;  %v545_v20 = vrot.slane %v543_v10, 4  ;;  %v546_v21 = vshll.u32 %v386_v59, 16  ;;  %v552_v25 = vshll.u32 %v387_v1, 16  ;;  %v7931_v10 = vld [vmem:[%s8815_s23 + $0x3c] sm:$0xe] }
  0x60   : > { %2951 = vrot.lane.b32.xlu1 %v8098_v12, %s8760_s30  ;;  %v531_v24 = vsel %vm8846_vm5, %v526_v13, %v530_v62  ;;  %v556_v26 = vshrl.u32 %v387_v1, 16  ;;  %v562_v27 = vshll.u32 %v388_v6, 16  ;;  %3270 = vrot.lane.b32.xlu0 %v8177_v61, %s8761_s6  ;;  %v536_v28 = vrot.slane %v535_v18, 4  ;;  %v7870_v61 = vld [vmem:[%s8815_s23 + $0x48] sm:$0xf] }
  0x61   : > { %v3133_v29 = vsel %vm8808_vm2, %v3131_v19, %v3132_v9  ;;  %v548_v30 = vrot.slane %v546_v21, 5  ;;  %v7779_v31 = vrot.slane %v931_v11, 9  ;;  %v554_v33 = vrot.slane %v552_v25, 5  ;;  %v7934_v25 = vld [vmem:[%s8815_s23 + $0x48] sm:$0xe] }
  0x62   : > { %v8178_v32 = vcombine.low %v3130_v15, %v3133_v29  ;;  %v558_v34 = vrot.slane %v556_v26, 4  ;;  %v564_v35 = vrot.slane %v562_v27, 5  ;;  %v541_v37 = vsel %vm8846_vm5, %v536_v28, %v540_v14  ;;  %v7932_v15 = vld [vmem:[%s8815_s23 + $0x40] sm:$0xf] }
  0x63   : > { %v549_v38 = vor.u32 %v548_v30, %v545_v20  ;;  %v1048_v39 = vrot.slane %v932_v16, 5  ;;  %v1051_v40 = vrot.slane %v933_v17, 5  ;;  %v7763_v42 = vcombine.low %v531_v24, %v541_v37  ;;  %v7933_v20 = vld [vmem:[%s8815_s23 + $0x44] sm:$0x1]  ;;  %v7935_v30 = vld [vmem:[%s8815_s23 + $0x4c] sm:$0xf] }
  0x64   : > { %v559_v44 = vor.u32 %v558_v34, %v554_v33  ;;  %v7780_v45 = vrot.slane %v934_v22, 9  ;;  %v1055_v46 = vrot.slane %v935_v23, 5  ;;  %3272 = vrot.lane.b32.xlu0 %v8178_v32, %s8761_s6  ;;  %v1058_v51 = vrot.slane %v936_v36, 5  ;;  %v8059_v36 = vld [vmem:[%s8815_s23 + $0x48] sm:$0xf] }
  0x65   : > { %v550_v48 = vrot.slane %v549_v38, 4  ;;  %v1049_v49 = vsel %vm8808_vm2, %v7779_v31, %v1048_v39  ;;  %v1050_v50 = vrot.slane %v1048_v39, 4  ;;  %862 = vrot.lane.b32.xlu1 %v7763_v42, %s8757_s27  ;;  %v1566_v55 = vshrl.u32 %v7867_v41, 16  ;;  %v8645_v37 = vld [vmem:[%s8815_s23 + $0x48] sm:$0xff]  }
  0x66   : > { %v560_v52 = vrot.slane %v559_v44, 4  ;;  %v1056_v53 = vsel %vm8808_vm2, %v7780_v45, %v1055_v46  ;;  %v1057_v54 = vrot.slane %v1055_v46, 4  ;;  %v1569_v59 = vshll.u32 %v7867_v41, 16 }
  0x67   : > { %v555_v56 = vsel %vm8846_vm5, %v550_v48, %v554_v33  ;;  %v1052_v57 = vsel %vm8808_vm2, %v1050_v50, %v1051_v40  ;;  %v1575_v60 = vshll.u32 %v7868_v47, 16  ;;  %v1568_v2 = vrot.slane %v1566_v55, 4  ;;  %v8061_v48 = vld [vmem:[%s8815_s23 + $0x50] sm:$0x1] }
  0x68   : > { %v565_v62 = vsel %vm8846_vm5, %v560_v52, %v564_v35  ;;  %v7795_v63 = vcombine.low %v1049_v49, %v1052_v57  ;;  %v1059_v1 = vsel %vm8808_vm2, %v1057_v54, %v1058_v51  ;;  %v1571_v8 = vrot.slane %v1569_v59, 5  ;;  %v7936_v35 = vld [vmem:[%s8815_s23 + $0x50] sm:$0x1] }
  0x69   : > { %v7764_v5 = vcombine.low %v555_v56, %v565_v62  ;;  %v7796_v6 = vcombine.low %v1056_v53, %v1059_v1  ;;  %v1577_v9 = vrot.slane %v1575_v60, 5  ;;  %v1579_v11 = vshrl.u32 %v7868_v47, 16  ;;  %v8060_v47 = vld [vmem:[%s8815_s23 + $0x4c] sm:$0xf]  ;;  %v8062_v53 = vld [vmem:[%s8815_s23 + $0x54] sm:$0xf] }
  0x6a   : > { %1186 = vrot.lane.b32.xlu0 %v7795_v63, %s8756_s26  ;;  %v1585_v12 = vshll.u32 %v7869_v58, 16  ;;  %v1590_v13 = vshrl.u32 %v7870_v61, 16  ;;  %v1593_v14 = vshll.u32 %v7870_v61, 16  ;;  %v1572_v16 = vor.u32 %v1571_v8, %v1568_v2  ;;  %v8063_v58 = vld [vmem:[%s8815_s23 + $0x58] sm:$0xf] }
  0x6b   : > { %864 = vrot.lane.b32.xlu1 %v7764_v5, %s8757_s27  ;;  %v1599_v17 = vshll.u32 %v7871_v3, 16  ;;  %v1603_v18 = vshrl.u32 %v7871_v3, 16  ;;  %v1609_v19 = vshll.u32 %v7872_v4, 16  ;;  %v1581_v21 = vrot.slane %v1579_v11, 4 }
  0x6c   : > { %v1587_v22 = vrot.slane %v1585_v12, 5  ;;  %v1592_v23 = vrot.slane %v1590_v13, 4  ;;  %v1595_v24 = vrot.slane %v1593_v14, 5  ;;  %v1573_v26 = vrot.slane %v1572_v16, 4  ;;  %v8123_v13 = vld [vmem:[%s8815_s23 + $0x48] sm:$0xe] }
  0x6d   : > { %v1601_v27 = vrot.slane %v1599_v17, 5  ;;  %v1605_v28 = vrot.slane %v1603_v18, 4  ;;  %v1611_v29 = vrot.slane %v1609_v19, 5  ;;  %v1582_v31 = vor.u32 %v1581_v21, %v1577_v9  ;;  %v8124_v14 = vld [vmem:[%s8815_s23 + $0x4c] sm:$0xf] }
  0x6e   : > { %1364 = vrot.lane.b32.xlu0 %v8644_v7, %s8754_s24  ;;  %v1596_v32 = vor.u32 %v1595_v24, %v1592_v23  ;;  %v7971_v33 = vrot.slane %v7931_v10, 9  ;;  %v2092_v34 = vrot.slane %v7932_v15, 5  ;;  %v1578_v38 = vsel %vm8846_vm5, %v1573_v26, %v1577_v9  ;;  %v8064_v7 = vld [vmem:[%s8815_s23 + $0x5c] sm:$0x1]  ;;  %v8125_v19 = vld [vmem:[%s8815_s23 + $0x50] sm:$0x1] }
  0x6f   : > { %1188 = vrot.lane.b32.xlu1 %v7796_v6, %s8756_s26  ;;  %v1606_v39 = vor.u32 %v1605_v28, %v1601_v27  ;;  %v2095_v40 = vrot.slane %v7933_v20, 5  ;;  %v7972_v41 = vrot.slane %v7934_v25, 9  ;;  %v1583_v42 = vrot.slane %v1582_v31, 4  ;;  %v389_v24 = vld [vmem:[%s8815_s23 + $0x48] sm:$0xf] }
  0x70   : > { %v1597_v44 = vrot.slane %v1596_v32, 4  ;;  %v2093_v45 = vsel %vm8808_vm2, %v7971_v33, %v2092_v34  ;;  %v2094_v46 = vrot.slane %v2092_v34, 4  ;;  %v2099_v50 = vrot.slane %v7935_v30, 5  ;;  %v8646_v25 = vld [vmem:[%s8815_s23 + $0x48] sm:$0xff]   ;;  %v8647_v30 = vld [vmem:[%s8815_s23 + $0x54] sm:$0xff]  }
  0x71   : > { %v1607_v49 = vrot.slane %v1606_v39, 4  ;;  %v2102_v51 = vrot.slane %v7936_v35, 5  ;;  %v2610_v52 = vshrl.u32 %v8059_v36, 16  ;;  %v1588_v54 = vsel %vm8846_vm5, %v1583_v42, %v1587_v22  ;;  %v390_v35 = vld [vmem:[%s8815_s23 + $0x4c] sm:$0xf] }
  0x72   : > { %v1602_v55 = vsel %vm8846_vm5, %v1597_v44, %v1601_v27  ;;  %v2096_v56 = vsel %vm8808_vm2, %v2094_v46, %v2095_v40  ;;  %v2613_v57 = vshll.u32 %v8059_v36, 16  ;;  %v7907_v59 = vcombine.low %v1578_v38, %v1588_v54  ;;  %v391_v39 = vld [vmem:[%s8815_s23 + $0x50] sm:$0x1]  ;;  %v8127_v42 = vld [vmem:[%s8815_s23 + $0x58] sm:$0xf] }
  0x73   : > { %1366 = vrot.lane.b32.xlu1 %v8645_v37, %s8754_s24  ;;  %v1612_v60 = vsel %vm8846_vm5, %v1607_v49, %v1611_v29  ;;  %v7987_v61 = vcombine.low %v2093_v45, %v2096_v56  ;;  %v2100_v62 = vsel %vm8808_vm2, %v7972_v41, %v2099_v50  ;;  %v2101_v1 = vrot.slane %v2099_v50, 4  ;;  %v8126_v41 = vld [vmem:[%s8815_s23 + $0x54] sm:$0xe] }
  0x74   : > { %v7908_v63 = vcombine.low %v1602_v55, %v1612_v60  ;;  %v2612_v2 = vrot.slane %v2610_v52, 4  ;;  %v2615_v3 = vrot.slane %v2613_v57, 5  ;;  %1909 = vrot.lane.b32.xlu0 %v7907_v59, %s8758_s28  ;;  %v2619_v4 = vshll.u32 %v8060_v47, 16 }
  0x75   : > { %v2623_v5 = vshrl.u32 %v8060_v47, 16  ;;  %v2629_v6 = vshll.u32 %v8061_v48, 16  ;;  %v2634_v8 = vshrl.u32 %v8062_v53, 16  ;;  %v2103_v9 = vsel %vm8808_vm2, %v2101_v1, %v2102_v51  ;;  %v8128_v48 = vld [vmem:[%s8815_s23 + $0x5c] sm:$0x1] }
  0x76   : > { %v2616_v10 = vor.u32 %v2615_v3, %v2612_v2  ;;  %v2637_v11 = vshll.u32 %v8062_v53, 16  ;;  %v2643_v12 = vshll.u32 %v8063_v58, 16  ;;  %v7988_v15 = vcombine.low %v2100_v62, %v2103_v9  ;;  %v392_v53 = vld [vmem:[%s8815_s23 + $0x54] sm:$0xf]  ;;  %v393_v62 = vld [vmem:[%s8815_s23 + $0x58] sm:$0xf] }
  0x77   : > { %1911 = vrot.lane.b32.xlu1 %v7908_v63, %s8758_s28  ;;  %v2621_v16 = vrot.slane %v2619_v4, 5  ;;  %v2625_v17 = vrot.slane %v2623_v5, 4  ;;  %v2631_v18 = vrot.slane %v2629_v6, 5  ;;  %v2636_v21 = vrot.slane %v2634_v8, 4  ;;  %v394_v4 = vld [vmem:[%s8815_s23 + $0x5c] sm:$0x1] }
  0x78   : > { %v2617_v20 = vrot.slane %v2616_v10, 4  ;;  %v2639_v22 = vrot.slane %v2637_v11, 5  ;;  %v2645_v23 = vrot.slane %v2643_v12, 5  ;;  %2230 = vrot.lane.b32.xlu0 %v7987_v61, %s8755_s25  ;;  %v2647_v27 = vshrl.u32 %v8063_v58, 16  ;;  %v937_v9 = vld [vmem:[%s8815_s23 + $0x48] sm:$0xe] }
  0x79   : > { %v2626_v26 = vor.u32 %v2625_v17, %v2621_v16  ;;  %v2653_v28 = vshll.u32 %v8064_v7, 16  ;;  %v8163_v29 = vrot.slane %v8123_v13, 9  ;;  %v3136_v33 = vrot.slane %v8124_v14, 5  ;;  %v938_v14 = vld [vmem:[%s8815_s23 + $0x4c] sm:$0xf] }
  0x7a   : > { %v2622_v31 = vsel %vm8846_vm5, %v2617_v20, %v2621_v16  ;;  %v2640_v32 = vor.u32 %v2639_v22, %v2636_v21  ;;  %v3139_v34 = vrot.slane %v8125_v19, 5  ;;  %v2649_v37 = vrot.slane %v2647_v27, 4  ;;  %v940_v20 = vld [vmem:[%s8815_s23 + $0x54] sm:$0xe]  ;;  %v941_v21 = vld [vmem:[%s8815_s23 + $0x58] sm:$0xf] }
  0x7b   : > { %2232 = vrot.lane.b32.xlu1 %v7988_v15, %s8755_s25  ;;  %v2627_v36 = vrot.slane %v2626_v26, 4  ;;  %v2655_v38 = vrot.slane %v2653_v28, 5  ;;  %v567_v40 = vshrl.u32 %v389_v24, 16  ;;  %v3137_v45 = vsel %vm8808_vm2, %v8163_v29, %v3136_v33  ;;  %v939_v15 = vld [vmem:[%s8815_s23 + $0x50] sm:$0x1] }
  0x7c   : > { %v2641_v44 = vrot.slane %v2640_v32, 4  ;;  %v3138_v46 = vrot.slane %v3136_v33, 4  ;;  %v570_v47 = vshll.u32 %v389_v24, 16  ;;  %2408 = vrot.lane.b32.xlu0 %v8646_v25, %s8759_s29  ;;  %v2650_v50 = vor.u32 %v2649_v37, %v2645_v23  ;;  %v942_v26 = vld [vmem:[%s8815_s23 + $0x5c] sm:$0x1] }
  0x7d   : > { %v2632_v49 = vsel %vm8846_vm5, %v2627_v36, %v2631_v18  ;;  %v569_v51 = vrot.slane %v567_v40, 4  ;;  %v576_v52 = vshll.u32 %v390_v35, 16  ;;  %v580_v61 = vshrl.u32 %v390_v35, 16 }
  0x7e   : > { %v8099_v54 = vcombine.low %v2622_v31, %v2632_v49  ;;  %v2646_v55 = vsel %vm8846_vm5, %v2641_v44, %v2645_v23  ;;  %v3140_v56 = vsel %vm8808_vm2, %v3138_v46, %v3139_v34  ;;  %v572_v57 = vrot.slane %v570_v47, 5 }
  0x7f   : > { %2410 = vrot.lane.b32.xlu1 %v8647_v30, %s8759_s29  ;;  %v2651_v58 = vrot.slane %v2650_v50, 4  ;;  %v8179_v59 = vcombine.low %v3137_v45, %v3140_v56  ;;  %v578_v60 = vrot.slane %v576_v52, 5  ;;  %v586_v1 = vshll.u32 %v391_v39, 16  ;;  %v7873_v39 = vld [vmem:[%s8815_s23 + $0x54] sm:$0xf] }
  0x80   : > { %v573_v63 = vor.u32 %v572_v57, %v569_v51  ;;  %v8164_v2 = vrot.slane %v8126_v41, 9  ;;  %v3143_v3 = vrot.slane %v8127_v42, 5  ;;  %2953 = vrot.lane.b32.xlu0 %v8099_v54, %s8760_s30  ;;  %v582_v6 = vrot.slane %v580_v61, 4  ;;  %v7874_v45 = vld [vmem:[%s8815_s23 + $0x58] sm:$0xf] }
  0x81   : > { %v2656_v5 = vsel %vm8846_vm5, %v2651_v58, %v2655_v38  ;;  %v3146_v7 = vrot.slane %v8128_v48, 5  ;;  %v591_v8 = vshrl.u32 %v392_v53, 16  ;;  %v588_v12 = vrot.slane %v586_v1, 5  ;;  %v7875_v50 = vld [vmem:[%s8815_s23 + $0x5c] sm:$0x1] }
  0x82   : > { %v8100_v10 = vcombine.low %v2646_v55, %v2656_v5  ;;  %v574_v11 = vrot.slane %v573_v63, 4  ;;  %v3144_v13 = vsel %vm8808_vm2, %v8164_v2, %v3143_v3  ;;  %v583_v16 = vor.u32 %v582_v6, %v578_v60  ;;  %v7876_v56 = vld [vmem:[%s8815_s23 + $0x60] sm:$0xf]  ;;  %v7877_v2 = vld [vmem:[%s8815_s23 + $0x64] sm:$0xf] }
  0x83   : > { %v3145_v17 = vrot.slane %v3143_v3, 4  ;;  %v593_v18 = vrot.slane %v591_v8, 4  ;;  %v594_v19 = vshll.u32 %v392_v53, 16  ;;  %v600_v23 = vshll.u32 %v393_v62, 16  ;;  %v7878_v3 = vld [vmem:[%s8815_s23 + $0x68] sm:$0x1] }
  0x84   : > { %2955 = vrot.lane.b32.xlu1 %v8100_v10, %s8760_s30  ;;  %v579_v22 = vsel %vm8846_vm5, %v574_v11, %v578_v60  ;;  %v604_v24 = vshrl.u32 %v393_v62, 16  ;;  %v610_v25 = vshll.u32 %v394_v4, 16  ;;  %3274 = vrot.lane.b32.xlu0 %v8179_v59, %s8761_s6  ;;  %v584_v27 = vrot.slane %v583_v16, 4  ;;  %v9162_v51 = vpop.permute.xlu0 %1356  ;;  %v9178_v4 = vpop.permute.xlu1 %1358  ;;  %v7937_v10 = vld [vmem:[%s8815_s23 + $0x54] sm:$0xe] }
  0x85   : > { %v3147_v28 = vsel %vm8808_vm2, %v3145_v17, %v3146_v7  ;;  %v596_v29 = vrot.slane %v594_v19, 5  ;;  %v7781_v30 = vrot.slane %v937_v9, 9  ;;  %v602_v32 = vrot.slane %v600_v23, 5  ;;  %v8648_v7 = vld [vmem:[%s8815_s23 + $0x54] sm:$0xff]  }
  0x86   : > { %v8180_v31 = vcombine.low %v3144_v13, %v3147_v28  ;;  %v606_v33 = vrot.slane %v604_v24, 4  ;;  %v612_v34 = vrot.slane %v610_v25, 5  ;;  %v589_v35 = vsel %vm8846_vm5, %v584_v27, %v588_v12 }
  0x87   : > { %v597_v36 = vor.u32 %v596_v29, %v593_v18  ;;  %v1062_v37 = vrot.slane %v938_v14, 5  ;;  %v1065_v38 = vrot.slane %v939_v15, 5  ;;  %v7765_v40 = vcombine.low %v579_v22, %v589_v35  ;;  %v7938_v15 = vld [vmem:[%s8815_s23 + $0x58] sm:$0xf] }
  0x88   : > { %v607_v41 = vor.u32 %v606_v33, %v602_v32  ;;  %v7782_v42 = vrot.slane %v940_v20, 9  ;;  %v1069_v44 = vrot.slane %v941_v21, 5  ;;  %3276 = vrot.lane.b32.xlu0 %v8180_v31, %s8761_s6  ;;  %v1072_v49 = vrot.slane %v942_v26, 5  ;;  %v7939_v20 = vld [vmem:[%s8815_s23 + $0x5c] sm:$0x1] }
  0x89   : > { %v598_v46 = vrot.slane %v597_v36, 4  ;;  %v1063_v47 = vsel %vm8808_vm2, %v7781_v30, %v1062_v37  ;;  %v1064_v48 = vrot.slane %v1062_v37, 4  ;;  %866 = vrot.lane.b32.xlu1 %v7765_v40, %s8757_s27  ;;  %v1614_v55 = vshrl.u32 %v7873_v39, 16  ;;  %v7940_v26 = vld [vmem:[%s8815_s23 + $0x60] sm:$0xe] }
  0x8a   : > { %v608_v52 = vrot.slane %v607_v41, 4  ;;  %v1070_v53 = vsel %vm8808_vm2, %v7782_v42, %v1069_v44  ;;  %v1071_v54 = vrot.slane %v1069_v44, 4  ;;  %v1617_v59 = vshll.u32 %v7873_v39, 16  ;;  %v7941_v31 = vld [vmem:[%s8815_s23 + $0x64] sm:$0xf] }
  0x8b   : > { %v603_v57 = vsel %vm8846_vm5, %v598_v46, %v602_v32  ;;  %v1066_v58 = vsel %vm8808_vm2, %v1064_v48, %v1065_v38  ;;  %v1623_v60 = vshll.u32 %v7874_v45, 16  ;;  %v1616_v1 = vrot.slane %v1614_v55, 4  ;;  %v7942_v36 = vld [vmem:[%s8815_s23 + $0x68] sm:$0x1]  ;;  %v8065_v38 = vld [vmem:[%s8815_s23 + $0x60] sm:$0xf] }
  0x8c   : > { %v613_v61 = vsel %vm8846_vm5, %v608_v52, %v612_v34  ;;  %v7797_v62 = vcombine.low %v1063_v47, %v1066_v58  ;;  %v1073_v63 = vsel %vm8808_vm2, %v1071_v54, %v1072_v49  ;;  %v1619_v8 = vrot.slane %v1617_v59, 5  ;;  %v9186_v21 = vpop.permute.xlu0 %2222  ;;  %v8649_v39 = vld [vmem:[%s8815_s23 + $0x60] sm:$0xff]   ;;  %v8068_v52 = vld [vmem:[%s8815_s23 + $0x6c] sm:$0xf] }
  0x8d   : > { %v7766_v5 = vcombine.low %v603_v57, %v613_v61  ;;  %v7798_v6 = vcombine.low %v1070_v53, %v1073_v63  ;;  %v1625_v9 = vrot.slane %v1623_v60, 5  ;;  %v1627_v11 = vshrl.u32 %v7874_v45, 16  ;;  %v9192_v37 = vpop.permute.xlu1 %1178  ;;  %v8066_v49 = vld [vmem:[%s8815_s23 + $0x64] sm:$0xf] }
  0x8e   : > { %1190 = vrot.lane.b32.xlu0 %v7797_v62, %s8756_s26  ;;  %v1633_v12 = vshll.u32 %v7875_v50, 16  ;;  %v1638_v13 = vshrl.u32 %v7876_v56, 16  ;;  %v1641_v14 = vshll.u32 %v7876_v56, 16  ;;  %v1620_v16 = vor.u32 %v1619_v8, %v1616_v1  ;;  %v8067_v50 = vld [vmem:[%s8815_s23 + $0x68] sm:$0x1] }
  0x8f   : > { %868 = vrot.lane.b32.xlu1 %v7766_v5, %s8757_s27  ;;  %v1647_v17 = vshll.u32 %v7877_v2, 16  ;;  %v1651_v18 = vshrl.u32 %v7877_v2, 16  ;;  %v1657_v19 = vshll.u32 %v7878_v3, 16  ;;  %v1629_v22 = vrot.slane %v1627_v11, 4  ;;  %v8069_v3 = vld [vmem:[%s8815_s23 + $0x70] sm:$0xf] }
  0x90   : > { %v1635_v23 = vrot.slane %v1633_v12, 5  ;;  %v1640_v24 = vrot.slane %v1638_v13, 4  ;;  %v1643_v25 = vrot.slane %v1641_v14, 5  ;;  %v1621_v27 = vrot.slane %v1620_v16, 4  ;;  %v8653_v11 = vld [vmem:[%s8815_s23 + $0xc] sm:$0xff]   ;;  %v8657_v12 = vld [vmem:[%s8815_s23 + $0x18] sm:$0xff]  }
  0x91   : > { %v1649_v28 = vrot.slane %v1647_v17, 5  ;;  %v1653_v29 = vrot.slane %v1651_v18, 4  ;;  %v1659_v30 = vrot.slane %v1657_v19, 5  ;;  %v1630_v32 = vor.u32 %v1629_v22, %v1625_v9  ;;  %v8659_v13 = vld [vmem:[%s8815_s23 + $0x24] sm:$0xff]   ;;  %v8665_v14 = vld [vmem:[%s8815_s23 + $0x30] sm:$0xff]   ;;  %356 = vst.msk [vmem:[#allocation2 + $0x8] sm:$0xff] %vm354_vm6, %v8653_v11 }
  0x92   : > { %1368 = vrot.lane.b32.xlu0 %v8648_v7, %s8754_s24  ;;  %v1644_v33 = vor.u32 %v1643_v25, %v1640_v24  ;;  %v7973_v34 = vrot.slane %v7937_v10, 9  ;;  %v2106_v35 = vrot.slane %v7938_v15, 5  ;;  %v1626_v40 = vsel %vm8846_vm5, %v1621_v27, %v1625_v9  ;;  %v8652_v9 = vld [vmem:[%s8815_s23] sm:$0xff]   ;;  %v8070_v19 = vld [vmem:[%s8815_s23 + $0x74] sm:$0x1]  ;;  %357 = vst.msk [vmem:[#allocation2 + $0x10] sm:$0xff] %vm354_vm6, %v8657_v12 }
  0x93   : > { %1192 = vrot.lane.b32.xlu1 %v7798_v6, %s8756_s26  ;;  %v1654_v41 = vor.u32 %v1653_v29, %v1649_v28  ;;  %v2109_v42 = vrot.slane %v7939_v20, 5  ;;  %v7974_v44 = vrot.slane %v7940_v26, 9  ;;  %v1631_v45 = vrot.slane %v1630_v32, 4  ;;  %v9219_v10 = vpop.permute.xlu1 %1180  ;;  %v8666_v15 = vld [vmem:[%s8815_s23 + $0x3c] sm:$0xff]   ;;  %v8672_v29 = vld [vmem:[%s8815_s23 + $0x54] sm:$0xff]   ;;  %355 = vst.msk [vmem:[#allocation2] sm:$0xff] %vm354_vm6, %v8652_v9 }
  0x94   : > { %v1645_v46 = vrot.slane %v1644_v33, 4  ;;  %v2107_v47 = vsel %vm8808_vm2, %v7973_v34, %v2106_v35  ;;  %v2108_v48 = vrot.slane %v2106_v35, 4  ;;  %v2113_v54 = vrot.slane %v7941_v31, 5  ;;  %v9231_v26 = vld [vmem:[%s8815_s23 + $0x60] sm:$0xe]  ;;  %358 = vst.msk [vmem:[#allocation2 + $0x18] sm:$0xff] %vm354_vm6, %v8659_v13 }
  0x95   : > { %v1655_v53 = vrot.slane %v1654_v41, 4  ;;  %v2116_v55 = vrot.slane %v7942_v36, 5  ;;  %v2658_v56 = vshrl.u32 %v8065_v38, 16  ;;  %v9204_v57 = vpop.permute.xlu0 %854  ;;  %v1636_v58 = vsel %vm8846_vm5, %v1631_v45, %v1635_v23  ;;  %v8130_v34 = vld [vmem:[%s8815_s23 + $0x64] sm:$0xf]  ;;  %359 = vst.msk [vmem:[#allocation2 + $0x20] sm:$0xff] %vm354_vm6, %v8665_v14 }
  0x96   : > { %v1650_v59 = vsel %vm8846_vm5, %v1645_v46, %v1649_v28  ;;  %v2110_v60 = vsel %vm8808_vm2, %v2108_v48, %v2109_v42  ;;  %v2661_v61 = vshll.u32 %v8065_v38, 16  ;;  %v7909_v62 = vcombine.low %v1626_v40, %v1636_v58  ;;  %v8671_v28 = vld [vmem:[%s8815_s23 + $0x48] sm:$0xff]   ;;  %v8650_v41 = vld [vmem:[%s8815_s23 + $0x60] sm:$0xff]   ;;  %360 = vst.msk [vmem:[#allocation2 + $0x28] sm:$0xff] %vm354_vm6, %v8666_v15  ;;  %362 = vst.msk [vmem:[#allocation2 + $0x38] sm:$0xff] %vm354_vm6, %v8672_v29 }
  0x97   : > { %1370 = vrot.lane.b32.xlu1 %v8649_v39, %s8754_s24  ;;  %v1660_v63 = vsel %vm8846_vm5, %v1655_v53, %v1659_v30  ;;  %v7989_v1 = vcombine.low %v2107_v47, %v2110_v60  ;;  %v2114_v2 = vsel %vm8808_vm2, %v7974_v44, %v2113_v54  ;;  %v2115_v6 = vrot.slane %v2113_v54, 4  ;;  %v8131_v40 = vld [vmem:[%s8815_s23 + $0x68] sm:$0x1]  ;;  %v395_v46 = vld [vmem:[%s8815_s23 + $0x60] sm:$0xf]  ;;  %v8651_v47 = vld [vmem:[%s8815_s23 + $0x6c] sm:$0xff]  }
  0x98   : > { %v7910_v5 = vcombine.low %v1650_v59, %v1660_v63  ;;  %v2660_v7 = vrot.slane %v2658_v56, 4  ;;  %v2663_v8 = vrot.slane %v2661_v61, 5  ;;  %1913 = vrot.lane.b32.xlu0 %v7909_v62, %s8758_s28  ;;  %v2667_v16 = vshll.u32 %v8066_v49, 16  ;;  %361 = vst.msk [vmem:[#allocation2 + $0x30] sm:$0xff] %vm354_vm6, %v8671_v28  ;;  %v397_v58 = vld [vmem:[%s8815_s23 + $0x68] sm:$0x1] }
  0x99   : > { %v2671_v17 = vshrl.u32 %v8066_v49, 16  ;;  %v2677_v18 = vshll.u32 %v8067_v50, 16  ;;  %v2682_v20 = vshrl.u32 %v8068_v52, 16  ;;  %v2117_v22 = vsel %vm8808_vm2, %v2115_v6, %v2116_v55  ;;  %v396_v50 = vld [vmem:[%s8815_s23 + $0x64] sm:$0xf]  ;;  %903 = vst.msk [vmem:[#allocation2] sm:$0xff] %vm902_vm7, %v9204_v57 }
  0x9a   : > { %v2664_v23 = vor.u32 %v2663_v8, %v2660_v7  ;;  %v2685_v24 = vshll.u32 %v8068_v52, 16  ;;  %v2691_v25 = vshll.u32 %v8069_v3, 16  ;;  %v857_v27 = vpop.permute.xlu0 %856  ;;  %v7990_v30 = vcombine.low %v2114_v2, %v2117_v22  ;;  %v9249_v52 = vpop.permute.xlu1 %2224  ;;  %v8132_v59 = vld [vmem:[%s8815_s23 + $0x6c] sm:$0xe]  ;;  %1227 = vst.msk [vmem:[#allocation2] sm:$0xff] %vm1226_vm8, %v9192_v37 }
  0x9b   : > { %1915 = vrot.lane.b32.xlu1 %v7910_v5, %s8758_s28  ;;  %v2669_v31 = vrot.slane %v2667_v16, 5  ;;  %v2673_v32 = vrot.slane %v2671_v17, 4  ;;  %v2679_v33 = vrot.slane %v2677_v18, 5  ;;  %v2684_v36 = vrot.slane %v2682_v20, 4  ;;  %904 = vst.msk [vmem:[#allocation2 + $0x8] sm:$0xff] %vm902_vm7, %v857_v27 }
  0x9c   : > { %v2665_v35 = vrot.slane %v2664_v23, 4  ;;  %v2687_v38 = vrot.slane %v2685_v24, 5  ;;  %v9237_v39 = vrot.slane %v2691_v25, 5  ;;  %2234 = vrot.lane.b32.xlu0 %v7989_v1, %s8755_s25  ;;  %v2695_v44 = vshrl.u32 %v8069_v3, 16  ;;  %1228 = vst.msk [vmem:[#allocation2 + $0x8] sm:$0xff] %vm1226_vm8, %v9219_v10 }
  0x9d   : > { %v2674_v42 = vor.u32 %v2673_v32, %v2669_v31  ;;  %v2701_v45 = vshll.u32 %v8070_v19, 16  ;;  %v8165_v56 = vrot.slane %v9231_v26, 9  ;;  %v3150_v61 = vrot.slane %v8130_v34, 5  ;;  %v8133_v1 = vld [vmem:[%s8815_s23 + $0x70] sm:$0xf]  ;;  %1405 = vst.msk [vmem:[#allocation2] sm:$0xff] %vm1404_vm9, %v9162_v51 }
  0x9e   : > { %v2670_v48 = vsel %vm8846_vm5, %v2665_v35, %v2669_v31  ;;  %v2688_v49 = vor.u32 %v2687_v38, %v2684_v36  ;;  %v2697_v54 = vrot.slane %v2695_v44, 4  ;;  %v3153_v62 = vrot.slane %v8131_v40, 5  ;;  %v8134_v37 = vld [vmem:[%s8815_s23 + $0x74] sm:$0x1]  ;;  %v398_v11 = vld [vmem:[%s8815_s23 + $0x6c] sm:$0xf] }
  0x9f   : > { %2236 = vrot.lane.b32.xlu1 %v7990_v30, %s8755_s25  ;;  %v2675_v53 = vrot.slane %v2674_v42, 4  ;;  %v2703_v55 = vrot.slane %v2701_v45, 5  ;;  %v615_v63 = vshrl.u32 %v395_v46, 16  ;;  %v618_v5 = vshll.u32 %v395_v46, 16  ;;  %v399_v27 = vld [vmem:[%s8815_s23 + $0x70] sm:$0xf] }
  0xa0   : > { %v2689_v60 = vrot.slane %v2688_v49, 4  ;;  %v9269_v57 = vpop.permute.xlu0 %1901  ;;  %2412 = vrot.lane.b32.xlu0 %v8650_v41, %s8759_s29  ;;  %v2698_v3 = vor.u32 %v2697_v54, %v9237_v39  ;;  %v624_v6 = vshll.u32 %v396_v50, 16  ;;  %v3151_v9 = vsel %vm8808_vm2, %v8165_v56, %v3150_v61  ;;  %v400_v32 = vld [vmem:[%s8815_s23 + $0x74] sm:$0x1]  ;;  %v943_v42 = vld [vmem:[%s8815_s23 + $0x60] sm:$0xe] }
  0xa1   : > { %v2680_v2 = vsel %vm8846_vm5, %v2675_v53, %v2679_v33  ;;  %v3152_v10 = vrot.slane %v3150_v61, 4  ;;  %v617_v13 = vrot.slane %v615_v63, 4  ;;  %v620_v14 = vrot.slane %v618_v5, 5  ;;  %v944_v49 = vld [vmem:[%s8815_s23 + $0x64] sm:$0xf]  ;;  %1406 = vst.msk [vmem:[#allocation2 + $0x8] sm:$0xff] %vm1404_vm9, %v9178_v4 }
  0xa2   : > { %v8101_v7 = vcombine.low %v2670_v48, %v2680_v2  ;;  %v2694_v8 = vsel %vm8846_vm5, %v2689_v60, %v9237_v39  ;;  %v2699_v12 = vrot.slane %v2698_v3, 4  ;;  %v626_v15 = vrot.slane %v624_v6, 5  ;;  %v948_v5 = vld [vmem:[%s8815_s23 + $0x74] sm:$0x1]  ;;  %1950 = vst.msk [vmem:[#allocation2] sm:$0xff] %vm1949_vm10, %v9269_v57 }
  0xa3   : > { %2414 = vrot.lane.b32.xlu1 %v8651_v47, %s8759_s29  ;;  %v3154_v16 = vsel %vm8808_vm2, %v3152_v10, %v3153_v62  ;;  %v628_v17 = vshrl.u32 %v396_v50, 16  ;;  %v634_v18 = vshll.u32 %v397_v58, 16  ;;  %v8166_v19 = vrot.slane %v8132_v59, 9  ;;  %v945_v50 = vld [vmem:[%s8815_s23 + $0x68] sm:$0x1]  ;;  %2271 = vst.msk [vmem:[#allocation2] sm:$0xff] %vm2270_vm11, %v9186_v21 }
  0xa4   : > { %v1904_v20 = vpop.permute.xlu1 %1903  ;;  %v9285_v22 = vpop.permute.xlu0 %2400  ;;  %2957 = vrot.lane.b32.xlu0 %v8101_v7, %s8760_s30  ;;  %v2704_v23 = vsel %vm8846_vm5, %v2699_v12, %v2703_v55  ;;  %v8181_v24 = vcombine.low %v3151_v9, %v3154_v16  ;;  %v621_v25 = vor.u32 %v620_v14, %v617_v13  ;;  %v3157_v26 = vrot.slane %v8133_v1, 5  ;;  %v946_v59 = vld [vmem:[%s8815_s23 + $0x6c] sm:$0xe]  ;;  %v947_v62 = vld [vmem:[%s8815_s23 + $0x70] sm:$0xf]  ;;  %v8677_v14 = vld [vmem:[%s8815_s23 + $0x60] sm:$0xff]  }
  0xa5   : > { %v8102_v28 = vcombine.low %v2694_v8, %v2704_v23  ;;  %v630_v29 = vrot.slane %v628_v17, 4  ;;  %v636_v30 = vrot.slane %v634_v18, 5  ;;  %v3160_v31 = vrot.slane %v8134_v37, 5  ;;  %1951 = vst.msk [vmem:[#allocation2 + $0x8] sm:$0xff] %vm1949_vm10, %v1904_v20  ;;  %v7879_v13 = vld [vmem:[%s8815_s23 + $0x6c] sm:$0xf] }
  0xa6   : > { %v622_v33 = vrot.slane %v621_v25, 4  ;;  %v3158_v34 = vsel %vm8808_vm2, %v8166_v19, %v3157_v26  ;;  %v3159_v35 = vrot.slane %v3157_v26, 4  ;;  %v639_v36 = vshrl.u32 %v398_v11, 16  ;;  %v7880_v16 = vld [vmem:[%s8815_s23 + $0x70] sm:$0xf]  ;;  %2272 = vst.msk [vmem:[#allocation2 + $0x8] sm:$0xff] %vm2270_vm11, %v9249_v52 }
  0xa7   : > { %2959 = vrot.lane.b32.xlu1 %v8102_v28, %s8760_s30  ;;  %v631_v38 = vor.u32 %v630_v29, %v626_v15  ;;  %v642_v39 = vshll.u32 %v398_v11, 16  ;;  %v648_v40 = vshll.u32 %v399_v27, 16  ;;  %v652_v41 = vshrl.u32 %v399_v27, 16  ;;  %v7881_v23 = vld [vmem:[%s8815_s23 + $0x74] sm:$0x1]  ;;  %363 = vst.msk [vmem:[#allocation2 + $0x40] sm:$0xff] %vm354_vm6, %v8677_v14 }
  0xa8   : > { %v2403_v44 = vpop.permute.xlu1 %2402  ;;  %3278 = vrot.lane.b32.xlu0 %v8181_v24, %s8761_s6  ;;  %v627_v45 = vsel %vm8846_vm5, %v622_v33, %v626_v15  ;;  %v3161_v46 = vsel %vm8808_vm2, %v3159_v35, %v3160_v31  ;;  %v641_v47 = vrot.slane %v639_v36, 4  ;;  %v658_v48 = vshll.u32 %v400_v32, 16  ;;  %2449 = vst.msk [vmem:[#allocation2] sm:$0xff] %vm2448_vm12, %v9285_v22  ;;  %v8654_v26 = vld [vmem:[%s8815_s23 + $0x6c] sm:$0xff]   ;;  %v7882_v27 = vld [vmem:[%s8815_s23 + $0x78] sm:$0xf] }
  0xa9   : > { %v2946_v53 = vpop.permute.xlu0 %2945  ;;  %v632_v54 = vrot.slane %v631_v38, 4  ;;  %v8182_v55 = vcombine.low %v3158_v34, %v3161_v46  ;;  %v644_v56 = vrot.slane %v642_v39, 5  ;;  %v650_v58 = vrot.slane %v648_v40, 5  ;;  %2450 = vst.msk [vmem:[#allocation2 + $0x8] sm:$0xff] %vm2448_vm12, %v2403_v44  ;;  %v7883_v31 = vld [vmem:[%s8815_s23 + $0x7c] sm:$0xf] }
  0xaa   : > { %v654_v60 = vrot.slane %v652_v41, 4  ;;  %v660_v61 = vrot.slane %v658_v48, 5  ;;  %v7783_v2 = vrot.slane %v943_v42, 9  ;;  %v1076_v3 = vrot.slane %v944_v49, 5  ;;  %2994 = vst.msk [vmem:[#allocation2] sm:$0xff] %vm2993_vm13, %v2946_v53  ;;  %v8678_v40 = vld [vmem:[%s8815_s23 + $0x6c] sm:$0xff]  }
  0xab   : > { %v637_v63 = vsel %vm8846_vm5, %v632_v54, %v636_v30  ;;  %v645_v1 = vor.u32 %v644_v56, %v641_v47  ;;  %v1079_v7 = vrot.slane %v945_v50, 5  ;;  %v7784_v51 = vrot.slane %v946_v59, 9  ;;  %v7884_v22 = vld [vmem:[%s8815_s23 + $0x80] sm:$0x1]  ;;  %v7943_v39 = vld [vmem:[%s8815_s23 + $0x6c] sm:$0xe] }
  0xac   : > { %v7767_v6 = vcombine.low %v627_v45, %v637_v63  ;;  %3280 = vrot.lane.b32.xlu0 %v8182_v55, %s8761_s6  ;;  %v655_v37 = vor.u32 %v654_v60, %v650_v58  ;;  %v1077_v9 = vsel %vm8808_vm2, %v7783_v2, %v1076_v3  ;;  %v1078_v10 = vrot.slane %v1076_v3, 4  ;;  %v7944_v46 = vld [vmem:[%s8815_s23 + $0x70] sm:$0xf]  ;;  %v7945_v47 = vld [vmem:[%s8815_s23 + $0x74] sm:$0x1]  ;;  %364 = vst.msk [vmem:[#allocation2 + $0x48] sm:$0xff] %vm354_vm6, %v8678_v40 }
  0xad   : > { %v9316_v8 = vpop.permute.xlu0 %3266  ;;  %v646_v4 = vrot.slane %v645_v1, 4  ;;  %v1083_v11 = vrot.slane %v947_v62, 5  ;;  %v1086_v15 = vrot.slane %v948_v5, 5  ;;  %v1662_v21 = vshrl.u32 %v7879_v13, 16  ;;  %v7946_v54 = vld [vmem:[%s8815_s23 + $0x78] sm:$0xe] }
  0xae   : > { %v2948_v12 = vpop.permute.xlu1 %2947  ;;  %870 = vrot.lane.b32.xlu1 %v7767_v6, %s8757_s27  ;;  %v656_v57 = vrot.slane %v655_v37, 4  ;;  %v1080_v18 = vsel %vm8808_vm2, %v1078_v10, %v1079_v7  ;;  %v1665_v29 = vshll.u32 %v7879_v13, 16  ;;  %v1671_v30 = vshll.u32 %v7880_v16, 16  ;;  %v7947_v60 = vld [vmem:[%s8815_s23 + $0x7c] sm:$0xf]  ;;  %3315 = vst.msk [vmem:[#allocation2] sm:$0xff] %vm3314_vm14, %v9316_v8 }
  0xaf   : > { %v651_v17 = vsel %vm8846_vm5, %v646_v4, %v650_v58  ;;  %v1084_v19 = vsel %vm8808_vm2, %v7784_v51, %v1083_v11  ;;  %v1085_v20 = vrot.slane %v1083_v11, 4  ;;  %v7799_v25 = vcombine.low %v1077_v9, %v1080_v18  ;;  %2995 = vst.msk [vmem:[#allocation2 + $0x8] sm:$0xff] %vm2993_vm13, %v2948_v12  ;;  %v8655_v1 = vld [vmem:[%s8815_s23 + $0x78] sm:$0xff]   ;;  %v7948_v37 = vld [vmem:[%s8815_s23 + $0x80] sm:$0x1] }
  0xb0   : > { %v661_v24 = vsel %vm8846_vm5, %v656_v57, %v660_v61  ;;  %v1664_v34 = vrot.slane %v1662_v21, 4  ;;  %v1675_v35 = vshrl.u32 %v7880_v16, 16  ;;  %v1681_v36 = vshll.u32 %v7881_v23, 16  ;;  %v8662_v51 = vld [vmem:[%s11190_s1 + $0x10] ss:$0 sps:$4 sm:$0x33]  }
  0xb1   : > { %v7768_v52 = vcombine.low %v651_v17, %v661_v24  ;;  %v1087_v28 = vsel %vm8808_vm2, %v1085_v20, %v1086_v15  ;;  %v3269_v32 = vpop.permute.xlu0 %3268  ;;  %1194 = vrot.lane.b32.xlu0 %v7799_v25, %s8756_s26  ;;  %v1667_v41 = vrot.slane %v1665_v29, 5  ;;  %v1673_v42 = vrot.slane %v1671_v30, 5  ;;  %v8073_v21 = vld [vmem:[%s8815_s23 + $0x80] sm:$0x1]  ;;  %8612 = vmatprep.subr.msk.bf16.mxu0 %vm3416_vm15, %v8662_v51 }
  0xb2   : > { %v7800_v33 = vcombine.low %v1084_v19, %v1087_v28  ;;  %v1686_v44 = vshrl.u32 %v7882_v27, 16  ;;  %v1689_v45 = vshll.u32 %v7882_v27, 16  ;;  %v1677_v48 = vrot.slane %v1675_v35, 4  ;;  %3316 = vst.msk [vmem:[#allocation2 + $0x8] sm:$0xff] %vm3314_vm14, %v3269_v32  ;;  %v8071_v19 = vld [vmem:[%s8815_s23 + $0x78] sm:$0xf] }
  0xb3   : > { %v859_v38 = vpop.permute.xlu1 %858  ;;  %872 = vrot.lane.b32.xlu1 %v7768_v52, %s8757_s27  ;;  %v1683_v49 = vrot.slane %v1681_v36, 5  ;;  %v1695_v50 = vshll.u32 %v7883_v31, 16  ;;  %v1699_v53 = vshrl.u32 %v7883_v31, 16  ;;  %v1668_v55 = vor.u32 %v1667_v41, %v1664_v34  ;;  %v8074_v31 = vld [vmem:[%s8815_s23 + $0x84] sm:$0xf] }
  0xb4   : > { %905 = vst.msk [vmem:[#allocation2 + $0x10] sm:$0xff] %vm902_vm7, %v859_v38  ;;  %v1688_v56 = vrot.slane %v1686_v44, 4  ;;  %v1691_v58 = vrot.slane %v1689_v45, 5  ;;  %v1705_v59 = vshll.u32 %v7884_v22, 16  ;;  %v1678_v61 = vor.u32 %v1677_v48, %v1673_v42  ;;  %v8075_v22 = vld [vmem:[%s8815_s23 + $0x88] sm:$0xf] }
  0xb5   : > { %1372 = vrot.lane.b32.xlu0 %v8654_v26, %s8754_s24  ;;  %v1697_v62 = vrot.slane %v1695_v50, 5  ;;  %v1701_v63 = vrot.slane %v1699_v53, 4  ;;  %v1669_v2 = vrot.slane %v1668_v55, 4  ;;  %v7975_v6 = vrot.slane %v7943_v39, 9  ;;  %v8072_v26 = vld [vmem:[%s8815_s23 + $0x7c] sm:$0xf] }
  0xb6   : > { %v1692_v3 = vor.u32 %v1691_v58, %v1688_v56  ;;  %v1707_v5 = vrot.slane %v1705_v59, 5  ;;  %v1679_v4 = vrot.slane %v1678_v61, 4  ;;  %v2120_v10 = vrot.slane %v7944_v46, 5  ;;  %v8076_v35 = vld [vmem:[%s8815_s23 + $0x8c] sm:$0x1]  ;;  %v3331_v38 = vld [vmem:[#allocation2] sm:$0xff] }
  0xb7   : > { %1196 = vrot.lane.b32.xlu1 %v7800_v33, %s8756_s26  ;;  %v1702_v9 = vor.u32 %v1701_v63, %v1697_v62  ;;  %v2123_v11 = vrot.slane %v7945_v47, 5  ;;  %v1674_v8 = vsel %vm8846_vm5, %v1669_v2, %v1673_v42  ;;  %v7976_v14 = vrot.slane %v7946_v54, 9  ;;  %8538 = vmatprep.mubr.msk.bf16.mxu0 %vm3367_vm0, %v3331_v38  ;;  %v8135_v48 = vld [vmem:[%s8815_s23 + $0x78] sm:$0xe]  ;;  %v8136_v56 = vld [vmem:[%s8815_s23 + $0x7c] sm:$0xf] }
  0xb8   : > { %v1183_v7 = vpop.permute.xlu0 %1182  ;;  %v1693_v13 = vrot.slane %v1692_v3, 4  ;;  %v2127_v57 = vrot.slane %v7947_v60, 5  ;;  %v1684_v15 = vsel %vm8846_vm5, %v1679_v4, %v1683_v49  ;;  %v2121_v17 = vsel %vm8808_vm2, %v7975_v6, %v2120_v10  ;;  %v8660_v58 = vld [vmem:[%s8815_s23 + $0x78] sm:$0xff]  }
  0xb9   : > { %v861_v12 = vpop.permute.xlu1 %860  ;;  %1229 = vst.msk [vmem:[#allocation2 + $0x10] sm:$0xff] %vm1226_vm8, %v1183_v7  ;;  %v1703_v16 = vrot.slane %v1702_v9, 4  ;;  %v2122_v18 = vrot.slane %v2120_v10, 4  ;;  %v7911_v20 = vcombine.low %v1674_v8, %v1684_v15  ;;  %v2130_v29 = vrot.slane %v7948_v37, 5  ;;  %v3332_v42 = vld [vmem:[#allocation2 + $0x8] sm:$0xff] }
  0xba   : > { %906 = vst.msk [vmem:[#allocation2 + $0x18] sm:$0xff] %vm902_vm7, %v861_v12  ;;  %v1698_v23 = vsel %vm8846_vm5, %v1693_v13, %v1697_v62  ;;  %v2128_v24 = vsel %vm8808_vm2, %v7976_v14, %v2127_v57  ;;  %v2129_v25 = vrot.slane %v2127_v57, 4  ;;  %v3418_v34 = vsel %vm3416_vm15, %v8662_v51, 0  ;;  %v8661_v37 = vld [vmem:[%s8815_s23 + $0x84] sm:$0xff]   ;;  %v401_v10 = vld [vmem:[%s8815_s23 + $0x78] sm:$0xf] }
  0xbb   : > { %1374 = vrot.lane.b32.xlu1 %v8655_v1, %s8754_s24  ;;  %v1708_v52 = vsel %vm8846_vm5, %v1703_v16, %v1707_v5  ;;  %v2124_v28 = vsel %vm8808_vm2, %v2122_v18, %v2123_v11  ;;  %1917 = vrot.lane.b32.xlu0 %v7911_v20, %s8758_s28  ;;  %v2706_v39 = vshrl.u32 %v8071_v19, 16  ;;  %v2709_v40 = vshll.u32 %v8071_v19, 16  ;;  %v8137_v5 = vld [vmem:[%s8815_s23 + $0x80] sm:$0x1]  ;;  %v402_v14 = vld [vmem:[%s8815_s23 + $0x7c] sm:$0xf] }
  0xbc   : > { %v1361_v27 = vpop.permute.xlu0 %1360  ;;  %v7912_v32 = vcombine.low %v1698_v23, %v1708_v52  ;;  %v7991_v33 = vcombine.low %v2121_v17, %v2124_v28  ;;  %v2131_v36 = vsel %vm8808_vm2, %v2129_v25, %v2130_v29  ;;  %8537 = vmatpush3.bf16.msra.mxu0 %v3418_v34  ;;  %v2715_v41 = vshll.u32 %v8072_v26, 16  ;;  %v403_v19 = vld [vmem:[%s8815_s23 + $0x80] sm:$0x1]  ;;  %v8138_v20 = vld [vmem:[%s8815_s23 + $0x84] sm:$0xe] }
  0xbd   : > { %v1185_v30 = vpop.permute.xlu1 %1184  ;;  %1407 = vst.msk [vmem:[#allocation2 + $0x10] sm:$0xff] %vm1404_vm9, %v1361_v27  ;;  %v7992_v44 = vcombine.low %v2128_v24, %v2131_v36  ;;  %v2719_v45 = vshrl.u32 %v8072_v26, 16  ;;  %v2725_v46 = vshll.u32 %v8073_v21, 16  ;;  %v2730_v47 = vshrl.u32 %v8074_v31, 16  ;;  %v8139_v23 = vld [vmem:[%s8815_s23 + $0x88] sm:$0xf] }
  0xbe   : > { %1230 = vst.msk [vmem:[#allocation2 + $0x18] sm:$0xff] %vm1226_vm8, %v1185_v30  ;;  %v2708_v49 = vrot.slane %v2706_v39, 4  ;;  %v2711_v50 = vrot.slane %v2709_v40, 5  ;;  %v2717_v53 = vrot.slane %v2715_v41, 5  ;;  %v2733_v54 = vshll.u32 %v8074_v31, 16  ;;  %v8681_v36 = vld [vmem:[%s8815_s23 + $0x78] sm:$0xff]  }
  0xbf   : > { %1919 = vrot.lane.b32.xlu1 %v7912_v32, %s8758_s28  ;;  %2238 = vrot.lane.b32.xlu0 %v7991_v33, %s8755_s25  ;;  %v2721_v59 = vrot.slane %v2719_v45, 4  ;;  %v2727_v60 = vrot.slane %v2725_v46, 5  ;;  %v2732_v61 = vrot.slane %v2730_v47, 4  ;;  %v2739_v62 = vshll.u32 %v8075_v22, 16  ;;  %v8140_v34 = vld [vmem:[%s8815_s23 + $0x8c] sm:$0x1] }
  0xc0   : > { %8539 = vmatmul.mubr.msk.bf16.vlgmr.msra.gmra.mrb[0].mxu0 %vm3367_vm0, %v3332_v42  ;;  %v2712_v63 = vor.u32 %v2711_v50, %v2708_v49  ;;  %v2735_v1 = vrot.slane %v2733_v54, 5  ;;  %v2743_v2 = vshrl.u32 %v8075_v22, 16  ;;  %v2749_v3 = vshll.u32 %v8076_v35, 16  ;;  %v404_v42 = vld [vmem:[%s8815_s23 + $0x84] sm:$0xf]  ;;  %365 = vst.msk [vmem:[#allocation2 + $0x50] sm:$0xff] %vm354_vm6, %v8681_v36 }
  0xc1   : > { %v1363_v55 = vpop.permute.xlu1 %1362  ;;  %v2722_v7 = vor.u32 %v2721_v59, %v2717_v53  ;;  %v2741_v51 = vrot.slane %v2739_v62, 5  ;;  %v8167_v4 = vrot.slane %v8135_v48, 9  ;;  %v3164_v9 = vrot.slane %v8136_v56, 5  ;;  %v405_v48 = vld [vmem:[%s8815_s23 + $0x88] sm:$0xf] }
  0xc2   : > { %1408 = vst.msk [vmem:[#allocation2 + $0x18] sm:$0xff] %vm1404_vm9, %v1363_v55  ;;  %v1906_v6 = vpop.permute.xlu0 %1905  ;;  %v2713_v11 = vrot.slane %v2712_v63, 4  ;;  %v2736_v12 = vor.u32 %v2735_v1, %v2732_v61  ;;  %v2745_v8 = vrot.slane %v2743_v2, 4  ;;  %v2751_v13 = vrot.slane %v2749_v3, 5  ;;  %v406_v56 = vld [vmem:[%s8815_s23 + $0x8c] sm:$0x1] }
  0xc3   : > { %2240 = vrot.lane.b32.xlu1 %v7992_v44, %s8755_s25  ;;  %1952 = vst.msk [vmem:[#allocation2 + $0x10] sm:$0xff] %vm1949_vm10, %v1906_v6  ;;  %2416 = vrot.lane.b32.xlu0 %v8660_v58, %s8759_s29  ;;  %v2723_v15 = vrot.slane %v2722_v7, 4  ;;  %v3165_v16 = vsel %vm8808_vm2, %v8167_v4, %v3164_v9  ;;  %v3166_v17 = vrot.slane %v3164_v9, 4  ;;  %v3167_v18 = vrot.slane %v8137_v5, 5  ;;  %v949_v62 = vld [vmem:[%s8815_s23 + $0x78] sm:$0xe] }
  0xc4   : > { %v2718_v24 = vsel %vm8846_vm5, %v2713_v11, %v2717_v53  ;;  %v2737_v25 = vrot.slane %v2736_v12, 4  ;;  %v2746_v26 = vor.u32 %v2745_v8, %v2741_v51  ;;  %v663_v21 = vshrl.u32 %v401_v10, 16  ;;  %v8682_v1 = vld [vmem:[%s8815_s23 + $0x84] sm:$0xff]  }
  0xc5   : > { %v1908_v57 = vpop.permute.xlu1 %1907  ;;  %v2728_v52 = vsel %vm8846_vm5, %v2723_v15, %v2727_v60  ;;  %v3168_v28 = vsel %vm8808_vm2, %v3166_v17, %v3167_v18  ;;  %v666_v29 = vshll.u32 %v401_v10, 16  ;;  %v672_v30 = vshll.u32 %v402_v14, 16  ;;  %v951_v10 = vld [vmem:[%s8815_s23 + $0x80] sm:$0x1]  ;;  %366 = vst.msk [vmem:[#allocation2 + $0x58] sm:$0xff] %vm354_vm6, %v8682_v1 }
  0xc6   : > { %1953 = vst.msk [vmem:[#allocation2 + $0x18] sm:$0xff] %vm1949_vm10, %v1908_v57  ;;  %v2227_v27 = vpop.permute.xlu0 %2226  ;;  %v8103_v31 = vcombine.low %v2718_v24, %v2728_v52  ;;  %v2742_v22 = vsel %vm8846_vm5, %v2737_v25, %v2741_v51  ;;  %v2747_v32 = vrot.slane %v2746_v26, 4  ;;  %v8183_v33 = vcombine.low %v3165_v16, %v3168_v28  ;;  %v952_v57 = vld [vmem:[%s8815_s23 + $0x84] sm:$0xe]  ;;  %v953_v15 = vld [vmem:[%s8815_s23 + $0x88] sm:$0xf] }
  0xc7   : > { %2418 = vrot.lane.b32.xlu1 %v8661_v37, %s8759_s29  ;;  %2273 = vst.msk [vmem:[#allocation2 + $0x10] sm:$0xff] %vm2270_vm11, %v2227_v27  ;;  %v665_v38 = vrot.slane %v663_v21, 4  ;;  %v668_v39 = vrot.slane %v666_v29, 5  ;;  %v674_v40 = vrot.slane %v672_v30, 5  ;;  %v676_v41 = vshrl.u32 %v402_v14, 16 }
  0xc8   : > { %2961 = vrot.lane.b32.xlu0 %v8103_v31, %s8760_s30  ;;  %v2752_v44 = vsel %vm8846_vm5, %v2747_v32, %v2751_v13  ;;  %v682_v45 = vshll.u32 %v403_v19, 16  ;;  %v8168_v46 = vrot.slane %v8138_v20, 9  ;;  %v3171_v47 = vrot.slane %v8139_v23, 5  ;;  %v950_v37 = vld [vmem:[%s8815_s23 + $0x7c] sm:$0xf] }
  0xc9   : > { %v2229_v35 = vpop.permute.xlu1 %2228  ;;  %v8104_v50 = vcombine.low %v2742_v22, %v2752_v44  ;;  %v669_v53 = vor.u32 %v668_v39, %v665_v38  ;;  %v678_v54 = vrot.slane %v676_v41, 4  ;;  %v3174_v55 = vrot.slane %v8140_v34, 5  ;;  %v954_v20 = vld [vmem:[%s8815_s23 + $0x8c] sm:$0x1]  ;;  %v7885_v27 = vld [vmem:[%s8815_s23 + $0x84] sm:$0xf] }
  0xca   : > { %2274 = vst.msk [vmem:[#allocation2 + $0x18] sm:$0xff] %vm2270_vm11, %v2229_v35  ;;  %v2405_v49 = vpop.permute.xlu0 %2404  ;;  %v684_v58 = vrot.slane %v682_v45, 5  ;;  %v3172_v59 = vsel %vm8808_vm2, %v8168_v46, %v3171_v47  ;;  %v3173_v60 = vrot.slane %v3171_v47, 4  ;;  %v687_v61 = vshrl.u32 %v404_v42, 16  ;;  %v7886_v31 = vld [vmem:[%s8815_s23 + $0x88] sm:$0xf] }
  0xcb   : > { %2451 = vst.msk [vmem:[#allocation2 + $0x10] sm:$0xff] %vm2448_vm12, %v2405_v49  ;;  %2963 = vrot.lane.b32.xlu1 %v8104_v50, %s8760_s30  ;;  %v670_v2 = vrot.slane %v669_v53, 4  ;;  %v679_v3 = vor.u32 %v678_v54, %v674_v40  ;;  %v690_v5 = vshll.u32 %v404_v42, 16  ;;  %v696_v6 = vshll.u32 %v405_v48, 16  ;;  %v7887_v44 = vld [vmem:[%s8815_s23 + $0x8c] sm:$0x1] }
  0xcc   : > { %3282 = vrot.lane.b32.xlu0 %v8183_v33, %s8761_s6  ;;  %v3175_v7 = vsel %vm8808_vm2, %v3173_v60, %v3174_v55  ;;  %v689_v51 = vrot.slane %v687_v61, 4  ;;  %v700_v4 = vshrl.u32 %v405_v48, 16  ;;  %v706_v9 = vshll.u32 %v406_v56, 16  ;;  %v7888_v47 = vld [vmem:[%s8815_s23 + $0x90] sm:$0xf]  ;;  %v8663_v53 = vld [vmem:[%s8815_s23 + $0x84] sm:$0xff]  }
  0xcd   : > { %v2407_v63 = vpop.permute.xlu1 %2406  ;;  %v675_v12 = vsel %vm8846_vm5, %v670_v2, %v674_v40  ;;  %v680_v8 = vrot.slane %v679_v3, 4  ;;  %v8184_v13 = vcombine.low %v3172_v59, %v3175_v7  ;;  %v692_v14 = vrot.slane %v690_v5, 5  ;;  %v7889_v55 = vld [vmem:[%s8815_s23 + $0x94] sm:$0xf]  ;;  %v7890_v56 = vld [vmem:[%s8815_s23 + $0x98] sm:$0x1] }
  0xce   : > { %2452 = vst.msk [vmem:[#allocation2 + $0x18] sm:$0xff] %vm2448_vm12, %v2407_v63  ;;  %v2950_v11 = vpop.permute.xlu0 %2949  ;;  %v698_v16 = vrot.slane %v696_v6, 5  ;;  %v702_v17 = vrot.slane %v700_v4, 4  ;;  %v708_v18 = vrot.slane %v706_v9, 5  ;;  %v7785_v19 = vrot.slane %v949_v62, 9 }
  0xcf   : > { %2996 = vst.msk [vmem:[#allocation2 + $0x10] sm:$0xff] %vm2993_vm13, %v2950_v11  ;;  %v685_v23 = vsel %vm8846_vm5, %v680_v8, %v684_v58  ;;  %v693_v24 = vor.u32 %v692_v14, %v689_v51  ;;  %v1090_v25 = vrot.slane %v950_v37, 5  ;;  %v1093_v26 = vrot.slane %v951_v10, 5  ;;  %v7949_v1 = vld [vmem:[%s8815_s23 + $0x84] sm:$0xe] }
  0xd0   : > { %v7769_v52 = vcombine.low %v675_v12, %v685_v23  ;;  %3284 = vrot.lane.b32.xlu0 %v8184_v13, %s8761_s6  ;;  %v703_v28 = vor.u32 %v702_v17, %v698_v16  ;;  %v7786_v29 = vrot.slane %v952_v57, 9  ;;  %v1097_v30 = vrot.slane %v953_v15, 5  ;;  %v7950_v2 = vld [vmem:[%s8815_s23 + $0x88] sm:$0xf]  ;;  %v7951_v7 = vld [vmem:[%s8815_s23 + $0x8c] sm:$0x1] }
  0xd1   : > { %v694_v32 = vrot.slane %v693_v24, 4  ;;  %v1091_v33 = vsel %vm8808_vm2, %v7785_v19, %v1090_v25  ;;  %v1092_v34 = vrot.slane %v1090_v25, 4  ;;  %v1100_v35 = vrot.slane %v954_v20, 5  ;;  %v7952_v51 = vld [vmem:[%s8815_s23 + $0x90] sm:$0xe] }
  0xd2   : > { %v2952_v21 = vpop.permute.xlu1 %2951  ;;  %v3271_v22 = vpop.permute.xlu0 %3270  ;;  %874 = vrot.lane.b32.xlu1 %v7769_v52, %s8757_s27  ;;  %v704_v36 = vrot.slane %v703_v28, 4  ;;  %v1098_v38 = vsel %vm8808_vm2, %v7786_v29, %v1097_v30  ;;  %v1099_v39 = vrot.slane %v1097_v30, 4  ;;  %v1710_v40 = vshrl.u32 %v7885_v27, 16  ;;  %v7953_v57 = vld [vmem:[%s8815_s23 + $0x94] sm:$0xf] }
  0xd3   : > { %2997 = vst.msk [vmem:[#allocation2 + $0x18] sm:$0xff] %vm2993_vm13, %v2952_v21  ;;  %v699_v41 = vsel %vm8846_vm5, %v694_v32, %v698_v16  ;;  %v1094_v42 = vsel %vm8808_vm2, %v1092_v34, %v1093_v26  ;;  %v1713_v45 = vshll.u32 %v7885_v27, 16  ;;  %v1719_v46 = vshll.u32 %v7886_v31, 16  ;;  %v9494_v15 = vld [vmem:[%s8815_s23 + $0x98] sm:$0x1]  ;;  %v8664_v28 = vld [vmem:[%s8815_s23 + $0x90] sm:$0xff]  }
  0xd4   : > { %3317 = vst.msk [vmem:[#allocation2 + $0x10] sm:$0xff] %vm3314_vm14, %v3271_v22  ;;  %v709_v48 = vsel %vm8846_vm5, %v704_v36, %v708_v18  ;;  %v7801_v49 = vcombine.low %v1091_v33, %v1094_v42  ;;  %v1101_v50 = vsel %vm8808_vm2, %v1099_v39, %v1100_v35  ;;  %v1712_v54 = vrot.slane %v1710_v40, 4  ;;  %v8077_v17 = vld [vmem:[%s8815_s23 + $0x90] sm:$0xf] }
  0xd5   : > { %v7770_v59 = vcombine.low %v699_v41, %v709_v48  ;;  %v7802_v60 = vcombine.low %v1098_v38, %v1101_v50  ;;  %v1715_v61 = vrot.slane %v1713_v45, 5  ;;  %v9482_v62 = vrot.slane %v1719_v46, 5  ;;  %v8078_v41 = vld [vmem:[%s8815_s23 + $0x94] sm:$0xf] }
  0xd6   : > { %v3273_v58 = vpop.permute.xlu0 %3272  ;;  %1198 = vrot.lane.b32.xlu0 %v7801_v49, %s8756_s26  ;;  %v1723_v3 = vshrl.u32 %v7886_v31, 16  ;;  %v1729_v5 = vshll.u32 %v7887_v44, 16  ;;  %v1734_v6 = vshrl.u32 %v7888_v47, 16  ;;  %v1737_v37 = vshll.u32 %v7888_v47, 16  ;;  %v8079_v49 = vld [vmem:[%s8815_s23 + $0x98] sm:$0x1] }
  0xd7   : > { %v863_v63 = vpop.permute.xlu1 %862  ;;  %3318 = vst.msk [vmem:[#allocation2 + $0x18] sm:$0xff] %vm3314_vm14, %v3273_v58  ;;  %876 = vrot.lane.b32.xlu1 %v7770_v59, %s8757_s27  ;;  %v1716_v4 = vor.u32 %v1715_v61, %v1712_v54  ;;  %v1743_v9 = vshll.u32 %v7889_v55, 16  ;;  %v1747_v10 = vshrl.u32 %v7889_v55, 16  ;;  %v1753_v11 = vshll.u32 %v7890_v56, 16  ;;  %v8081_v59 = vld [vmem:[%s8815_s23 + $0xa0] sm:$0xf] }
  0xd8   : > { %907 = vst.msk [vmem:[#allocation2 + $0x20] sm:$0xff] %vm902_vm7, %v863_v63  ;;  %v1725_v12 = vrot.slane %v1723_v3, 4  ;;  %v1731_v8 = vrot.slane %v1729_v5, 5  ;;  %v1736_v13 = vrot.slane %v1734_v6, 4  ;;  %v1739_v14 = vrot.slane %v1737_v37, 5 }
  0xd9   : > { %v1717_v18 = vrot.slane %v1716_v4, 4  ;;  %v1745_v19 = vrot.slane %v1743_v9, 5  ;;  %v1749_v20 = vrot.slane %v1747_v10, 4  ;;  %v1755_v23 = vrot.slane %v1753_v11, 5  ;;  %v8141_v37 = vld [vmem:[%s8815_s23 + $0x90] sm:$0xe] }
  0xda   : > { %1376 = vrot.lane.b32.xlu0 %v8663_v53, %s8754_s24  ;;  %v1726_v25 = vor.u32 %v1725_v12, %v9482_v62  ;;  %v1740_v26 = vor.u32 %v1739_v14, %v1736_v13  ;;  %v7977_v21 = vrot.slane %v7949_v1, 9  ;;  %v2134_v27 = vrot.slane %v7950_v2, 5  ;;  %v8080_v53 = vld [vmem:[%s8815_s23 + $0x9c] sm:$0xf]  ;;  %v8082_v1 = vld [vmem:[%s8815_s23 + $0xa4] sm:$0x1] }
  0xdb   : > { %v3333_v16 = vld [vmem:[#allocation2 + $0x10] sm:$0xff]  ;;  %1200 = vrot.lane.b32.xlu1 %v7802_v60, %s8756_s26  ;;  %v1722_v29 = vsel %vm8846_vm5, %v1717_v18, %v9482_v62  ;;  %v1750_v30 = vor.u32 %v1749_v20, %v1745_v19  ;;  %v2137_v31 = vrot.slane %v7951_v7, 5  ;;  %v7978_v22 = vrot.slane %v7952_v51, 9  ;;  %v8143_v12 = vld [vmem:[%s8815_s23 + $0x98] sm:$0x1] }
  0xdc   : > { %v1187_v24 = vpop.permute.xlu0 %1186  ;;  %8542 = vmatprep.mubr.msk.bf16.mxu0 %vm3367_vm0, %v3333_v16  ;;  %v1727_v32 = vrot.slane %v1726_v25, 4  ;;  %v1741_v33 = vrot.slane %v1740_v26, 4  ;;  %v2135_v34 = vsel %vm8808_vm2, %v7977_v21, %v2134_v27  ;;  %v2136_v35 = vrot.slane %v2134_v27, 4  ;;  %v8142_v11 = vld [vmem:[%s8815_s23 + $0x94] sm:$0xf]  ;;  %v8668_v25 = vld [vmem:[%s8815_s23 + $0x9c] sm:$0xff]  }
  0xdd   : > { %v865_v52 = vpop.permute.xlu1 %864  ;;  %1231 = vst.msk [vmem:[#allocation2 + $0x20] sm:$0xff] %vm1226_vm8, %v1187_v24  ;;  %v1751_v38 = vrot.slane %v1750_v30, 4  ;;  %v2141_v39 = vrot.slane %v7953_v57, 5  ;;  %v2144_v40 = vrot.slane %v9494_v15, 5  ;;  %v2754_v42 = vshrl.u32 %v8077_v17, 16  ;;  %v8667_v13 = vld [vmem:[%s8815_s23 + $0x90] sm:$0xff]  }
  0xde   : > { %908 = vst.msk [vmem:[#allocation2 + $0x28] sm:$0xff] %vm902_vm7, %v865_v52  ;;  %v3334_v36 = vld [vmem:[#allocation2 + $0x18] sm:$0xff]  ;;  %v1732_v45 = vsel %vm8846_vm5, %v1727_v32, %v1731_v8  ;;  %v1746_v46 = vsel %vm8846_vm5, %v1741_v33, %v1745_v19  ;;  %v2138_v47 = vsel %vm8808_vm2, %v2136_v35, %v2137_v31  ;;  %v2757_v50 = vshll.u32 %v8077_v17, 16  ;;  %v407_v16 = vld [vmem:[%s8815_s23 + $0x90] sm:$0xf] }
  0xdf   : > { %8543 = vmatmul.mubr.msk.bf16.gmra.mrb[4].mxu0 %vm3367_vm0, %v3334_v36  ;;  %1378 = vrot.lane.b32.xlu1 %v8664_v28, %s8754_s24  ;;  %v7913_v54 = vcombine.low %v1722_v29, %v1732_v45  ;;  %v1756_v55 = vsel %vm8846_vm5, %v1751_v38, %v1755_v23  ;;  %v7993_v56 = vcombine.low %v2135_v34, %v2138_v47  ;;  %v2143_v61 = vrot.slane %v2141_v39, 4  ;;  %v408_v23 = vld [vmem:[%s8815_s23 + $0x94] sm:$0xf]  ;;  %v409_v35 = vld [vmem:[%s8815_s23 + $0x98] sm:$0x1] }
  0xe0   : > { %v1365_v44 = vpop.permute.xlu0 %1364  ;;  %v2142_v58 = vsel %vm8808_vm2, %v7978_v22, %v2141_v39  ;;  %v7914_v60 = vcombine.low %v1746_v46, %v1756_v55  ;;  %v2756_v62 = vrot.slane %v2754_v42, 4  ;;  %v2759_v63 = vrot.slane %v2757_v50, 5  ;;  %v8145_v50 = vld [vmem:[%s8815_s23 + $0xa0] sm:$0xf] }
  0xe1   : > { %v1189_v48 = vpop.permute.xlu1 %1188  ;;  %1409 = vst.msk [vmem:[#allocation2 + $0x20] sm:$0xff] %vm1404_vm9, %v1365_v44  ;;  %1921 = vrot.lane.b32.xlu0 %v7913_v54, %s8758_s28  ;;  %v2763_v2 = vshll.u32 %v8078_v41, 16  ;;  %v2767_v3 = vshrl.u32 %v8078_v41, 16  ;;  %v2773_v5 = vshll.u32 %v8079_v49, 16  ;;  %v2778_v6 = vshrl.u32 %v8080_v53, 16  ;;  %v8683_v44 = vld [vmem:[%s8815_s23 + $0x90] sm:$0xff]  }
  0xe2   : > { %1232 = vst.msk [vmem:[#allocation2 + $0x28] sm:$0xff] %vm1226_vm8, %v1189_v48  ;;  %v2145_v7 = vsel %vm8808_vm2, %v2143_v61, %v2144_v40  ;;  %v2760_v51 = vor.u32 %v2759_v63, %v2756_v62  ;;  %v2781_v4 = vshll.u32 %v8080_v53, 16  ;;  %v2787_v9 = vshll.u32 %v8081_v59, 16  ;;  %v8144_v49 = vld [vmem:[%s8815_s23 + $0x9c] sm:$0xe] }
  0xe3   : > { %1923 = vrot.lane.b32.xlu1 %v7914_v60, %s8758_s28  ;;  %v7994_v8 = vcombine.low %v2142_v58, %v2145_v7  ;;  %v2765_v14 = vrot.slane %v2763_v2, 5  ;;  %v2769_v57 = vrot.slane %v2767_v3, 4  ;;  %v2775_v15 = vrot.slane %v2773_v5, 5  ;;  %v8146_v58 = vld [vmem:[%s8815_s23 + $0xa4] sm:$0x1]  ;;  %367 = vst.msk [vmem:[#allocation2 + $0x60] sm:$0xff] %vm354_vm6, %v8683_v44 }
  0xe4   : > { %v2761_v17 = vrot.slane %v2760_v51, 4  ;;  %v2780_v18 = vrot.slane %v2778_v6, 4  ;;  %v2783_v19 = vrot.slane %v2781_v4, 5  ;;  %v9539_v20 = vrot.slane %v2787_v9, 5 }
  0xe5   : > { %v1367_v10 = vpop.permute.xlu1 %1366  ;;  %2242 = vrot.lane.b32.xlu0 %v7993_v56, %s8755_s25  ;;  %v2770_v26 = vor.u32 %v2769_v57, %v2765_v14  ;;  %v2791_v21 = vshrl.u32 %v8081_v59, 16  ;;  %v2797_v27 = vshll.u32 %v8082_v1, 16  ;;  %v8169_v52 = vrot.slane %v8141_v37, 9  ;;  %v410_v59 = vld [vmem:[%s8815_s23 + $0x9c] sm:$0xf] }
  0xe6   : > { %1410 = vst.msk [vmem:[#allocation2 + $0x28] sm:$0xff] %vm1404_vm9, %v1367_v10  ;;  %v1910_v24 = vpop.permute.xlu0 %1909  ;;  %v2766_v28 = vsel %vm8846_vm5, %v2761_v17, %v2765_v14  ;;  %v2784_v29 = vor.u32 %v2783_v19, %v2780_v18  ;;  %v3178_v30 = vrot.slane %v8142_v11, 5  ;;  %v3181_v31 = vrot.slane %v8143_v12, 5  ;;  %v411_v37 = vld [vmem:[%s8815_s23 + $0xa0] sm:$0xf] }
  0xe7   : > { %1954 = vst.msk [vmem:[#allocation2 + $0x20] sm:$0xff] %vm1949_vm10, %v1910_v24  ;;  %2244 = vrot.lane.b32.xlu1 %v7994_v8, %s8755_s25  ;;  %v2771_v32 = vrot.slane %v2770_v26, 4  ;;  %v2793_v33 = vrot.slane %v2791_v21, 4  ;;  %v2799_v34 = vrot.slane %v2797_v27, 5  ;;  %v711_v36 = vshrl.u32 %v407_v16, 16  ;;  %v8684_v12 = vld [vmem:[%s8815_s23 + $0x9c] sm:$0xff]  }
  0xe8   : > { %v2785_v38 = vrot.slane %v2784_v29, 4  ;;  %v3179_v39 = vsel %vm8808_vm2, %v8169_v52, %v3178_v30  ;;  %v3180_v40 = vrot.slane %v3178_v30, 4  ;;  %v714_v41 = vshll.u32 %v407_v16, 16  ;;  %v412_v10 = vld [vmem:[%s8815_s23 + $0xa4] sm:$0x1]  ;;  %368 = vst.msk [vmem:[#allocation2 + $0x68] sm:$0xff] %vm354_vm6, %v8684_v12 }
  0xe9   : > { %v1912_v22 = vpop.permute.xlu1 %1911  ;;  %2420 = vrot.lane.b32.xlu0 %v8667_v13, %s8759_s29  ;;  %v2776_v45 = vsel %vm8846_vm5, %v2771_v32, %v2775_v15  ;;  %v2794_v46 = vor.u32 %v2793_v33, %v9539_v20  ;;  %v713_v47 = vrot.slane %v711_v36, 4  ;;  %v720_v48 = vshll.u32 %v408_v23, 16  ;;  %v955_v15 = vld [vmem:[%s8815_s23 + $0x90] sm:$0xe]  ;;  %v956_v16 = vld [vmem:[%s8815_s23 + $0x94] sm:$0xf] }
  0xea   : > { %1955 = vst.msk [vmem:[#allocation2 + $0x28] sm:$0xff] %vm1949_vm10, %v1912_v22  ;;  %v2231_v42 = vpop.permute.xlu0 %2230  ;;  %v8105_v53 = vcombine.low %v2766_v28, %v2776_v45  ;;  %v2790_v54 = vsel %vm8846_vm5, %v2785_v38, %v9539_v20  ;;  %v3182_v55 = vsel %vm8808_vm2, %v3180_v40, %v3181_v31  ;;  %v716_v56 = vrot.slane %v714_v41, 5  ;;  %v957_v24 = vld [vmem:[%s8815_s23 + $0x98] sm:$0x1]  ;;  %v958_v52 = vld [vmem:[%s8815_s23 + $0x9c] sm:$0xe] }
  0xeb   : > { %2275 = vst.msk [vmem:[#allocation2 + $0x20] sm:$0xff] %vm2270_vm11, %v2231_v42  ;;  %2422 = vrot.lane.b32.xlu1 %v8668_v25, %s8759_s29  ;;  %v2795_v61 = vrot.slane %v2794_v46, 4  ;;  %v8185_v62 = vcombine.low %v3179_v39, %v3182_v55  ;;  %v722_v63 = vrot.slane %v720_v48, 5  ;;  %v724_v1 = vshrl.u32 %v408_v23, 16  ;;  %v959_v32 = vld [vmem:[%s8815_s23 + $0xa0] sm:$0xf] }
  0xec   : > { %v717_v2 = vor.u32 %v716_v56, %v713_v47  ;;  %v730_v3 = vshll.u32 %v409_v35, 16  ;;  %v8170_v5 = vrot.slane %v8144_v49, 9  ;;  %v3185_v6 = vrot.slane %v8145_v50, 5  ;;  %v960_v38 = vld [vmem:[%s8815_s23 + $0xa4] sm:$0x1] }
  0xed   : > { %v2233_v60 = vpop.permute.xlu1 %2232  ;;  %2965 = vrot.lane.b32.xlu0 %v8105_v53, %s8760_s30  ;;  %v2800_v51 = vsel %vm8846_vm5, %v2795_v61, %v2799_v34  ;;  %v726_v4 = vrot.slane %v724_v1, 4  ;;  %v3188_v9 = vrot.slane %v8146_v58, 5  ;;  %v735_v11 = vshrl.u32 %v410_v59, 16  ;;  %v7891_v45 = vld [vmem:[%s8815_s23 + $0x9c] sm:$0xf] }
  0xee   : > { %2276 = vst.msk [vmem:[#allocation2 + $0x28] sm:$0xff] %vm2270_vm11, %v2233_v60  ;;  %v2409_v7 = vpop.permute.xlu0 %2408  ;;  %v8106_v8 = vcombine.low %v2790_v54, %v2800_v51  ;;  %v718_v13 = vrot.slane %v717_v2, 4  ;;  %v732_v14 = vrot.slane %v730_v3, 5  ;;  %v3186_v57 = vsel %vm8808_vm2, %v8170_v5, %v3185_v6  ;;  %v7892_v50 = vld [vmem:[%s8815_s23 + $0xa0] sm:$0xf] }
  0xef   : > { %2453 = vst.msk [vmem:[#allocation2 + $0x20] sm:$0xff] %vm2448_vm12, %v2409_v7  ;;  %v727_v18 = vor.u32 %v726_v4, %v722_v63  ;;  %v3187_v19 = vrot.slane %v3185_v6, 4  ;;  %v737_v20 = vrot.slane %v735_v11, 4  ;;  %v738_v23 = vshll.u32 %v410_v59, 16  ;;  %v7893_v2 = vld [vmem:[%s8815_s23 + $0xa4] sm:$0x1] }
  0xf0   : > { %2967 = vrot.lane.b32.xlu1 %v8106_v8, %s8760_s30  ;;  %v723_v25 = vsel %vm8846_vm5, %v718_v13, %v722_v63  ;;  %v744_v26 = vshll.u32 %v411_v37, 16  ;;  %v748_v21 = vshrl.u32 %v411_v37, 16  ;;  %v754_v27 = vshll.u32 %v412_v10, 16  ;;  %v7894_v6 = vld [vmem:[%s8815_s23 + $0xa8] sm:$0xf]  ;;  %v8669_v4 = vld [vmem:[%s8815_s23 + $0x9c] sm:$0xff]  }
  0xf1   : > { %v2411_v17 = vpop.permute.xlu1 %2410  ;;  %3286 = vrot.lane.b32.xlu0 %v8185_v62, %s8761_s6  ;;  %v728_v29 = vrot.slane %v727_v18, 4  ;;  %v3189_v30 = vsel %vm8808_vm2, %v3187_v19, %v3188_v9  ;;  %v740_v31 = vrot.slane %v738_v23, 5  ;;  %v7787_v22 = vrot.slane %v955_v15, 9  ;;  %v7895_v10 = vld [vmem:[%s8815_s23 + $0xac] sm:$0xf] }
  0xf2   : > { %2454 = vst.msk [vmem:[#allocation2 + $0x28] sm:$0xff] %vm2448_vm12, %v2411_v17  ;;  %v2954_v28 = vpop.permute.xlu0 %2953  ;;  %v8186_v33 = vcombine.low %v3186_v57, %v3189_v30  ;;  %v746_v34 = vrot.slane %v744_v26, 5  ;;  %v750_v35 = vrot.slane %v748_v21, 4  ;;  %v756_v36 = vrot.slane %v754_v27, 5  ;;  %v7896_v11 = vld [vmem:[%s8815_s23 + $0xb0] sm:$0x1] }
  0xf3   : > { %2998 = vst.msk [vmem:[#allocation2 + $0x20] sm:$0xff] %vm2993_vm13, %v2954_v28  ;;  %v733_v39 = vsel %vm8846_vm5, %v728_v29, %v732_v14  ;;  %v741_v40 = vor.u32 %v740_v31, %v737_v20  ;;  %v1104_v41 = vrot.slane %v956_v16, 5  ;;  %v1107_v42 = vrot.slane %v957_v24, 5  ;;  %v7955_v16 = vld [vmem:[%s8815_s23 + $0x9c] sm:$0xe] }
  0xf4   : > { %v7771_v46 = vcombine.low %v723_v25, %v733_v39  ;;  %v751_v47 = vor.u32 %v750_v35, %v746_v34  ;;  %v7788_v48 = vrot.slane %v958_v52, 9  ;;  %v1111_v49 = vrot.slane %v959_v32, 5  ;;  %v7956_v17 = vld [vmem:[%s8815_s23 + $0xa0] sm:$0xf]  ;;  %v7957_v24 = vld [vmem:[%s8815_s23 + $0xa4] sm:$0x1] }
  0xf5   : > { %3288 = vrot.lane.b32.xlu0 %v8186_v33, %s8761_s6  ;;  %v742_v54 = vrot.slane %v741_v40, 4  ;;  %v1105_v55 = vsel %vm8808_vm2, %v7787_v22, %v1104_v41  ;;  %v1106_v56 = vrot.slane %v1104_v41, 4  ;;  %v1114_v58 = vrot.slane %v960_v38, 5  ;;  %v7958_v25 = vld [vmem:[%s8815_s23 + $0xa8] sm:$0xe] }
  0xf6   : > { %v2956_v44 = vpop.permute.xlu1 %2955  ;;  %v3275_v53 = vpop.permute.xlu0 %3274  ;;  %878 = vrot.lane.b32.xlu1 %v7771_v46, %s8757_s27  ;;  %v752_v59 = vrot.slane %v751_v47, 4  ;;  %v1112_v60 = vsel %vm8808_vm2, %v7788_v48, %v1111_v49  ;;  %v1113_v61 = vrot.slane %v1111_v49, 4  ;;  %v1758_v62 = vshrl.u32 %v7891_v45, 16  ;;  %v7959_v22 = vld [vmem:[%s8815_s23 + $0xac] sm:$0xf] }
  0xf7   : > { %2999 = vst.msk [vmem:[#allocation2 + $0x28] sm:$0xff] %vm2993_vm13, %v2956_v44  ;;  %v747_v63 = vsel %vm8846_vm5, %v742_v54, %v746_v34  ;;  %v1108_v1 = vsel %vm8808_vm2, %v1106_v56, %v1107_v42  ;;  %v1761_v3 = vshll.u32 %v7891_v45, 16  ;;  %v1767_v5 = vshll.u32 %v7892_v50, 16  ;;  %v7960_v44 = vld [vmem:[%s8815_s23 + $0xb0] sm:$0x1]  ;;  %v8670_v47 = vld [vmem:[%s8815_s23 + $0xa8] sm:$0xff]  }
  0xf8   : > { %3319 = vst.msk [vmem:[#allocation2 + $0x20] sm:$0xff] %vm3314_vm14, %v3275_v53  ;;  %v757_v37 = vsel %vm8846_vm5, %v752_v59, %v756_v36  ;;  %v7803_v7 = vcombine.low %v1105_v55, %v1108_v1  ;;  %v1115_v51 = vsel %vm8808_vm2, %v1113_v61, %v1114_v58  ;;  %v1760_v9 = vrot.slane %v1758_v62, 4  ;;  %v8083_v46 = vld [vmem:[%s8815_s23 + $0xa8] sm:$0xf]  ;;  %v8084_v59 = vld [vmem:[%s8815_s23 + $0xac] sm:$0xf] }
  0xf9   : > { %v7772_v8 = vcombine.low %v747_v63, %v757_v37  ;;  %v7804_v13 = vcombine.low %v1112_v60, %v1115_v51  ;;  %v1763_v14 = vrot.slane %v1761_v3, 5  ;;  %v9619_v57 = vrot.slane %v1767_v5, 5  ;;  %v8085_v60 = vld [vmem:[%s8815_s23 + $0xb0] sm:$0x1]  ;;  %v8086_v3 = vld [vmem:[%s8815_s23 + $0xb4] sm:$0xf] }
  0xfa   : > { %v3277_v12 = vpop.permute.xlu0 %3276  ;;  %1202 = vrot.lane.b32.xlu0 %v7803_v7, %s8756_s26  ;;  %v1771_v18 = vshrl.u32 %v7892_v50, 16  ;;  %v1777_v19 = vshll.u32 %v7893_v2, 16  ;;  %v1782_v20 = vshrl.u32 %v7894_v6, 16  ;;  %v1785_v23 = vshll.u32 %v7894_v6, 16 }
  0xfb   : > { %v867_v15 = vpop.permute.xlu1 %866  ;;  %3320 = vst.msk [vmem:[#allocation2 + $0x28] sm:$0xff] %vm3314_vm14, %v3277_v12  ;;  %880 = vrot.lane.b32.xlu1 %v7772_v8, %s8757_s27  ;;  %v1764_v26 = vor.u32 %v1763_v14, %v1760_v9  ;;  %v1791_v21 = vshll.u32 %v7895_v10, 16  ;;  %v1795_v27 = vshrl.u32 %v7895_v10, 16  ;;  %v1801_v52 = vshll.u32 %v7896_v11, 16  ;;  %v8087_v8 = vld [vmem:[%s8815_s23 + $0xb8] sm:$0xf] }
  0xfc   : > { %909 = vst.msk [vmem:[#allocation2 + $0x30] sm:$0xff] %vm902_vm7, %v867_v15  ;;  %v1773_v28 = vrot.slane %v1771_v18, 4  ;;  %v1779_v29 = vrot.slane %v1777_v19, 5  ;;  %v1784_v30 = vrot.slane %v1782_v20, 4  ;;  %v1787_v31 = vrot.slane %v1785_v23, 5 }
  0xfd   : > { %v1765_v33 = vrot.slane %v1764_v26, 4  ;;  %v1793_v34 = vrot.slane %v1791_v21, 5  ;;  %v1797_v35 = vrot.slane %v1795_v27, 4  ;;  %v1803_v36 = vrot.slane %v1801_v52, 5 }
  0xfe   : > { %1380 = vrot.lane.b32.xlu0 %v8669_v4, %s8754_s24  ;;  %v1774_v39 = vor.u32 %v1773_v28, %v9619_v57  ;;  %v1788_v40 = vor.u32 %v1787_v31, %v1784_v30  ;;  %v7979_v41 = vrot.slane %v7955_v16, 9  ;;  %v2148_v42 = vrot.slane %v7956_v17, 5  ;;  %v8088_v16 = vld [vmem:[%s8815_s23 + $0xbc] sm:$0x1]  ;;  %v8147_v17 = vld [vmem:[%s8815_s23 + $0xa8] sm:$0xe] }
  0xff   : > { %v3335_v32 = vld [vmem:[#allocation2 + $0x20] sm:$0xff]  ;;  %1204 = vrot.lane.b32.xlu1 %v7804_v13, %s8756_s26  ;;  %v1770_v48 = vsel %vm8846_vm5, %v1765_v33, %v9619_v57  ;;  %v1798_v49 = vor.u32 %v1797_v35, %v1793_v34  ;;  %v2151_v50 = vrot.slane %v7957_v24, 5  ;;  %v7980_v53 = vrot.slane %v7958_v25, 9  ;;  %v8148_v24 = vld [vmem:[%s8815_s23 + $0xac] sm:$0xf] }
 0x100   : > { %v1191_v38 = vpop.permute.xlu0 %1190  ;;  %8546 = vmatprep.mubr.msk.bf16.mxu0 %vm3367_vm0, %v3335_v32  ;;  %v1775_v54 = vrot.slane %v1774_v39, 4  ;;  %v1789_v55 = vrot.slane %v1788_v40, 4  ;;  %v2149_v56 = vsel %vm8808_vm2, %v7979_v41, %v2148_v42  ;;  %v2150_v58 = vrot.slane %v2148_v42, 4  ;;  %v8149_v25 = vld [vmem:[%s8815_s23 + $0xb0] sm:$0x1]  ;;  %v8673_v40 = vld [vmem:[%s8815_s23 + $0xa8] sm:$0xff]  }
 0x101   : > { %v869_v45 = vpop.permute.xlu1 %868  ;;  %1233 = vst.msk [vmem:[#allocation2 + $0x30] sm:$0xff] %vm1226_vm8, %v1191_v38  ;;  %v1799_v62 = vrot.slane %v1798_v49, 4  ;;  %v2155_v63 = vrot.slane %v7959_v22, 5  ;;  %v2158_v1 = vrot.slane %v7960_v44, 5  ;;  %v2802_v2 = vshrl.u32 %v8083_v46, 16 }
 0x102   : > { %910 = vst.msk [vmem:[#allocation2 + $0x38] sm:$0xff] %vm902_vm7, %v869_v45  ;;  %v3336_v61 = vld [vmem:[#allocation2 + $0x28] sm:$0xff]  ;;  %v1780_v6 = vsel %vm8846_vm5, %v1775_v54, %v1779_v29  ;;  %v1794_v37 = vsel %vm8846_vm5, %v1789_v55, %v1793_v34  ;;  %v2152_v7 = vsel %vm8808_vm2, %v2150_v58, %v2151_v50  ;;  %v2805_v4 = vshll.u32 %v8083_v46, 16 }
 0x103   : > { %8547 = vmatmul.mubr.msk.bf16.gmra.mrb[8].mxu0 %vm3367_vm0, %v3336_v61  ;;  %1382 = vrot.lane.b32.xlu1 %v8670_v47, %s8754_s24  ;;  %v7915_v9 = vcombine.low %v1770_v48, %v1780_v6  ;;  %v1804_v10 = vsel %vm8846_vm5, %v1799_v62, %v1803_v36  ;;  %v7995_v11 = vcombine.low %v2149_v56, %v2152_v7  ;;  %v2157_v14 = vrot.slane %v2155_v63, 4  ;;  %v413_v29 = vld [vmem:[%s8815_s23 + $0xa8] sm:$0xf]  ;;  %v414_v38 = vld [vmem:[%s8815_s23 + $0xac] sm:$0xf] }
 0x104   : > { %v1369_v5 = vpop.permute.xlu0 %1368  ;;  %v2156_v12 = vsel %vm8808_vm2, %v7980_v53, %v2155_v63  ;;  %v7916_v13 = vcombine.low %v1794_v37, %v1804_v10  ;;  %v2804_v57 = vrot.slane %v2802_v2, 4  ;;  %v2807_v15 = vrot.slane %v2805_v4, 5  ;;  %v8674_v53 = vld [vmem:[%s8815_s23 + $0xb4] sm:$0xff]   ;;  %v415_v62 = vld [vmem:[%s8815_s23 + $0xb0] sm:$0x1]  ;;  %v8685_v2 = vld [vmem:[%s8815_s23 + $0xa8] sm:$0xff]  }
 0x105   : > { %v1193_v51 = vpop.permute.xlu1 %1192  ;;  %1411 = vst.msk [vmem:[#allocation2 + $0x30] sm:$0xff] %vm1404_vm9, %v1369_v5  ;;  %1925 = vrot.lane.b32.xlu0 %v7915_v9, %s8758_s28  ;;  %v2811_v18 = vshll.u32 %v8084_v59, 16  ;;  %v2815_v19 = vshrl.u32 %v8084_v59, 16  ;;  %v2821_v20 = vshll.u32 %v8085_v60, 16  ;;  %v2826_v23 = vshrl.u32 %v8086_v3, 16 }
 0x106   : > { %1234 = vst.msk [vmem:[#allocation2 + $0x38] sm:$0xff] %vm1226_vm8, %v1193_v51  ;;  %v2159_v26 = vsel %vm8808_vm2, %v2157_v14, %v2158_v1  ;;  %v2808_v21 = vor.u32 %v2807_v15, %v2804_v57  ;;  %v2829_v27 = vshll.u32 %v8086_v3, 16  ;;  %v2835_v52 = vshll.u32 %v8087_v8, 16  ;;  %v8150_v7 = vld [vmem:[%s8815_s23 + $0xb4] sm:$0xe] }
 0x107   : > { %1927 = vrot.lane.b32.xlu1 %v7916_v13, %s8758_s28  ;;  %v7996_v30 = vcombine.low %v2156_v12, %v2159_v26  ;;  %v2813_v31 = vrot.slane %v2811_v18, 5  ;;  %v2817_v22 = vrot.slane %v2815_v19, 4  ;;  %v2823_v32 = vrot.slane %v2821_v20, 5  ;;  %v8151_v51 = vld [vmem:[%s8815_s23 + $0xb8] sm:$0xf]  ;;  %369 = vst.msk [vmem:[#allocation2 + $0x70] sm:$0xff] %vm354_vm6, %v8685_v2 }
 0x108   : > { %v2809_v33 = vrot.slane %v2808_v21, 4  ;;  %v2828_v34 = vrot.slane %v2826_v23, 4  ;;  %v2831_v35 = vrot.slane %v2829_v27, 5  ;;  %v9672_v36 = vrot.slane %v2835_v52, 5  ;;  %v8152_v12 = vld [vmem:[%s8815_s23 + $0xbc] sm:$0x1] }
 0x109   : > { %v1371_v28 = vpop.permute.xlu1 %1370  ;;  %2246 = vrot.lane.b32.xlu0 %v7995_v11, %s8755_s25  ;;  %v2818_v41 = vor.u32 %v2817_v22, %v2813_v31  ;;  %v2839_v42 = vshrl.u32 %v8087_v8, 16  ;;  %v2845_v44 = vshll.u32 %v8088_v16, 16  ;;  %v8171_v45 = vrot.slane %v8147_v17, 9  ;;  %v416_v8 = vld [vmem:[%s8815_s23 + $0xb4] sm:$0xf] }
 0x10a   : > { %1412 = vst.msk [vmem:[#allocation2 + $0x38] sm:$0xff] %vm1404_vm9, %v1371_v28  ;;  %v1914_v39 = vpop.permute.xlu0 %1913  ;;  %v2814_v46 = vsel %vm8846_vm5, %v2809_v33, %v2813_v31  ;;  %v2832_v47 = vor.u32 %v2831_v35, %v2828_v34  ;;  %v3192_v48 = vrot.slane %v8148_v24, 5  ;;  %v3195_v49 = vrot.slane %v8149_v25, 5  ;;  %v417_v17 = vld [vmem:[%s8815_s23 + $0xb8] sm:$0xf] }
 0x10b   : > { %1956 = vst.msk [vmem:[#allocation2 + $0x30] sm:$0xff] %vm1949_vm10, %v1914_v39  ;;  %2248 = vrot.lane.b32.xlu1 %v7996_v30, %s8755_s25  ;;  %v2819_v54 = vrot.slane %v2818_v41, 4  ;;  %v2841_v55 = vrot.slane %v2839_v42, 4  ;;  %v2847_v56 = vrot.slane %v2845_v44, 5  ;;  %v759_v58 = vshrl.u32 %v413_v29, 16 }
 0x10c   : > { %v2833_v59 = vrot.slane %v2832_v47, 4  ;;  %v9685_v60 = vsel %vm8808_vm2, %v8171_v45, %v3192_v48  ;;  %v3194_v61 = vrot.slane %v3192_v48, 4  ;;  %v762_v63 = vshll.u32 %v413_v29, 16  ;;  %v418_v24 = vld [vmem:[%s8815_s23 + $0xbc] sm:$0x1]  ;;  %v8686_v29 = vld [vmem:[%s8815_s23 + $0xb4] sm:$0xff]  }
 0x10d   : > { %v1916_v50 = vpop.permute.xlu1 %1915  ;;  %2424 = vrot.lane.b32.xlu0 %v8673_v40, %s8759_s29  ;;  %v2824_v3 = vsel %vm8846_vm5, %v2819_v54, %v2823_v32  ;;  %v2842_v5 = vor.u32 %v2841_v55, %v9672_v36  ;;  %v761_v6 = vrot.slane %v759_v58, 4  ;;  %v768_v37 = vshll.u32 %v414_v38, 16  ;;  %v961_v28 = vld [vmem:[%s8815_s23 + $0xa8] sm:$0xe]  ;;  %v962_v33 = vld [vmem:[%s8815_s23 + $0xac] sm:$0xf] }
 0x10e   : > { %1957 = vst.msk [vmem:[#allocation2 + $0x38] sm:$0xff] %vm1949_vm10, %v1916_v50  ;;  %v2235_v1 = vpop.permute.xlu0 %2234  ;;  %v8107_v4 = vcombine.low %v2814_v46, %v2824_v3  ;;  %v2838_v9 = vsel %vm8846_vm5, %v2833_v59, %v9672_v36  ;;  %v3196_v10 = vsel %vm8808_vm2, %v3194_v61, %v3195_v49  ;;  %v764_v11 = vrot.slane %v762_v63, 5  ;;  %v963_v34 = vld [vmem:[%s8815_s23 + $0xb0] sm:$0x1]  ;;  %v964_v41 = vld [vmem:[%s8815_s23 + $0xb4] sm:$0xe] }
 0x10f   : > { %2277 = vst.msk [vmem:[#allocation2 + $0x30] sm:$0xff] %vm2270_vm11, %v2235_v1  ;;  %2426 = vrot.lane.b32.xlu1 %v8674_v53, %s8759_s29  ;;  %v2843_v14 = vrot.slane %v2842_v5, 4  ;;  %v8187_v57 = vcombine.low %v9685_v60, %v3196_v10  ;;  %v770_v15 = vrot.slane %v768_v37, 5  ;;  %v772_v16 = vshrl.u32 %v414_v38, 16  ;;  %v965_v42 = vld [vmem:[%s8815_s23 + $0xb8] sm:$0xf] }
 0x110   : > { %v765_v18 = vor.u32 %v764_v11, %v761_v6  ;;  %v778_v19 = vshll.u32 %v415_v62, 16  ;;  %v8172_v20 = vrot.slane %v8150_v7, 9  ;;  %v3199_v23 = vrot.slane %v8151_v51, 5  ;;  %370 = vst.msk [vmem:[#allocation2 + $0x78] sm:$0xff] %vm354_vm6, %v8686_v29  ;;  %v966_v48 = vld [vmem:[%s8815_s23 + $0xbc] sm:$0x1] }
 0x111   : > { %v2237_v13 = vpop.permute.xlu1 %2236  ;;  %2969 = vrot.lane.b32.xlu0 %v8107_v4, %s8760_s30  ;;  %v2848_v26 = vsel %vm8846_vm5, %v2843_v14, %v2847_v56  ;;  %v774_v21 = vrot.slane %v772_v16, 4  ;;  %v3202_v27 = vrot.slane %v8152_v12, 5  ;;  %v783_v52 = vshrl.u32 %v416_v8, 16  ;;  %v7897_v56 = vld [vmem:[%s8815_s23 + $0xb4] sm:$0xf] }
 0x112   : > { %2278 = vst.msk [vmem:[#allocation2 + $0x38] sm:$0xff] %vm2270_vm11, %v2237_v13  ;;  %v2413_v25 = vpop.permute.xlu0 %2412  ;;  %v8108_v30 = vcombine.low %v2838_v9, %v2848_v26  ;;  %v766_v31 = vrot.slane %v765_v18, 4  ;;  %v780_v22 = vrot.slane %v778_v19, 5  ;;  %v3200_v32 = vsel %vm8808_vm2, %v8172_v20, %v3199_v23  ;;  %v7898_v62 = vld [vmem:[%s8815_s23 + $0xb8] sm:$0xf] }
 0x113   : > { %2455 = vst.msk [vmem:[#allocation2 + $0x30] sm:$0xff] %vm2448_vm12, %v2413_v25  ;;  %v775_v36 = vor.u32 %v774_v21, %v770_v15  ;;  %v3201_v38 = vrot.slane %v3199_v23, 4  ;;  %v785_v39 = vrot.slane %v783_v52, 4  ;;  %v786_v40 = vshll.u32 %v416_v8, 16  ;;  %v7899_v8 = vld [vmem:[%s8815_s23 + $0xbc] sm:$0x1] }
 0x114   : > { %2971 = vrot.lane.b32.xlu1 %v8108_v30, %s8760_s30  ;;  %v771_v44 = vsel %vm8846_vm5, %v766_v31, %v770_v15  ;;  %v792_v45 = vshll.u32 %v417_v17, 16  ;;  %v796_v46 = vshrl.u32 %v417_v17, 16  ;;  %v802_v47 = vshll.u32 %v418_v24, 16  ;;  %v7900_v13 = vld [vmem:[%s8815_s23 + $0xc0] sm:$0xf] }
 0x115   : > { %v2415_v35 = vpop.permute.xlu1 %2414  ;;  %3290 = vrot.lane.b32.xlu0 %v8187_v57, %s8761_s6  ;;  %v776_v50 = vrot.slane %v775_v36, 4  ;;  %v3203_v53 = vsel %vm8808_vm2, %v3201_v38, %v3202_v27  ;;  %v788_v54 = vrot.slane %v786_v40, 5  ;;  %v7789_v55 = vrot.slane %v961_v28, 9  ;;  %v7901_v17 = vld [vmem:[%s8815_s23 + $0xc4] sm:$0xf]  ;;  %v8675_v27 = vld [vmem:[%s8815_s23 + $0xb4] sm:$0xff]  }
 0x116   : > { %2456 = vst.msk [vmem:[#allocation2 + $0x38] sm:$0xff] %vm2448_vm12, %v2415_v35  ;;  %v2958_v49 = vpop.permute.xlu0 %2957  ;;  %v8188_v58 = vcombine.low %v3200_v32, %v3203_v53  ;;  %v794_v59 = vrot.slane %v792_v45, 5  ;;  %v798_v60 = vrot.slane %v796_v46, 4  ;;  %v804_v61 = vrot.slane %v802_v47, 5  ;;  %v7902_v18 = vld [vmem:[%s8815_s23 + $0xc8] sm:$0x1] }
 0x117   : > { %3000 = vst.msk [vmem:[#allocation2 + $0x30] sm:$0xff] %vm2993_vm13, %v2958_v49  ;;  %v781_v63 = vsel %vm8846_vm5, %v776_v50, %v780_v22  ;;  %v789_v1 = vor.u32 %v788_v54, %v785_v39  ;;  %v1118_v2 = vrot.slane %v962_v33, 5  ;;  %v1121_v3 = vrot.slane %v963_v34, 5  ;;  %v7961_v32 = vld [vmem:[%s8815_s23 + $0xb4] sm:$0xe] }
 0x118   : > { %v7773_v6 = vcombine.low %v771_v44, %v781_v63  ;;  %v799_v37 = vor.u32 %v798_v60, %v794_v59  ;;  %v7790_v7 = vrot.slane %v964_v41, 9  ;;  %v1125_v51 = vrot.slane %v965_v42, 5  ;;  %v7962_v33 = vld [vmem:[%s8815_s23 + $0xb8] sm:$0xf]  ;;  %v7963_v40 = vld [vmem:[%s8815_s23 + $0xbc] sm:$0x1] }
 0x119   : > { %v2960_v5 = vpop.permute.xlu1 %2959  ;;  %3292 = vrot.lane.b32.xlu0 %v8188_v58, %s8761_s6  ;;  %v790_v9 = vrot.slane %v789_v1, 4  ;;  %v1119_v10 = vsel %vm8808_vm2, %v7789_v55, %v1118_v2  ;;  %v1120_v11 = vrot.slane %v1118_v2, 4  ;;  %v1128_v12 = vrot.slane %v966_v48, 5  ;;  %v7964_v46 = vld [vmem:[%s8815_s23 + $0xc0] sm:$0xe] }
 0x11a   : > { %3001 = vst.msk [vmem:[#allocation2 + $0x38] sm:$0xff] %vm2993_vm13, %v2960_v5  ;;  %v3279_v4 = vpop.permute.xlu0 %3278  ;;  %882 = vrot.lane.b32.xlu1 %v7773_v6, %s8757_s27  ;;  %v800_v14 = vrot.slane %v799_v37, 4  ;;  %v1126_v57 = vsel %vm8808_vm2, %v7790_v7, %v1125_v51  ;;  %v1127_v15 = vrot.slane %v1125_v51, 4  ;;  %v1806_v16 = vshrl.u32 %v7897_v56, 16  ;;  %v7966_v1 = vld [vmem:[%s8815_s23 + $0xc8] sm:$0x1] }
 0x11b   : > { %3321 = vst.msk [vmem:[#allocation2 + $0x30] sm:$0xff] %vm3314_vm14, %v3279_v4  ;;  %v795_v19 = vsel %vm8846_vm5, %v790_v9, %v794_v59  ;;  %v1122_v20 = vsel %vm8808_vm2, %v1120_v11, %v1121_v3  ;;  %v1809_v23 = vshll.u32 %v7897_v56, 16  ;;  %v1815_v24 = vshll.u32 %v7898_v62, 16  ;;  %v7965_v59 = vld [vmem:[%s8815_s23 + $0xc4] sm:$0xf] }
 0x11c   : > { %v805_v25 = vsel %vm8846_vm5, %v800_v14, %v804_v61  ;;  %v7805_v26 = vcombine.low %v1119_v10, %v1122_v20  ;;  %v1129_v21 = vsel %vm8808_vm2, %v1127_v15, %v1128_v12  ;;  %v1808_v52 = vrot.slane %v1806_v16, 4  ;;  %v8089_v3 = vld [vmem:[%s8815_s23 + $0xc0] sm:$0xf]  ;;  %v8090_v15 = vld [vmem:[%s8815_s23 + $0xc4] sm:$0xf] }
 0x11d   : > { %v7774_v29 = vcombine.low %v795_v19, %v805_v25  ;;  %v7806_v30 = vcombine.low %v1126_v57, %v1129_v21  ;;  %v1811_v31 = vrot.slane %v1809_v23, 5  ;;  %v9756_v22 = vrot.slane %v1815_v24, 5  ;;  %v8676_v5 = vld [vmem:[%s8815_s23 + $0xc0] sm:$0xff]   ;;  %v8091_v20 = vld [vmem:[%s8815_s23 + $0xc8] sm:$0x1] }
 0x11e   : > { %v3281_v28 = vpop.permute.xlu0 %3280  ;;  %1206 = vrot.lane.b32.xlu0 %v7805_v26, %s8756_s26  ;;  %v1819_v34 = vshrl.u32 %v7898_v62, 16  ;;  %v1825_v35 = vshll.u32 %v7899_v8, 16  ;;  %v1830_v36 = vshrl.u32 %v7900_v13, 16  ;;  %v1833_v38 = vshll.u32 %v7900_v13, 16  ;;  %v8092_v24 = vld [vmem:[%s8815_s23 + $0xcc] sm:$0xf] }
 0x11f   : > { %3322 = vst.msk [vmem:[#allocation2 + $0x38] sm:$0xff] %vm3314_vm14, %v3281_v28  ;;  %884 = vrot.lane.b32.xlu1 %v7774_v29, %s8757_s27  ;;  %v1812_v41 = vor.u32 %v1811_v31, %v1808_v52  ;;  %v1839_v42 = vshll.u32 %v7901_v17, 16  ;;  %v1843_v44 = vshrl.u32 %v7901_v17, 16  ;;  %v1849_v45 = vshll.u32 %v7902_v18, 16  ;;  %v8093_v29 = vld [vmem:[%s8815_s23 + $0xd0] sm:$0xf] }
 0x120   : > { %v871_v39 = vpop.permute.xlu1 %870  ;;  %v1821_v47 = vrot.slane %v1819_v34, 4  ;;  %v1827_v48 = vrot.slane %v1825_v35, 5  ;;  %v1832_v49 = vrot.slane %v1830_v36, 4  ;;  %v1835_v50 = vrot.slane %v1833_v38, 5 }
 0x121   : > { %911 = vst.msk [vmem:[#allocation2 + $0x40] sm:$0xff] %vm902_vm7, %v871_v39  ;;  %v1813_v54 = vrot.slane %v1812_v41, 4  ;;  %v1841_v55 = vrot.slane %v1839_v42, 5  ;;  %v1845_v56 = vrot.slane %v1843_v44, 4  ;;  %v1851_v58 = vrot.slane %v1849_v45, 5 }
 0x122   : > { %v3337_v53 = vld [vmem:[#allocation2 + $0x30] sm:$0xff]  ;;  %1384 = vrot.lane.b32.xlu0 %v8675_v27, %s8754_s24  ;;  %v1822_v60 = vor.u32 %v1821_v47, %v9756_v22  ;;  %v1836_v61 = vor.u32 %v1835_v50, %v1832_v49  ;;  %v7981_v62 = vrot.slane %v7961_v32, 9  ;;  %v2162_v63 = vrot.slane %v7962_v33, 5  ;;  %v8153_v44 = vld [vmem:[%s8815_s23 + $0xc0] sm:$0xe] }
 0x123   : > { %8550 = vmatprep.mubr.msk.bf16.mxu0 %vm3367_vm0, %v3337_v53  ;;  %v1195_v2 = vpop.permute.xlu0 %1194  ;;  %1208 = vrot.lane.b32.xlu1 %v7806_v30, %s8756_s26  ;;  %v1818_v6 = vsel %vm8846_vm5, %v1813_v54, %v9756_v22  ;;  %v1846_v37 = vor.u32 %v1845_v56, %v1841_v55  ;;  %v2165_v7 = vrot.slane %v7963_v40, 5  ;;  %v7982_v51 = vrot.slane %v7964_v46, 9  ;;  %v8094_v40 = vld [vmem:[%s8815_s23 + $0xd4] sm:$0x1]  ;;  %v8154_v49 = vld [vmem:[%s8815_s23 + $0xc4] sm:$0xf] }
 0x124   : > { %1235 = vst.msk [vmem:[#allocation2 + $0x40] sm:$0xff] %vm1226_vm8, %v1195_v2  ;;  %v1823_v9 = vrot.slane %v1822_v60, 4  ;;  %v1837_v10 = vrot.slane %v1836_v61, 4  ;;  %v2163_v11 = vsel %vm8808_vm2, %v7981_v62, %v2162_v63  ;;  %v2164_v12 = vrot.slane %v2162_v63, 4  ;;  %v8155_v50 = vld [vmem:[%s8815_s23 + $0xc8] sm:$0x1] }
 0x125   : > { %v873_v4 = vpop.permute.xlu1 %872  ;;  %v1847_v13 = vrot.slane %v1846_v37, 4  ;;  %v2169_v14 = vrot.slane %v7965_v59, 5  ;;  %v2172_v57 = vrot.slane %v7966_v1, 5  ;;  %v2850_v16 = vshrl.u32 %v8089_v3, 16  ;;  %v8679_v59 = vld [vmem:[%s8815_s23 + $0xc0] sm:$0xff]  }
 0x126   : > { %912 = vst.msk [vmem:[#allocation2 + $0x48] sm:$0xff] %vm902_vm7, %v873_v4  ;;  %v3338_v8 = vld [vmem:[#allocation2 + $0x38] sm:$0xff]  ;;  %v1828_v17 = vsel %vm8846_vm5, %v1823_v9, %v1827_v48  ;;  %v1842_v18 = vsel %vm8846_vm5, %v1837_v10, %v1841_v55  ;;  %v2166_v19 = vsel %vm8808_vm2, %v2164_v12, %v2165_v7  ;;  %v2853_v23 = vshll.u32 %v8089_v3, 16  ;;  %v9816_v1 = vld [vmem:[%s8815_s23 + $0xd0] sm:$0xf] }
 0x127   : > { %8551 = vmatmul.mubr.msk.bf16.gmra.mrb[12].mxu0 %vm3367_vm0, %v3338_v8  ;;  %v1373_v25 = vpop.permute.xlu0 %1372  ;;  %1386 = vrot.lane.b32.xlu1 %v8676_v5, %s8754_s24  ;;  %v7917_v26 = vcombine.low %v1818_v6, %v1828_v17  ;;  %v1852_v21 = vsel %vm8846_vm5, %v1847_v13, %v1851_v58  ;;  %v7997_v27 = vcombine.low %v2163_v11, %v2166_v19  ;;  %v2171_v31 = vrot.slane %v2169_v14, 4  ;;  %v9809_v58 = vld [vmem:[%s8815_s23 + $0xcc] sm:$0xe]  ;;  %v9819_v7 = vld [vmem:[%s8815_s23 + $0xd4] sm:$0x1] }
 0x128   : > { %v2170_v52 = vsel %vm8808_vm2, %v7982_v51, %v2169_v14  ;;  %1413 = vst.msk [vmem:[#allocation2 + $0x40] sm:$0xff] %vm1404_vm9, %v1373_v25  ;;  %v7918_v30 = vcombine.low %v1842_v18, %v1852_v21  ;;  %v2852_v22 = vrot.slane %v2850_v16, 4  ;;  %v2855_v32 = vrot.slane %v2853_v23, 5  ;;  %v8680_v51 = vld [vmem:[%s8815_s23 + $0xcc] sm:$0xff]  }
 0x129   : > { %v1197_v28 = vpop.permute.xlu1 %1196  ;;  %1929 = vrot.lane.b32.xlu0 %v7917_v26, %s8758_s28  ;;  %v2859_v33 = vshll.u32 %v8090_v15, 16  ;;  %v2863_v34 = vshrl.u32 %v8090_v15, 16  ;;  %v2869_v35 = vshll.u32 %v8091_v20, 16  ;;  %v2874_v36 = vshrl.u32 %v8092_v24, 16 }
 0x12a   : > { %1236 = vst.msk [vmem:[#allocation2 + $0x48] sm:$0xff] %vm1226_vm8, %v1197_v28  ;;  %v2173_v38 = vsel %vm8808_vm2, %v2171_v31, %v2172_v57  ;;  %v2856_v39 = vor.u32 %v2855_v32, %v2852_v22  ;;  %v2877_v41 = vshll.u32 %v8092_v24, 16  ;;  %v2883_v42 = vshll.u32 %v8093_v29, 16 }
 0x12b   : > { %1931 = vrot.lane.b32.xlu1 %v7918_v30, %s8758_s28  ;;  %v7998_v45 = vcombine.low %v2170_v52, %v2173_v38  ;;  %v2861_v46 = vrot.slane %v2859_v33, 5  ;;  %v2865_v47 = vrot.slane %v2863_v34, 4  ;;  %v2871_v54 = vrot.slane %v2869_v35, 5 }
 0x12c   : > { %v2857_v53 = vrot.slane %v2856_v39, 4  ;;  %v2876_v55 = vrot.slane %v2874_v36, 4  ;;  %v2879_v56 = vrot.slane %v2877_v41, 5  ;;  %v9813_v61 = vrot.slane %v2883_v42, 5 }
 0x12d   : > { %v1375_v48 = vpop.permute.xlu1 %1374  ;;  %2250 = vrot.lane.b32.xlu0 %v7997_v27, %s8755_s25  ;;  %v2866_v60 = vor.u32 %v2865_v47, %v2861_v46  ;;  %v2887_v62 = vshrl.u32 %v8093_v29, 16  ;;  %v2893_v63 = vshll.u32 %v8094_v40, 16  ;;  %v1918_v2 = vpop.permute.xlu0 %1917  ;;  %v8173_v5 = vrot.slane %v8153_v44, 9 }
 0x12e   : > { %1414 = vst.msk [vmem:[#allocation2 + $0x48] sm:$0xff] %vm1404_vm9, %v1375_v48  ;;  %v2880_v3 = vor.u32 %v2879_v56, %v2876_v55  ;;  %v3206_v6 = vrot.slane %v8154_v49, 5  ;;  %v3209_v37 = vrot.slane %v8155_v50, 5  ;;  %v2862_v4 = vsel %vm8846_vm5, %v2857_v53, %v2861_v46 }
 0x12f   : > { %1958 = vst.msk [vmem:[#allocation2 + $0x40] sm:$0xff] %vm1949_vm10, %v1918_v2  ;;  %2252 = vrot.lane.b32.xlu1 %v7998_v45, %s8755_s25  ;;  %v2867_v9 = vrot.slane %v2866_v60, 4  ;;  %v2889_v10 = vrot.slane %v2887_v62, 4  ;;  %v9826_v11 = vrot.slane %v2893_v63, 5  ;;  %v8174_v14 = vrot.slane %v9809_v58, 9 }
 0x130   : > { %v9828_v8 = vrot.slane %v2880_v3, 4  ;;  %v3208_v13 = vrot.slane %v3206_v6, 4  ;;  %v3213_v57 = vrot.slane %v9816_v1, 5  ;;  %v3216_v17 = vrot.slane %v9819_v7, 5 }
 0x131   : > { %v1920_v12 = vpop.permute.xlu1 %1919  ;;  %2428 = vrot.lane.b32.xlu0 %v8679_v59, %s8759_s29  ;;  %v2872_v15 = vsel %vm8846_vm5, %v2867_v9, %v2871_v54  ;;  %v2890_v16 = vor.u32 %v2889_v10, %v9813_v61  ;;  %v2239_v18 = vpop.permute.xlu0 %2238  ;;  %v9840_v20 = vsel %vm8808_vm2, %v8173_v5, %v3206_v6  ;;  %v8762_v27 = vmov 0  }
 0x132   : > { %1959 = vst.msk [vmem:[#allocation2 + $0x48] sm:$0xff] %vm1949_vm10, %v1920_v12  ;;  %v8109_v19 = vcombine.low %v2862_v4, %v2872_v15  ;;  %v9844_v23 = vsel %vm8808_vm2, %v3208_v13, %v3209_v37  ;;  %v2886_v24 = vsel %vm8846_vm5, %v9828_v8, %v9813_v61  ;;  %v3215_v26 = vrot.slane %v3213_v57, 4 }
 0x133   : > { %2279 = vst.msk [vmem:[#allocation2 + $0x40] sm:$0xff] %vm2270_vm11, %v2239_v18  ;;  %2430 = vrot.lane.b32.xlu1 %v8680_v51, %s8759_s29  ;;  %v9852_v25 = vrot.slane %v2890_v16, 4  ;;  %v8189_v28 = vcombine.low %v9840_v20, %v9844_v23  ;;  %v3214_v29 = vsel %vm8808_vm2, %v8174_v14, %v3213_v57  ;;  %vm3843_vm6 = vsmask.f32 256 }
 0x134   : > { %3715 = vst.msk [vmem:[#allocation3 + $0x18] sm:$0xf] %vm3707_vm1, %v8762_v27  ;;  %3708 = vst.msk [vmem:[#allocation3] sm:$0xf] %vm3707_vm1, %v8762_v27  ;;  %v3217_v30 = vsel %vm8808_vm2, %v3215_v26, %v3216_v17  ;;  %vm6000_vm15 = vcmask 326912  }
 0x135   : > { %v2241_v21 = vpop.permute.xlu1 %2240  ;;  %3709 = vst.msk [vmem:[#allocation3 + $0x4] sm:$0xf] %vm3707_vm1, %v8762_v27  ;;  %3712 = vst.msk [vmem:[#allocation3 + $0xc] sm:$0xf] %vm3707_vm1, %v8762_v27  ;;  %2973 = vrot.lane.b32.xlu0 %v8109_v19, %s8760_s30  ;;  %v2896_v52 = vsel %vm8846_vm5, %v9852_v25, %v9826_v11  ;;  %v2417_v31 = vpop.permute.xlu0 %2416  ;;  %v8190_v33 = vcombine.low %v3214_v29, %v3217_v30 }
 0x136   : > { %2280 = vst.msk [vmem:[#allocation2 + $0x48] sm:$0xff] %vm2270_vm11, %v2241_v21  ;;  %v8110_v22 = vcombine.low %v2886_v24, %v2896_v52 }
 0x137   : > { %3713 = vst.msk [vmem:[#allocation3 + $0x10] sm:$0xf] %vm3707_vm1, %v8762_v27  ;;  %3716 = vst.msk [vmem:[#allocation3 + $0x1c] sm:$0xf] %vm3707_vm1, %v8762_v27 }
 0x138   : > { %3718 = vst.msk [vmem:[#allocation3 + $0x24] sm:$0xf] %vm3707_vm1, %v8762_v27  ;;  %3719 = vst.msk [vmem:[#allocation3 + $0x28] sm:$0xf] %vm3707_vm1, %v8762_v27  ;;  %2975 = vrot.lane.b32.xlu1 %v8110_v22, %s8760_s30 }
 0x139   : > { %3721 = vst.msk [vmem:[#allocation3 + $0x30] sm:$0xf] %vm3707_vm1, %v8762_v27  ;;  %3722 = vst.msk [vmem:[#allocation3 + $0x34] sm:$0xf] %vm3707_vm1, %v8762_v27  ;;  %v2419_v32 = vpop.permute.xlu1 %2418  ;;  %3294 = vrot.lane.b32.xlu0 %v8189_v28, %s8761_s6 }
 0x13a   : > { %3724 = vst.msk [vmem:[#allocation3 + $0x3c] sm:$0xf] %vm3707_vm1, %v8762_v27  ;;  %3725 = vst.msk [vmem:[#allocation3 + $0x40] sm:$0xf] %vm3707_vm1, %v8762_v27  ;;  %v2962_v34 = vpop.permute.xlu0 %2961 }
 0x13b   : > { %3727 = vst.msk [vmem:[#allocation3 + $0x48] sm:$0xf] %vm3707_vm1, %v8762_v27  ;;  %3728 = vst.msk [vmem:[#allocation3 + $0x4c] sm:$0xf] %vm3707_vm1, %v8762_v27  ;;  %v4429_v35 = vld [vmem:[#allocation3] sm:$0xf] }
 0x13c   : > { %3730 = vst.msk [vmem:[#allocation3 + $0x54] sm:$0xf] %vm3707_vm1, %v8762_v27  ;;  %3731 = vst.msk [vmem:[#allocation3 + $0x58] sm:$0xf] %vm3707_vm1, %v8762_v27  ;;  %3296 = vrot.lane.b32.xlu1 %v8190_v33, %s8761_s6  ;;  %v4430_v36 = vld [vmem:[#allocation3 + $0x4] sm:$0xf] }
 0x13d   : > { %3733 = vst.msk [vmem:[#allocation3 + $0x60] sm:$0xf] %vm3707_vm1, %v8762_v27  ;;  %3734 = vst.msk [vmem:[#allocation3 + $0x64] sm:$0xf] %vm3707_vm1, %v8762_v27  ;;  %v2964_v38 = vpop.permute.xlu1 %2963  ;;  %v4478_v40 = vshrl.u32 %v4429_v35, 16  ;;  %v4481_v41 = vshll.u32 %v4429_v35, 16 }
 0x13e   : > { %3736 = vst.msk [vmem:[#allocation3 + $0x6c] sm:$0xf] %vm3707_vm1, %v8762_v27  ;;  %3737 = vst.msk [vmem:[#allocation3 + $0x70] sm:$0xf] %vm3707_vm1, %v8762_v27  ;;  %v4487_v42 = vshll.u32 %v4430_v36, 16  ;;  %v4491_v44 = vshrl.u32 %v4430_v36, 16  ;;  %v3283_v45 = vpop.permute.xlu0 %3282 }
 0x13f   : > { %3739 = vst.msk [vmem:[#allocation3 + $0x78] sm:$0xf] %vm3707_vm1, %v8762_v27  ;;  %3740 = vst.msk [vmem:[#allocation3 + $0x7c] sm:$0xf] %vm3707_vm1, %v8762_v27  ;;  %v4974_v47 = vld [vmem:[#allocation3] sm:$0xe] }
 0x140   : > { %3742 = vst.msk [vmem:[#allocation3 + $0x84] sm:$0xf] %vm3707_vm1, %v8762_v27  ;;  %3743 = vst.msk [vmem:[#allocation3 + $0x88] sm:$0xf] %vm3707_vm1, %v8762_v27  ;;  %v4975_v48 = vld [vmem:[#allocation3 + $0x4] sm:$0xf] }
 0x141   : > { %3745 = vst.msk [vmem:[#allocation3 + $0x90] sm:$0xf] %vm3707_vm1, %v8762_v27  ;;  %3746 = vst.msk [vmem:[#allocation3 + $0x94] sm:$0xf] %vm3707_vm1, %v8762_v27  ;;  %v4480_v49 = vrot.slane %v4478_v40, 4  ;;  %v4483_v50 = vrot.slane %v4481_v41, 5 }
 0x142   : > { %3748 = vst.msk [vmem:[#allocation3 + $0x9c] sm:$0xf] %vm3707_vm1, %v8762_v27  ;;  %3749 = vst.msk [vmem:[#allocation3 + $0xa0] sm:$0xf] %vm3707_vm1, %v8762_v27  ;;  %v4489_v53 = vrot.slane %v4487_v42, 5  ;;  %v4493_v54 = vrot.slane %v4491_v44, 4  ;;  %v3285_v63 = vpop.permute.xlu0 %3284 }
 0x143   : > { %3751 = vst.msk [vmem:[#allocation3 + $0xa8] sm:$0xf] %vm3707_vm1, %v8762_v27  ;;  %3752 = vst.msk [vmem:[#allocation3 + $0xac] sm:$0xf] %vm3707_vm1, %v8762_v27  ;;  %v5072_v58 = vrot.slane %v4975_v48, 5  ;;  %v4484_v59 = vor.u32 %v4483_v50, %v4480_v49  ;;  %v8276_v61 = vrot.slane %v4974_v47, 9 }
 0x144   : > { %3754 = vst.msk [vmem:[#allocation3 + $0xb4] sm:$0xf] %vm3707_vm1, %v8762_v27  ;;  %3755 = vst.msk [vmem:[#allocation3 + $0xb8] sm:$0xf] %vm3707_vm1, %v8762_v27  ;;  %v4494_v60 = vor.u32 %v4493_v54, %v4489_v53  ;;  %v875_v5 = vpop.permute.xlu1 %874  ;;  %v9985_v47 = vld [vmem:[%s11191_s2] ss:$0 sm:$0xff] }
 0x145   : > { %3757 = vst.msk [vmem:[#allocation3 + $0xc0] sm:$0xf] %vm3707_vm1, %v8762_v27  ;;  %3758 = vst.msk [vmem:[#allocation3 + $0xc4] sm:$0xf] %vm3707_vm1, %v8762_v27  ;;  %v5074_v1 = vrot.slane %v5072_v58, 4  ;;  %v4485_v2 = vrot.slane %v4484_v59, 4  ;;  %v5073_v7 = vsel %vm8808_vm2, %v8276_v61, %v5072_v58 }
 0x146   : > { %3760 = vst.msk [vmem:[#allocation3 + $0xcc] sm:$0xf] %vm3707_vm1, %v8762_v27  ;;  %3761 = vst.msk [vmem:[#allocation3 + $0xd0] sm:$0xf] %vm3707_vm1, %v8762_v27  ;;  %v4495_v3 = vrot.slane %v4494_v60, 4 }
 0x147   : > { %3717 = vst.msk [vmem:[#allocation3 + $0x20] sm:$0x1] %vm3710_vm3, %v8762_v27  ;;  %3711 = vst.msk [vmem:[#allocation3 + $0x8] sm:$0x1] %vm3710_vm3, %v8762_v27  ;;  %v4490_v6 = vsel %vm8846_vm5, %v4485_v2, %v4489_v53  ;;  %v9992_v50 = vld [vmem:[%s11192_s3] ss:$0 sm:$0xff] }
 0x148   : > { %3714 = vst.msk [vmem:[#allocation3 + $0x14] sm:$0x1] %vm3710_vm3, %v8762_v27  ;;  %3720 = vst.msk [vmem:[#allocation3 + $0x2c] sm:$0x1] %vm3710_vm3, %v8762_v27  ;;  %v1199_v10 = vpop.permute.xlu0 %1198 }
 0x149   : > { %3723 = vst.msk [vmem:[#allocation3 + $0x38] sm:$0x1] %vm3710_vm3, %v8762_v27  ;;  %3726 = vst.msk [vmem:[#allocation3 + $0x44] sm:$0x1] %vm3710_vm3, %v8762_v27  ;;  %v877_v12 = vpop.permute.xlu1 %876 }
 0x14a   : > { %3729 = vst.msk [vmem:[#allocation3 + $0x50] sm:$0x1] %vm3710_vm3, %v8762_v27  ;;  %3732 = vst.msk [vmem:[#allocation3 + $0x5c] sm:$0x1] %vm3710_vm3, %v8762_v27 }
 0x14b   : > { %3735 = vst.msk [vmem:[#allocation3 + $0x68] sm:$0x1] %vm3710_vm3, %v8762_v27  ;;  %3738 = vst.msk [vmem:[#allocation3 + $0x74] sm:$0x1] %vm3710_vm3, %v8762_v27 }
 0x14c   : > { %3741 = vst.msk [vmem:[#allocation3 + $0x80] sm:$0x1] %vm3710_vm3, %v8762_v27  ;;  %3744 = vst.msk [vmem:[#allocation3 + $0x8c] sm:$0x1] %vm3710_vm3, %v8762_v27  ;;  %v1377_v13 = vpop.permute.xlu0 %1376 }
 0x14d   : > { %3747 = vst.msk [vmem:[#allocation3 + $0x98] sm:$0x1] %vm3710_vm3, %v8762_v27  ;;  %3750 = vst.msk [vmem:[#allocation3 + $0xa4] sm:$0x1] %vm3710_vm3, %v8762_v27  ;;  %v1201_v14 = vpop.permute.xlu1 %1200 }
 0x14e   : > { %3753 = vst.msk [vmem:[#allocation3 + $0xb0] sm:$0x1] %vm3710_vm3, %v8762_v27  ;;  %3756 = vst.msk [vmem:[#allocation3 + $0xbc] sm:$0x1] %vm3710_vm3, %v8762_v27  ;;  %v4431_v39 = vld [vmem:[#allocation3 + $0x8] sm:$0x1] }
 0x14f   : > { %3759 = vst.msk [vmem:[#allocation3 + $0xc8] sm:$0x1] %vm3710_vm3, %v8762_v27  ;;  %3762 = vst.msk [vmem:[#allocation3 + $0xd4] sm:$0x1] %vm3710_vm3, %v8762_v27  ;;  %v4497_v46 = vshll.u32 %v4431_v39, 16 }
 0x150   : > { %2457 = vst.msk [vmem:[#allocation2 + $0x40] sm:$0xff] %vm2448_vm12, %v2417_v31  ;;  %2458 = vst.msk [vmem:[#allocation2 + $0x48] sm:$0xff] %vm2448_vm12, %v2419_v32  ;;  %v4976_v55 = vld [vmem:[#allocation3 + $0x8] sm:$0x1] }
 0x151   : > { %3002 = vst.msk [vmem:[#allocation2 + $0x40] sm:$0xff] %vm2993_vm13, %v2962_v34  ;;  %3003 = vst.msk [vmem:[#allocation2 + $0x48] sm:$0xff] %vm2993_vm13, %v2964_v38  ;;  %v4499_v56 = vrot.slane %v4497_v46, 5  ;;  %v5075_v62 = vrot.slane %v4976_v55, 5  ;;  %v1379_v57 = vpop.permute.xlu1 %1378 }
 0x152   : > { %3323 = vst.msk [vmem:[#allocation2 + $0x40] sm:$0xff] %vm3314_vm14, %v3283_v45  ;;  %3324 = vst.msk [vmem:[#allocation2 + $0x48] sm:$0xff] %vm3314_vm14, %v3285_v63 }
 0x153   : > { %913 = vst.msk [vmem:[#allocation2 + $0x50] sm:$0xff] %vm902_vm7, %v875_v5  ;;  %v4500_v37 = vsel %vm8846_vm5, %v4495_v3, %v4499_v56  ;;  %v5076_v51 = vsel %vm8808_vm2, %v5074_v1, %v5075_v62  ;;  %914 = vst.msk [vmem:[#allocation2 + $0x58] sm:$0xff] %vm902_vm7, %v877_v12  ;;  %v1922_v15 = vpop.permute.xlu0 %1921 }
 0x154   : > { %v8260_v9 = vcombine.low %v4490_v6, %v4500_v37  ;;  %v8292_v11 = vcombine.low %v5073_v7, %v5076_v51  ;;  %1237 = vst.msk [vmem:[#allocation2 + $0x50] sm:$0xff] %vm1226_vm8, %v1199_v10  ;;  %1238 = vst.msk [vmem:[#allocation2 + $0x58] sm:$0xff] %vm1226_vm8, %v1201_v14 }
 0x155   : > { %1415 = vst.msk [vmem:[#allocation2 + $0x50] sm:$0xff] %vm1404_vm9, %v1377_v13  ;;  %1416 = vst.msk [vmem:[#allocation2 + $0x58] sm:$0xff] %vm1404_vm9, %v1379_v57  ;;  %v1924_v16 = vpop.permute.xlu1 %1923 }
 0x156   : > { %4909 = vrot.lane.b32.xlu0 %v8260_v9, %s8756_s26  ;;  %1960 = vst.msk [vmem:[#allocation2 + $0x50] sm:$0xff] %vm1949_vm10, %v1922_v15  ;;  %1961 = vst.msk [vmem:[#allocation2 + $0x58] sm:$0xff] %vm1949_vm10, %v1924_v16 }
 0x157   : > { %v2243_v17 = vpop.permute.xlu0 %2242 }
 0x158   : > { %2281 = vst.msk [vmem:[#allocation2 + $0x50] sm:$0xff] %vm2270_vm11, %v2243_v17 }
 0x159   : > { %v3339_v4 = vld [vmem:[#allocation2 + $0x40] sm:$0xff]  ;;  %v3340_v8 = vld [vmem:[#allocation2 + $0x48] sm:$0xff]  ;;  %v2245_v18 = vpop.permute.xlu1 %2244 }
 0x15a   : > { %8554 = vmatprep.mubr.msk.bf16.mxu0 %vm3367_vm0, %v3339_v4  ;;  %5230 = vrot.lane.b32.xlu0 %v8292_v11, %s8758_s28  ;;  %2282 = vst.msk [vmem:[#allocation2 + $0x58] sm:$0xff] %vm2270_vm11, %v2245_v18 }
 0x15b   : > { %8555 = vmatmul.mubr.msk.bf16.gmra.mrb[16].mxu0 %vm3367_vm0, %v3340_v8  ;;  %v2421_v19 = vpop.permute.xlu0 %2420 }
 0x15c   : > { %2459 = vst.msk [vmem:[#allocation2 + $0x50] sm:$0xff] %vm2448_vm12, %v2421_v19  ;;  %v4179_v19 = vld [vmem:[#allocation3 + $0x18] sm:$0xf] }
 0x15d   : > { %v2423_v20 = vpop.permute.xlu1 %2422 }
 0x15e   : > { %2460 = vst.msk [vmem:[#allocation2 + $0x58] sm:$0xff] %vm2448_vm12, %v2423_v20 }
 0x15f   : > { %v2966_v23 = vpop.permute.xlu0 %2965 }
 0x160   : > { %3004 = vst.msk [vmem:[#allocation2 + $0x50] sm:$0xff] %vm2993_vm13, %v2966_v23 }
 0x162   : > { %v2968_v24 = vpop.permute.xlu1 %2967 }
 0x163   : > { %3005 = vst.msk [vmem:[#allocation2 + $0x58] sm:$0xff] %vm2993_vm13, %v2968_v24  ;;  %v3287_v25 = vpop.permute.xlu0 %3286 }
 0x164   : > { %3325 = vst.msk [vmem:[#allocation2 + $0x50] sm:$0xff] %vm3314_vm14, %v3287_v25 }
 0x167   : > { %v3289_v26 = vpop.permute.xlu0 %3288 }
 0x168   : > { %v879_v21 = vpop.permute.xlu1 %878  ;;  %3326 = vst.msk [vmem:[#allocation2 + $0x58] sm:$0xff] %vm3314_vm14, %v3289_v26 }
 0x169   : > { %915 = vst.msk [vmem:[#allocation2 + $0x60] sm:$0xff] %vm902_vm7, %v879_v21  ;;  %v4170_v21 = vld [vmem:[#allocation3 + $0xc] sm:$0xf] }
 0x16b   : > { %v3341_v27 = vld [vmem:[#allocation2 + $0x50] sm:$0xff] }
 0x16c   : > { %v1203_v52 = vpop.permute.xlu0 %1202  ;;  %8558 = vmatprep.mubr.msk.bf16.mxu0 %vm3367_vm0, %v3341_v27 }
 0x16d   : > { %v881_v28 = vpop.permute.xlu1 %880  ;;  %1239 = vst.msk [vmem:[#allocation2 + $0x60] sm:$0xff] %vm1226_vm8, %v1203_v52 }
 0x16e   : > { %916 = vst.msk [vmem:[#allocation2 + $0x68] sm:$0xff] %vm902_vm7, %v881_v28 }
 0x16f   : > { %v3342_v29 = vld [vmem:[#allocation2 + $0x58] sm:$0xff] }
 0x170   : > { %v1381_v30 = vpop.permute.xlu0 %1380  ;;  %8559 = vmatmul.mubr.msk.bf16.gmra.mrb[20].mxu0 %vm3367_vm0, %v3342_v29 }
 0x171   : > { %v1205_v31 = vpop.permute.xlu1 %1204  ;;  %1417 = vst.msk [vmem:[#allocation2 + $0x60] sm:$0xff] %vm1404_vm9, %v1381_v30 }
 0x172   : > { %1240 = vst.msk [vmem:[#allocation2 + $0x68] sm:$0xff] %vm1226_vm8, %v1205_v31  ;;  %v4183_v31 = vld [vmem:[#allocation3 + $0x20] sm:$0x1] }
 0x175   : > { %v1383_v22 = vpop.permute.xlu1 %1382 }
 0x176   : > { %1418 = vst.msk [vmem:[#allocation2 + $0x68] sm:$0xff] %vm1404_vm9, %v1383_v22 }
 0x177   : > { %v1926_v32 = vpop.permute.xlu0 %1925 }
 0x178   : > { %1962 = vst.msk [vmem:[#allocation2 + $0x60] sm:$0xff] %vm1949_vm10, %v1926_v32 }
 0x179   : > { %v1928_v33 = vpop.permute.xlu1 %1927 }
 0x17a   : > { %1963 = vst.msk [vmem:[#allocation2 + $0x68] sm:$0xff] %vm1949_vm10, %v1928_v33 }
 0x17b   : > { %v2247_v34 = vpop.permute.xlu0 %2246 }
 0x17c   : > { %2283 = vst.msk [vmem:[#allocation2 + $0x60] sm:$0xff] %vm2270_vm11, %v2247_v34 }
 0x17d   : > { %v2249_v35 = vpop.permute.xlu1 %2248 }
 0x17e   : > { %2284 = vst.msk [vmem:[#allocation2 + $0x68] sm:$0xff] %vm2270_vm11, %v2249_v35 }
 0x17f   : > { %v2425_v36 = vpop.permute.xlu0 %2424 }
 0x180   : > { %2461 = vst.msk [vmem:[#allocation2 + $0x60] sm:$0xff] %vm2448_vm12, %v2425_v36 }
 0x181   : > { %v2427_v38 = vpop.permute.xlu1 %2426 }
 0x182   : > { %2462 = vst.msk [vmem:[#allocation2 + $0x68] sm:$0xff] %vm2448_vm12, %v2427_v38 }
 0x183   : > { %v2970_v39 = vpop.permute.xlu0 %2969 }
 0x184   : > { %3006 = vst.msk [vmem:[#allocation2 + $0x60] sm:$0xff] %vm2993_vm13, %v2970_v39  ;;  %v4176_v39 = vld [vmem:[#allocation3 + $0x14] sm:$0x1] }
 0x186   : > { %v2972_v40 = vpop.permute.xlu1 %2971 }
 0x187   : > { %3007 = vst.msk [vmem:[#allocation2 + $0x68] sm:$0xff] %vm2993_vm13, %v2972_v40  ;;  %v3291_v41 = vpop.permute.xlu0 %3290 }
 0x188   : > { %3327 = vst.msk [vmem:[#allocation2 + $0x60] sm:$0xff] %vm3314_vm14, %v3291_v41 }
 0x18b   : > { %v3293_v42 = vpop.permute.xlu0 %3292 }
 0x18c   : > { %v883_v44 = vpop.permute.xlu1 %882  ;;  %3328 = vst.msk [vmem:[#allocation2 + $0x68] sm:$0xff] %vm3314_vm14, %v3293_v42 }
 0x18d   : > { %917 = vst.msk [vmem:[#allocation2 + $0x70] sm:$0xff] %vm902_vm7, %v883_v44 }
 0x18f   : > { %v3343_v45 = vld [vmem:[#allocation2 + $0x60] sm:$0xff] }
 0x190   : > { %v1207_v46 = vpop.permute.xlu0 %1206  ;;  %8562 = vmatprep.mubr.msk.bf16.mxu0 %vm3367_vm0, %v3343_v45 }
 0x191   : > { %v885_v48 = vpop.permute.xlu1 %884  ;;  %1241 = vst.msk [vmem:[#allocation2 + $0x70] sm:$0xff] %vm1226_vm8, %v1207_v46 }
 0x192   : > { %918 = vst.msk [vmem:[#allocation2 + $0x78] sm:$0xff] %vm902_vm7, %v885_v48  ;;  %vm3844_vm7 = vsmask.f32 4368 }
 0x193   : > { %v8540_v49 = vpop.f32.mrb[0].mxu0  ;;  %v3344_v53 = vld [vmem:[#allocation2 + $0x68] sm:$0xff] }
 0x194   : > { %v3590_v54 = vmul.f32 %v8540_v49, %v9985_v47  ;;  %v3454_v55 = vpop.f32.mrb[1].mxu0  ;;  %v1385_v56 = vpop.permute.xlu0 %1384  ;;  %8563 = vmatmul.mubr.msk.bf16.gmra.mrb[24].mxu0 %vm3367_vm0, %v3344_v53 }
 0x195   : > { %v3588_v58 = vmul.f32 %v9985_v47, %v3454_v55  ;;  %v8541_v59 = vpop.f32.mrb[2].mxu0  ;;  %v1209_v60 = vpop.permute.xlu1 %1208  ;;  %1419 = vst.msk [vmem:[#allocation2 + $0x70] sm:$0xff] %vm1404_vm9, %v1385_v56 }
 0x196   : > { %v3629_v61 = vadd.f32 %v9992_v50, %v3590_v54  ;;  %v3591_v62 = vmul.f32 %v8541_v59, %v9985_v47  ;;  %v3457_v63 = vpop.f32.mrb[3].mxu0  ;;  %1242 = vst.msk [vmem:[#allocation2 + $0x78] sm:$0xff] %vm1226_vm8, %v1209_v60  ;;  %vm10009_vm8 = vmand %vm3707_vm1, %vm4168_vm4  ;;  %vm7044_vm4 = vcmask 523712  }
 0x197   : > { %v3627_v1 = vadd.f32 %v9992_v50, %v3588_v58  ;;  %v3589_v2 = vmul.f32 %v9985_v47, %v3457_v63 }
 0x198   : > { %v3661_v3 = vmax.f32 %v3629_v61, 0.0  ;;  %v3630_v5 = vadd.f32 %v9992_v50, %v3591_v62 }
 0x199   : > { %v3659_v6 = vmax.f32 %v3627_v1, 0.0  ;;  %v3628_v37 = vadd.f32 %v9992_v50, %v3589_v2  ;;  %v1387_v7 = vpop.permute.xlu1 %1386 }
 0x19a   : > { %v8462_v51 = vpack.c.bf16 %v3661_v3, %v3661_v3  ;;  %v3662_v4 = vmax.f32 %v3630_v5, 0.0  ;;  %1420 = vst.msk [vmem:[#allocation2 + $0x78] sm:$0xff] %vm1404_vm9, %v1387_v7  ;;  %vm10015_vm9 = vmor %vm3843_vm6, %vm3844_vm7  ;;  %vm7434_vm7 = vcmask 588800  }
 0x19b   : > { %v8460_v9 = vpack.c.bf16 %v3659_v6, %v3659_v6  ;;  %v3660_v10 = vmax.f32 %v3628_v37, 0.0  ;;  %v1930_v11 = vpop.permute.xlu0 %1929 }
 0x19c   : > { %v3864_v12 = vshrl.u32 %v8462_v51, 16  ;;  %v8463_v8 = vpack.c.bf16 %v3662_v4, %v3662_v4  ;;  %1964 = vst.msk [vmem:[#allocation2 + $0x70] sm:$0xff] %vm1949_vm10, %v1930_v11  ;;  %v3867_v16 = vshll.u32 %v8462_v51, 16 }
 0x19d   : > { %v3847_v13 = vshrl.u32 %v8460_v9, 16  ;;  %v8461_v14 = vpack.c.bf16 %v3660_v10, %v3660_v10  ;;  %v1932_v57 = vpop.permute.xlu1 %1931  ;;  %v3850_v23 = vshll.u32 %v8460_v9, 16 }
 0x19e   : > { %v3866_v15 = vrot.slane %v3864_v12, 7  ;;  %v3872_v17 = vshrl.u32 %v8463_v8, 16  ;;  %1965 = vst.msk [vmem:[#allocation2 + $0x78] sm:$0xff] %vm1949_vm10, %v1932_v57  ;;  %v3875_v28 = vshll.u32 %v8463_v8, 16  ;;  %vm10022_vm10 = vmand %vm3710_vm3, %vm3843_vm6  ;;  %vm6499_vm3 = vcmask 458112  }
 0x19f   : > { %v3849_v20 = vrot.slane %v3847_v13, 7  ;;  %v3855_v24 = vshrl.u32 %v8461_v14, 16  ;;  %v2251_v25 = vpop.permute.xlu0 %2250  ;;  %v3858_v32 = vshll.u32 %v8461_v14, 16  ;;  %vm11195_vm6 = vcmask 589312  }
 0x1a0   : > { %v3869_v26 = vor.u32 %v3867_v16, %v3866_v15  ;;  %v3874_v52 = vrot.slane %v3872_v17, 7  ;;  %2285 = vst.msk [vmem:[#allocation2 + $0x70] sm:$0xff] %vm2270_vm11, %v2251_v25  ;;  %v3870_v34 = vrot.slane %v3866_v15, 4 }
 0x1a1   : > { %v3852_v29 = vor.u32 %v3850_v23, %v3849_v20  ;;  %v3857_v22 = vrot.slane %v3855_v24, 7  ;;  %v2253_v33 = vpop.permute.xlu1 %2252  ;;  %v3853_v40 = vrot.slane %v3849_v20, 4 }
 0x1a2   : > { %v4180_v35 = vsel %vm10009_vm8, %v3869_v26, %v4179_v19  ;;  %v3877_v36 = vor.u32 %v3875_v28, %v3874_v52  ;;  %v3879_v38 = vrot.slane %v3874_v52, 4  ;;  %2286 = vst.msk [vmem:[#allocation2 + $0x78] sm:$0xff] %vm2270_vm11, %v2253_v33  ;;  %vm4412_vm11 = vcmask 64512  }
 0x1a3   : > { %4181 = vst [vmem:[#allocation3 + $0x18] sm:$0xf] %v4180_v35  ;;  %v4171_v41 = vsel %vm10009_vm8, %v3852_v29, %v4170_v21  ;;  %v3860_v42 = vor.u32 %v3858_v32, %v3857_v22  ;;  %v3862_v44 = vrot.slane %v3857_v22, 4  ;;  %v2429_v45 = vpop.permute.xlu0 %2428 }
 0x1a4   : > { %4172 = vst [vmem:[#allocation3 + $0xc] sm:$0xf] %v4171_v41  ;;  %v3878_v46 = vsel %vm10015_vm9, %v3870_v34, %v3877_v36  ;;  %v4184_v48 = vsel %vm10022_vm10, %v3879_v38, %v4183_v31  ;;  %2463 = vst.msk [vmem:[#allocation2 + $0x70] sm:$0xff] %vm2448_vm12, %v2429_v45 }
 0x1a5   : > { %4182 = vst.msk [vmem:[#allocation3 + $0x1c] sm:$0xf] %vm3707_vm1, %v3878_v46  ;;  %4185 = vst [vmem:[#allocation3 + $0x20] sm:$0x1] %v4184_v48  ;;  %v3861_v49 = vsel %vm10015_vm9, %v3853_v40, %v3860_v42  ;;  %v4177_v53 = vsel %vm10022_vm10, %v3862_v44, %v4176_v39  ;;  %v2431_v54 = vpop.permute.xlu1 %2430  ;;  %v8702_v48 = vld [vmem:[#allocation3] sm:$0xff]  }
 0x1a6   : > { %4173 = vst.msk [vmem:[#allocation3 + $0x10] sm:$0xf] %vm3707_vm1, %v3861_v49  ;;  %4178 = vst [vmem:[#allocation3 + $0x14] sm:$0x1] %v4177_v53 }
 0x1a7   : > { %2464 = vst.msk [vmem:[#allocation2 + $0x78] sm:$0xff] %vm2448_vm12, %v2431_v54  ;;  %v2974_v55 = vpop.permute.xlu0 %2973  ;;  %vm4957_vm12 = vcmask 130112  }
 0x1a8   : > { %3008 = vst.msk [vmem:[#allocation2 + $0x70] sm:$0xff] %vm2993_vm13, %v2974_v55 }
 0x1a9   : > { %4413 = vst.msk [vmem:[#allocation4] sm:$0xff] %vm4412_vm11, %v8702_v48 }
 0x1aa   : > { %v6020_v56 = vld [vmem:[#allocation3 + $0x18] sm:$0xe]  ;;  %v2976_v58 = vpop.permute.xlu1 %2975 }
 0x1ab   : > { %v7061_v59 = vld [vmem:[#allocation3 + $0x18] sm:$0xe]  ;;  %3009 = vst.msk [vmem:[#allocation2 + $0x78] sm:$0xff] %vm2993_vm13, %v2976_v58  ;;  %v3295_v60 = vpop.permute.xlu0 %3294  ;;  %v8341_v63 = vrot.slane %v6020_v56, 9  ;;  %v4977_v12 = vld [vmem:[#allocation3 + $0xc] sm:$0xe] }
 0x1ac   : > { %v8687_v61 = vld [vmem:[#allocation3 + $0x18] sm:$0xff]   ;;  %3329 = vst.msk [vmem:[#allocation2 + $0x70] sm:$0xff] %vm3314_vm14, %v3295_v60  ;;  %v8404_v1 = vrot.slane %v7061_v59, 9  ;;  %v6022_v5 = vld [vmem:[#allocation3 + $0x20] sm:$0x1]  ;;  %v8277_v24 = vrot.slane %v4977_v12, 9 }
 0x1ad   : > { %v8688_v62 = vld [vmem:[#allocation3 + $0x18] sm:$0xff]   ;;  %6451 = vrot.lane.b32.xlu0 %v8687_v61, %s8763_s17  ;;  %v8689_v2 = vld [vmem:[#allocation3 + $0xc] sm:$0xff]   ;;  %v6125_v51 = vrot.slane %v6022_v5, 5  ;;  %v7063_v4 = vld [vmem:[#allocation3 + $0x20] sm:$0x1]  ;;  %vm5278_vm13 = vcmask 195712  }
 0x1ae   : > { %v6021_v3 = vld [vmem:[#allocation3 + $0x1c] sm:$0xf]  ;;  %v3297_v37 = vpop.permute.xlu1 %3296  ;;  %5409 = vrot.lane.b32.xlu1 %v8688_v62, %s8759_s29  ;;  %v7162_v11 = vrot.slane %v7063_v4, 5  ;;  %v4978_v8 = vld [vmem:[#allocation3 + $0x10] sm:$0xf] }
 0x1af   : > { %v7062_v6 = vld [vmem:[#allocation3 + $0x1c] sm:$0xf]  ;;  %v6122_v7 = vrot.slane %v6021_v3, 5  ;;  %3330 = vst.msk [vmem:[#allocation2 + $0x78] sm:$0xff] %vm3314_vm14, %v3297_v37  ;;  %v8710_v13 = vld [vmem:[#allocation3 + $0xc] sm:$0xff]   ;;  %v5079_v25 = vrot.slane %v4978_v8, 5 }
 0x1b0   : > { %v7159_v9 = vrot.slane %v7062_v6, 5  ;;  %v8707_v10 = vld [vmem:[#allocation3 + $0x18] sm:$0xff]   ;;  %v4979_v19 = vld [vmem:[#allocation3 + $0x14] sm:$0x1]  ;;  %4414 = vst.msk [vmem:[#allocation4 + $0x8] sm:$0xff] %vm4412_vm11, %v8710_v13  ;;  %vm5455_vm14 = vcmask 261312  }
 0x1b1   : > { %v6123_v57 = vsel %vm8808_vm2, %v8341_v63, %v6122_v7  ;;  %v6124_v15 = vrot.slane %v6122_v7, 4  ;;  %4415 = vst.msk [vmem:[#allocation4 + $0x10] sm:$0xff] %vm4412_vm11, %v8707_v10  ;;  %5407 = vrot.lane.b32.xlu0 %v8689_v2, %s8759_s29  ;;  %v5082_v26 = vrot.slane %v4979_v19, 5  ;;  %v4980_v21 = vld [vmem:[#allocation3 + $0x18] sm:$0xe]  ;;  %v5080_v45 = vsel %vm8808_vm2, %v8277_v24, %v5079_v25 }
 0x1b2   : > { %v8544_v14 = vpop.f32.mrb[4].mxu0  ;;  %v7160_v16 = vsel %vm8808_vm2, %v8404_v1, %v7159_v9  ;;  %v7161_v17 = vrot.slane %v7159_v9, 4  ;;  %v4981_v22 = vld [vmem:[#allocation3 + $0x1c] sm:$0xf]  ;;  %v4982_v32 = vld [vmem:[#allocation3 + $0x20] sm:$0x1] }
 0x1b3   : > { %v3594_v20 = vmul.f32 %v8544_v14, %v9985_v47  ;;  %v3470_v23 = vpop.f32.mrb[5].mxu0  ;;  %v6126_v52 = vsel %vm8808_vm2, %v6124_v15, %v6125_v51  ;;  %v8278_v33 = vrot.slane %v4980_v21, 9  ;;  %v3345_v34 = vld [vmem:[#allocation2 + $0x70] sm:$0xff]  ;;  %v6017_v41 = vld [vmem:[#allocation3 + $0xc] sm:$0xe]  ;;  %v5081_v46 = vrot.slane %v5079_v25, 4 }
 0x1b4   : > { %v3592_v28 = vmul.f32 %v9985_v47, %v3470_v23  ;;  %v8545_v29 = vpop.f32.mrb[6].mxu0  ;;  %v7163_v31 = vsel %vm8808_vm2, %v7161_v17, %v7162_v11  ;;  %v8357_v36 = vcombine.low %v6123_v57, %v6126_v52  ;;  %8566 = vmatprep.mubr.msk.bf16.mxu0 %vm3367_vm0, %v3345_v34  ;;  %v5086_v54 = vrot.slane %v4981_v22, 5  ;;  %v6018_v56 = vld [vmem:[#allocation3 + $0x10] sm:$0xf]  ;;  %v6019_v62 = vld [vmem:[#allocation3 + $0x14] sm:$0x1] }
 0x1b5   : > { %v3633_v35 = vadd.f32 %v9992_v50, %v3594_v20  ;;  %v3595_v38 = vmul.f32 %v8545_v29, %v9985_v47  ;;  %v3473_v39 = vpop.f32.mrb[7].mxu0  ;;  %v8420_v40 = vcombine.low %v7160_v16, %v7163_v31  ;;  %v5089_v55 = vrot.slane %v4982_v32, 5  ;;  %v6516_v19 = vld [vmem:[#allocation3 + $0x18] sm:$0xf]  ;;  %v4193_v20 = vld [vmem:[#allocation3 + $0x30] sm:$0xf] }
 0x1b6   : > { %v3631_v42 = vadd.f32 %v9992_v50, %v3592_v28  ;;  %v3593_v44 = vmul.f32 %v9985_v47, %v3473_v39  ;;  %6275 = vrot.lane.b32.xlu1 %v8357_v36, %s8764_s20  ;;  %v3346_v58 = vld [vmem:[#allocation2 + $0x78] sm:$0xff]  ;;  %v5083_v61 = vsel %vm8808_vm2, %v5081_v46, %v5082_v26  ;;  %v8340_v63 = vrot.slane %v6017_v41, 9  ;;  %v4186_v28 = vld [vmem:[#allocation3 + $0x24] sm:$0xf] }
 0x1b7   : > { %v3665_v49 = vmax.f32 %v3633_v35, 0.0  ;;  %v3634_v53 = vadd.f32 %v9992_v50, %v3595_v38  ;;  %7317 = vrot.lane.b32.xlu0 %v8420_v40, %s8765_s21  ;;  %8567 = vmatmul.mubr.msk.bf16.gmra.mrb[28].mxu0 %vm3367_vm0, %v3346_v58  ;;  %v8293_v3 = vcombine.low %v5080_v45, %v5083_v61  ;;  %v5087_v5 = vsel %vm8808_vm2, %v8278_v33, %v5086_v54  ;;  %v4197_v33 = vld [vmem:[#allocation3 + $0x38] sm:$0x1]  ;;  %v4190_v40 = vld [vmem:[#allocation3 + $0x2c] sm:$0x1] }
 0x1b8   : > { %v3663_v59 = vmax.f32 %v3631_v42, 0.0  ;;  %v3632_v60 = vadd.f32 %v9992_v50, %v3593_v44  ;;  %v5088_v7 = vrot.slane %v5086_v54, 4  ;;  %v6115_v51 = vrot.slane %v6018_v56, 5  ;;  %v6517_v42 = vld [vmem:[#allocation3 + $0x1c] sm:$0xf] }
 0x1b9   : > { %v8466_v1 = vpack.c.bf16 %v3665_v49, %v3665_v49  ;;  %v3666_v2 = vmax.f32 %v3634_v53, 0.0  ;;  %v6118_v11 = vrot.slane %v6019_v62, 5  ;;  %v6565_v35 = vshrl.u32 %v6516_v19, 16  ;;  %v6518_v49 = vld [vmem:[#allocation3 + $0x20] sm:$0x1] }
 0x1ba   : > { %v8464_v6 = vpack.c.bf16 %v3663_v59, %v3663_v59  ;;  %v3664_v37 = vmax.f32 %v3632_v60, 0.0  ;;  %5232 = vrot.lane.b32.xlu1 %v8293_v3, %s8758_s28  ;;  %v5090_v14 = vsel %vm8808_vm2, %v5088_v7, %v5089_v55  ;;  %v6116_v26 = vsel %vm8808_vm2, %v8340_v63, %v6115_v51  ;;  %v5475_v53 = vld [vmem:[#allocation3 + $0x18] sm:$0xf]  ;;  %v5476_v59 = vld [vmem:[#allocation3 + $0x1c] sm:$0xf] }
 0x1bb   : > { %v3898_v4 = vshrl.u32 %v8466_v1, 16  ;;  %v3901_v9 = vshll.u32 %v8466_v1, 16  ;;  %v8467_v10 = vpack.c.bf16 %v3666_v2, %v3666_v2  ;;  %v8294_v17 = vcombine.low %v5087_v5, %v5090_v14  ;;  %v5477_v60 = vld [vmem:[#allocation3 + $0x20] sm:$0x1]  ;;  %v4435_v2 = vld [vmem:[#allocation3 + $0x18] sm:$0xf] }
 0x1bc   : > { %v3881_v12 = vshrl.u32 %v8464_v6, 16  ;;  %v3884_v8 = vshll.u32 %v8464_v6, 16  ;;  %v8465_v13 = vpack.c.bf16 %v3664_v37, %v3664_v37  ;;  %v6117_v31 = vrot.slane %v6115_v51, 4 }
 0x1bd   : > { %v3900_v57 = vrot.slane %v3898_v4, 7  ;;  %v3906_v15 = vshrl.u32 %v8467_v10, 16  ;;  %v3909_v16 = vshll.u32 %v8467_v10, 16  ;;  %5234 = vrot.lane.b32.xlu0 %v8294_v17, %s8758_s28  ;;  %v6567_v56 = vrot.slane %v6565_v35, 4 }
 0x1be   : > { %v3883_v23 = vrot.slane %v3881_v12, 7  ;;  %v3889_v24 = vshrl.u32 %v8465_v13, 16  ;;  %v3892_v25 = vshll.u32 %v8465_v13, 16  ;;  %v6119_v41 = vsel %vm8808_vm2, %v6117_v31, %v6118_v11 }
 0x1bf   : > { %v3903_v21 = vor.u32 %v3901_v9, %v3900_v57  ;;  %v3904_v52 = vrot.slane %v3900_v57, 4  ;;  %v3908_v29 = vrot.slane %v3906_v15, 7  ;;  %v8356_v48 = vcombine.low %v6116_v26, %v6119_v41  ;;  %v4436_v15 = vld [vmem:[#allocation3 + $0x1c] sm:$0xf]  ;;  %v4437_v26 = vld [vmem:[#allocation3 + $0x20] sm:$0x1] }
 0x1c0   : > { %v3886_v22 = vor.u32 %v3884_v8, %v3883_v23  ;;  %v3887_v32 = vrot.slane %v3883_v23, 4  ;;  %v3891_v34 = vrot.slane %v3889_v24, 7  ;;  %v6568_v58 = vshll.u32 %v6516_v19, 16 }
 0x1c1   : > { %v4194_v36 = vsel %vm10009_vm8, %v3903_v21, %v4193_v20  ;;  %v3911_v38 = vor.u32 %v3909_v16, %v3908_v29  ;;  %v3913_v39 = vrot.slane %v3908_v29, 4  ;;  %6273 = vrot.lane.b32.xlu0 %v8356_v48, %s8764_s20  ;;  %v6574_v63 = vshll.u32 %v6517_v42, 16  ;;  %v5472_v20 = vld [vmem:[#allocation3 + $0xc] sm:$0xf] }
 0x1c2   : > { %4195 = vst [vmem:[#allocation3 + $0x30] sm:$0xf] %v4194_v36  ;;  %v4187_v44 = vsel %vm10009_vm8, %v3886_v22, %v4186_v28  ;;  %v3894_v45 = vor.u32 %v3892_v25, %v3891_v34  ;;  %v3896_v46 = vrot.slane %v3891_v34, 4  ;;  %v6578_v1 = vshrl.u32 %v6517_v42, 16  ;;  %v5473_v28 = vld [vmem:[#allocation3 + $0x10] sm:$0xf] }
 0x1c3   : > { %4188 = vst [vmem:[#allocation3 + $0x24] sm:$0xf] %v4187_v44  ;;  %v3912_v54 = vsel %vm10015_vm9, %v3904_v52, %v3911_v38  ;;  %v4198_v55 = vsel %vm10022_vm10, %v3913_v39, %v4197_v33  ;;  %v6570_v3 = vrot.slane %v6568_v58, 5  ;;  %v6584_v5 = vshll.u32 %v6518_v49, 16  ;;  %v5474_v44 = vld [vmem:[#allocation3 + $0x14] sm:$0x1] }
 0x1c4   : > { %4196 = vst.msk [vmem:[#allocation3 + $0x34] sm:$0xf] %vm3707_vm1, %v3912_v54  ;;  %4199 = vst [vmem:[#allocation3 + $0x38] sm:$0x1] %v4198_v55  ;;  %v3895_v61 = vsel %vm10015_vm9, %v3887_v32, %v3894_v45  ;;  %v4191_v62 = vsel %vm10022_vm10, %v3896_v46, %v4190_v40  ;;  %v5545_v6 = vshrl.u32 %v5475_v53, 16  ;;  %v5548_v37 = vshll.u32 %v5475_v53, 16 }
 0x1c5   : > { %4189 = vst.msk [vmem:[#allocation3 + $0x28] sm:$0xf] %vm3707_vm1, %v3895_v61  ;;  %4192 = vst [vmem:[#allocation3 + $0x2c] sm:$0x1] %v4191_v62  ;;  %v6576_v7 = vrot.slane %v6574_v63, 5  ;;  %v6580_v51 = vrot.slane %v6578_v1, 4  ;;  %v6571_v10 = vor.u32 %v6570_v3, %v6567_v56 }
 0x1c6   : > { %v5554_v4 = vshll.u32 %v5476_v59, 16  ;;  %v5558_v9 = vshrl.u32 %v5476_v59, 16  ;;  %v5547_v11 = vrot.slane %v5545_v6, 4  ;;  %v5550_v12 = vrot.slane %v5548_v37, 5  ;;  %v4432_v55 = vld [vmem:[#allocation3 + $0xc] sm:$0xf] }
 0x1c7   : > { %v6581_v8 = vor.u32 %v6580_v51, %v6576_v7  ;;  %v5564_v57 = vshll.u32 %v5477_v60, 16  ;;  %v6572_v16 = vrot.slane %v6571_v10, 4  ;;  %v4526_v19 = vshrl.u32 %v4435_v2, 16 }
 0x1c8   : > { %v5556_v13 = vrot.slane %v5554_v4, 5  ;;  %v5560_v14 = vrot.slane %v5558_v9, 4  ;;  %v5551_v17 = vor.u32 %v5550_v12, %v5547_v11  ;;  %v6586_v24 = vrot.slane %v6584_v5, 5  ;;  %v4434_v11 = vld [vmem:[#allocation3 + $0x14] sm:$0x1] }
 0x1c9   : > { %v6582_v23 = vrot.slane %v6581_v8, 4  ;;  %v6577_v31 = vsel %vm8846_vm5, %v6572_v16, %v6576_v7  ;;  %v5566_v33 = vrot.slane %v5564_v57, 5  ;;  %v4528_v35 = vrot.slane %v4526_v19, 4 }
 0x1ca   : > { %v5561_v25 = vor.u32 %v5560_v14, %v5556_v13  ;;  %v5552_v52 = vrot.slane %v5551_v17, 4  ;;  %v4529_v36 = vshll.u32 %v4435_v2, 16  ;;  %v4535_v38 = vshll.u32 %v4436_v15, 16  ;;  %v4433_v2 = vld [vmem:[#allocation3 + $0x10] sm:$0xf] }
 0x1cb   : > { %v8690_v21 = vld [vmem:[#allocation3 + $0x30] sm:$0xff]   ;;  %v6587_v22 = vsel %vm8846_vm5, %v6582_v23, %v6586_v24  ;;  %v4539_v42 = vshrl.u32 %v4436_v15, 16  ;;  %v5521_v45 = vshrl.u32 %v5472_v20, 16  ;;  %v4545_v53 = vshll.u32 %v4437_v26, 16 }
 0x1cc   : > { %v8691_v29 = vld [vmem:[#allocation3 + $0x30] sm:$0xff]   ;;  %v5562_v32 = vrot.slane %v5561_v25, 4  ;;  %6455 = vrot.lane.b32.xlu0 %v8690_v21, %s8763_s17  ;;  %v8388_v34 = vcombine.low %v6577_v31, %v6587_v22  ;;  %v5557_v40 = vsel %vm8846_vm5, %v5552_v52, %v5556_v13  ;;  %v8719_v46 = vld [vmem:[#allocation3 + $0x24] sm:$0xff]   ;;  %v4531_v48 = vrot.slane %v4529_v36, 5 }
 0x1cd   : > { %v8715_v39 = vld [vmem:[#allocation3 + $0x30] sm:$0xff]   ;;  %5413 = vrot.lane.b32.xlu1 %v8691_v29, %s8759_s29  ;;  %v4537_v49 = vrot.slane %v4535_v38, 5  ;;  %v5524_v54 = vshll.u32 %v5472_v20, 16  ;;  %v4541_v58 = vrot.slane %v4539_v42, 4  ;;  %v5523_v59 = vrot.slane %v5521_v45, 4  ;;  %4416 = vst.msk [vmem:[#allocation4 + $0x18] sm:$0xff] %vm4412_vm11, %v8719_v46 }
 0x1ce   : > { %v5567_v41 = vsel %vm8846_vm5, %v5562_v32, %v5566_v33  ;;  %4417 = vst.msk [vmem:[#allocation4 + $0x20] sm:$0xff] %vm4412_vm11, %v8715_v39  ;;  %v5530_v60 = vshll.u32 %v5473_v28, 16  ;;  %v4532_v61 = vor.u32 %v4531_v48, %v4528_v35  ;;  %v5534_v63 = vshrl.u32 %v5473_v28, 16  ;;  %v8693_v7 = vld [vmem:[#allocation3 + $0x24] sm:$0xff]   ;;  %v7067_v22 = vld [vmem:[#allocation3 + $0x30] sm:$0xe] }
 0x1cf   : > { %v8325_v56 = vcombine.low %v5557_v40, %v5567_v41  ;;  %v5526_v62 = vrot.slane %v5524_v54, 5  ;;  %v5540_v1 = vshll.u32 %v5474_v44, 16  ;;  %v4542_v3 = vor.u32 %v4541_v58, %v4537_v49  ;;  %v8692_v12 = vld [vmem:[#allocation3 + $0x24] sm:$0xff]   ;;  %v7068_v38 = vld [vmem:[#allocation3 + $0x34] sm:$0xf] }
 0x1d0   : > { %6996 = vrot.lane.b32.xlu0 %v8388_v34, %s8766_s22  ;;  %v5532_v5 = vrot.slane %v5530_v60, 5  ;;  %v4502_v6 = vshrl.u32 %v4432_v55, 16  ;;  %v4505_v37 = vshll.u32 %v4432_v55, 16  ;;  %v4533_v51 = vrot.slane %v4532_v61, 4  ;;  %v7069_v45 = vld [vmem:[#allocation3 + $0x38] sm:$0x1] }
 0x1d1   : > { %5954 = vrot.lane.b32.xlu1 %v8325_v56, %s8761_s6  ;;  %v4547_v4 = vrot.slane %v4545_v53, 5  ;;  %v5527_v9 = vor.u32 %v5526_v62, %v5523_v59  ;;  %v5536_v10 = vrot.slane %v5534_v63, 4  ;;  %v4543_v8 = vrot.slane %v4542_v3, 4  ;;  %v6026_v54 = vld [vmem:[#allocation3 + $0x30] sm:$0xe] }
 0x1d2   : > { %v4504_v13 = vrot.slane %v4502_v6, 4  ;;  %v4507_v14 = vrot.slane %v4505_v37, 5  ;;  %v4511_v57 = vshll.u32 %v4433_v2, 16  ;;  %v5542_v17 = vrot.slane %v5540_v1, 5 }
 0x1d3   : > { %v5528_v15 = vrot.slane %v5527_v9, 4  ;;  %v5537_v16 = vor.u32 %v5536_v10, %v5532_v5  ;;  %v4515_v19 = vshrl.u32 %v4433_v2, 16  ;;  %v4538_v23 = vsel %vm8846_vm5, %v4533_v51, %v4537_v49 }
 0x1d4   : > { %5411 = vrot.lane.b32.xlu0 %v8693_v7, %s8759_s29  ;;  %v4548_v24 = vsel %vm8846_vm5, %v4543_v8, %v4547_v4  ;;  %v4508_v25 = vor.u32 %v4507_v14, %v4504_v13  ;;  %v4521_v26 = vshll.u32 %v4434_v11, 16  ;;  %v4513_v31 = vrot.slane %v4511_v57, 5 }
 0x1d5   : > { %6453 = vrot.lane.b32.xlu1 %v8692_v12, %s8763_s17  ;;  %v8262_v28 = vcombine.low %v4538_v23, %v4548_v24  ;;  %v5538_v29 = vrot.slane %v5537_v16, 4  ;;  %v5533_v34 = vsel %vm8846_vm5, %v5528_v15, %v5532_v5  ;;  %v4517_v36 = vrot.slane %v4515_v19, 4  ;;  %v4207_v12 = vld [vmem:[#allocation3 + $0x48] sm:$0xf]  ;;  %v4200_v16 = vld [vmem:[#allocation3 + $0x3c] sm:$0xf] }
 0x1d6   : > { %v8548_v20 = vpop.f32.mrb[8].mxu0  ;;  %v4509_v35 = vrot.slane %v4508_v25, 4  ;;  %v4523_v44 = vrot.slane %v4521_v26, 5  ;;  %v8406_v53 = vrot.slane %v7067_v22, 9  ;;  %v7173_v59 = vrot.slane %v7068_v38, 5 }
 0x1d7   : > { %v3598_v21 = vmul.f32 %v8548_v20, %v9985_v47  ;;  %v3486_v52 = vpop.f32.mrb[9].mxu0  ;;  %v5543_v42 = vsel %vm8846_vm5, %v5538_v29, %v5542_v17  ;;  %v4518_v58 = vor.u32 %v4517_v36, %v4513_v31  ;;  %v7176_v63 = vrot.slane %v7069_v45, 5  ;;  %v4211_v24 = vld [vmem:[#allocation3 + $0x50] sm:$0x1]  ;;  %v4204_v22 = vld [vmem:[#allocation3 + $0x44] sm:$0x1] }
 0x1d8   : > { %v3596_v32 = vmul.f32 %v9985_v47, %v3486_v52  ;;  %v8549_v33 = vpop.f32.mrb[10].mxu0  ;;  %v8324_v49 = vcombine.low %v5533_v34, %v5543_v42  ;;  %v4514_v62 = vsel %vm8846_vm5, %v4509_v35, %v4513_v31  ;;  %v8343_v5 = vrot.slane %v6026_v54, 9  ;;  %v4987_v38 = vld [vmem:[#allocation3 + $0x34] sm:$0xf]  ;;  %v7064_v45 = vld [vmem:[#allocation3 + $0x24] sm:$0xe] }
 0x1d9   : > { %v3637_v39 = vadd.f32 %v9992_v50, %v3598_v21  ;;  %v3599_v40 = vmul.f32 %v8549_v33, %v9985_v47  ;;  %v3489_v41 = vpop.f32.mrb[11].mxu0  ;;  %4913 = vrot.lane.b32.xlu1 %v8262_v28, %s8756_s26  ;;  %v4519_v3 = vrot.slane %v4518_v58, 4  ;;  %v7174_v7 = vsel %vm8808_vm2, %v8406_v53, %v7173_v59  ;;  %v6028_v21 = vld [vmem:[#allocation3 + $0x38] sm:$0x1] }
 0x1da   : > { %v3635_v46 = vadd.f32 %v9992_v50, %v3596_v32  ;;  %v3597_v48 = vmul.f32 %v9985_v47, %v3489_v41  ;;  %5952 = vrot.lane.b32.xlu0 %v8324_v49, %s8761_s6  ;;  %v6027_v47 = vld [vmem:[#allocation3 + $0x34] sm:$0xf]  ;;  %v7175_v51 = vrot.slane %v7173_v59, 4  ;;  %v4986_v32 = vld [vmem:[#allocation3 + $0x30] sm:$0xe]  ;;  %vm6321_vm0 = vcmask 392512  }
 0x1db   : > { %v3669_v55 = vmax.f32 %v3637_v39, 0.0  ;;  %v3638_v56 = vadd.f32 %v9992_v50, %v3599_v40  ;;  %v6136_v10 = vrot.slane %v6027_v47, 5  ;;  %v4988_v39 = vld [vmem:[#allocation3 + $0x38] sm:$0x1] }
 0x1dc   : > { %v3667_v60 = vmax.f32 %v3635_v46, 0.0  ;;  %v3636_v61 = vadd.f32 %v9992_v50, %v3597_v48  ;;  %v4524_v50 = vsel %vm8846_vm5, %v4519_v3, %v4523_v44  ;;  %v7177_v19 = vsel %vm8808_vm2, %v7175_v51, %v7176_v63  ;;  %v7065_v46 = vld [vmem:[#allocation3 + $0x28] sm:$0xf]  ;;  %v4985_v63 = vld [vmem:[#allocation3 + $0x2c] sm:$0x1] }
 0x1dd   : > { %v8470_v1 = vpack.c.bf16 %v3669_v55, %v3669_v55  ;;  %v3670_v2 = vmax.f32 %v3638_v56, 0.0  ;;  %v8261_v14 = vcombine.low %v4514_v62, %v4524_v50  ;;  %v8422_v26 = vcombine.low %v7174_v7, %v7177_v19  ;;  %v7066_v55 = vld [vmem:[#allocation3 + $0x2c] sm:$0x1]  ;;  %v4983_v56 = vld [vmem:[#allocation3 + $0x24] sm:$0xe] }
 0x1de   : > { %v8468_v6 = vpack.c.bf16 %v3667_v60, %v3667_v60  ;;  %v3668_v37 = vmax.f32 %v3636_v61, 0.0  ;;  %v6137_v35 = vsel %vm8808_vm2, %v8343_v5, %v6136_v10  ;;  %v6138_v36 = vrot.slane %v6136_v10, 4  ;;  %v4984_v62 = vld [vmem:[#allocation3 + $0x28] sm:$0xf]  ;;  %v6023_v5 = vld [vmem:[#allocation3 + $0x24] sm:$0xe] }
 0x1df   : > { %v3932_v4 = vshrl.u32 %v8470_v1, 16  ;;  %v8471_v9 = vpack.c.bf16 %v3670_v2, %v3670_v2  ;;  %v3935_v11 = vshll.u32 %v8470_v1, 16  ;;  %4911 = vrot.lane.b32.xlu1 %v8261_v14, %s8756_s26  ;;  %7321 = vrot.lane.b32.xlu0 %v8422_v26, %s8765_s21  ;;  %v6139_v44 = vrot.slane %v6028_v21, 5 }
 0x1e0   : > { %v3915_v8 = vshrl.u32 %v8468_v6, 16  ;;  %v8469_v13 = vpack.c.bf16 %v3668_v37, %v3668_v37  ;;  %v3918_v15 = vshll.u32 %v8468_v6, 16  ;;  %v5100_v61 = vrot.slane %v4987_v38, 5  ;;  %v6024_v6 = vld [vmem:[#allocation3 + $0x28] sm:$0xf] }
 0x1e1   : > { %v3934_v57 = vrot.slane %v3932_v4, 7  ;;  %v3940_v17 = vshrl.u32 %v8471_v9, 16  ;;  %v3943_v23 = vshll.u32 %v8471_v9, 16  ;;  %v6140_v60 = vsel %vm8808_vm2, %v6138_v36, %v6139_v44  ;;  %v6025_v4 = vld [vmem:[#allocation3 + $0x2c] sm:$0x1] }
 0x1e2   : > { %v3917_v20 = vrot.slane %v3915_v8, 7  ;;  %v3923_v25 = vshrl.u32 %v8469_v13, 16  ;;  %v3926_v31 = vshll.u32 %v8469_v13, 16  ;;  %v8359_v2 = vcombine.low %v6137_v35, %v6140_v60  ;;  %v5483_v36 = vld [vmem:[#allocation3 + $0x38] sm:$0x1] }
 0x1e3   : > { %v3937_v52 = vor.u32 %v3935_v11, %v3934_v57  ;;  %v3938_v28 = vrot.slane %v3934_v57, 4  ;;  %v3942_v29 = vrot.slane %v3940_v17, 7  ;;  %v8280_v3 = vrot.slane %v4986_v32, 9  ;;  %v6522_v11 = vld [vmem:[#allocation3 + $0x30] sm:$0xf] }
 0x1e4   : > { %v3920_v33 = vor.u32 %v3918_v15, %v3917_v20  ;;  %v3925_v34 = vrot.slane %v3923_v25, 7  ;;  %v3921_v48 = vrot.slane %v3917_v20, 4  ;;  %v5102_v37 = vrot.slane %v5100_v61, 4  ;;  %6279 = vrot.lane.b32.xlu1 %v8359_v2, %s8764_s20  ;;  %v6523_v57 = vld [vmem:[#allocation3 + $0x34] sm:$0xf] }
 0x1e5   : > { %v4208_v40 = vsel %vm10009_vm8, %v3937_v52, %v4207_v12  ;;  %v3945_v41 = vor.u32 %v3943_v23, %v3942_v29  ;;  %v3947_v42 = vrot.slane %v3942_v29, 4  ;;  %v5103_v7 = vrot.slane %v4988_v39, 5  ;;  %v6524_v20 = vld [vmem:[#allocation3 + $0x38] sm:$0x1]  ;;  %v5481_v23 = vld [vmem:[#allocation3 + $0x30] sm:$0xf] }
 0x1e6   : > { %4209 = vst [vmem:[#allocation3 + $0x48] sm:$0xf] %v4208_v40  ;;  %v4201_v49 = vsel %vm10009_vm8, %v3920_v33, %v4200_v16  ;;  %v3928_v53 = vor.u32 %v3926_v31, %v3925_v34  ;;  %v3930_v54 = vrot.slane %v3925_v34, 4  ;;  %v7166_v51 = vrot.slane %v7065_v46, 5  ;;  %v5482_v52 = vld [vmem:[#allocation3 + $0x34] sm:$0xf] }
 0x1e7   : > { %4202 = vst [vmem:[#allocation3 + $0x3c] sm:$0xf] %v4201_v49  ;;  %v3946_v58 = vsel %vm10015_vm9, %v3938_v28, %v3945_v41  ;;  %v4212_v59 = vsel %vm10022_vm10, %v3947_v42, %v4211_v24  ;;  %v5101_v9 = vsel %vm8808_vm2, %v8280_v3, %v5100_v61  ;;  %v8405_v50 = vrot.slane %v7064_v45, 9  ;;  %v4441_v42 = vld [vmem:[#allocation3 + $0x30] sm:$0xf] }
 0x1e8   : > { %4210 = vst.msk [vmem:[#allocation3 + $0x4c] sm:$0xf] %vm3707_vm1, %v3946_v58  ;;  %4213 = vst [vmem:[#allocation3 + $0x50] sm:$0x1] %v4212_v59  ;;  %v3929_v47 = vsel %vm10015_vm9, %v3921_v48, %v3928_v53  ;;  %v4205_v1 = vsel %vm10022_vm10, %v3930_v54, %v4204_v22  ;;  %v5093_v10 = vrot.slane %v4984_v62, 5  ;;  %v5104_v12 = vsel %vm8808_vm2, %v5102_v37, %v5103_v7 }
 0x1e9   : > { %4203 = vst.msk [vmem:[#allocation3 + $0x40] sm:$0xf] %vm3707_vm1, %v3929_v47  ;;  %4206 = vst [vmem:[#allocation3 + $0x44] sm:$0x1] %v4205_v1  ;;  %v7168_v8 = vrot.slane %v7166_v51, 4  ;;  %v7169_v13 = vrot.slane %v7066_v55, 5  ;;  %v8296_v15 = vcombine.low %v5101_v9, %v5104_v12  ;;  %v7167_v24 = vsel %vm8808_vm2, %v8405_v50, %v7166_v51 }
 0x1ea   : > { %v8279_v14 = vrot.slane %v4983_v56, 9  ;;  %v5095_v16 = vrot.slane %v5093_v10, 4  ;;  %v5096_v17 = vrot.slane %v4985_v63, 5  ;;  %v6129_v19 = vrot.slane %v6024_v6, 5  ;;  %v4442_v63 = vld [vmem:[#allocation3 + $0x34] sm:$0xf] }
 0x1eb   : > { %v7170_v25 = vsel %vm8808_vm2, %v7168_v8, %v7169_v13  ;;  %v8342_v26 = vrot.slane %v6023_v5, 9  ;;  %v6613_v21 = vshrl.u32 %v6522_v11, 16  ;;  %5238 = vrot.lane.b32.xlu0 %v8296_v15, %s8758_s28  ;;  %v6132_v22 = vrot.slane %v6025_v4, 5  ;;  %v4443_v37 = vld [vmem:[#allocation3 + $0x38] sm:$0x1] }
 0x1ec   : > { %v5094_v28 = vsel %vm8808_vm2, %v8279_v14, %v5093_v10  ;;  %v5097_v29 = vsel %vm8808_vm2, %v5095_v16, %v5096_v17  ;;  %v6131_v31 = vrot.slane %v6129_v19, 4  ;;  %v8421_v32 = vcombine.low %v7167_v24, %v7170_v25  ;;  %v5478_v15 = vld [vmem:[#allocation3 + $0x24] sm:$0xf] }
 0x1ed   : > { %v8295_v33 = vcombine.low %v5094_v28, %v5097_v29  ;;  %v6130_v34 = vsel %vm8808_vm2, %v8342_v26, %v6129_v19  ;;  %v6615_v35 = vrot.slane %v6613_v21, 4  ;;  %v6616_v39 = vshll.u32 %v6522_v11, 16 }
 0x1ee   : > { %v6133_v38 = vsel %vm8808_vm2, %v6131_v31, %v6132_v22  ;;  %v6622_v40 = vshll.u32 %v6523_v57, 16  ;;  %v6626_v41 = vshrl.u32 %v6523_v57, 16  ;;  %v6632_v46 = vshll.u32 %v6524_v20, 16 }
 0x1ef   : > { %5236 = vrot.lane.b32.xlu1 %v8295_v33, %s8758_s28  ;;  %v8358_v44 = vcombine.low %v6130_v34, %v6133_v38  ;;  %v8695_v45 = vld [vmem:[#allocation3 + $0x48] sm:$0xff]   ;;  %v5593_v48 = vshrl.u32 %v5481_v23, 16  ;;  %v5596_v49 = vshll.u32 %v5481_v23, 16  ;;  %7319 = vrot.lane.b32.xlu0 %v8421_v32, %s8765_s21  ;;  %v6618_v53 = vrot.slane %v6616_v39, 5  ;;  %v10200_v33 = vld [vmem:[%s11191_s2] ss:$0 sm:$0xff] }
 0x1f0   : > { %v6624_v54 = vrot.slane %v6622_v40, 5  ;;  %v6628_v55 = vrot.slane %v6626_v41, 4  ;;  %v5602_v56 = vshll.u32 %v5482_v52, 16  ;;  %v8723_v58 = vld [vmem:[#allocation3 + $0x48] sm:$0xff]   ;;  %v6634_v59 = vrot.slane %v6632_v46, 5  ;;  %v8725_v4 = vld [vmem:[#allocation3 + $0x3c] sm:$0xff]  }
 0x1f1   : > { %v5595_v60 = vrot.slane %v5593_v48, 4  ;;  %v5598_v61 = vrot.slane %v5596_v49, 5  ;;  %v5606_v62 = vshrl.u32 %v5482_v52, 16  ;;  %v6619_v47 = vor.u32 %v6618_v53, %v6615_v35  ;;  %4419 = vst.msk [vmem:[#allocation4 + $0x30] sm:$0xff] %vm4412_vm11, %v8723_v58  ;;  %v8694_v9 = vld [vmem:[#allocation3 + $0x48] sm:$0xff]   ;;  %4418 = vst.msk [vmem:[#allocation4 + $0x28] sm:$0xff] %vm4412_vm11, %v8725_v4 }
 0x1f2   : > { %v6629_v1 = vor.u32 %v6628_v55, %v6624_v54  ;;  %v5604_v2 = vrot.slane %v5602_v56, 5  ;;  %v5612_v3 = vshll.u32 %v5483_v36, 16  ;;  %v4574_v7 = vshrl.u32 %v4441_v42, 16  ;;  %v5479_v23 = vld [vmem:[#allocation3 + $0x28] sm:$0xf] }
 0x1f3   : > { %5417 = vrot.lane.b32.xlu1 %v8695_v45, %s8759_s29  ;;  %v5599_v5 = vor.u32 %v5598_v61, %v5595_v60  ;;  %v5608_v6 = vrot.slane %v5606_v62, 4  ;;  %v4577_v51 = vshll.u32 %v4441_v42, 16  ;;  %6277 = vrot.lane.b32.xlu0 %v8358_v44, %s8764_s20  ;;  %v6620_v50 = vrot.slane %v6619_v47, 4  ;;  %v10207_v45 = vld [vmem:[%s11192_s3] ss:$0 sm:$0xff] }
 0x1f4   : > { %v6630_v10 = vrot.slane %v6629_v1, 4  ;;  %v5614_v11 = vrot.slane %v5612_v3, 5  ;;  %v4583_v12 = vshll.u32 %v4442_v63, 16  ;;  %v4576_v14 = vrot.slane %v4574_v7, 4  ;;  %v5480_v62 = vld [vmem:[#allocation3 + $0x2c] sm:$0x1] }
 0x1f5   : > { %v5600_v8 = vrot.slane %v5599_v5, 4  ;;  %v5609_v13 = vor.u32 %v5608_v6, %v5604_v2  ;;  %v4579_v57 = vrot.slane %v4577_v51, 5  ;;  %v6625_v16 = vsel %vm8846_vm5, %v6620_v50, %v6624_v54  ;;  %v8696_v3 = vld [vmem:[#allocation3 + $0x3c] sm:$0xff]  }
 0x1f6   : > { %v6635_v17 = vsel %vm8846_vm5, %v6630_v10, %v6634_v59  ;;  %v4585_v19 = vrot.slane %v4583_v12, 5  ;;  %v4587_v20 = vshrl.u32 %v4442_v63, 16  ;;  %v4593_v29 = vshll.u32 %v4443_v37, 16  ;;  %v8697_v5 = vld [vmem:[#allocation3 + $0x3c] sm:$0xff]  }
 0x1f7   : > { %v8390_v24 = vcombine.low %v6625_v16, %v6635_v17  ;;  %v5605_v25 = vsel %vm8846_vm5, %v5600_v8, %v5604_v2  ;;  %v5610_v26 = vrot.slane %v5609_v13, 4  ;;  %v4580_v21 = vor.u32 %v4579_v57, %v4576_v14  ;;  %6459 = vrot.lane.b32.xlu0 %v8694_v9, %s8763_s17 }
 0x1f8   : > { %v4589_v28 = vrot.slane %v4587_v20, 4  ;;  %v5569_v31 = vshrl.u32 %v5478_v15, 16  ;;  %v5572_v22 = vshll.u32 %v5478_v15, 16  ;;  %v5578_v38 = vshll.u32 %v5479_v23, 16  ;;  %v4221_v15 = vld [vmem:[#allocation3 + $0x60] sm:$0xf] }
 0x1f9   : > { %v5615_v32 = vsel %vm8846_vm5, %v5610_v26, %v5614_v11  ;;  %v4581_v36 = vrot.slane %v4580_v21, 4  ;;  %v4595_v44 = vrot.slane %v4593_v29, 5  ;;  %v5582_v47 = vshrl.u32 %v5479_v23, 16  ;;  %v6519_v23 = vld [vmem:[#allocation3 + $0x24] sm:$0xf] }
 0x1fa   : > { %v8552_v52 = vpop.f32.mrb[12].mxu0  ;;  %v8327_v39 = vcombine.low %v5605_v25, %v5615_v32  ;;  %v4590_v42 = vor.u32 %v4589_v28, %v4585_v19  ;;  %v5571_v54 = vrot.slane %v5569_v31, 4  ;;  %v5574_v59 = vrot.slane %v5572_v22, 5  ;;  %v4214_v25 = vld [vmem:[#allocation3 + $0x54] sm:$0xf] }
 0x1fb   : > { %v3602_v34 = vmul.f32 %v10200_v33, %v8552_v52  ;;  %v3502_v35 = vpop.f32.mrb[13].mxu0  ;;  %v4586_v53 = vsel %vm8846_vm5, %v4581_v36, %v4585_v19  ;;  %7000 = vrot.lane.b32.xlu0 %v8390_v24, %s8766_s22  ;;  %v5580_v63 = vrot.slane %v5578_v38, 5  ;;  %v5584_v9 = vrot.slane %v5582_v47, 4  ;;  %v4225_v29 = vld [vmem:[#allocation3 + $0x68] sm:$0x1] }
 0x1fc   : > { %v3600_v40 = vmul.f32 %v10200_v33, %v3502_v35  ;;  %v8553_v41 = vpop.f32.mrb[14].mxu0  ;;  %5958 = vrot.lane.b32.xlu1 %v8327_v39, %s8761_s6  ;;  %v4591_v58 = vrot.slane %v4590_v42, 4  ;;  %v5575_v37 = vor.u32 %v5574_v59, %v5571_v54  ;;  %v5588_v12 = vshll.u32 %v5480_v62, 16  ;;  %v4218_v38 = vld [vmem:[#allocation3 + $0x5c] sm:$0x1] }
 0x1fd   : > { %v3641_v46 = vadd.f32 %v10207_v45, %v3602_v34  ;;  %v3603_v48 = vmul.f32 %v10200_v33, %v8553_v41  ;;  %v3505_v49 = vpop.f32.mrb[15].mxu0  ;;  %v5585_v57 = vor.u32 %v5584_v9, %v5580_v63  ;;  %v6589_v39 = vshrl.u32 %v6519_v23, 16  ;;  %v7075_v47 = vld [vmem:[#allocation3 + $0x50] sm:$0x1] }
 0x1fe   : > { %v3639_v55 = vadd.f32 %v10207_v45, %v3600_v40  ;;  %v3601_v56 = vmul.f32 %v10200_v33, %v3505_v49  ;;  %v4596_v6 = vsel %vm8846_vm5, %v4591_v58, %v4595_v44  ;;  %v5576_v11 = vrot.slane %v5575_v37, 4  ;;  %v4438_v58 = vld [vmem:[#allocation3 + $0x24] sm:$0xf] }
 0x1ff   : > { %v3673_v60 = vmax.f32 %v3641_v46, 0.0  ;;  %v3642_v61 = vadd.f32 %v10207_v45, %v3603_v48  ;;  %v8264_v4 = vcombine.low %v4586_v53, %v4596_v6  ;;  %5415 = vrot.lane.b32.xlu0 %v8697_v5, %s8759_s29  ;;  %v5586_v52 = vrot.slane %v5585_v57, 4  ;;  %v6520_v46 = vld [vmem:[#allocation3 + $0x28] sm:$0xf]  ;;  %v6521_v48 = vld [vmem:[#allocation3 + $0x2c] sm:$0x1] }
 0x200   : > { %v3671_v1 = vmax.f32 %v3639_v55, 0.0  ;;  %v3640_v2 = vadd.f32 %v10207_v45, %v3601_v56  ;;  %6457 = vrot.lane.b32.xlu1 %v8696_v3, %s8763_s17  ;;  %v5581_v20 = vsel %vm8846_vm5, %v5576_v11, %v5580_v63  ;;  %v5590_v32 = vrot.slane %v5588_v12, 5  ;;  %v7073_v56 = vld [vmem:[#allocation3 + $0x48] sm:$0xe]  ;;  %v7074_v63 = vld [vmem:[#allocation3 + $0x4c] sm:$0xf] }
 0x201   : > { %v8474_v7 = vpack.c.bf16 %v3673_v60, %v3673_v60  ;;  %v3674_v51 = vmax.f32 %v3642_v61, 0.0  ;;  %v6591_v62 = vrot.slane %v6589_v39, 4  ;;  %v6592_v3 = vshll.u32 %v6519_v23, 16  ;;  %v4439_v6 = vld [vmem:[#allocation3 + $0x28] sm:$0xf] }
 0x202   : > { %v8472_v50 = vpack.c.bf16 %v3671_v1, %v3671_v1  ;;  %v3672_v10 = vmax.f32 %v3640_v2, 0.0  ;;  %v5591_v44 = vsel %vm8846_vm5, %v5586_v52, %v5590_v32  ;;  %v6598_v5 = vshll.u32 %v6520_v46, 16  ;;  %v4440_v12 = vld [vmem:[#allocation3 + $0x2c] sm:$0x1] }
 0x203   : > { %v3966_v8 = vshrl.u32 %v8474_v7, 16  ;;  %v3969_v13 = vshll.u32 %v8474_v7, 16  ;;  %v8475_v14 = vpack.c.bf16 %v3674_v51, %v3674_v51  ;;  %v8326_v55 = vcombine.low %v5581_v20, %v5591_v44  ;;  %v4993_v23 = vld [vmem:[#allocation3 + $0x4c] sm:$0xf] }
 0x204   : > { %v3949_v16 = vshrl.u32 %v8472_v50, 16  ;;  %v3952_v17 = vshll.u32 %v8472_v50, 16  ;;  %v8473_v19 = vpack.c.bf16 %v3672_v10, %v3672_v10  ;;  %4917 = vrot.lane.b32.xlu1 %v8264_v4, %s8756_s26  ;;  %v6602_v51 = vshrl.u32 %v6520_v46, 16 }
 0x205   : > { %v3968_v24 = vrot.slane %v3966_v8, 7  ;;  %v3974_v26 = vshrl.u32 %v8475_v14, 16  ;;  %v3977_v21 = vshll.u32 %v8475_v14, 16  ;;  %5956 = vrot.lane.b32.xlu0 %v8326_v55, %s8761_s6  ;;  %v6608_v4 = vshll.u32 %v6521_v48, 16 }
 0x206   : > { %v3951_v28 = vrot.slane %v3949_v16, 7  ;;  %v3957_v31 = vshrl.u32 %v8473_v19, 16  ;;  %v3960_v22 = vshll.u32 %v8473_v19, 16  ;;  %v6594_v9 = vrot.slane %v6592_v3, 5 }
 0x207   : > { %v3971_v34 = vor.u32 %v3969_v13, %v3968_v24  ;;  %v3972_v35 = vrot.slane %v3968_v24, 4  ;;  %v3976_v36 = vrot.slane %v3974_v26, 7  ;;  %v6600_v50 = vrot.slane %v6598_v5, 5  ;;  %v4994_v24 = vld [vmem:[#allocation3 + $0x50] sm:$0x1] }
 0x208   : > { %v3954_v40 = vor.u32 %v3952_v17, %v3951_v28  ;;  %v3955_v41 = vrot.slane %v3951_v28, 4  ;;  %v3959_v42 = vrot.slane %v3957_v31, 7  ;;  %v8408_v10 = vrot.slane %v7073_v56, 9  ;;  %v6032_v28 = vld [vmem:[#allocation3 + $0x48] sm:$0xe] }
 0x209   : > { %v4222_v49 = vsel %vm10009_vm8, %v3971_v34, %v4221_v15  ;;  %v3979_v53 = vor.u32 %v3977_v21, %v3976_v36  ;;  %v3981_v54 = vrot.slane %v3976_v36, 4  ;;  %v7187_v11 = vrot.slane %v7074_v63, 5  ;;  %v4992_v15 = vld [vmem:[#allocation3 + $0x48] sm:$0xe] }
 0x20a   : > { %4223 = vst [vmem:[#allocation3 + $0x60] sm:$0xf] %v4222_v49  ;;  %v4215_v59 = vsel %vm10009_vm8, %v3954_v40, %v4214_v25  ;;  %v3962_v60 = vor.u32 %v3960_v22, %v3959_v42  ;;  %v3964_v61 = vrot.slane %v3959_v42, 4  ;;  %v6604_v8 = vrot.slane %v6602_v51, 4  ;;  %v7071_v49 = vld [vmem:[#allocation3 + $0x40] sm:$0xf] }
 0x20b   : > { %4216 = vst [vmem:[#allocation3 + $0x54] sm:$0xf] %v4215_v59  ;;  %v3980_v1 = vsel %vm10015_vm9, %v3972_v35, %v3979_v53  ;;  %v4226_v2 = vsel %vm10022_vm10, %v3981_v54, %v4225_v29  ;;  %v6610_v13 = vrot.slane %v6608_v4, 5  ;;  %v7190_v14 = vrot.slane %v7075_v47, 5  ;;  %v6033_v29 = vld [vmem:[#allocation3 + $0x4c] sm:$0xf] }
 0x20c   : > { %4224 = vst.msk [vmem:[#allocation3 + $0x64] sm:$0xf] %vm3707_vm1, %v3980_v1  ;;  %4227 = vst [vmem:[#allocation3 + $0x68] sm:$0x1] %v4226_v2  ;;  %v3963_v37 = vsel %vm10015_vm9, %v3955_v41, %v3962_v60  ;;  %v4219_v7 = vsel %vm10022_vm10, %v3964_v61, %v4218_v38  ;;  %v4550_v57 = vshrl.u32 %v4438_v58, 16  ;;  %v6595_v16 = vor.u32 %v6594_v9, %v6591_v62 }
 0x20d   : > { %4217 = vst.msk [vmem:[#allocation3 + $0x58] sm:$0xf] %vm3707_vm1, %v3963_v37  ;;  %4220 = vst [vmem:[#allocation3 + $0x5c] sm:$0x1] %v4219_v7  ;;  %v7188_v17 = vsel %vm8808_vm2, %v8408_v10, %v7187_v11  ;;  %v7189_v19 = vrot.slane %v7187_v11, 4  ;;  %v4553_v20 = vshll.u32 %v4438_v58, 16  ;;  %v6605_v25 = vor.u32 %v6604_v8, %v6600_v50 }
 0x20e   : > { %v4552_v26 = vrot.slane %v4550_v57, 4  ;;  %v4559_v21 = vshll.u32 %v4439_v6, 16  ;;  %v4563_v52 = vshrl.u32 %v4439_v6, 16  ;;  %v6596_v31 = vrot.slane %v6595_v16, 4  ;;  %v6034_v35 = vld [vmem:[#allocation3 + $0x50] sm:$0x1] }
 0x20f   : > { %v7191_v22 = vsel %vm8808_vm2, %v7189_v19, %v7190_v14  ;;  %v4555_v32 = vrot.slane %v4553_v20, 5  ;;  %v4569_v34 = vshll.u32 %v4440_v12, 16  ;;  %v6606_v36 = vrot.slane %v6605_v25, 4  ;;  %v7070_v41 = vld [vmem:[#allocation3 + $0x3c] sm:$0xe]  ;;  %v10265_v19 = vpop.permute.xlu0 %4909 }
 0x210   : > { %v8424_v38 = vcombine.low %v7188_v17, %v7191_v22  ;;  %v4561_v39 = vrot.slane %v4559_v21, 5  ;;  %v4565_v40 = vrot.slane %v4563_v52, 4  ;;  %v6601_v42 = vsel %vm8846_vm5, %v6596_v31, %v6600_v50  ;;  %v7072_v53 = vld [vmem:[#allocation3 + $0x44] sm:$0x1]  ;;  %v6029_v59 = vld [vmem:[#allocation3 + $0x3c] sm:$0xe] }
 0x211   : > { %v4556_v44 = vor.u32 %v4555_v32, %v4552_v26  ;;  %v4571_v46 = vrot.slane %v4569_v34, 5  ;;  %v8282_v48 = vrot.slane %v4992_v15, 9  ;;  %v6611_v54 = vsel %vm8846_vm5, %v6606_v36, %v6610_v13  ;;  %v6030_v47 = vld [vmem:[#allocation3 + $0x40] sm:$0xf]  ;;  %v6031_v6 = vld [vmem:[#allocation3 + $0x44] sm:$0x1] }
 0x212   : > { %7325 = vrot.lane.b32.xlu0 %v8424_v38, %s8765_s21  ;;  %v4566_v55 = vor.u32 %v4565_v40, %v4561_v39  ;;  %v5114_v56 = vrot.slane %v4993_v23, 5  ;;  %v5117_v58 = vrot.slane %v4994_v24, 5  ;;  %v8389_v60 = vcombine.low %v6601_v42, %v6611_v54  ;;  %v4989_v9 = vld [vmem:[#allocation3 + $0x3c] sm:$0xe]  ;;  %v4990_v8 = vld [vmem:[#allocation3 + $0x40] sm:$0xf] }
 0x213   : > { %v4557_v61 = vrot.slane %v4556_v44, 4  ;;  %v8345_v62 = vrot.slane %v6032_v28, 9  ;;  %v6150_v63 = vrot.slane %v6033_v29, 5  ;;  %v6153_v5 = vrot.slane %v6034_v35, 5  ;;  %v4991_v13 = vld [vmem:[#allocation3 + $0x44] sm:$0x1] }
 0x214   : > { %v4567_v1 = vrot.slane %v4566_v55, 4  ;;  %v5115_v2 = vsel %vm8808_vm2, %v8282_v48, %v5114_v56  ;;  %v5116_v3 = vrot.slane %v5114_v56, 4  ;;  %6998 = vrot.lane.b32.xlu1 %v8389_v60, %s8766_s22  ;;  %v8407_v4 = vrot.slane %v7070_v41, 9  ;;  %v6528_v17 = vld [vmem:[#allocation3 + $0x48] sm:$0xf]  ;;  %v8729_v20 = vld [vmem:[#allocation3 + $0x60] sm:$0xff]  }
 0x215   : > { %v4562_v37 = vsel %vm8846_vm5, %v4557_v61, %v4561_v39  ;;  %v6151_v7 = vsel %vm8808_vm2, %v8345_v62, %v6150_v63  ;;  %v6152_v51 = vrot.slane %v6150_v63, 4  ;;  %v7180_v11 = vrot.slane %v7071_v49, 5  ;;  %v6529_v31 = vld [vmem:[#allocation3 + $0x4c] sm:$0xf]  ;;  %4421 = vst.msk [vmem:[#allocation4 + $0x40] sm:$0xff] %vm4412_vm11, %v8729_v20  ;;  %v8731_v54 = vld [vmem:[#allocation3 + $0x54] sm:$0xff]   ;;  %v10284_v61 = vpop.permute.xlu0 %5230 }
 0x216   : > { %v4572_v50 = vsel %vm8846_vm5, %v4567_v1, %v4571_v46  ;;  %v5118_v10 = vsel %vm8808_vm2, %v5116_v3, %v5117_v58  ;;  %v7183_v12 = vrot.slane %v7072_v53, 5  ;;  %v8344_v16 = vrot.slane %v6029_v59, 9  ;;  %v6530_v35 = vld [vmem:[#allocation3 + $0x50] sm:$0x1]  ;;  %v5487_v42 = vld [vmem:[#allocation3 + $0x48] sm:$0xf] }
 0x217   : > { %v8263_v14 = vcombine.low %v4562_v37, %v4572_v50  ;;  %v8298_v57 = vcombine.low %v5115_v2, %v5118_v10  ;;  %v6154_v15 = vsel %vm8808_vm2, %v6152_v51, %v6153_v5  ;;  %v7181_v24 = vsel %vm8808_vm2, %v8407_v4, %v7180_v11  ;;  %v5488_v53 = vld [vmem:[#allocation3 + $0x4c] sm:$0xf]  ;;  %v5489_v60 = vld [vmem:[#allocation3 + $0x50] sm:$0x1]  ;;  %4420 = vst.msk [vmem:[#allocation4 + $0x38] sm:$0xff] %vm4412_vm11, %v8731_v54 }
 0x218   : > { %v8361_v23 = vcombine.low %v6151_v7, %v6154_v15  ;;  %v7182_v25 = vrot.slane %v7180_v11, 4  ;;  %v6143_v26 = vrot.slane %v6030_v47, 5  ;;  %v6146_v21 = vrot.slane %v6031_v6, 5  ;;  %v8698_v11 = vld [vmem:[#allocation3 + $0x60] sm:$0xff]   ;;  %4958 = vst.msk [vmem:[#allocation4] sm:$0xff] %vm4957_vm12, %v10265_v19 }
 0x219   : > { %4915 = vrot.lane.b32.xlu1 %v8263_v14, %s8756_s26  ;;  %5242 = vrot.lane.b32.xlu0 %v8298_v57, %s8758_s28  ;;  %v8281_v52 = vrot.slane %v4989_v9, 9  ;;  %v5107_v28 = vrot.slane %v4990_v8, 5  ;;  %v5110_v29 = vrot.slane %v4991_v13, 5  ;;  %v6661_v36 = vshrl.u32 %v6528_v17, 16  ;;  %5279 = vst.msk [vmem:[#allocation4] sm:$0xff] %vm5278_vm13, %v10284_v61 }
 0x21a   : > { %v7184_v22 = vsel %vm8808_vm2, %v7182_v25, %v7183_v12  ;;  %v6144_v32 = vsel %vm8808_vm2, %v8344_v16, %v6143_v26  ;;  %v6145_v34 = vrot.slane %v6143_v26, 4  ;;  %v6664_v41 = vshll.u32 %v6528_v17, 16  ;;  %v8699_v12 = vld [vmem:[#allocation3 + $0x60] sm:$0xff]  }
 0x21b   : > { %v8423_v38 = vcombine.low %v7181_v24, %v7184_v22  ;;  %v5108_v39 = vsel %vm8808_vm2, %v8281_v52, %v5107_v28  ;;  %v5109_v40 = vrot.slane %v5107_v28, 4  ;;  %v6663_v46 = vrot.slane %v6661_v36, 4 }
 0x21c   : > { %v6147_v44 = vsel %vm8808_vm2, %v6145_v34, %v6146_v21  ;;  %v6670_v48 = vshll.u32 %v6529_v31, 16  ;;  %v6674_v49 = vshrl.u32 %v6529_v31, 16  ;;  %v6666_v58 = vrot.slane %v6664_v41, 5 }
 0x21d   : > { %6283 = vrot.lane.b32.xlu1 %v8361_v23, %s8764_s20  ;;  %7323 = vrot.lane.b32.xlu0 %v8423_v38, %s8765_s21  ;;  %v8360_v55 = vcombine.low %v6144_v32, %v6147_v44  ;;  %v5111_v56 = vsel %vm8808_vm2, %v5109_v40, %v5110_v29  ;;  %v6680_v59 = vshll.u32 %v6530_v35, 16  ;;  %v5641_v1 = vshrl.u32 %v5487_v42, 16  ;;  %v4447_v32 = vld [vmem:[#allocation3 + $0x48] sm:$0xf] }
 0x21e   : > { %v8297_v62 = vcombine.low %v5108_v39, %v5111_v56  ;;  %v6672_v63 = vrot.slane %v6670_v48, 5  ;;  %v6676_v47 = vrot.slane %v6674_v49, 4  ;;  %v6667_v3 = vor.u32 %v6666_v58, %v6663_v46 }
 0x21f   : > { %v6682_v5 = vrot.slane %v6680_v59, 5  ;;  %v5644_v6 = vshll.u32 %v5487_v42, 16  ;;  %v5650_v37 = vshll.u32 %v5488_v53, 16  ;;  %v5643_v4 = vrot.slane %v5641_v1, 4  ;;  %v10295_v52 = vpop.permute.xlu0 %6451  ;;  %v4448_v59 = vld [vmem:[#allocation3 + $0x4c] sm:$0xf] }
 0x220   : > { %v6677_v51 = vor.u32 %v6676_v47, %v6672_v63  ;;  %v5654_v9 = vshrl.u32 %v5488_v53, 16  ;;  %v5660_v50 = vshll.u32 %v5489_v60, 16  ;;  %v6668_v8 = vrot.slane %v6667_v3, 4 }
 0x221   : > { %6281 = vrot.lane.b32.xlu0 %v8360_v55, %s8764_s20  ;;  %5240 = vrot.lane.b32.xlu1 %v8297_v62, %s8758_s28  ;;  %v5646_v13 = vrot.slane %v5644_v6, 5  ;;  %v5652_v14 = vrot.slane %v5650_v37, 5  ;;  %v4622_v46 = vshrl.u32 %v4447_v32, 16  ;;  %v4625_v54 = vshll.u32 %v4447_v32, 16  ;;  %v4235_v62 = vld [vmem:[#allocation3 + $0x78] sm:$0xf] }
 0x222   : > { %v6678_v16 = vrot.slane %v6677_v51, 4  ;;  %v5656_v17 = vrot.slane %v5654_v9, 4  ;;  %v5662_v20 = vrot.slane %v5660_v50, 5  ;;  %v6673_v24 = vsel %vm8846_vm5, %v6668_v8, %v6672_v63  ;;  %v4239_v9 = vld [vmem:[#allocation3 + $0x80] sm:$0x1] }
 0x223   : > { %v5647_v25 = vor.u32 %v5646_v13, %v5643_v4  ;;  %v10312_v60 = vpop.permute.xlu0 %5407  ;;  %v4624_v1 = vrot.slane %v4622_v46, 4  ;;  %v4627_v51 = vrot.slane %v4625_v54, 5  ;;  %v6525_v54 = vld [vmem:[#allocation3 + $0x3c] sm:$0xf] }
 0x224   : > { %v6683_v28 = vsel %vm8846_vm5, %v6678_v16, %v6682_v5  ;;  %v5657_v29 = vor.u32 %v5656_v17, %v5652_v14  ;;  %v4228_v5 = vld [vmem:[#allocation3 + $0x6c] sm:$0xf]  ;;  %v5484_v17 = vld [vmem:[#allocation3 + $0x3c] sm:$0xf]  ;;  %5456 = vst.msk [vmem:[#allocation4] sm:$0xff] %vm5455_vm14, %v10312_v60 }
 0x225   : > { %6463 = vrot.lane.b32.xlu0 %v8698_v11, %s8763_s17  ;;  %5421 = vrot.lane.b32.xlu1 %v8699_v12, %s8759_s29  ;;  %v8392_v34 = vcombine.low %v6673_v24, %v6683_v28  ;;  %v5648_v35 = vrot.slane %v5647_v25, 4  ;;  %v4449_v11 = vld [vmem:[#allocation3 + $0x50] sm:$0x1]  ;;  %v4631_v12 = vshll.u32 %v4448_v59, 16  ;;  %v4628_v16 = vor.u32 %v4627_v51, %v4624_v1  ;;  %v7080_v51 = vld [vmem:[#allocation3 + $0x64] sm:$0xf] }
 0x226   : > { %v5658_v39 = vrot.slane %v5657_v29, 4 }
 0x227   : > { %v5653_v42 = vsel %vm8846_vm5, %v5648_v35, %v5652_v14  ;;  %v10319_v25 = vrot.slane %v4631_v12, 5  ;;  %v10324_v29 = vrot.slane %v4628_v16, 4  ;;  %v4635_v35 = vshrl.u32 %v4448_v59, 16  ;;  %v6526_v59 = vld [vmem:[#allocation3 + $0x40] sm:$0xf] }
 0x228   : > { %v5663_v48 = vsel %vm8846_vm5, %v5658_v39, %v5662_v20  ;;  %v8714_v39 = vld [vmem:[%s11193_s4 + $0x8] sm:$0xff]  }
 0x229   : > { %7004 = vrot.lane.b32.xlu0 %v8392_v34, %s8766_s22  ;;  %v8329_v55 = vcombine.low %v5653_v42, %v5663_v48  ;;  %v4634_v42 = vsel %vm8846_vm5, %v10324_v29, %v10319_v25  ;;  %v7081_v12 = vld [vmem:[#allocation3 + $0x68] sm:$0x1] }
 0x22b   : > { %5962 = vrot.lane.b32.xlu1 %v8329_v55, %s8761_s6 }
 0x22e   : > { %v8556_v2 = vpop.f32.mrb[16].mxu0 }
 0x22f   : > { %v3518_v7 = vpop.f32.mrb[17].mxu0  ;;  %v3606_v57 = vmul.f32 %v10200_v33, %v8556_v2  ;;  %v8713_v2 = vld [vmem:[%s11193_s4] sm:$0xff]  }
 0x230   : > { %v8557_v10 = vpop.f32.mrb[18].mxu0  ;;  %v3604_v23 = vmul.f32 %v10200_v33, %v3518_v7  ;;  %v8701_v7 = vld [vmem:[#allocation3 + $0x54] sm:$0xff]   ;;  %8570 = vmatprep.subr.bf16.mxu1 %v8713_v2 }
 0x231   : > { %v3521_v15 = vpop.f32.mrb[19].mxu0  ;;  %v3645_v26 = vadd.f32 %v10207_v45, %v3606_v57  ;;  %v3607_v21 = vmul.f32 %v10200_v33, %v8557_v10  ;;  %v4232_v57 = vld [vmem:[#allocation3 + $0x74] sm:$0x1]  ;;  %5419 = vrot.lane.b32.xlu0 %v8701_v7, %s8759_s29  ;;  %8571 = vmatpush3.bf16.msra.mxu1 %v8713_v2  ;;  %v7079_v7 = vld [vmem:[#allocation3 + $0x60] sm:$0xe] }
 0x232   : > { %v3643_v31 = vadd.f32 %v10207_v45, %v3604_v23  ;;  %v3605_v22 = vmul.f32 %v10200_v33, %v3521_v15  ;;  %v8700_v15 = vld [vmem:[#allocation3 + $0x54] sm:$0xff]   ;;  %8572 = vmatprep.subr.bf16.mxu1 %v8714_v39 }
 0x233   : > { %v3677_v36 = vmax.f32 %v3645_v26, 0.0  ;;  %v3646_v38 = vadd.f32 %v10207_v45, %v3607_v21  ;;  %6461 = vrot.lane.b32.xlu1 %v8700_v15, %s8763_s17  ;;  %v8716_v2 = vld [vmem:[%s11193_s4 + $0x10] sm:$0xff]  }
 0x234   : > { %v3675_v40 = vmax.f32 %v3643_v31, 0.0  ;;  %v3644_v41 = vadd.f32 %v10207_v45, %v3605_v22  ;;  %v10326_v31 = vpop.permute.xlu0 %7317 }
 0x235   : > { %v8478_v44 = vpack.c.bf16 %v3677_v36, %v3677_v36  ;;  %v3678_v33 = vmax.f32 %v3646_v38, 0.0  ;;  %v5485_v36 = vld [vmem:[#allocation3 + $0x40] sm:$0xf]  ;;  %v10330_v38 = vpop.permute.xlu1 %5409  ;;  %8573 = vmatpush3.bf16.msra.mxu1 %v8714_v39 }
 0x236   : > { %v8476_v49 = vpack.c.bf16 %v3675_v40, %v3675_v40  ;;  %v3676_v53 = vmax.f32 %v3644_v41, 0.0  ;;  %8574 = vmatprep.subr.bf16.mxu1 %v8716_v2 }
 0x237   : > { %v4000_v45 = vshrl.u32 %v8478_v44, 16  ;;  %v4003_v56 = vshll.u32 %v8478_v44, 16  ;;  %v8479_v58 = vpack.c.bf16 %v3678_v33, %v3678_v33  ;;  %v4641_v44 = vshll.u32 %v4449_v11, 16  ;;  %v5486_v33 = vld [vmem:[#allocation3 + $0x44] sm:$0x1] }
 0x238   : > { %v3983_v63 = vshrl.u32 %v8476_v49, 16  ;;  %v3986_v47 = vshll.u32 %v8476_v49, 16  ;;  %v8477_v19 = vpack.c.bf16 %v3676_v53, %v3676_v53  ;;  %v4637_v49 = vrot.slane %v4635_v35, 4 }
 0x239   : > { %v4002_v3 = vrot.slane %v4000_v45, 7  ;;  %v4008_v6 = vshrl.u32 %v8479_v58, 16  ;;  %v4011_v37 = vshll.u32 %v8479_v58, 16  ;;  %v5617_v53 = vshrl.u32 %v5484_v17, 16  ;;  %v10350_v1 = vpop.permute.xlu1 %6275  ;;  %8575 = vmatpush3.bf16.msra.mxu1 %v8716_v2  ;;  %v6038_v2 = vld [vmem:[#allocation3 + $0x60] sm:$0xe] }
 0x23a   : > { %v3985_v4 = vrot.slane %v3983_v63, 7  ;;  %v3991_v50 = vshrl.u32 %v8477_v19, 16  ;;  %v3994_v10 = vshll.u32 %v8477_v19, 16  ;;  %v4643_v55 = vrot.slane %v4641_v44, 5  ;;  %v6527_v19 = vld [vmem:[#allocation3 + $0x44] sm:$0x1] }
 0x23b   : > { %v4005_v8 = vor.u32 %v4003_v56, %v4002_v3  ;;  %v4006_v13 = vrot.slane %v4002_v3, 4  ;;  %v4010_v14 = vrot.slane %v4008_v6, 7  ;;  %v5620_v45 = vshll.u32 %v5484_v17, 16 }
 0x23c   : > { %v3988_v20 = vor.u32 %v3986_v47, %v3985_v4  ;;  %v3989_v23 = vrot.slane %v3985_v4, 4  ;;  %v3993_v24 = vrot.slane %v3991_v50, 7  ;;  %v5626_v56 = vshll.u32 %v5485_v36, 16  ;;  %v10357_v4 = vpop.permute.xlu0 %5234 }
 0x23d   : > { %v4236_v26 = vsel %vm10009_vm8, %v4005_v8, %v4235_v62  ;;  %v4013_v21 = vor.u32 %v4011_v37, %v4010_v14  ;;  %v4015_v28 = vrot.slane %v4010_v14, 4  ;;  %v5630_v58 = vshrl.u32 %v5485_v36, 16  ;;  %v10361_v35 = vpop.permute.xlu1 %5232 }
 0x23e   : > { %4237 = vst [vmem:[#allocation3 + $0x78] sm:$0xf] %v4236_v26  ;;  %v4229_v22 = vsel %vm10009_vm8, %v3988_v20, %v4228_v5  ;;  %v3996_v32 = vor.u32 %v3994_v10, %v3993_v24  ;;  %v3998_v34 = vrot.slane %v3993_v24, 4  ;;  %v4638_v62 = vor.u32 %v4637_v49, %v10319_v25  ;;  %v4444_v20 = vld [vmem:[#allocation3 + $0x3c] sm:$0xf] }
 0x23f   : > { %4230 = vst [vmem:[#allocation3 + $0x6c] sm:$0xf] %v4229_v22  ;;  %v4014_v40 = vsel %vm10015_vm9, %v4006_v13, %v4013_v21  ;;  %v4240_v41 = vsel %vm10022_vm10, %v4015_v28, %v4239_v9  ;;  %v5619_v63 = vrot.slane %v5617_v53, 4  ;;  %v5636_v47 = vshll.u32 %v5486_v33, 16  ;;  %v4446_v28 = vld [vmem:[#allocation3 + $0x44] sm:$0x1] }
 0x240   : > { %4238 = vst.msk [vmem:[#allocation3 + $0x7c] sm:$0xf] %vm3707_vm1, %v4014_v40  ;;  %4241 = vst [vmem:[#allocation3 + $0x80] sm:$0x1] %v4240_v41  ;;  %v3997_v46 = vsel %vm10015_vm9, %v3989_v23, %v3996_v32  ;;  %v4233_v48 = vsel %vm10022_vm10, %v3998_v34, %v4232_v57  ;;  %v5622_v3 = vrot.slane %v5620_v45, 5  ;;  %v5628_v5 = vrot.slane %v5626_v56, 5 }
 0x241   : > { %4231 = vst.msk [vmem:[#allocation3 + $0x70] sm:$0xf] %vm3707_vm1, %v3997_v46  ;;  %4234 = vst [vmem:[#allocation3 + $0x74] sm:$0x1] %v4233_v48  ;;  %v5632_v6 = vrot.slane %v5630_v58, 4  ;;  %v6637_v37 = vshrl.u32 %v6525_v54, 16 }
 0x242   : > { %v4639_v9 = vrot.slane %v4638_v62, 4  ;;  %v5638_v50 = vrot.slane %v5636_v47, 5  ;;  %v6640_v10 = vshll.u32 %v6525_v54, 16  ;;  %v6646_v11 = vshll.u32 %v6526_v59, 16  ;;  %v4445_v23 = vld [vmem:[#allocation3 + $0x40] sm:$0xf] }
 0x243   : > { %v5623_v8 = vor.u32 %v5622_v3, %v5619_v63  ;;  %v5633_v13 = vor.u32 %v5632_v6, %v5628_v5  ;;  %v6639_v14 = vrot.slane %v6637_v37, 4  ;;  %v6650_v57 = vshrl.u32 %v6526_v59, 16  ;;  %v4998_v49 = vld [vmem:[#allocation3 + $0x60] sm:$0xe]  ;;  %v4999_v53 = vld [vmem:[#allocation3 + $0x64] sm:$0xf] }
 0x244   : > { %v4644_v15 = vsel %vm8846_vm5, %v4639_v9, %v4643_v55  ;;  %v6642_v61 = vrot.slane %v6640_v10, 5  ;;  %v6648_v16 = vrot.slane %v6646_v11, 5  ;;  %v6656_v17 = vshll.u32 %v6527_v19, 16  ;;  %v5000_v59 = vld [vmem:[#allocation3 + $0x68] sm:$0x1] }
 0x245   : > { %v8266_v24 = vcombine.low %v4634_v42, %v4644_v15  ;;  %v5624_v25 = vrot.slane %v5623_v8, 4  ;;  %v5634_v26 = vrot.slane %v5633_v13, 4  ;;  %v6652_v21 = vrot.slane %v6650_v57, 4  ;;  %v10368_v42 = vpop.permute.xlu0 %6273  ;;  %v6039_v3 = vld [vmem:[#allocation3 + $0x64] sm:$0xf] }
 0x246   : > { %v6643_v29 = vor.u32 %v6642_v61, %v6639_v14  ;;  %v6658_v22 = vrot.slane %v6656_v17, 5  ;;  %v8410_v32 = vrot.slane %v7079_v7, 9  ;;  %v7201_v34 = vrot.slane %v7080_v51, 5  ;;  %v6040_v9 = vld [vmem:[#allocation3 + $0x68] sm:$0x1] }
 0x247   : > { %4921 = vrot.lane.b32.xlu1 %v8266_v24, %s8756_s26  ;;  %v5629_v36 = vsel %vm8846_vm5, %v5624_v25, %v5628_v5  ;;  %v5639_v39 = vsel %vm8846_vm5, %v5634_v26, %v5638_v50  ;;  %v6653_v40 = vor.u32 %v6652_v21, %v6648_v16  ;;  %v7204_v41 = vrot.slane %v7081_v12, 5  ;;  %v8733_v54 = vld [vmem:[#allocation3 + $0x78] sm:$0xff]   ;;  %v10377_v5 = vpop.permute.xlu1 %5413  ;;  %v7076_v50 = vld [vmem:[#allocation3 + $0x54] sm:$0xe] }
 0x248   : > { %v8328_v44 = vcombine.low %v5629_v36, %v5639_v39  ;;  %v6644_v33 = vrot.slane %v6643_v29, 4  ;;  %v7202_v46 = vsel %vm8808_vm2, %v8410_v32, %v7201_v34  ;;  %v7203_v48 = vrot.slane %v7201_v34, 4  ;;  %4423 = vst.msk [vmem:[#allocation4 + $0x50] sm:$0xff] %vm4412_vm11, %v8733_v54  ;;  %v7077_v14 = vld [vmem:[#allocation3 + $0x58] sm:$0xf]  ;;  %v8734_v57 = vld [vmem:[#allocation3 + $0x6c] sm:$0xff]  }
 0x249   : > { %v6654_v55 = vrot.slane %v6653_v40, 4  ;;  %v4598_v45 = vshrl.u32 %v4444_v20, 16  ;;  %v4601_v56 = vshll.u32 %v4444_v20, 16  ;;  %v4607_v58 = vshll.u32 %v4445_v23, 16  ;;  %v10382_v10 = vpop.permute.xlu0 %6455  ;;  %v7078_v20 = vld [vmem:[#allocation3 + $0x5c] sm:$0x1] }
 0x24a   : > { %5960 = vrot.lane.b32.xlu0 %v8328_v44, %s8761_s6  ;;  %v6649_v62 = vsel %vm8846_vm5, %v6644_v33, %v6648_v16  ;;  %v7205_v63 = vsel %vm8808_vm2, %v7203_v48, %v7204_v41  ;;  %v4611_v47 = vshrl.u32 %v4445_v23, 16  ;;  %v4617_v19 = vshll.u32 %v4446_v28, 16  ;;  %v6035_v26 = vld [vmem:[#allocation3 + $0x54] sm:$0xe]  ;;  %4422 = vst.msk [vmem:[#allocation4 + $0x48] sm:$0xff] %vm4412_vm11, %v8734_v57  ;;  %v10393_v39 = vpop.f32.mrb[20].mxu0 }
 0x24b   : > { %v6659_v6 = vsel %vm8846_vm5, %v6654_v55, %v6658_v22  ;;  %v8426_v37 = vcombine.low %v7202_v46, %v7205_v63  ;;  %v4600_v7 = vrot.slane %v4598_v45, 4  ;;  %v4603_v51 = vrot.slane %v4601_v56, 5  ;;  %v10386_v21 = vpop.permute.xlu1 %5954  ;;  %v6036_v34 = vld [vmem:[#allocation3 + $0x58] sm:$0xf]  ;;  %v6037_v36 = vld [vmem:[#allocation3 + $0x5c] sm:$0x1] }
 0x24c   : > { %v8391_v11 = vcombine.low %v6649_v62, %v6659_v6  ;;  %v4609_v12 = vrot.slane %v4607_v58, 5  ;;  %v4613_v8 = vrot.slane %v4611_v47, 4  ;;  %v4619_v13 = vrot.slane %v4617_v19, 5  ;;  %v4995_v46 = vld [vmem:[#allocation3 + $0x54] sm:$0xe]  ;;  %v10397_v48 = vpop.f32.mrb[21].mxu0 }
 0x24d   : > { %v4604_v15 = vor.u32 %v4603_v51, %v4600_v7  ;;  %v8284_v61 = vrot.slane %v4998_v49, 9  ;;  %v5128_v16 = vrot.slane %v4999_v53, 5  ;;  %v5131_v17 = vrot.slane %v5000_v59, 5  ;;  %v4996_v55 = vld [vmem:[#allocation3 + $0x58] sm:$0xf]  ;;  %v10403_v45 = vpop.f32.mrb[22].mxu0  ;;  %v10405_v56 = vpop.permute.xlu0 %6996 }
 0x24e   : > { %7002 = vrot.lane.b32.xlu1 %v8391_v11, %s8766_s22  ;;  %7329 = vrot.lane.b32.xlu0 %v8426_v37, %s8765_s21  ;;  %v4614_v23 = vor.u32 %v4613_v8, %v4609_v12  ;;  %v8347_v24 = vrot.slane %v6038_v2, 9  ;;  %v6164_v25 = vrot.slane %v6039_v3, 5  ;;  %v6167_v32 = vrot.slane %v6040_v9, 5  ;;  %v8717_v58 = vld [vmem:[%s11193_s4 + $0x18] sm:$0xff]   ;;  %v6534_v2 = vld [vmem:[#allocation3 + $0x60] sm:$0xf] }
 0x24f   : > { %v4605_v28 = vrot.slane %v4604_v15, 4  ;;  %v5129_v29 = vsel %vm8808_vm2, %v8284_v61, %v5128_v16  ;;  %v5130_v22 = vrot.slane %v5128_v16, 4  ;;  %v8409_v33 = vrot.slane %v7076_v50, 9  ;;  %v4997_v19 = vld [vmem:[#allocation3 + $0x5c] sm:$0x1]  ;;  %v10414_v3 = vpop.f32.mrb[23].mxu0  ;;  %v10416_v6 = vpop.permute.xlu1 %6453  ;;  %8576 = vmatprep.subr.bf16.mxu1 %v8717_v58 }
 0x250   : > { %v4615_v40 = vrot.slane %v4614_v23, 4  ;;  %v6165_v41 = vsel %vm8808_vm2, %v8347_v24, %v6164_v25  ;;  %v6166_v44 = vrot.slane %v6164_v25, 4  ;;  %v7194_v53 = vrot.slane %v7077_v14, 5  ;;  %v6535_v50 = vld [vmem:[#allocation3 + $0x64] sm:$0xf]  ;;  %8577 = vmatpush3.bf16.msra.mxu1 %v8717_v58 }
 0x251   : > { %v4610_v49 = vsel %vm8846_vm5, %v4605_v28, %v4609_v12  ;;  %v5132_v60 = vsel %vm8808_vm2, %v5130_v22, %v5131_v17  ;;  %v7197_v54 = vrot.slane %v7078_v20, 5  ;;  %v8346_v47 = vrot.slane %v6035_v26, 9  ;;  %v6536_v14 = vld [vmem:[#allocation3 + $0x68] sm:$0x1]  ;;  %v5493_v17 = vld [vmem:[#allocation3 + $0x60] sm:$0xf] }
 0x252   : > { %v4620_v59 = vsel %vm8846_vm5, %v4615_v40, %v4619_v13  ;;  %v8300_v62 = vcombine.low %v5129_v29, %v5132_v60  ;;  %v6168_v63 = vsel %vm8808_vm2, %v6166_v44, %v6167_v32  ;;  %v7195_v51 = vsel %vm8808_vm2, %v8409_v33, %v7194_v53  ;;  %v5412_v33 = vpop.permute.xlu0 %5411 }
 0x253   : > { %v8265_v37 = vcombine.low %v4610_v49, %v4620_v59  ;;  %v8363_v7 = vcombine.low %v6165_v41, %v6168_v63  ;;  %v7196_v9 = vrot.slane %v7194_v53, 4  ;;  %v6157_v11 = vrot.slane %v6036_v34, 5  ;;  %v4914_v26 = vpop.permute.xlu1 %4913  ;;  %v5494_v41 = vld [vmem:[#allocation3 + $0x64] sm:$0xf] }
 0x254   : > { %5246 = vrot.lane.b32.xlu0 %v8300_v62, %s8758_s28  ;;  %v6160_v12 = vrot.slane %v6037_v36, 5  ;;  %v8283_v8 = vrot.slane %v4995_v46, 9  ;;  %v5121_v13 = vrot.slane %v4996_v55, 5  ;;  %v5124_v15 = vrot.slane %v4997_v19, 5  ;;  %4960 = vst.msk [vmem:[#allocation4 + $0x10] sm:$0xff] %vm4957_vm12, %v4914_v26 }
 0x255   : > { %4919 = vrot.lane.b32.xlu1 %v8265_v37, %s8756_s26  ;;  %v7198_v57 = vsel %vm8808_vm2, %v7196_v9, %v7197_v54  ;;  %v6709_v61 = vshrl.u32 %v6534_v2, 16  ;;  %v6712_v16 = vshll.u32 %v6534_v2, 16  ;;  %v6158_v23 = vsel %vm8808_vm2, %v8346_v47, %v6157_v11  ;;  %5281 = vst.msk [vmem:[#allocation4 + $0x10] sm:$0xff] %vm5278_vm13, %v10357_v4  ;;  %v5495_v54 = vld [vmem:[#allocation3 + $0x68] sm:$0x1]  ;;  %v8703_v4 = vld [vmem:[#allocation3 + $0x78] sm:$0xff]  }
 0x256   : > { %v8425_v20 = vcombine.low %v7195_v51, %v7198_v57  ;;  %v6159_v24 = vrot.slane %v6157_v11, 4  ;;  %v5122_v25 = vsel %vm8808_vm2, %v8283_v8, %v5121_v13  ;;  %v5123_v28 = vrot.slane %v5121_v13, 4  ;;  %5458 = vst.msk [vmem:[#allocation4 + $0x10] sm:$0xff] %vm5455_vm14, %v5412_v33  ;;  %v10442_v51 = vld [vmem:[%s11191_s2] ss:$0 sm:$0xff]  ;;  %v8704_v11 = vld [vmem:[#allocation3 + $0x78] sm:$0xff]  }
 0x257   : > { %v6711_v29 = vrot.slane %v6709_v61, 4  ;;  %v6714_v22 = vrot.slane %v6712_v16, 5  ;;  %v6718_v32 = vshll.u32 %v6535_v50, 16  ;;  %v6722_v36 = vshrl.u32 %v6535_v50, 16  ;;  %v4453_v57 = vld [vmem:[#allocation3 + $0x60] sm:$0xf] }
 0x258   : > { %7327 = vrot.lane.b32.xlu0 %v8425_v20, %s8765_s21  ;;  %v6161_v34 = vsel %vm8808_vm2, %v6159_v24, %v6160_v12  ;;  %v6728_v40 = vshll.u32 %v6536_v14, 16  ;;  %v5689_v44 = vshrl.u32 %v5493_v17, 16  ;;  %v5125_v49 = vsel %vm8808_vm2, %v5123_v28, %v5124_v15  ;;  %v10454_v16 = vld [vmem:[%s11192_s3] ss:$0 sm:$0xff]  ;;  %v4912_v20 = vpop.permute.xlu1 %4911 }
 0x259   : > { %6287 = vrot.lane.b32.xlu1 %v8363_v7, %s8764_s20  ;;  %v8362_v46 = vcombine.low %v6158_v23, %v6161_v34  ;;  %v6715_v60 = vor.u32 %v6714_v22, %v6711_v29  ;;  %v6720_v53 = vrot.slane %v6718_v32, 5  ;;  %v8299_v55 = vcombine.low %v5122_v25, %v5125_v49  ;;  %4959 = vst.msk [vmem:[#allocation4 + $0x8] sm:$0xff] %vm4957_vm12, %v4912_v20  ;;  %v4455_v20 = vld [vmem:[#allocation3 + $0x68] sm:$0x1] }
 0x25a   : > { %v6724_v58 = vrot.slane %v6722_v36, 4  ;;  %v6730_v59 = vrot.slane %v6728_v40, 5  ;;  %v5691_v62 = vrot.slane %v5689_v44, 4  ;;  %v5692_v47 = vshll.u32 %v5493_v17, 16  ;;  %v10458_v17 = vpop.permute.xlu0 %5952  ;;  %5280 = vst.msk [vmem:[#allocation4 + $0x8] sm:$0xff] %vm5278_vm13, %v10361_v35 }
 0x25b   : > { %v6716_v63 = vrot.slane %v6715_v60, 4  ;;  %v5698_v19 = vshll.u32 %v5494_v41, 16  ;;  %v5702_v2 = vshrl.u32 %v5494_v41, 16  ;;  %v5708_v7 = vshll.u32 %v5495_v54, 16  ;;  %5457 = vst.msk [vmem:[#allocation4 + $0x8] sm:$0xff] %vm5455_vm14, %v10330_v38 }
 0x25c   : > { %6285 = vrot.lane.b32.xlu0 %v8362_v46, %s8764_s20  ;;  %v6725_v37 = vor.u32 %v6724_v58, %v6720_v53  ;;  %v3610_v9 = vmul.f32 %v10442_v51, %v10393_v39  ;;  %v3608_v50 = vmul.f32 %v10442_v51, %v10397_v48  ;;  %v5694_v8 = vrot.slane %v5692_v47, 5  ;;  %v4454_v60 = vld [vmem:[#allocation3 + $0x64] sm:$0xf]  ;;  %6001 = vst.msk [vmem:[#allocation4] sm:$0xff] %vm6000_vm15, %v10458_v17 }
 0x25d   : > { %5244 = vrot.lane.b32.xlu1 %v8299_v55, %s8758_s28  ;;  %v6721_v12 = vsel %vm8846_vm5, %v6716_v63, %v6720_v53  ;;  %v5700_v13 = vrot.slane %v5698_v19, 5  ;;  %v5704_v14 = vrot.slane %v5702_v2, 4  ;;  %v5710_v61 = vrot.slane %v5708_v7, 5  ;;  %v4242_v47 = vld [vmem:[#allocation3 + $0x84] sm:$0xf]  ;;  %6002 = vst.msk [vmem:[#allocation4 + $0x8] sm:$0xff] %vm6000_vm15, %v10386_v21 }
 0x25e   : > { %v6726_v15 = vrot.slane %v6725_v37, 4  ;;  %v3649_v39 = vadd.f32 %v10454_v16, %v3610_v9  ;;  %v3647_v48 = vadd.f32 %v10454_v16, %v3608_v50  ;;  %v5695_v23 = vor.u32 %v5694_v8, %v5691_v62  ;;  %v4249_v62 = vld [vmem:[#allocation3 + $0x90] sm:$0xf]  ;;  %6322 = vst.msk [vmem:[#allocation4] sm:$0xff] %vm6321_vm0, %v10368_v42  ;;  %6323 = vst.msk [vmem:[#allocation4 + $0x8] sm:$0xff] %vm6321_vm0, %v10350_v1 }
 0x25f   : > { %v5705_v24 = vor.u32 %v5704_v14, %v5700_v13  ;;  %v3611_v25 = vmul.f32 %v10442_v51, %v10403_v45  ;;  %v3609_v26 = vmul.f32 %v10442_v51, %v10414_v3  ;;  %v4670_v32 = vshrl.u32 %v4453_v57, 16  ;;  %6500 = vst.msk [vmem:[#allocation4] sm:$0xff] %vm6499_vm3, %v10295_v52  ;;  %6501 = vst.msk [vmem:[#allocation4 + $0x8] sm:$0xff] %vm6499_vm3, %v10416_v6  ;;  %v5501_v1 = vld [vmem:[#allocation3 + $0x80] sm:$0x1] }
 0x260   : > { %6467 = vrot.lane.b32.xlu0 %v8703_v4, %s8763_s17  ;;  %v6731_v28 = vsel %vm8846_vm5, %v6726_v15, %v6730_v59  ;;  %v3681_v29 = vmax.f32 %v3649_v39, 0.0  ;;  %v3679_v22 = vmax.f32 %v3647_v48, 0.0  ;;  %v5696_v45 = vrot.slane %v5695_v23, 4  ;;  %v10480_v59 = vpop.permute.xlu0 %7321  ;;  %v8706_v4 = vld [vmem:[#allocation3 + $0x6c] sm:$0xff]   ;;  %7045 = vst.msk [vmem:[#allocation4] sm:$0xff] %vm7044_vm4, %v10405_v56 }
 0x261   : > { %5425 = vrot.lane.b32.xlu1 %v8704_v11, %s8759_s29  ;;  %v8394_v34 = vcombine.low %v6721_v12, %v6731_v28  ;;  %v5706_v36 = vrot.slane %v5705_v24, 4  ;;  %v3650_v3 = vadd.f32 %v10454_v16, %v3611_v25  ;;  %v3648_v44 = vadd.f32 %v10454_v16, %v3609_v26  ;;  %v8705_v48 = vld [vmem:[#allocation3 + $0x6c] sm:$0xff]   ;;  %v5490_v28 = vld [vmem:[#allocation3 + $0x54] sm:$0xf]  ;;  %7366 = vst.msk [vmem:[#allocation4] sm:$0xff] %vm11195_vm6, %v10326_v31 }
 0x262   : > { %v8482_v40 = vpack.c.bf16 %v3681_v29, %v3681_v29  ;;  %v8480_v41 = vpack.c.bf16 %v3679_v22, %v3679_v22  ;;  %v4672_v33 = vrot.slane %v4670_v32, 4  ;;  %v5701_v46 = vsel %vm8846_vm5, %v5696_v45, %v5700_v13  ;;  %v4253_v32 = vld [vmem:[#allocation3 + $0x98] sm:$0x1] }
 0x263   : > { %v5711_v35 = vsel %vm8846_vm5, %v5706_v36, %v5710_v61  ;;  %v3682_v49 = vmax.f32 %v3650_v3, 0.0  ;;  %v4673_v53 = vshll.u32 %v4453_v57, 16  ;;  %v3680_v2 = vmax.f32 %v3648_v44, 0.0  ;;  %v10489_v36 = vpop.permute.xlu1 %6279 }
 0x264   : > { %7008 = vrot.lane.b32.xlu0 %v8394_v34, %s8766_s22  ;;  %v8331_v54 = vcombine.low %v5701_v46, %v5711_v35  ;;  %v4034_v55 = vshrl.u32 %v8482_v40, 16  ;;  %v4037_v58 = vshll.u32 %v8482_v40, 16  ;;  %v4017_v38 = vshrl.u32 %v8480_v41, 16  ;;  %v10491_v3 = vpop.permute.xlu0 %5238  ;;  %v4246_v46 = vld [vmem:[#allocation3 + $0x8c] sm:$0x1] }
 0x265   : > { %v4020_v63 = vshll.u32 %v8480_v41, 16  ;;  %v8483_v19 = vpack.c.bf16 %v3682_v49, %v3682_v49  ;;  %v4675_v37 = vrot.slane %v4673_v53, 5  ;;  %v4679_v50 = vshll.u32 %v4454_v60, 16 }
 0x266   : > { %5966 = vrot.lane.b32.xlu1 %v8331_v54, %s8761_s6  ;;  %v4036_v7 = vrot.slane %v4034_v55, 7  ;;  %v4019_v9 = vrot.slane %v4017_v38, 7  ;;  %v4683_v11 = vshrl.u32 %v4454_v60, 16  ;;  %v8481_v13 = vpack.c.bf16 %v3680_v2, %v3680_v2  ;;  %v5491_v60 = vld [vmem:[#allocation3 + $0x58] sm:$0xf] }
 0x267   : > { %v4042_v12 = vshrl.u32 %v8483_v19, 16  ;;  %v4045_v8 = vshll.u32 %v8483_v19, 16  ;;  %v4676_v14 = vor.u32 %v4675_v37, %v4672_v33  ;;  %v4681_v34 = vrot.slane %v4679_v50, 5 }
 0x268   : > { %v4039_v57 = vor.u32 %v4037_v58, %v4036_v7  ;;  %v4040_v15 = vrot.slane %v4036_v7, 4  ;;  %v4022_v61 = vor.u32 %v4020_v63, %v4019_v9  ;;  %v4023_v39 = vrot.slane %v4019_v9, 4  ;;  %5423 = vrot.lane.b32.xlu0 %v8706_v4, %s8759_s29  ;;  %v5492_v63 = vld [vmem:[#allocation3 + $0x5c] sm:$0x1]  ;;  %v10500_v7 = vpop.permute.xlu0 %7319 }
 0x269   : > { %v4044_v23 = vrot.slane %v4042_v12, 7  ;;  %v4025_v24 = vshrl.u32 %v8481_v13, 16  ;;  %v4028_v25 = vshll.u32 %v8481_v13, 16  ;;  %v4677_v26 = vrot.slane %v4676_v14, 4  ;;  %v6533_v13 = vld [vmem:[#allocation3 + $0x5c] sm:$0x1] }
 0x26a   : > { %v4250_v29 = vsel %vm10009_vm8, %v4039_v57, %v4249_v62  ;;  %v4243_v22 = vsel %vm10009_vm8, %v4022_v61, %v4242_v47  ;;  %6465 = vrot.lane.b32.xlu1 %v8705_v48, %s8763_s17  ;;  %v4685_v45 = vrot.slane %v4683_v11, 4  ;;  %v4689_v33 = vshll.u32 %v4455_v20, 16  ;;  %v6531_v47 = vld [vmem:[#allocation3 + $0x54] sm:$0xf]  ;;  %v7085_v48 = vld [vmem:[#allocation3 + $0x78] sm:$0xe] }
 0x26b   : > { %4251 = vst [vmem:[#allocation3 + $0x90] sm:$0xf] %v4250_v29  ;;  %4244 = vst [vmem:[#allocation3 + $0x84] sm:$0xf] %v4243_v22  ;;  %v4047_v40 = vor.u32 %v4045_v8, %v4044_v23  ;;  %v4049_v41 = vrot.slane %v4044_v23, 4  ;;  %v4027_v44 = vrot.slane %v4025_v24, 7  ;;  %v4682_v35 = vsel %vm8846_vm5, %v4677_v26, %v4681_v34  ;;  %v10509_v23 = vpop.permute.xlu1 %5236 }
 0x26c   : > { %v4686_v49 = vor.u32 %v4685_v45, %v4681_v34  ;;  %v5665_v53 = vshrl.u32 %v5490_v28, 16  ;;  %v5668_v54 = vshll.u32 %v5490_v28, 16  ;;  %v4691_v2 = vrot.slane %v4689_v33, 5  ;;  %v6532_v8 = vld [vmem:[#allocation3 + $0x58] sm:$0xf] }
 0x26d   : > { %v4048_v55 = vsel %vm10015_vm9, %v4040_v15, %v4047_v40  ;;  %v4254_v58 = vsel %vm10022_vm10, %v4049_v41, %v4253_v32  ;;  %v4030_v38 = vor.u32 %v4028_v25, %v4027_v44  ;;  %v4032_v62 = vrot.slane %v4027_v44, 4  ;;  %v7086_v20 = vld [vmem:[#allocation3 + $0x7c] sm:$0xf]  ;;  %v7087_v28 = vld [vmem:[#allocation3 + $0x80] sm:$0x1]  ;;  %v10511_v40 = vpop.permute.xlu0 %6277 }
 0x26e   : > { %4252 = vst.msk [vmem:[#allocation3 + $0x94] sm:$0xf] %vm3707_vm1, %v4048_v55  ;;  %4255 = vst [vmem:[#allocation3 + $0x98] sm:$0x1] %v4254_v58  ;;  %v4687_v19 = vrot.slane %v4686_v49, 4  ;;  %v5667_v4 = vrot.slane %v5665_v53, 4 }
 0x26f   : > { %v5670_v37 = vrot.slane %v5668_v54, 5  ;;  %v4031_v9 = vsel %vm10015_vm9, %v4023_v39, %v4030_v38  ;;  %v4247_v50 = vsel %vm10022_vm10, %v4032_v62, %v4246_v46  ;;  %v5674_v11 = vshll.u32 %v5491_v60, 16  ;;  %v4450_v29 = vld [vmem:[#allocation3 + $0x54] sm:$0xf]  ;;  %v4451_v49 = vld [vmem:[#allocation3 + $0x58] sm:$0xf]  ;;  %v10520_v38 = vpop.permute.xlu1 %5417 }
 0x270   : > { %v5678_v12 = vshrl.u32 %v5491_v60, 16  ;;  %4245 = vst.msk [vmem:[#allocation3 + $0x88] sm:$0xf] %vm3707_vm1, %v4031_v9  ;;  %4248 = vst [vmem:[#allocation3 + $0x8c] sm:$0x1] %v4247_v50  ;;  %v4692_v14 = vsel %vm8846_vm5, %v4687_v19, %v4691_v2  ;;  %v5684_v15 = vshll.u32 %v5492_v63, 16 }
 0x271   : > { %v5671_v57 = vor.u32 %v5670_v37, %v5667_v4  ;;  %v6685_v61 = vshrl.u32 %v6531_v47, 16  ;;  %v8268_v39 = vcombine.low %v4682_v35, %v4692_v14  ;;  %v5676_v24 = vrot.slane %v5674_v11, 5  ;;  %v10514_v60 = vpop.f32.mrb[24].mxu0  ;;  %v4452_v2 = vld [vmem:[#allocation3 + $0x5c] sm:$0x1] }
 0x272   : > { %v5680_v25 = vrot.slane %v5678_v12, 4  ;;  %v6688_v26 = vshll.u32 %v6531_v47, 16  ;;  %v5686_v32 = vrot.slane %v5684_v15, 5  ;;  %v6694_v45 = vshll.u32 %v6532_v8, 16  ;;  %v10518_v58 = vpop.f32.mrb[25].mxu0 }
 0x273   : > { %v5672_v22 = vrot.slane %v5671_v57, 4  ;;  %v6687_v34 = vrot.slane %v6685_v61, 4  ;;  %4925 = vrot.lane.b32.xlu1 %v8268_v39, %s8756_s26  ;;  %v6698_v33 = vshrl.u32 %v6532_v8, 16  ;;  %v6704_v46 = vshll.u32 %v6533_v13, 16  ;;  %v5004_v4 = vld [vmem:[#allocation3 + $0x78] sm:$0xe]  ;;  %v10524_v13 = vpop.permute.xlu0 %6459 }
 0x274   : > { %v5681_v41 = vor.u32 %v5680_v25, %v5676_v24  ;;  %v6690_v44 = vrot.slane %v6688_v26, 5  ;;  %v6696_v53 = vrot.slane %v6694_v45, 5  ;;  %v8412_v54 = vrot.slane %v7085_v48, 9  ;;  %v5005_v12 = vld [vmem:[#allocation3 + $0x7c] sm:$0xf] }
 0x275   : > { %v5677_v35 = vsel %vm8846_vm5, %v5672_v22, %v5676_v24  ;;  %v7215_v55 = vrot.slane %v7086_v20, 5  ;;  %v6700_v47 = vrot.slane %v6698_v33, 4  ;;  %v6706_v19 = vrot.slane %v6704_v46, 5  ;;  %v5006_v8 = vld [vmem:[#allocation3 + $0x80] sm:$0x1]  ;;  %v10528_v20 = vpop.f32.mrb[26].mxu0 }
 0x276   : > { %v5682_v62 = vrot.slane %v5681_v41, 4  ;;  %v6691_v63 = vor.u32 %v6690_v44, %v6687_v34  ;;  %v7218_v50 = vrot.slane %v7087_v28, 5  ;;  %v4646_v11 = vshrl.u32 %v4450_v29, 16  ;;  %v6044_v48 = vld [vmem:[#allocation3 + $0x78] sm:$0xe]  ;;  %v10532_v28 = vpop.f32.mrb[27].mxu0 }
 0x277   : > { %v7216_v37 = vsel %vm8808_vm2, %v8412_v54, %v7215_v55  ;;  %v7217_v9 = vrot.slane %v7215_v55, 4  ;;  %v6701_v15 = vor.u32 %v6700_v47, %v6696_v53  ;;  %v4649_v61 = vshll.u32 %v4450_v29, 16  ;;  %v6045_v41 = vld [vmem:[#allocation3 + $0x7c] sm:$0xf]  ;;  %v10537_v54 = vpop.permute.xlu1 %5958  ;;  %v8708_v56 = vld [vmem:[#allocation3 + $0x90] sm:$0xff]  }
 0x278   : > { %v5687_v14 = vsel %vm8846_vm5, %v5682_v62, %v5686_v32  ;;  %v6692_v57 = vrot.slane %v6691_v63, 4  ;;  %v4648_v25 = vrot.slane %v4646_v11, 4  ;;  %v4655_v26 = vshll.u32 %v4451_v49, 16 }
 0x279   : > { %v8330_v39 = vcombine.low %v5677_v35, %v5687_v14  ;;  %v7219_v24 = vsel %vm8808_vm2, %v7217_v9, %v7218_v50  ;;  %v6702_v34 = vrot.slane %v6701_v15, 4  ;;  %v4651_v32 = vrot.slane %v4649_v61, 5  ;;  %v6046_v35 = vld [vmem:[#allocation3 + $0x80] sm:$0x1]  ;;  %v7083_v9 = vld [vmem:[#allocation3 + $0x70] sm:$0xf] }
 0x27a   : > { %v6697_v22 = vsel %vm8846_vm5, %v6692_v57, %v6696_v53  ;;  %v8428_v45 = vcombine.low %v7216_v37, %v7219_v24  ;;  %v4657_v29 = vrot.slane %v4655_v26, 5  ;;  %v4659_v44 = vshrl.u32 %v4451_v49, 16  ;;  %v7082_v53 = vld [vmem:[#allocation3 + $0x6c] sm:$0xe]  ;;  %v10541_v37 = vpop.permute.xlu0 %7000  ;;  %v7084_v49 = vld [vmem:[#allocation3 + $0x74] sm:$0x1] }
 0x27b   : > { %5964 = vrot.lane.b32.xlu0 %v8330_v39, %s8761_s6  ;;  %v4665_v33 = vshll.u32 %v4452_v2, 16  ;;  %v8286_v46 = vrot.slane %v5004_v4, 9  ;;  %v6707_v55 = vsel %vm8846_vm5, %v6702_v34, %v6706_v19  ;;  %v4652_v62 = vor.u32 %v4651_v32, %v4648_v25  ;;  %v8735_v2 = vld [vmem:[#allocation3 + $0x84] sm:$0xff]   ;;  %v6041_v19 = vld [vmem:[#allocation3 + $0x6c] sm:$0xe]  ;;  %v8736_v24 = vld [vmem:[#allocation3 + $0x90] sm:$0xff]  }
 0x27c   : > { %v5142_v63 = vrot.slane %v5005_v12, 5  ;;  %v5145_v47 = vrot.slane %v5006_v8, 5  ;;  %v8393_v50 = vcombine.low %v6697_v22, %v6707_v55  ;;  %v4661_v11 = vrot.slane %v4659_v44, 4  ;;  %v6042_v22 = vld [vmem:[#allocation3 + $0x70] sm:$0xf]  ;;  %4424 = vst.msk [vmem:[#allocation4 + $0x58] sm:$0xff] %vm4412_vm11, %v8735_v2 }
 0x27d   : > { %v4667_v14 = vrot.slane %v4665_v33, 5  ;;  %v8349_v57 = vrot.slane %v6044_v48, 9  ;;  %v4653_v4 = vrot.slane %v4652_v62, 4  ;;  %v6178_v39 = vrot.slane %v6045_v41, 5  ;;  %v10547_v48 = vpop.permute.xlu1 %6457  ;;  %v6043_v44 = vld [vmem:[#allocation3 + $0x74] sm:$0x1] }
 0x27e   : > { %v5143_v15 = vsel %vm8808_vm2, %v8286_v46, %v5142_v63  ;;  %v5144_v61 = vrot.slane %v5142_v63, 4  ;;  %7006 = vrot.lane.b32.xlu1 %v8393_v50, %s8766_s22  ;;  %v4662_v12 = vor.u32 %v4661_v11, %v4657_v29  ;;  %v6181_v8 = vrot.slane %v6046_v35, 5  ;;  %v5001_v33 = vld [vmem:[#allocation3 + $0x6c] sm:$0xe]  ;;  %4425 = vst.msk [vmem:[#allocation4 + $0x60] sm:$0xff] %vm4412_vm11, %v8736_v24  ;;  %v5416_v11 = vpop.permute.xlu0 %5415 }
 0x27f   : > { %7333 = vrot.lane.b32.xlu0 %v8428_v45, %s8765_s21  ;;  %v8411_v25 = vrot.slane %v7082_v53, 9  ;;  %v7208_v26 = vrot.slane %v7083_v9, 5  ;;  %v4658_v34 = vsel %vm8846_vm5, %v4653_v4, %v4657_v29  ;;  %v10556_v41 = vsel %vm8808_vm2, %v8349_v57, %v6178_v39  ;;  %v5002_v63 = vld [vmem:[#allocation3 + $0x70] sm:$0xf]  ;;  %v5003_v50 = vld [vmem:[#allocation3 + $0x74] sm:$0x1] }
 0x280   : > { %v5146_v32 = vsel %vm8808_vm2, %v5144_v61, %v5145_v47  ;;  %v6180_v45 = vrot.slane %v6178_v39, 4  ;;  %v4663_v46 = vrot.slane %v4662_v12, 4  ;;  %v7211_v47 = vrot.slane %v7084_v49, 5  ;;  %v6540_v12 = vld [vmem:[#allocation3 + $0x78] sm:$0xf] }
 0x281   : > { %v8302_v35 = vcombine.low %v5143_v15, %v5146_v32  ;;  %v7209_v55 = vsel %vm8808_vm2, %v8411_v25, %v7208_v26  ;;  %v7210_v62 = vrot.slane %v7208_v26, 4  ;;  %v8348_v53 = vrot.slane %v6041_v19, 9  ;;  %v4918_v61 = vpop.permute.xlu1 %4917  ;;  %v5499_v32 = vld [vmem:[#allocation3 + $0x78] sm:$0xf] }
 0x282   : > { %v6182_v29 = vsel %vm8808_vm2, %v6180_v45, %v6181_v8  ;;  %v6171_v9 = vrot.slane %v6042_v22, 5  ;;  %v4668_v57 = vsel %vm8846_vm5, %v4663_v46, %v4667_v14  ;;  %v6174_v4 = vrot.slane %v6043_v44, 5  ;;  %v6541_v8 = vld [vmem:[#allocation3 + $0x7c] sm:$0xf]  ;;  %4962 = vst.msk [vmem:[#allocation4 + $0x20] sm:$0xff] %vm4957_vm12, %v4918_v61 }
 0x283   : > { %5250 = vrot.lane.b32.xlu0 %v8302_v35, %s8758_s28  ;;  %v8365_v2 = vcombine.low %v10556_v41, %v6182_v29  ;;  %v8285_v15 = vrot.slane %v5001_v33, 9  ;;  %v8267_v39 = vcombine.low %v4658_v34, %v4668_v57  ;;  %v7212_v24 = vsel %vm8808_vm2, %v7210_v62, %v7211_v47  ;;  %v6542_v22 = vld [vmem:[#allocation3 + $0x80] sm:$0x1]  ;;  %5283 = vst.msk [vmem:[#allocation4 + $0x20] sm:$0xff] %vm5278_vm13, %v10491_v3  ;;  %v5500_v46 = vld [vmem:[#allocation3 + $0x7c] sm:$0xf]  ;;  %v5957_v35 = vpop.permute.xlu0 %5956 }
 0x284   : > { %v6172_v49 = vsel %vm8808_vm2, %v8348_v53, %v6171_v9  ;;  %v6173_v19 = vrot.slane %v6171_v9, 4  ;;  %v8427_v14 = vcombine.low %v7209_v55, %v7212_v24  ;;  %v5135_v25 = vrot.slane %v5002_v63, 5  ;;  %5460 = vst.msk [vmem:[#allocation4 + $0x20] sm:$0xff] %vm5455_vm14, %v5416_v11 }
 0x285   : > { %v5138_v26 = vrot.slane %v5003_v50, 5  ;;  %4923 = vrot.lane.b32.xlu1 %v8267_v39, %s8756_s26  ;;  %v6757_v21 = vshrl.u32 %v6540_v12, 16  ;;  %v6760_v17 = vshll.u32 %v6540_v12, 16  ;;  %v6766_v44 = vshll.u32 %v6541_v8, 16  ;;  %6003 = vst.msk [vmem:[#allocation4 + $0x10] sm:$0xff] %vm6000_vm15, %v5957_v35 }
 0x286   : > { %v6175_v34 = vsel %vm8808_vm2, %v6173_v19, %v6174_v4  ;;  %v5136_v41 = vsel %vm8808_vm2, %v8285_v15, %v5135_v25  ;;  %v5137_v45 = vrot.slane %v5135_v25, 4  ;;  %v6770_v33 = vshrl.u32 %v6541_v8, 16  ;;  %6324 = vst.msk [vmem:[#allocation4 + $0x10] sm:$0xff] %vm6321_vm0, %v10511_v40 }
 0x287   : > { %7331 = vrot.lane.b32.xlu0 %v8427_v14, %s8765_s21  ;;  %v8364_v3 = vcombine.low %v6172_v49, %v6175_v34  ;;  %v6776_v42 = vshll.u32 %v6542_v22, 16  ;;  %v5737_v62 = vshrl.u32 %v5499_v32, 16  ;;  %v5740_v63 = vshll.u32 %v5499_v32, 16  ;;  %6502 = vst.msk [vmem:[#allocation4 + $0x10] sm:$0xff] %vm6499_vm3, %v10382_v10  ;;  %v8709_v10 = vld [vmem:[#allocation3 + $0x90] sm:$0xff]   ;;  %v10633_v35 = vpop.permute.xlu0 %7325 }
 0x288   : > { %v5139_v55 = vsel %vm8808_vm2, %v5137_v45, %v5138_v26  ;;  %v6759_v6 = vrot.slane %v6757_v21, 4  ;;  %v6762_v29 = vrot.slane %v6760_v17, 5  ;;  %v6768_v47 = vrot.slane %v6766_v44, 5  ;;  %7047 = vst.msk [vmem:[#allocation4 + $0x10] sm:$0xff] %vm7044_vm4, %v10541_v37  ;;  %v4459_v22 = vld [vmem:[#allocation3 + $0x78] sm:$0xf] }
 0x289   : > { %6291 = vrot.lane.b32.xlu1 %v8365_v2, %s8764_s20  ;;  %v8301_v52 = vcombine.low %v5136_v41, %v5139_v55  ;;  %v6772_v53 = vrot.slane %v6770_v33, 4  ;;  %v6778_v9 = vrot.slane %v6776_v42, 5  ;;  %v5739_v50 = vrot.slane %v5737_v62, 4  ;;  %7368 = vst.msk [vmem:[#allocation4 + $0x10] sm:$0xff] %vm11195_vm6, %v10480_v59  ;;  %v7382_v45 = vld [vmem:[#allocation4] sm:$0xff] }
 0x28a   : > { %v5742_v11 = vrot.slane %v5740_v63, 5  ;;  %v6763_v57 = vor.u32 %v6762_v29, %v6759_v6  ;;  %v5746_v2 = vshll.u32 %v5500_v46, 16  ;;  %v5750_v4 = vshrl.u32 %v5500_v46, 16  ;;  %v10631_v33 = vld [vmem:[#allocation3 + $0x7c] sm:$0xf]  ;;  %8580 = vmatprep.mubr.msk.bf16.mxu1 %vm7434_vm7, %v7382_v45  ;;  %v6999_v63 = vpop.permute.xlu1 %6998 }
 0x28b   : > { %6289 = vrot.lane.b32.xlu0 %v8364_v3, %s8764_s20  ;;  %v5756_v31 = vshll.u32 %v5501_v1, 16  ;;  %v6773_v15 = vor.u32 %v6772_v53, %v6768_v47  ;;  %v3614_v40 = vmul.f32 %v10442_v51, %v10514_v60  ;;  %v3612_v39 = vmul.f32 %v10442_v51, %v10518_v58  ;;  %7046 = vst.msk [vmem:[#allocation4 + $0x8] sm:$0xff] %vm7044_vm4, %v6999_v63  ;;  %v4256_v53 = vld [vmem:[#allocation3 + $0x9c] sm:$0xf] }
 0x28c   : > { %v5743_v61 = vor.u32 %v5742_v11, %v5739_v50  ;;  %v6764_v24 = vrot.slane %v6763_v57, 4  ;;  %v5748_v49 = vrot.slane %v5746_v2, 5  ;;  %v5752_v19 = vrot.slane %v5750_v4, 4  ;;  %v8712_v11 = vld [vmem:[#allocation3 + $0x84] sm:$0xff]   ;;  %v4461_v57 = vld [vmem:[#allocation3 + $0x80] sm:$0x1] }
 0x28d   : > { %5248 = vrot.lane.b32.xlu1 %v8301_v52, %s8758_s28  ;;  %v5758_v12 = vrot.slane %v5756_v31, 5  ;;  %v6774_v37 = vrot.slane %v6773_v15, 4  ;;  %v3653_v14 = vadd.f32 %v10454_v16, %v3614_v40  ;;  %v3651_v60 = vadd.f32 %v10454_v16, %v3612_v39  ;;  %7367 = vst.msk [vmem:[#allocation4 + $0x8] sm:$0xff] %vm11195_vm6, %v10500_v7  ;;  %v10644_v40 = vpop.f32.mrb[28].mxu0 }
 0x28e   : > { %v5744_v8 = vrot.slane %v5743_v61, 4  ;;  %v6769_v58 = vsel %vm8846_vm5, %v6764_v24, %v6768_v47  ;;  %v5753_v25 = vor.u32 %v5752_v19, %v5748_v49  ;;  %v3615_v59 = vmul.f32 %v10442_v51, %v10528_v20  ;;  %v4263_v47 = vld [vmem:[#allocation3 + $0xa8] sm:$0xf]  ;;  %v10647_v19 = vpop.f32.mrb[29].mxu0 }
 0x28f   : > { %6471 = vrot.lane.b32.xlu0 %v8708_v56, %s8763_s17  ;;  %v3613_v26 = vmul.f32 %v10442_v51, %v10532_v28  ;;  %v6779_v34 = vsel %vm8846_vm5, %v6774_v37, %v6778_v9  ;;  %v3685_v3 = vmax.f32 %v3653_v14, 0.0  ;;  %v3683_v41 = vmax.f32 %v3651_v60, 0.0  ;;  %v8711_v60 = vld [vmem:[#allocation3 + $0x84] sm:$0xff]  }
 0x290   : > { %v5749_v32 = vsel %vm8846_vm5, %v5744_v8, %v5748_v49  ;;  %v8396_v21 = vcombine.low %v6769_v58, %v6779_v34  ;;  %v5754_v17 = vrot.slane %v5753_v25, 4  ;;  %v3654_v44 = vadd.f32 %v10454_v16, %v3615_v59  ;;  %v10649_v58 = vpop.f32.mrb[30].mxu0  ;;  %v10652_v25 = vpop.permute.xlu0 %5242 }
 0x291   : > { %5429 = vrot.lane.b32.xlu1 %v8709_v10, %s8759_s29  ;;  %v3652_v20 = vadd.f32 %v10454_v16, %v3613_v26  ;;  %v8486_v51 = vpack.c.bf16 %v3685_v3, %v3685_v3  ;;  %v8484_v28 = vpack.c.bf16 %v3683_v41, %v3683_v41  ;;  %v4718_v46 = vshrl.u32 %v4459_v22, 16  ;;  %v10656_v3 = vpop.f32.mrb[31].mxu0 }
 0x292   : > { %v5759_v55 = vsel %vm8846_vm5, %v5754_v17, %v5758_v12  ;;  %v3686_v42 = vmax.f32 %v3654_v44, 0.0  ;;  %v4721_v62 = vshll.u32 %v4459_v22, 16  ;;  %v4727_v61 = vshll.u32 %v10631_v33, 16  ;;  %v4916_v12 = vpop.permute.xlu1 %4915  ;;  %v4260_v17 = vld [vmem:[#allocation3 + $0xa4] sm:$0x1] }
 0x293   : > { %7012 = vrot.lane.b32.xlu0 %v8396_v21, %s8766_s22  ;;  %v3684_v1 = vmax.f32 %v3652_v20, 0.0  ;;  %v8333_v16 = vcombine.low %v5749_v32, %v5759_v55  ;;  %v4068_v52 = vshrl.u32 %v8486_v51, 16  ;;  %v4071_v6 = vshll.u32 %v8486_v51, 16  ;;  %4961 = vst.msk [vmem:[#allocation4 + $0x18] sm:$0xff] %vm4957_vm12, %v4916_v12  ;;  %v5496_v32 = vld [vmem:[#allocation3 + $0x6c] sm:$0xf] }
 0x294   : > { %v4051_v29 = vshrl.u32 %v8484_v28, 16  ;;  %v4054_v56 = vshll.u32 %v8484_v28, 16  ;;  %v8487_v9 = vpack.c.bf16 %v3686_v42, %v3686_v42  ;;  %v4720_v2 = vrot.slane %v4718_v46, 4  ;;  %5282 = vst.msk [vmem:[#allocation4 + $0x18] sm:$0xff] %vm5278_vm13, %v10509_v23  ;;  %v4267_v21 = vld [vmem:[#allocation3 + $0xb0] sm:$0x1] }
 0x295   : > { %v8485_v50 = vpack.c.bf16 %v3684_v1, %v3684_v1  ;;  %5970 = vrot.lane.b32.xlu1 %v8333_v16, %s8761_s6  ;;  %v4070_v4 = vrot.slane %v4068_v52, 7  ;;  %v4723_v15 = vrot.slane %v4721_v62, 5  ;;  %v10654_v34 = vrot.slane %v4727_v61, 5  ;;  %5459 = vst.msk [vmem:[#allocation4 + $0x18] sm:$0xff] %vm5455_vm14, %v10377_v5  ;;  %v5497_v55 = vld [vmem:[#allocation3 + $0x70] sm:$0xf] }
 0x296   : > { %v4053_v31 = vrot.slane %v4051_v29, 7  ;;  %v4076_v39 = vshrl.u32 %v8487_v9, 16  ;;  %v4079_v10 = vshll.u32 %v8487_v9, 16  ;;  %v4731_v44 = vshrl.u32 %v10631_v33, 16  ;;  %v5498_v42 = vld [vmem:[#allocation3 + $0x74] sm:$0x1]  ;;  %v10670_v1 = vpop.permute.xlu1 %6283 }
 0x297   : > { %v4059_v24 = vshrl.u32 %v8485_v50, 16  ;;  %v4062_v49 = vshll.u32 %v8485_v50, 16  ;;  %5427 = vrot.lane.b32.xlu0 %v8712_v11, %s8759_s29  ;;  %v4073_v37 = vor.u32 %v4071_v6, %v4070_v4  ;;  %v4074_v7 = vrot.slane %v4070_v4, 4  ;;  %6004 = vst.msk [vmem:[#allocation4 + $0x18] sm:$0xff] %vm6000_vm15, %v10537_v54  ;;  %v6537_v52 = vld [vmem:[#allocation3 + $0x6c] sm:$0xf]  ;;  %v10690_v50 = vpop.permute.xlu0 %7323 }
 0x298   : > { %v4056_v8 = vor.u32 %v4054_v56, %v4053_v31  ;;  %v4057_v14 = vrot.slane %v4053_v31, 4  ;;  %v4078_v59 = vrot.slane %v4076_v39, 7  ;;  %v4724_v22 = vor.u32 %v4723_v15, %v4720_v2  ;;  %6325 = vst.msk [vmem:[#allocation4 + $0x18] sm:$0xff] %vm6321_vm0, %v10489_v36 }
 0x299   : > { %v4061_v26 = vrot.slane %v4059_v24, 7  ;;  %v4264_v41 = vsel %vm10009_vm8, %v4073_v37, %v4263_v47  ;;  %6469 = vrot.lane.b32.xlu1 %v8711_v60, %s8763_s17  ;;  %v4737_v20 = vshll.u32 %v4461_v57, 16  ;;  %v4733_v63 = vrot.slane %v4731_v44, 4  ;;  %v6538_v47 = vld [vmem:[#allocation3 + $0x70] sm:$0xf]  ;;  %6503 = vst.msk [vmem:[#allocation4 + $0x18] sm:$0xff] %vm6499_vm3, %v10547_v48 }
 0x29a   : > { %v4257_v45 = vsel %vm10009_vm8, %v4056_v8, %v4256_v53  ;;  %4265 = vst [vmem:[#allocation3 + $0xa8] sm:$0xf] %v4264_v41  ;;  %v4081_v51 = vor.u32 %v4079_v10, %v4078_v59  ;;  %v4083_v23 = vrot.slane %v4078_v59, 4  ;;  %v4725_v62 = vrot.slane %v4724_v22, 4  ;;  %v6539_v48 = vld [vmem:[#allocation3 + $0x74] sm:$0x1]  ;;  %v10692_v8 = vpop.permute.xlu1 %5240 }
 0x29b   : > { %4258 = vst [vmem:[#allocation3 + $0x9c] sm:$0xf] %v4257_v45  ;;  %v4064_v28 = vor.u32 %v4062_v49, %v4061_v26  ;;  %v4066_v46 = vrot.slane %v4061_v26, 4  ;;  %v4739_v33 = vrot.slane %v4737_v20, 5  ;;  %v5713_v16 = vshrl.u32 %v5496_v32, 16 }
 0x29c   : > { %v4082_v5 = vsel %vm10015_vm9, %v4074_v7, %v4081_v51  ;;  %v4268_v6 = vsel %vm10022_vm10, %v4083_v23, %v4267_v21  ;;  %v4730_v36 = vsel %vm8846_vm5, %v4725_v62, %v10654_v34  ;;  %v4734_v56 = vor.u32 %v4733_v63, %v10654_v34  ;;  %v7088_v10 = vld [vmem:[#allocation3 + $0x84] sm:$0xe]  ;;  %v7089_v7 = vld [vmem:[#allocation3 + $0x88] sm:$0xf]  ;;  %v7090_v22 = vld [vmem:[#allocation3 + $0x8c] sm:$0x1] }
 0x29d   : > { %v4065_v29 = vsel %vm10015_vm9, %v4057_v14, %v4064_v28  ;;  %v4261_v54 = vsel %vm10022_vm10, %v4066_v46, %v4260_v17  ;;  %4266 = vst.msk [vmem:[#allocation3 + $0xac] sm:$0xf] %vm3707_vm1, %v4082_v5  ;;  %4269 = vst [vmem:[#allocation3 + $0xb0] sm:$0x1] %v4268_v6  ;;  %v5715_v53 = vrot.slane %v5713_v16, 4  ;;  %v5716_v9 = vshll.u32 %v5496_v32, 16  ;;  %v10696_v28 = vpop.permute.xlu0 %6281 }
 0x29e   : > { %4259 = vst.msk [vmem:[#allocation3 + $0xa0] sm:$0xf] %vm3707_vm1, %v4065_v29  ;;  %4262 = vst [vmem:[#allocation3 + $0xa4] sm:$0x1] %v4261_v54  ;;  %v5722_v11 = vshll.u32 %v5497_v55, 16  ;;  %v5726_v57 = vshrl.u32 %v5497_v55, 16 }
 0x29f   : > { %v5732_v2 = vshll.u32 %v5498_v42, 16  ;;  %v6733_v4 = vshrl.u32 %v6537_v52, 16  ;;  %v4735_v31 = vrot.slane %v4734_v56, 4  ;;  %v5718_v15 = vrot.slane %v5716_v9, 5  ;;  %v4456_v21 = vld [vmem:[#allocation3 + $0x6c] sm:$0xf]  ;;  %v10705_v56 = vpop.permute.xlu1 %5421 }
 0x2a0   : > { %v6736_v61 = vshll.u32 %v6537_v52, 16  ;;  %v6742_v39 = vshll.u32 %v6538_v47, 16  ;;  %v5724_v24 = vrot.slane %v5722_v11, 5  ;;  %v5728_v49 = vrot.slane %v5726_v57, 4  ;;  %v4457_v23 = vld [vmem:[#allocation3 + $0x70] sm:$0xf] }
 0x2a1   : > { %v5734_v12 = vrot.slane %v5732_v2, 5  ;;  %v6735_v37 = vrot.slane %v6733_v4, 4  ;;  %v4740_v14 = vsel %vm8846_vm5, %v4735_v31, %v4739_v33  ;;  %v5719_v60 = vor.u32 %v5718_v15, %v5715_v53  ;;  %v4458_v5 = vld [vmem:[#allocation3 + $0x74] sm:$0x1]  ;;  %v6048_v2 = vld [vmem:[#allocation3 + $0x88] sm:$0xf] }
 0x2a2   : > { %v6738_v59 = vrot.slane %v6736_v61, 5  ;;  %v6744_v26 = vrot.slane %v6742_v39, 5  ;;  %v8270_v34 = vcombine.low %v4730_v36, %v4740_v14  ;;  %v5729_v32 = vor.u32 %v5728_v49, %v5724_v24  ;;  %v6047_v36 = vld [vmem:[#allocation3 + $0x84] sm:$0xe]  ;;  %v6050_v39 = vld [vmem:[#allocation3 + $0x90] sm:$0xe] }
 0x2a3   : > { %v6746_v41 = vshrl.u32 %v6538_v47, 16  ;;  %v6752_v45 = vshll.u32 %v6539_v48, 16  ;;  %v5720_v17 = vrot.slane %v5719_v60, 4  ;;  %v8413_v20 = vrot.slane %v7088_v10, 9  ;;  %v6049_v48 = vld [vmem:[#allocation3 + $0x8c] sm:$0x1] }
 0x2a4   : > { %v6739_v44 = vor.u32 %v6738_v59, %v6735_v37  ;;  %v7222_v51 = vrot.slane %v7089_v7, 5  ;;  %4929 = vrot.lane.b32.xlu1 %v8270_v34, %s8756_s26  ;;  %v5730_v46 = vrot.slane %v5729_v32, 4  ;;  %v7225_v62 = vrot.slane %v7090_v22, 5  ;;  %v6051_v37 = vld [vmem:[#allocation3 + $0x94] sm:$0xf]  ;;  %v10712_v7 = vpop.permute.xlu0 %6463 }
 0x2a5   : > { %v6748_v55 = vrot.slane %v6746_v41, 4  ;;  %v6754_v42 = vrot.slane %v6752_v45, 5  ;;  %v5725_v63 = vsel %vm8846_vm5, %v5720_v17, %v5724_v24  ;;  %v4694_v54 = vshrl.u32 %v4456_v21, 16  ;;  %v6052_v22 = vld [vmem:[#allocation3 + $0x98] sm:$0x1] }
 0x2a6   : > { %v6740_v33 = vrot.slane %v6739_v44, 4  ;;  %v7223_v16 = vsel %vm8808_vm2, %v8413_v20, %v7222_v51  ;;  %v7224_v52 = vrot.slane %v7222_v51, 4  ;;  %v5735_v6 = vsel %vm8846_vm5, %v5730_v46, %v5734_v12  ;;  %v5502_v34 = vld [vmem:[#allocation3 + $0x84] sm:$0xf]  ;;  %v5503_v17 = vld [vmem:[#allocation3 + $0x88] sm:$0xf] }
 0x2a7   : > { %v6749_v29 = vor.u32 %v6748_v55, %v6744_v26  ;;  %v4697_v47 = vshll.u32 %v4456_v21, 16  ;;  %v8332_v53 = vcombine.low %v5725_v63, %v5735_v6  ;;  %v4703_v57 = vshll.u32 %v4457_v23, 16  ;;  %v5504_v46 = vld [vmem:[#allocation3 + $0x8c] sm:$0x1]  ;;  %v10718_v55 = vpop.permute.xlu1 %5962 }
 0x2a8   : > { %v6745_v9 = vsel %vm8846_vm5, %v6740_v33, %v6744_v26  ;;  %v7226_v11 = vsel %vm8808_vm2, %v7224_v52, %v7225_v62  ;;  %v4696_v15 = vrot.slane %v4694_v54, 4  ;;  %v4707_v24 = vshrl.u32 %v4457_v23, 16  ;;  %v6546_v52 = vld [vmem:[#allocation3 + $0x90] sm:$0xf] }
 0x2a9   : > { %v6750_v4 = vrot.slane %v6749_v29, 4  ;;  %v8429_v31 = vcombine.low %v7223_v16, %v7226_v11  ;;  %v4699_v61 = vrot.slane %v4697_v47, 5  ;;  %5968 = vrot.lane.b32.xlu0 %v8332_v53, %s8761_s6  ;;  %v4705_v10 = vrot.slane %v4703_v57, 5 }
 0x2aa   : > { %v4713_v49 = vshll.u32 %v4458_v5, 16  ;;  %v8350_v12 = vrot.slane %v6047_v36, 9  ;;  %v6185_v59 = vrot.slane %v6048_v2, 5  ;;  %v6188_v26 = vrot.slane %v6049_v48, 5  ;;  %v8738_v5 = vld [vmem:[#allocation3 + $0xa8] sm:$0xff]   ;;  %v10729_v48 = vpop.permute.xlu0 %7004 }
 0x2ab   : > { %v6755_v14 = vsel %vm8846_vm5, %v6750_v4, %v6754_v42  ;;  %v4700_v60 = vor.u32 %v4699_v61, %v4696_v15  ;;  %v4709_v41 = vrot.slane %v4707_v24, 4  ;;  %v8351_v21 = vrot.slane %v6050_v39, 9  ;;  %v8737_v42 = vld [vmem:[#allocation3 + $0x9c] sm:$0xff]   ;;  %v6547_v36 = vld [vmem:[#allocation3 + $0x94] sm:$0xf]  ;;  %4427 = vst.msk [vmem:[#allocation4 + $0x70] sm:$0xff] %vm4412_vm11, %v8738_v5 }
 0x2ac   : > { %v8395_v32 = vcombine.low %v6745_v9, %v6755_v14  ;;  %v4715_v45 = vrot.slane %v4713_v49, 5  ;;  %v6186_v20 = vsel %vm8808_vm2, %v8350_v12, %v6185_v59  ;;  %v6187_v51 = vrot.slane %v6185_v59, 4  ;;  %4426 = vst.msk [vmem:[#allocation4 + $0x68] sm:$0xff] %vm4412_vm11, %v8737_v42  ;;  %v6548_v2 = vld [vmem:[#allocation3 + $0x98] sm:$0x1] }
 0x2ad   : > { %v4701_v44 = vrot.slane %v4700_v60, 4  ;;  %v6192_v23 = vrot.slane %v6051_v37, 5  ;;  %7335 = vrot.lane.b32.xlu0 %v8429_v31, %s8765_s21  ;;  %v4710_v62 = vor.u32 %v4709_v41, %v4705_v10  ;;  %v6195_v63 = vrot.slane %v6052_v22, 5  ;;  %v5007_v39 = vld [vmem:[#allocation3 + $0x84] sm:$0xe] }
 0x2ae   : > { %7010 = vrot.lane.b32.xlu1 %v8395_v32, %s8766_s22  ;;  %v5761_v33 = vshrl.u32 %v5502_v34, 16  ;;  %v5764_v16 = vshll.u32 %v5502_v34, 16  ;;  %v6189_v29 = vsel %vm8808_vm2, %v6187_v51, %v6188_v26  ;;  %v5770_v31 = vshll.u32 %v5503_v17, 16  ;;  %v5008_v37 = vld [vmem:[#allocation3 + $0x88] sm:$0xf]  ;;  %v10737_v32 = vpop.permute.xlu1 %6461 }
 0x2af   : > { %v4706_v6 = vsel %vm8846_vm5, %v4701_v44, %v4705_v10  ;;  %v6193_v54 = vsel %vm8808_vm2, %v8351_v21, %v6192_v23  ;;  %v6194_v47 = vrot.slane %v6192_v23, 4  ;;  %v4711_v53 = vrot.slane %v4710_v62, 4  ;;  %v5009_v14 = vld [vmem:[#allocation3 + $0x8c] sm:$0x1]  ;;  %v7091_v34 = vld [vmem:[#allocation3 + $0x90] sm:$0xe] }
 0x2b0   : > { %v8366_v9 = vcombine.low %v6186_v20, %v6189_v29  ;;  %v5763_v11 = vrot.slane %v5761_v33, 4  ;;  %v5766_v57 = vrot.slane %v5764_v16, 5  ;;  %v5774_v15 = vshrl.u32 %v5503_v17, 16  ;;  %v7092_v20 = vld [vmem:[#allocation3 + $0x94] sm:$0xf] }
 0x2b1   : > { %v6196_v4 = vsel %vm8808_vm2, %v6194_v47, %v6195_v63  ;;  %v5780_v61 = vshll.u32 %v5504_v46, 16  ;;  %v4716_v10 = vsel %vm8846_vm5, %v4711_v53, %v4715_v45  ;;  %v6805_v12 = vshrl.u32 %v6546_v52, 16  ;;  %v7093_v45 = vld [vmem:[#allocation3 + $0x98] sm:$0x1]  ;;  %v5505_v62 = vld [vmem:[#allocation3 + $0x90] sm:$0xf] }
 0x2b2   : > { %6293 = vrot.lane.b32.xlu0 %v8366_v9, %s8764_s20  ;;  %v8367_v24 = vcombine.low %v6193_v54, %v6196_v4  ;;  %v5767_v49 = vor.u32 %v5766_v57, %v5763_v11  ;;  %v8269_v60 = vcombine.low %v4706_v6, %v4716_v10  ;;  %v5772_v59 = vrot.slane %v5770_v31, 5  ;;  %v5420_v6 = vpop.permute.xlu0 %5419 }
 0x2b3   : > { %v5776_v26 = vrot.slane %v5774_v15, 4  ;;  %v5782_v22 = vrot.slane %v5780_v61, 5  ;;  %v6807_v21 = vrot.slane %v6805_v12, 4  ;;  %v6808_v17 = vshll.u32 %v6546_v52, 16  ;;  %v5506_v15 = vld [vmem:[#allocation3 + $0x94] sm:$0xf] }
 0x2b4   : > { %v5768_v41 = vrot.slane %v5767_v49, 4  ;;  %v6814_v44 = vshll.u32 %v6547_v36, 16  ;;  %4927 = vrot.lane.b32.xlu1 %v8269_v60, %s8756_s26  ;;  %v6818_v23 = vshrl.u32 %v6547_v36, 16  ;;  %v6824_v46 = vshll.u32 %v6548_v2, 16  ;;  %v5507_v12 = vld [vmem:[#allocation3 + $0x98] sm:$0x1] }
 0x2b5   : > { %v5777_v51 = vor.u32 %v5776_v26, %v5772_v59  ;;  %v8287_v42 = vrot.slane %v5007_v39, 9  ;;  %v6810_v33 = vrot.slane %v6808_v17, 5  ;;  %v5149_v5 = vrot.slane %v5008_v37, 5 }
 0x2b6   : > { %v5773_v63 = vsel %vm8846_vm5, %v5768_v41, %v5772_v59  ;;  %v6816_v16 = vrot.slane %v6814_v44, 5  ;;  %v6820_v54 = vrot.slane %v6818_v23, 4  ;;  %v6826_v52 = vrot.slane %v6824_v46, 5 }
 0x2b7   : > { %v5778_v29 = vrot.slane %v5777_v51, 4  ;;  %v5152_v47 = vrot.slane %v5009_v14, 5  ;;  %v6811_v53 = vor.u32 %v6810_v33, %v6807_v21  ;;  %v5150_v9 = vsel %vm8808_vm2, %v8287_v42, %v5149_v5 }
 0x2b8   : > { %v5151_v11 = vrot.slane %v5149_v5, 4  ;;  %v8414_v36 = vrot.slane %v7091_v34, 9  ;;  %6295 = vrot.lane.b32.xlu1 %v8367_v24, %s8764_s20  ;;  %v6821_v2 = vor.u32 %v6820_v54, %v6816_v16  ;;  %v7229_v4 = vrot.slane %v7092_v20, 5 }
 0x2b9   : > { %v5783_v57 = vsel %vm8846_vm5, %v5778_v29, %v5782_v22  ;;  %v7232_v31 = vrot.slane %v7093_v45, 5  ;;  %v4922_v61 = vpop.permute.xlu1 %4921  ;;  %v6812_v10 = vrot.slane %v6811_v53, 4  ;;  %v5785_v37 = vshrl.u32 %v5505_v62, 16  ;;  %v7094_v45 = vld [vmem:[#allocation3 + $0x9c] sm:$0xe] }
 0x2ba   : > { %v8334_v39 = vcombine.low %v5773_v63, %v5783_v57  ;;  %v5153_v49 = vsel %vm8808_vm2, %v5151_v11, %v5152_v47  ;;  %4964 = vst.msk [vmem:[#allocation4 + $0x30] sm:$0xff] %vm4957_vm12, %v4922_v61  ;;  %v6822_v14 = vrot.slane %v6821_v2, 4  ;;  %v7230_v24 = vsel %vm8808_vm2, %v8414_v36, %v7229_v4  ;;  %v7096_v29 = vld [vmem:[#allocation3 + $0xa4] sm:$0x1] }
 0x2bb   : > { %v8303_v60 = vcombine.low %v5150_v9, %v5153_v49  ;;  %v7231_v59 = vrot.slane %v7229_v4, 4  ;;  %5285 = vst.msk [vmem:[#allocation4 + $0x30] sm:$0xff] %vm5278_vm13, %v10652_v25  ;;  %v6817_v26 = vsel %vm8846_vm5, %v6812_v10, %v6816_v16  ;;  %v5787_v22 = vrot.slane %v5785_v37, 4  ;;  %v8744_v16 = vld [vmem:[%s11191_s2] ss:$0 sm:$0xff] }
 0x2bc   : > { %5972 = vrot.lane.b32.xlu0 %v8334_v39, %s8761_s6  ;;  %v5788_v34 = vshll.u32 %v5505_v62, 16  ;;  %v5794_v41 = vshll.u32 %v5506_v15, 16  ;;  %5462 = vst.msk [vmem:[#allocation4 + $0x30] sm:$0xff] %vm5455_vm14, %v5420_v6  ;;  %v5961_v21 = vpop.permute.xlu0 %5960  ;;  %v6827_v17 = vsel %vm8846_vm5, %v6822_v14, %v6826_v52  ;;  %v5798_v25 = vshrl.u32 %v5506_v15, 16  ;;  %v7095_v62 = vld [vmem:[#allocation3 + $0xa0] sm:$0xf] }
 0x2bd   : > { %5252 = vrot.lane.b32.xlu1 %v8303_v60, %s8758_s28  ;;  %v7233_v44 = vsel %vm8808_vm2, %v7231_v59, %v7232_v31  ;;  %v5804_v20 = vshll.u32 %v5507_v12, 16  ;;  %6005 = vst.msk [vmem:[#allocation4 + $0x20] sm:$0xff] %vm6000_vm15, %v5961_v21  ;;  %v8398_v51 = vcombine.low %v6817_v26, %v6827_v17  ;;  %v3618_v5 = vmul.f32 %v8744_v16, %v10644_v40  ;;  %v8745_v40 = vld [vmem:[%s11192_s3] ss:$0 sm:$0xff]  ;;  %v6543_v26 = vld [vmem:[#allocation3 + $0x84] sm:$0xf] }
 0x2be   : > { %v8430_v23 = vcombine.low %v7230_v24, %v7233_v44  ;;  %v5790_v46 = vrot.slane %v5788_v34, 5  ;;  %v5796_v42 = vrot.slane %v5794_v41, 5  ;;  %6326 = vst.msk [vmem:[#allocation4 + $0x20] sm:$0xff] %vm6321_vm0, %v10696_v28  ;;  %v5800_v63 = vrot.slane %v5798_v25, 4  ;;  %v10804_v17 = vld [vmem:[#allocation3 + $0x88] sm:$0xf] }
 0x2bf   : > { %v5806_v33 = vrot.slane %v5804_v20, 5  ;;  %v3616_v6 = vmul.f32 %v8744_v16, %v10647_v19  ;;  %6504 = vst.msk [vmem:[#allocation4 + $0x20] sm:$0xff] %vm6499_vm3, %v10524_v13  ;;  %v3619_v52 = vmul.f32 %v8744_v16, %v10649_v58  ;;  %v3617_v28 = vmul.f32 %v8744_v16, %v10656_v3  ;;  %v4277_v25 = vld [vmem:[#allocation3 + $0xc0] sm:$0xf] }
 0x2c0   : > { %7016 = vrot.lane.b32.xlu0 %v8398_v51, %s8766_s22  ;;  %v5791_v54 = vor.u32 %v5790_v46, %v5787_v22  ;;  %v8415_v47 = vrot.slane %v7094_v45, 9  ;;  %7049 = vst.msk [vmem:[#allocation4 + $0x20] sm:$0xff] %vm7044_vm4, %v10729_v48  ;;  %v7003_v53 = vpop.permute.xlu1 %7002  ;;  %v5801_v9 = vor.u32 %v5800_v63, %v5796_v42  ;;  %v3657_v19 = vadd.f32 %v8745_v40, %v3618_v5  ;;  %v10787_v48 = vld [vmem:[%s11193_s4 + $0x20] ss:$0 sps:$4 sm:$0xff]   ;;  %v10791_v2 = vpop.permute.xlu0 %7329  ;;  %v4270_v63 = vld [vmem:[#allocation3 + $0xb4] sm:$0xf] }
 0x2c1   : > { %v3655_v11 = vadd.f32 %v8745_v40, %v3616_v6  ;;  %v7236_v13 = vrot.slane %v7095_v62, 5  ;;  %7370 = vst.msk [vmem:[#allocation4 + $0x20] sm:$0xff] %vm11195_vm6, %v10633_v35  ;;  %v3658_v3 = vadd.f32 %v8745_v40, %v3619_v52  ;;  %v3656_v36 = vadd.f32 %v8745_v40, %v3617_v28  ;;  %v8718_v6 = vld [vmem:[#allocation3 + $0x9c] sm:$0xff]   ;;  %v4281_v40 = vld [vmem:[#allocation3 + $0xc8] sm:$0x1] }
 0x2c2   : > { %7048 = vst.msk [vmem:[#allocation4 + $0x18] sm:$0xff] %vm7044_vm4, %v7003_v53  ;;  %v5792_v58 = vrot.slane %v5791_v54, 4  ;;  %v7239_v57 = vrot.slane %v7096_v29, 5  ;;  %v5802_v4 = vrot.slane %v5801_v9, 4  ;;  %v3689_v31 = vmax.f32 %v3657_v19, 0.0 }
 0x2c3   : > { %7369 = vst.msk [vmem:[#allocation4 + $0x18] sm:$0xff] %vm11195_vm6, %v10690_v50  ;;  %v3687_v15 = vmax.f32 %v3655_v11, 0.0  ;;  %v7237_v35 = vsel %vm8808_vm2, %v8415_v47, %v7236_v13  ;;  %v3690_v39 = vmax.f32 %v3658_v3, 0.0  ;;  %v3688_v10 = vmax.f32 %v3656_v36, 0.0  ;;  %v4274_v19 = vld [vmem:[#allocation3 + $0xbc] sm:$0x1] }
 0x2c4   : > { %7337 = vrot.lane.b32.xlu0 %v8430_v23, %s8765_s21  ;;  %v5797_v61 = vsel %vm8846_vm5, %v5792_v58, %v5796_v42  ;;  %v7238_v49 = vrot.slane %v7236_v13, 4  ;;  %v5807_v12 = vsel %vm8846_vm5, %v5802_v4, %v5806_v33  ;;  %v8490_v50 = vpack.c.bf16 %v3689_v31, %v3689_v31  ;;  %v5010_v36 = vld [vmem:[#allocation3 + $0x90] sm:$0xe] }
 0x2c5   : > { %v8488_v37 = vpack.c.bf16 %v3687_v15, %v3687_v15  ;;  %vm7483_vm6 = vcmask 1043456   ;;  %v8335_v14 = vcombine.low %v5797_v61, %v5807_v12  ;;  %v8491_v60 = vpack.c.bf16 %v3690_v39, %v3690_v39  ;;  %v5011_v15 = vld [vmem:[#allocation3 + $0x94] sm:$0xf] }
 0x2c6   : > { %v8489_v24 = vpack.c.bf16 %v3688_v10, %v3688_v10  ;;  %v7240_v59 = vsel %vm8808_vm2, %v7238_v49, %v7239_v57  ;;  %8613 = vmatprep.subr.msk.bf16.mxu1 %vm7483_vm6, %v10787_v48  ;;  %v4102_v22 = vshrl.u32 %v8490_v50, 16  ;;  %v4105_v34 = vshll.u32 %v8490_v50, 16  ;;  %v10808_v46 = vpop.permute.xlu0 %5246  ;;  %v4462_v10 = vld [vmem:[#allocation3 + $0x84] sm:$0xf] }
 0x2c7   : > { %v4085_v41 = vshrl.u32 %v8488_v37, 16  ;;  %v4088_v21 = vshll.u32 %v8488_v37, 16  ;;  %v4920_v44 = vpop.permute.xlu1 %4919  ;;  %5974 = vrot.lane.b32.xlu1 %v8335_v14, %s8761_s6  ;;  %v4110_v20 = vshrl.u32 %v8491_v60, 16  ;;  %v4113_v45 = vshll.u32 %v8491_v60, 16  ;;  %v4463_v14 = vld [vmem:[#allocation3 + $0x88] sm:$0xf] }
 0x2c8   : > { %v4093_v51 = vshrl.u32 %v8489_v24, 16  ;;  %v4096_v23 = vshll.u32 %v8489_v24, 16  ;;  %4963 = vst.msk [vmem:[#allocation4 + $0x28] sm:$0xff] %vm4957_vm12, %v4920_v44  ;;  %v4104_v42 = vrot.slane %v4102_v22, 7  ;;  %v8431_v33 = vcombine.low %v7237_v35, %v7240_v59  ;;  %v5012_v35 = vld [vmem:[#allocation3 + $0x98] sm:$0x1] }
 0x2c9   : > { %v4087_v62 = vrot.slane %v4085_v41, 7  ;;  %v6781_v16 = vshrl.u32 %v6543_v26, 16  ;;  %5284 = vst.msk [vmem:[#allocation4 + $0x28] sm:$0xff] %vm5278_vm13, %v10692_v8  ;;  %v4112_v5 = vrot.slane %v4110_v20, 7  ;;  %v6784_v54 = vshll.u32 %v6543_v26, 16 }
 0x2ca   : > { %v4095_v29 = vrot.slane %v4093_v51, 7  ;;  %v6790_v52 = vshll.u32 %v10804_v17, 16  ;;  %5461 = vst.msk [vmem:[#allocation4 + $0x28] sm:$0xff] %vm5455_vm14, %v10520_v38  ;;  %v4107_v28 = vor.u32 %v4105_v34, %v4104_v42  ;;  %v4108_v47 = vrot.slane %v4104_v42, 4  ;;  %7339 = vrot.lane.b32.xlu0 %v8431_v33, %s8765_s21  ;;  %v6545_v38 = vld [vmem:[#allocation3 + $0x8c] sm:$0x1]  ;;  %v10837_v49 = vpop.permute.xlu0 %7327 }
 0x2cb   : > { %v4090_v53 = vor.u32 %v4088_v21, %v4087_v62  ;;  %v4091_v9 = vrot.slane %v4087_v62, 4  ;;  %6006 = vst.msk [vmem:[#allocation4 + $0x28] sm:$0xff] %vm6000_vm15, %v10718_v55  ;;  %v10818_v8 = vpop.permute.xlu1 %6287  ;;  %v4115_v11 = vor.u32 %v4113_v45, %v4112_v5  ;;  %v4117_v13 = vrot.slane %v4112_v5, 4  ;;  %6473 = vrot.lane.b32.xlu1 %v8718_v6, %s8763_s17  ;;  %v4464_v26 = vld [vmem:[#allocation3 + $0x8c] sm:$0x1]  ;;  %v7383_v21 = vld [vmem:[#allocation4 + $0x8] sm:$0xff] }
 0x2cc   : > { %v4098_v58 = vor.u32 %v4096_v23, %v4095_v29  ;;  %v4100_v3 = vrot.slane %v4095_v29, 4  ;;  %6327 = vst.msk [vmem:[#allocation4 + $0x28] sm:$0xff] %vm6321_vm0, %v10670_v1  ;;  %v4278_v57 = vsel %vm10009_vm8, %v4107_v28, %v4277_v25  ;;  %v6783_v55 = vrot.slane %v6781_v16, 4  ;;  %v4465_v51 = vld [vmem:[#allocation3 + $0x90] sm:$0xf] }
 0x2cd   : > { %v4271_v4 = vsel %vm10009_vm8, %v4090_v53, %v4270_v63  ;;  %v6786_v31 = vrot.slane %v6784_v54, 5  ;;  %6505 = vst.msk [vmem:[#allocation4 + $0x28] sm:$0xff] %vm6499_vm3, %v10737_v32  ;;  %4279 = vst [vmem:[#allocation3 + $0xc0] sm:$0xf] %v4278_v57  ;;  %v4116_v61 = vsel %vm10015_vm9, %v4108_v47, %v4115_v11  ;;  %v4282_v1 = vsel %vm10022_vm10, %v4117_v13, %v4281_v40  ;;  %v4466_v63 = vld [vmem:[#allocation3 + $0x94] sm:$0xf] }
 0x2ce   : > { %4272 = vst [vmem:[#allocation3 + $0xb4] sm:$0xf] %v4271_v4  ;;  %v4099_v39 = vsel %vm10015_vm9, %v4091_v9, %v4098_v58  ;;  %v4275_v18 = vsel %vm10022_vm10, %v4100_v3, %v4274_v19  ;;  %4280 = vst.msk [vmem:[#allocation3 + $0xc4] sm:$0xf] %vm3707_vm1, %v4116_v61  ;;  %v6792_v12 = vrot.slane %v6790_v52, 5  ;;  %v6794_v50 = vshrl.u32 %v10804_v17, 16  ;;  %v10855_v52 = vpop.permute.xlu0 %6285 }
 0x2cf   : > { %4283 = vst [vmem:[#allocation3 + $0xc8] sm:$0x1] %v4282_v1  ;;  %4273 = vst.msk [vmem:[#allocation3 + $0xb8] sm:$0xf] %vm3707_vm1, %v4099_v39  ;;  %v6787_v32 = vor.u32 %v6786_v31, %v6783_v55  ;;  %v6800_v37 = vshll.u32 %v6545_v38, 16  ;;  %v10842_v27 = vpop.permute.xlu1 %5244  ;;  %v7485_v30 = vsel %vm7483_vm6, %v10787_v48, 0 }
 0x2d0   : > { %4276 = vst [vmem:[#allocation3 + $0xbc] sm:$0x1] %v4275_v18  ;;  %v8288_v60 = vrot.slane %v5010_v36, 9  ;;  %v5156_v24 = vrot.slane %v5011_v15, 5  ;;  %v5159_v59 = vrot.slane %v5012_v35, 5  ;;  %v6796_v34 = vrot.slane %v6794_v50, 4  ;;  %8579 = vmatpush3.bf16.msra.mxu1 %v7485_v30 }
 0x2d1   : > { %v6788_v22 = vrot.slane %v6787_v32, 4  ;;  %v6802_v41 = vrot.slane %v6800_v37, 5  ;;  %v4742_v44 = vshrl.u32 %v4462_v10, 16  ;;  %v4745_v20 = vshll.u32 %v4462_v10, 16  ;;  %v7384_v54 = vld [vmem:[#allocation4 + $0x10] sm:$0xff]  ;;  %v8721_v57 = vld [vmem:[#allocation3 + $0x9c] sm:$0xff]  }
 0x2d2   : > { %v5157_v17 = vsel %vm8808_vm2, %v8288_v60, %v5156_v24  ;;  %v5158_v25 = vrot.slane %v5156_v24, 4  ;;  %v4751_v45 = vshll.u32 %v4463_v14, 16  ;;  %v6797_v23 = vor.u32 %v6796_v34, %v6792_v12  ;;  %v4467_v9 = vld [vmem:[#allocation3 + $0x98] sm:$0x1]  ;;  %v5508_v3 = vld [vmem:[#allocation3 + $0x9c] sm:$0xf] }
 0x2d3   : > { %v6793_v48 = vsel %vm8846_vm5, %v6788_v22, %v6792_v12  ;;  %v4744_v42 = vrot.slane %v4742_v44, 4  ;;  %v4755_v62 = vshrl.u32 %v4463_v14, 16  ;;  %v10850_v33 = vpop.permute.xlu1 %5425  ;;  %8581 = vmatmul.mubr.msk.bf16.vlgmr.msra.gmra.mrb[0].mxu1 %vm7434_vm7, %v7383_v21  ;;  %v4747_v5 = vrot.slane %v4745_v20, 5  ;;  %v5509_v31 = vld [vmem:[#allocation3 + $0xa0] sm:$0xf]  ;;  %v7385_v18 = vld [vmem:[#allocation4 + $0x18] sm:$0xff] }
 0x2d4   : > { %v5160_v16 = vsel %vm8808_vm2, %v5158_v25, %v5159_v59  ;;  %v4753_v6 = vrot.slane %v4751_v45, 5  ;;  %v4761_v29 = vshll.u32 %v4464_v26, 16  ;;  %v6798_v28 = vrot.slane %v6797_v23, 4  ;;  %8584 = vmatprep.mubr.msk.bf16.mxu1 %vm7434_vm7, %v7384_v54  ;;  %v6549_v39 = vld [vmem:[#allocation3 + $0x9c] sm:$0xf]  ;;  %v10866_v26 = vpop.permute.xlu0 %6467 }
 0x2d5   : > { %v8304_v47 = vcombine.low %v5157_v17, %v5160_v16  ;;  %v4757_v53 = vrot.slane %v4755_v62, 4  ;;  %v4766_v40 = vshrl.u32 %v4465_v51, 16  ;;  %v4748_v19 = vor.u32 %v4747_v5, %v4744_v42  ;;  %v5510_v60 = vld [vmem:[#allocation3 + $0xa4] sm:$0x1]  ;;  %v6550_v44 = vld [vmem:[#allocation3 + $0xa0] sm:$0xf] }
 0x2d6   : > { %v4763_v11 = vrot.slane %v4761_v29, 5  ;;  %v4769_v13 = vshll.u32 %v4465_v51, 16  ;;  %v4775_v58 = vshll.u32 %v4466_v63, 16  ;;  %v6803_v38 = vsel %vm8846_vm5, %v6798_v28, %v6802_v41  ;;  %v7386_v51 = vld [vmem:[#allocation4 + $0x20] sm:$0xff]  ;;  %v6551_v62 = vld [vmem:[#allocation3 + $0xa4] sm:$0x1] }
 0x2d7   : > { %5254 = vrot.lane.b32.xlu0 %v8304_v47, %s8758_s28  ;;  %v4758_v36 = vor.u32 %v4757_v53, %v4753_v6  ;;  %v4768_v4 = vrot.slane %v4766_v40, 4  ;;  %v4779_v55 = vshrl.u32 %v4466_v63, 16  ;;  %v8397_v15 = vcombine.low %v6793_v48, %v6803_v38  ;;  %v6053_v54 = vld [vmem:[#allocation3 + $0x9c] sm:$0xe]  ;;  %v6054_v28 = vld [vmem:[#allocation3 + $0xa0] sm:$0xf] }
 0x2d8   : > { %v4749_v35 = vrot.slane %v4748_v19, 4  ;;  %v4771_v61 = vrot.slane %v4769_v13, 5  ;;  %v4777_v1 = vrot.slane %v4775_v58, 5  ;;  %v4785_v12 = vshll.u32 %v4467_v9, 16  ;;  %v10861_v37 = vpop.permute.xlu1 %5966  ;;  %v6055_v19 = vld [vmem:[#allocation3 + $0xa4] sm:$0x1] }
 0x2d9   : > { %v4759_v10 = vrot.slane %v4758_v36, 4  ;;  %v4781_v32 = vrot.slane %v4779_v55, 4  ;;  %v5809_v50 = vshrl.u32 %v5508_v3, 16  ;;  %7014 = vrot.lane.b32.xlu1 %v8397_v15, %s8766_s22  ;;  %v5812_v24 = vshll.u32 %v5508_v3, 16  ;;  %v4468_v36 = vld [vmem:[#allocation3 + $0x9c] sm:$0xf] }
 0x2da   : > { %v4754_v14 = vsel %vm8846_vm5, %v4749_v35, %v4753_v6  ;;  %v4772_v30 = vor.u32 %v4771_v61, %v4768_v4  ;;  %v5818_v59 = vshll.u32 %v5509_v31, 16  ;;  %v4787_v41 = vrot.slane %v4785_v12, 5  ;;  %v8739_v4 = vld [vmem:[#allocation3 + $0xb4] sm:$0xff]  }
 0x2db   : > { %v4764_v22 = vsel %vm8846_vm5, %v4759_v10, %v4763_v11  ;;  %5431 = vrot.lane.b32.xlu0 %v8721_v57, %s8759_s29  ;;  %v4782_v34 = vor.u32 %v4781_v32, %v4777_v1  ;;  %v5811_v21 = vrot.slane %v5809_v50, 4  ;;  %v5814_v20 = vrot.slane %v5812_v24, 5  ;;  %8585 = vmatmul.mubr.msk.bf16.gmra.mrb[4].mxu1 %vm7434_vm7, %v7385_v18  ;;  %v10880_v57 = vpop.permute.xlu0 %7008  ;;  %v4469_v10 = vld [vmem:[#allocation3 + $0xa0] sm:$0xf]  ;;  %4428 = vst.msk [vmem:[#allocation4 + $0x78] sm:$0xff] %vm4412_vm11, %v8739_v4 }
 0x2dc   : > { %v8271_v17 = vcombine.low %v4754_v14, %v4764_v22  ;;  %v4773_v25 = vrot.slane %v4772_v30, 4  ;;  %v5820_v45 = vrot.slane %v5818_v59, 5  ;;  %v5822_v23 = vshrl.u32 %v5509_v31, 16  ;;  %8588 = vmatprep.mubr.msk.bf16.mxu1 %vm7434_vm7, %v7386_v51  ;;  %v10878_v11 = vpop.permute.xlu1 %6465  ;;  %v4470_v14 = vld [vmem:[#allocation3 + $0xa4] sm:$0x1] }
 0x2dd   : > { %v4783_v48 = vrot.slane %v4782_v34, 4  ;;  %v5828_v42 = vshll.u32 %v5510_v60, 16  ;;  %v6829_v63 = vshrl.u32 %v6549_v39, 16  ;;  %v5815_v5 = vor.u32 %v5814_v20, %v5811_v21 }
 0x2de   : > { %4931 = vrot.lane.b32.xlu1 %v8271_v17, %s8756_s26  ;;  %v4778_v16 = vsel %vm8846_vm5, %v4773_v25, %v4777_v1  ;;  %v6832_v6 = vshll.u32 %v6549_v39, 16  ;;  %v6838_v29 = vshll.u32 %v6550_v44, 16  ;;  %v5824_v53 = vrot.slane %v5822_v23, 4  ;;  %v5013_v17 = vld [vmem:[#allocation3 + $0x9c] sm:$0xe] }
 0x2df   : > { %v4788_v47 = vsel %vm8846_vm5, %v4783_v48, %v4787_v41  ;;  %v5830_v9 = vrot.slane %v5828_v42, 5  ;;  %v6831_v40 = vrot.slane %v6829_v63, 4  ;;  %v5816_v58 = vrot.slane %v5815_v5, 4  ;;  %v5014_v25 = vld [vmem:[#allocation3 + $0xa0] sm:$0xf]  ;;  %v5424_v63 = vpop.permute.xlu0 %5423 }
 0x2e0   : > { %v8272_v13 = vcombine.low %v4778_v16, %v4788_v47  ;;  %v6834_v3 = vrot.slane %v6832_v6, 5  ;;  %v6840_v38 = vrot.slane %v6838_v29, 5  ;;  %v5825_v55 = vor.u32 %v5824_v53, %v5820_v45  ;;  %v5015_v42 = vld [vmem:[#allocation3 + $0xa4] sm:$0x1] }
 0x2e1   : > { %v6842_v31 = vshrl.u32 %v6550_v44, 16  ;;  %v6848_v15 = vshll.u32 %v6551_v62, 16  ;;  %v8352_v35 = vrot.slane %v6053_v54, 9  ;;  %v5821_v61 = vsel %vm8846_vm5, %v5816_v58, %v5820_v45  ;;  %v6552_v62 = vld [vmem:[#allocation3 + $0xa8] sm:$0xf] }
 0x2e2   : > { %4933 = vrot.lane.b32.xlu1 %v8272_v13, %s8756_s26  ;;  %v6835_v1 = vor.u32 %v6834_v3, %v6831_v40  ;;  %v6199_v39 = vrot.slane %v6054_v28, 5  ;;  %v6202_v18 = vrot.slane %v6055_v19, 5  ;;  %v5826_v32 = vrot.slane %v5825_v55, 4  ;;  %v6553_v54 = vld [vmem:[#allocation3 + $0xac] sm:$0xf] }
 0x2e3   : > { %v6844_v12 = vrot.slane %v6842_v31, 4  ;;  %v6850_v50 = vrot.slane %v6848_v15, 5  ;;  %v4790_v30 = vshrl.u32 %v4468_v36, 16  ;;  %v4793_v22 = vshll.u32 %v4468_v36, 16  ;;  %v6554_v40 = vld [vmem:[#allocation3 + $0xb0] sm:$0x1] }
 0x2e4   : > { %v6836_v60 = vrot.slane %v6835_v1, 4  ;;  %v6200_v24 = vsel %vm8808_vm2, %v8352_v35, %v6199_v39  ;;  %v6201_v59 = vrot.slane %v6199_v39, 4  ;;  %v5831_v34 = vsel %vm8846_vm5, %v5826_v32, %v5830_v9  ;;  %v7097_v55 = vld [vmem:[#allocation3 + $0xa8] sm:$0xe]  ;;  %v7098_v1 = vld [vmem:[#allocation3 + $0xac] sm:$0xf] }
 0x2e5   : > { %v6845_v41 = vor.u32 %v6844_v12, %v6840_v38  ;;  %v4792_v21 = vrot.slane %v4790_v30, 4  ;;  %v4799_v44 = vshll.u32 %v4469_v10, 16  ;;  %v4926_v20 = vpop.permute.xlu1 %4925  ;;  %v8336_v45 = vcombine.low %v5821_v61, %v5831_v34  ;;  %v7099_v12 = vld [vmem:[#allocation3 + $0xb0] sm:$0x1] }
 0x2e6   : > { %v6841_v51 = vsel %vm8846_vm5, %v6836_v60, %v6840_v38  ;;  %v6203_v48 = vsel %vm8808_vm2, %v6201_v59, %v6202_v18  ;;  %v4795_v23 = vrot.slane %v4793_v22, 5  ;;  %4966 = vst.msk [vmem:[#allocation4 + $0x40] sm:$0xff] %vm4957_vm12, %v4926_v20  ;;  %v4803_v29 = vshrl.u32 %v4469_v10, 16  ;;  %v5511_v59 = vld [vmem:[#allocation3 + $0xa8] sm:$0xf] }
 0x2e7   : > { %v6846_v16 = vrot.slane %v6845_v41, 4  ;;  %v8368_v5 = vcombine.low %v6200_v24, %v6203_v48  ;;  %v4801_v6 = vrot.slane %v4799_v44, 5  ;;  %5287 = vst.msk [vmem:[#allocation4 + $0x40] sm:$0xff] %vm5278_vm13, %v10808_v46  ;;  %5976 = vrot.lane.b32.xlu0 %v8336_v45, %s8761_s6  ;;  %v4809_v47 = vshll.u32 %v4470_v14, 16  ;;  %v8722_v22 = vld [vmem:[#allocation3 + $0xa8] sm:$0xff]  }
 0x2e8   : > { %v4796_v28 = vor.u32 %v4795_v23, %v4792_v21  ;;  %v8289_v53 = vrot.slane %v5013_v17, 9  ;;  %v5163_v9 = vrot.slane %v5014_v25, 5  ;;  %5464 = vst.msk [vmem:[#allocation4 + $0x40] sm:$0xff] %vm5455_vm14, %v5424_v63  ;;  %v4805_v13 = vrot.slane %v4803_v29, 4  ;;  %v5512_v17 = vld [vmem:[#allocation3 + $0xac] sm:$0xf] }
 0x2e9   : > { %v6851_v19 = vsel %vm8846_vm5, %v6846_v16, %v6850_v50  ;;  %v5166_v58 = vrot.slane %v5015_v42, 5  ;;  %v6853_v3 = vshrl.u32 %v6552_v62, 16  ;;  %v4811_v4 = vrot.slane %v4809_v47, 5  ;;  %v5513_v48 = vld [vmem:[#allocation3 + $0xb0] sm:$0x1] }
 0x2ea   : > { %v8399_v38 = vcombine.low %v6841_v51, %v6851_v19  ;;  %v4797_v36 = vrot.slane %v4796_v28, 4  ;;  %v10903_v46 = vsel %vm8808_vm2, %v8289_v53, %v5163_v9  ;;  %v4806_v31 = vor.u32 %v4805_v13, %v4801_v6  ;;  %v7100_v16 = vld [vmem:[#allocation3 + $0xb4] sm:$0xe] }
 0x2eb   : > { %v5165_v15 = vrot.slane %v5163_v9, 4  ;;  %v6855_v35 = vrot.slane %v6853_v3, 4  ;;  %v6856_v61 = vshll.u32 %v6552_v62, 16  ;;  %6297 = vrot.lane.b32.xlu0 %v8368_v5, %s8764_s20  ;;  %v6862_v18 = vshll.u32 %v6553_v54, 16  ;;  %v7101_v5 = vld [vmem:[#allocation3 + $0xb8] sm:$0xf] }
 0x2ec   : > { %7018 = vrot.lane.b32.xlu1 %v8399_v38, %s8766_s22  ;;  %v4802_v39 = vsel %vm8846_vm5, %v4797_v36, %v4801_v6  ;;  %v6866_v10 = vshrl.u32 %v6553_v54, 16  ;;  %v6872_v32 = vshll.u32 %v6554_v40, 16  ;;  %v4807_v14 = vrot.slane %v4806_v31, 4  ;;  %v7102_v3 = vld [vmem:[#allocation3 + $0xbc] sm:$0x1] }
 0x2ed   : > { %v5965_v50 = vpop.permute.xlu0 %5964  ;;  %v5167_v30 = vsel %vm8808_vm2, %v5165_v15, %v5166_v58  ;;  %v6858_v60 = vrot.slane %v6856_v61, 5  ;;  %v8416_v24 = vrot.slane %v7097_v55, 9  ;;  %v6864_v41 = vrot.slane %v6862_v18, 5  ;;  %v6057_v38 = vld [vmem:[#allocation3 + $0xac] sm:$0xf] }
 0x2ee   : > { %6007 = vst.msk [vmem:[#allocation4 + $0x30] sm:$0xff] %vm6000_vm15, %v5965_v50  ;;  %v8305_v34 = vcombine.low %v10903_v46, %v5167_v30  ;;  %v6868_v21 = vrot.slane %v6866_v10, 4  ;;  %v6874_v44 = vrot.slane %v6872_v32, 5  ;;  %v4812_v25 = vsel %vm8846_vm5, %v4807_v14, %v4811_v4  ;;  %v5016_v31 = vld [vmem:[#allocation3 + $0xa8] sm:$0xe] }
 0x2ef   : > { %6328 = vst.msk [vmem:[#allocation4 + $0x30] sm:$0xff] %vm6321_vm0, %v10855_v52  ;;  %v6859_v20 = vor.u32 %v6858_v60, %v6855_v35  ;;  %v7243_v45 = vrot.slane %v7098_v1, 5  ;;  %v7246_v51 = vrot.slane %v7099_v12, 5  ;;  %v8273_v23 = vcombine.low %v4802_v39, %v4812_v25  ;;  %6475 = vrot.lane.b32.xlu0 %v8722_v22, %s8763_s17  ;;  %v5017_v39 = vld [vmem:[#allocation3 + $0xac] sm:$0xf] }
 0x2f0   : > { %6506 = vst.msk [vmem:[#allocation4 + $0x30] sm:$0xff] %vm6499_vm3, %v10712_v7  ;;  %v6869_v42 = vor.u32 %v6868_v21, %v6864_v41  ;;  %v5833_v62 = vshrl.u32 %v5511_v59, 16  ;;  %v5836_v63 = vshll.u32 %v5511_v59, 16  ;;  %v7007_v52 = vpop.permute.xlu1 %7006  ;;  %v5842_v28 = vshll.u32 %v5512_v17, 16  ;;  %v6056_v7 = vld [vmem:[#allocation3 + $0xa8] sm:$0xe] }
 0x2f1   : > { %7051 = vst.msk [vmem:[#allocation4 + $0x30] sm:$0xff] %vm7044_vm4, %v10880_v57  ;;  %v6860_v6 = vrot.slane %v6859_v20, 4  ;;  %v10924_v29 = vsel %vm8808_vm2, %v8416_v24, %v7243_v45  ;;  %v7245_v54 = vrot.slane %v7243_v45, 4  ;;  %vm11206_vm1 = vcmask 589312   ;;  %7050 = vst.msk [vmem:[#allocation4 + $0x28] sm:$0xff] %vm7044_vm4, %v7007_v52  ;;  %4935 = vrot.lane.b32.xlu1 %v8273_v23, %s8756_s26  ;;  %v10932_v40 = vpop.permute.xlu0 %7333  ;;  %v8724_v22 = vld [vmem:[#allocation3 + $0xa8] sm:$0xff]  }
 0x2f2   : > { %7372 = vst.msk [vmem:[#allocation4 + $0x30] sm:$0xff] %vm11206_vm1, %v10791_v2  ;;  %v6870_v47 = vrot.slane %v6869_v42, 4  ;;  %v5835_v53 = vrot.slane %v5833_v62, 4  ;;  %v5838_v9 = vrot.slane %v5836_v63, 5  ;;  %v5846_v57 = vshrl.u32 %v5512_v17, 16  ;;  %vm11207_vm8 = vmmov %vm11206_vm1 }
 0x2f3   : > { %7371 = vst.msk [vmem:[#allocation4 + $0x28] sm:$0xff] %vm11207_vm8, %v10837_v49  ;;  %v6865_v19 = vsel %vm8846_vm5, %v6860_v6, %v6864_v41  ;;  %v7247_v13 = vsel %vm8808_vm2, %v7245_v54, %v7246_v51  ;;  %v5844_v2 = vrot.slane %v5842_v28, 5  ;;  %v5852_v58 = vshll.u32 %v5513_v48, 16  ;;  %v6058_v49 = vld [vmem:[#allocation3 + $0xb0] sm:$0x1]  ;;  %vm11208_vm9 = vmmov %vm11206_vm1 }
 0x2f4   : > { %v6875_v36 = vsel %vm8846_vm5, %v6870_v47, %v6874_v44  ;;  %v8432_v4 = vcombine.low %v10924_v29, %v7247_v13  ;;  %v5839_v46 = vor.u32 %v5838_v9, %v5835_v53  ;;  %v5848_v55 = vrot.slane %v5846_v57, 4  ;;  %v5018_v50 = vld [vmem:[#allocation3 + $0xb0] sm:$0x1]  ;;  %v6555_v17 = vld [vmem:[#allocation3 + $0xb4] sm:$0xf]  ;;  %vm11209_vm10 = vmmov %vm11206_vm1 }
 0x2f5   : > { %v8400_v15 = vcombine.low %v6865_v19, %v6875_v36  ;;  %v5854_v35 = vrot.slane %v5852_v58, 5  ;;  %v8417_v61 = vrot.slane %v7100_v16, 9  ;;  %v7250_v1 = vrot.slane %v7101_v5, 5  ;;  %5256 = vrot.lane.b32.xlu1 %v8305_v34, %s8758_s28  ;;  %v10948_v25 = vpop.permute.xlu0 %5250  ;;  %v6556_v23 = vld [vmem:[#allocation3 + $0xb8] sm:$0xf]  ;;  %vm11212_vm11 = vmmov %vm11206_vm1 }
 0x2f6   : > { %v5840_v18 = vrot.slane %v5839_v46, 4  ;;  %v5849_v10 = vor.u32 %v5848_v55, %v5844_v2  ;;  %v7253_v32 = vrot.slane %v7102_v3, 5  ;;  %v8353_v12 = vrot.slane %v6056_v7, 9  ;;  %v6557_v52 = vld [vmem:[#allocation3 + $0xbc] sm:$0x1]  ;;  %vm11213_vm6 = vmmov %vm11206_vm1 }
 0x2f7   : > { %7020 = vrot.lane.b32.xlu0 %v8400_v15, %s8766_s22  ;;  %v7251_v14 = vsel %vm8808_vm2, %v8417_v61, %v7250_v1  ;;  %v7252_v30 = vrot.slane %v7250_v1, 4  ;;  %v6206_v60 = vrot.slane %v6057_v38, 5  ;;  %v6209_v24 = vrot.slane %v6058_v49, 5  ;;  %v4924_v59 = vpop.permute.xlu1 %4923  ;;  %v5514_v7 = vld [vmem:[#allocation3 + $0xb4] sm:$0xf]  ;;  %vm11214_vm8 = vmmov %vm11206_vm1 }
 0x2f8   : > { %v5845_v41 = vsel %vm8846_vm5, %v5840_v18, %v5844_v2  ;;  %v5850_v21 = vrot.slane %v5849_v10, 4  ;;  %v8290_v34 = vrot.slane %v5016_v31, 9  ;;  %v5170_v44 = vrot.slane %v5017_v39, 5  ;;  %4965 = vst.msk [vmem:[#allocation4 + $0x38] sm:$0xff] %vm4957_vm12, %v4924_v59  ;;  %v5515_v19 = vld [vmem:[#allocation3 + $0xb8] sm:$0xf] }
 0x2f9   : > { %v7254_v20 = vsel %vm8808_vm2, %v7252_v30, %v7253_v32  ;;  %v6207_v45 = vsel %vm8808_vm2, %v8353_v12, %v6206_v60  ;;  %v6208_v51 = vrot.slane %v6206_v60, 4  ;;  %v5173_v48 = vrot.slane %v5018_v50, 5  ;;  %5286 = vst.msk [vmem:[#allocation4 + $0x38] sm:$0xff] %vm5278_vm13, %v10842_v27  ;;  %5433 = vrot.lane.b32.xlu1 %v8724_v22, %s8759_s29  ;;  %v7388_v6 = vld [vmem:[#allocation4 + $0x30] sm:$0xff]  ;;  %v5516_v38 = vld [vmem:[#allocation3 + $0xbc] sm:$0x1]  ;;  %v10979_v49 = vpop.permute.xlu0 %7331 }
 0x2fa   : > { %v7387_v42 = vld [vmem:[#allocation4 + $0x28] sm:$0xff]  ;;  %v5855_v62 = vsel %vm8846_vm5, %v5850_v21, %v5854_v35  ;;  %v8433_v63 = vcombine.low %v7251_v14, %v7254_v20  ;;  %v5171_v16 = vsel %vm8808_vm2, %v8290_v34, %v5170_v44  ;;  %v5172_v5 = vrot.slane %v5170_v44, 4  ;;  %5463 = vst.msk [vmem:[#allocation4 + $0x38] sm:$0xff] %vm5455_vm14, %v10705_v56  ;;  %v4471_v55 = vld [vmem:[#allocation3 + $0xa8] sm:$0xf] }
 0x2fb   : > { %8589 = vmatmul.mubr.msk.bf16.gmra.mrb[8].mxu1 %vm7434_vm7, %v7387_v42  ;;  %7341 = vrot.lane.b32.xlu0 %v8432_v4, %s8765_s21  ;;  %v8337_v27 = vcombine.low %v5845_v41, %v5855_v62  ;;  %v6210_v29 = vsel %vm8808_vm2, %v6208_v51, %v6209_v24  ;;  %v6877_v54 = vshrl.u32 %v6555_v17, 16  ;;  %v6880_v28 = vshll.u32 %v6555_v17, 16  ;;  %6008 = vst.msk [vmem:[#allocation4 + $0x38] sm:$0xff] %vm6000_vm15, %v10861_v37  ;;  %v10969_v47 = vpop.permute.xlu1 %6291  ;;  %v4472_v10 = vld [vmem:[#allocation3 + $0xac] sm:$0xf] }
 0x2fc   : > { %8592 = vmatprep.mubr.msk.bf16.mxu1 %vm7434_vm7, %v7388_v6  ;;  %v8369_v56 = vcombine.low %v6207_v45, %v6210_v29  ;;  %v5174_v53 = vsel %vm8808_vm2, %v5172_v5, %v5173_v48  ;;  %v6886_v9 = vshll.u32 %v6556_v23, 16  ;;  %v6890_v57 = vshrl.u32 %v6556_v23, 16  ;;  %6329 = vst.msk [vmem:[#allocation4 + $0x38] sm:$0xff] %vm6321_vm0, %v10818_v8  ;;  %v4473_v59 = vld [vmem:[#allocation3 + $0xb0] sm:$0x1]  ;;  %v8726_v45 = vld [vmem:[#allocation3 + $0xb4] sm:$0xff]  }
 0x2fd   : > { %v8306_v13 = vcombine.low %v5171_v16, %v5174_v53  ;;  %v6879_v2 = vrot.slane %v6877_v54, 4  ;;  %v6882_v58 = vrot.slane %v6880_v28, 5  ;;  %v6896_v3 = vshll.u32 %v6557_v52, 16  ;;  %6507 = vst.msk [vmem:[#allocation4 + $0x38] sm:$0xff] %vm6499_vm3, %v10878_v11  ;;  %5978 = vrot.lane.b32.xlu1 %v8337_v27, %s8761_s6  ;;  %v6059_v17 = vld [vmem:[#allocation3 + $0xb4] sm:$0xe] }
 0x2fe   : > { %v6888_v37 = vrot.slane %v6886_v9, 5  ;;  %v6892_v36 = vrot.slane %v6890_v57, 4  ;;  %v5857_v4 = vshrl.u32 %v5514_v7, 16  ;;  %v5860_v46 = vshll.u32 %v5514_v7, 16  ;;  %v6060_v20 = vld [vmem:[#allocation3 + $0xb8] sm:$0xf] }
 0x2ff   : > { %7343 = vrot.lane.b32.xlu0 %v8433_v63, %s8765_s21  ;;  %v6883_v8 = vor.u32 %v6882_v58, %v6879_v2  ;;  %v6898_v31 = vrot.slane %v6896_v3, 5  ;;  %v5866_v15 = vshll.u32 %v5515_v19, 16  ;;  %v5870_v35 = vshrl.u32 %v5515_v19, 16  ;;  %v10982_v61 = vpop.permute.xlu1 %5248  ;;  %v6061_v62 = vld [vmem:[#allocation3 + $0xbc] sm:$0x1]  ;;  %v10990_v63 = vpop.permute.xlu0 %6289  ;;  %v8727_v16 = vld [vmem:[#allocation3 + $0xb4] sm:$0xff]  }
 0x300   : > { %v6893_v1 = vor.u32 %v6892_v36, %v6888_v37  ;;  %v5859_v39 = vrot.slane %v5857_v4, 4  ;;  %v5862_v11 = vrot.slane %v5860_v46, 5  ;;  %v5876_v18 = vshll.u32 %v5516_v38, 16  ;;  %v4474_v29 = vld [vmem:[#allocation3 + $0xb4] sm:$0xf] }
 0x301   : > { %v6884_v32 = vrot.slane %v6883_v8, 4  ;;  %v5868_v12 = vrot.slane %v5866_v15, 5  ;;  %v5872_v50 = vrot.slane %v5870_v35, 4  ;;  %v4814_v14 = vshrl.u32 %v4471_v55, 16  ;;  %6299 = vrot.lane.b32.xlu1 %v8369_v56, %s8764_s20  ;;  %v4475_v9 = vld [vmem:[#allocation3 + $0xb8] sm:$0xf] }
 0x302   : > { %v6894_v30 = vrot.slane %v6893_v1, 4  ;;  %v5863_v60 = vor.u32 %v5862_v11, %v5859_v39  ;;  %v5878_v24 = vrot.slane %v5876_v18, 5  ;;  %v4817_v22 = vshll.u32 %v4471_v55, 16  ;;  %v5019_v4 = vld [vmem:[#allocation3 + $0xb4] sm:$0xe] }
 0x303   : > { %5258 = vrot.lane.b32.xlu0 %v8306_v13, %s8758_s28  ;;  %v6889_v41 = vsel %vm8846_vm5, %v6884_v32, %v6888_v37  ;;  %v5873_v21 = vor.u32 %v5872_v50, %v5868_v12  ;;  %v4816_v34 = vrot.slane %v4814_v14, 4  ;;  %v4823_v44 = vshll.u32 %v4472_v10, 16  ;;  %v10992_v54 = vpop.permute.xlu1 %5429  ;;  %v4476_v37 = vld [vmem:[#allocation3 + $0xbc] sm:$0x1]  ;;  %v5020_v15 = vld [vmem:[#allocation3 + $0xb8] sm:$0xf] }
 0x304   : > { %v6899_v51 = vsel %vm8846_vm5, %v6894_v30, %v6898_v31  ;;  %v5864_v48 = vrot.slane %v5863_v60, 4  ;;  %v4819_v23 = vrot.slane %v4817_v22, 5  ;;  %v4827_v42 = vshrl.u32 %v4472_v10, 16  ;;  %v5021_v18 = vld [vmem:[#allocation3 + $0xbc] sm:$0x1]  ;;  %v11005_v10 = vpop.permute.xlu0 %6471 }
 0x305   : > { %v8401_v5 = vcombine.low %v6889_v41, %v6899_v51  ;;  %v5874_v52 = vrot.slane %v5873_v21, 4  ;;  %v4825_v6 = vrot.slane %v4823_v44, 5  ;;  %v4833_v27 = vshll.u32 %v4473_v59, 16  ;;  %6477 = vrot.lane.b32.xlu1 %v8726_v45, %s8763_s17  ;;  %v6558_v30 = vld [vmem:[#allocation3 + $0xc0] sm:$0xf] }
 0x306   : > { %v5869_v28 = vsel %vm8846_vm5, %v5864_v48, %v5868_v12  ;;  %v4820_v7 = vor.u32 %v4819_v23, %v4816_v34  ;;  %v4829_v56 = vrot.slane %v4827_v42, 4  ;;  %v8354_v53 = vrot.slane %v6059_v17, 9  ;;  %v6559_v21 = vld [vmem:[#allocation3 + $0xc4] sm:$0xf]  ;;  %v6560_v48 = vld [vmem:[#allocation3 + $0xc8] sm:$0x1] }
 0x307   : > { %5435 = vrot.lane.b32.xlu0 %v8727_v16, %s8759_s29  ;;  %v5879_v57 = vsel %vm8846_vm5, %v5874_v52, %v5878_v24  ;;  %v4835_v19 = vrot.slane %v4833_v27, 5  ;;  %v6213_v13 = vrot.slane %v6060_v20, 5  ;;  %v6216_v2 = vrot.slane %v6061_v62, 5  ;;  %v11010_v60 = vpop.permute.xlu1 %5970  ;;  %v8728_v16 = vld [vmem:[#allocation3 + $0xc0] sm:$0xff]  }
 0x308   : > { %v8338_v58 = vcombine.low %v5869_v28, %v5879_v57  ;;  %v4821_v3 = vrot.slane %v4820_v7, 4  ;;  %v4830_v38 = vor.u32 %v4829_v56, %v4825_v6  ;;  %v4838_v36 = vshrl.u32 %v4474_v29, 16  ;;  %v7104_v56 = vld [vmem:[#allocation3 + $0xc4] sm:$0xf] }
 0x309   : > { %v6214_v46 = vsel %vm8808_vm2, %v8354_v53, %v6213_v13  ;;  %v6215_v55 = vrot.slane %v6213_v13, 4  ;;  %v4841_v8 = vshll.u32 %v4474_v29, 16  ;;  %v4847_v31 = vshll.u32 %v4475_v9, 16  ;;  %7022 = vrot.lane.b32.xlu1 %v8401_v5, %s8766_s22  ;;  %v11016_v53 = vpop.permute.xlu0 %7012 }
 0x30a   : > { %v4826_v35 = vsel %vm8846_vm5, %v4821_v3, %v4825_v6  ;;  %v4831_v1 = vrot.slane %v4830_v38, 4  ;;  %v4840_v39 = vrot.slane %v4838_v36, 4  ;;  %v4851_v11 = vshrl.u32 %v4475_v9, 16  ;;  %v7103_v6 = vld [vmem:[#allocation3 + $0xc0] sm:$0xe] }
 0x30b   : > { %5980 = vrot.lane.b32.xlu0 %v8338_v58, %s8761_s6  ;;  %v6217_v32 = vsel %vm8808_vm2, %v6215_v55, %v6216_v2  ;;  %v4843_v12 = vrot.slane %v4841_v8, 5  ;;  %v4849_v50 = vrot.slane %v4847_v31, 5  ;;  %v4857_v14 = vshll.u32 %v4476_v37, 16  ;;  %v7105_v2 = vld [vmem:[#allocation3 + $0xc8] sm:$0x1]  ;;  %v11022_v3 = vpop.permute.xlu1 %6469 }
 0x30c   : > { %v4836_v24 = vsel %vm8846_vm5, %v4831_v1, %v4835_v19  ;;  %v8370_v59 = vcombine.low %v6214_v46, %v6217_v32  ;;  %v4853_v22 = vrot.slane %v4851_v11, 4  ;;  %v8291_v41 = vrot.slane %v5019_v4, 9  ;;  %v5517_v58 = vld [vmem:[#allocation3 + $0xc0] sm:$0xf]  ;;  %v5518_v46 = vld [vmem:[#allocation3 + $0xc4] sm:$0xf] }
 0x30d   : > { %v8274_v34 = vcombine.low %v4826_v35, %v4836_v24  ;;  %v4844_v44 = vor.u32 %v4843_v12, %v4840_v39  ;;  %v4859_v17 = vrot.slane %v4857_v14, 5  ;;  %v5177_v20 = vrot.slane %v5020_v15, 5  ;;  %v5519_v11 = vld [vmem:[#allocation3 + $0xc8] sm:$0x1]  ;;  %v6062_v14 = vld [vmem:[#allocation3 + $0xc0] sm:$0xe] }
 0x30e   : > { %v4854_v45 = vor.u32 %v4853_v22, %v4849_v50  ;;  %v5180_v51 = vrot.slane %v5021_v18, 5  ;;  %v6901_v23 = vshrl.u32 %v6558_v30, 16  ;;  %v6904_v42 = vshll.u32 %v6558_v30, 16 }
 0x30f   : > { %4937 = vrot.lane.b32.xlu1 %v8274_v34, %s8756_s26  ;;  %6301 = vrot.lane.b32.xlu0 %v8370_v59, %s8764_s20  ;;  %v4845_v62 = vrot.slane %v4844_v44, 4  ;;  %v5179_v5 = vrot.slane %v5177_v20, 4  ;;  %v6910_v52 = vshll.u32 %v6559_v21, 16  ;;  %v6914_v7 = vshrl.u32 %v6559_v21, 16  ;;  %v5428_v21 = vpop.permute.xlu0 %5427 }
 0x310   : > { %v4855_v27 = vrot.slane %v4854_v45, 4  ;;  %v6903_v29 = vrot.slane %v6901_v23, 4  ;;  %v6906_v28 = vrot.slane %v6904_v42, 5  ;;  %v5178_v57 = vsel %vm8808_vm2, %v8291_v41, %v5177_v20  ;;  %v6063_v41 = vld [vmem:[#allocation3 + $0xc4] sm:$0xf] }
 0x311   : > { %v4850_v9 = vsel %vm8846_vm5, %v4845_v62, %v4849_v50  ;;  %v6912_v19 = vrot.slane %v6910_v52, 5  ;;  %v6920_v13 = vshll.u32 %v6560_v48, 16  ;;  %v5181_v37 = vsel %vm8808_vm2, %v5179_v5, %v5180_v51  ;;  %v6561_v45 = vld [vmem:[#allocation3 + $0xcc] sm:$0xf]  ;;  %v6562_v5 = vld [vmem:[#allocation3 + $0xd0] sm:$0xf] }
 0x312   : > { %v4860_v38 = vsel %vm8846_vm5, %v4855_v27, %v4859_v17  ;;  %v6907_v36 = vor.u32 %v6906_v28, %v6903_v29  ;;  %v6916_v4 = vrot.slane %v6914_v7, 4  ;;  %v8418_v31 = vrot.slane %v7103_v6, 9 }
 0x313   : > { %v8275_v55 = vcombine.low %v4850_v9, %v4860_v38  ;;  %6479 = vrot.lane.b32.xlu0 %v8728_v16, %s8763_s17  ;;  %v6922_v8 = vrot.slane %v6920_v13, 5  ;;  %v7257_v15 = vrot.slane %v7104_v56, 5  ;;  %v7260_v39 = vrot.slane %v7105_v2, 5  ;;  %v6064_v16 = vld [vmem:[#allocation3 + $0xc8] sm:$0x1] }
 0x314   : > { %v6908_v35 = vrot.slane %v6907_v36, 4  ;;  %v6917_v1 = vor.u32 %v6916_v4, %v6912_v19  ;;  %v5881_v18 = vshrl.u32 %v5517_v58, 16  ;;  %v5884_v12 = vshll.u32 %v5517_v58, 16  ;;  %v6563_v56 = vld [vmem:[#allocation3 + $0xd4] sm:$0x1] }
 0x315   : > { %4939 = vrot.lane.b32.xlu1 %v8275_v55, %s8756_s26  ;;  %v7259_v32 = vrot.slane %v7257_v15, 4  ;;  %v5890_v50 = vshll.u32 %v5518_v46, 16  ;;  %v5894_v22 = vshrl.u32 %v5518_v46, 16  ;;  %v8307_v34 = vcombine.low %v5178_v57, %v5181_v37  ;;  %s8459_s26 = sshll.u32 %s11217_s19, 8 }
 0x316   : > { %v6913_v30 = vsel %vm8846_vm5, %v6908_v35, %v6912_v19  ;;  %v6918_v24 = vrot.slane %v6917_v1, 4  ;;  %v5883_v59 = vrot.slane %v5881_v18, 4  ;;  %v5886_v44 = vrot.slane %v5884_v12, 5  ;;  %v4930_v51 = vpop.permute.xlu1 %4929  ;;  %v8730_v19 = vld [vmem:[#allocation3 + $0xc0] sm:$0xff]   ;;  %v7107_v18 = vld [vmem:[#allocation3 + $0xd0] sm:$0xf] }
 0x317   : > { %v5892_v17 = vrot.slane %v5890_v50, 5  ;;  %v5900_v20 = vshll.u32 %v5519_v11, 16  ;;  %v7258_v23 = vsel %vm8808_vm2, %v8418_v31, %v7257_v15  ;;  %v7261_v42 = vsel %vm8808_vm2, %v7259_v32, %v7260_v39  ;;  %4968 = vst.msk [vmem:[#allocation4 + $0x50] sm:$0xff] %vm4957_vm12, %v4930_v51 }
 0x318   : > { %v6923_v48 = vsel %vm8846_vm5, %v6918_v24, %v6922_v8  ;;  %v5896_v62 = vrot.slane %v5894_v22, 4  ;;  %v5887_v6 = vor.u32 %v5886_v44, %v5883_v59  ;;  %v8355_v27 = vrot.slane %v6062_v14, 9  ;;  %5289 = vst.msk [vmem:[#allocation4 + $0x50] sm:$0xff] %vm5278_vm13, %v10948_v25  ;;  %v7106_v24 = vld [vmem:[#allocation3 + $0xcc] sm:$0xe] }
 0x319   : > { %5260 = vrot.lane.b32.xlu1 %v8307_v34, %s8758_s28  ;;  %v8402_v52 = vcombine.low %v6913_v30, %v6923_v48  ;;  %v6220_v29 = vrot.slane %v6063_v41, 5  ;;  %v5902_v7 = vrot.slane %v5900_v20, 5  ;;  %v6925_v9 = vshrl.u32 %v6561_v45, 16  ;;  %5466 = vst.msk [vmem:[#allocation4 + $0x50] sm:$0xff] %vm5455_vm14, %v5428_v21  ;;  %v7108_v21 = vld [vmem:[#allocation3 + $0xd4] sm:$0x1] }
 0x31a   : > { %v5897_v28 = vor.u32 %v5896_v62, %v5892_v17  ;;  %v6928_v57 = vshll.u32 %v6561_v45, 16  ;;  %v5888_v13 = vrot.slane %v5887_v6, 4  ;;  %v6223_v58 = vrot.slane %v6064_v16, 5 }
 0x31b   : > { %7024 = vrot.lane.b32.xlu0 %v8402_v52, %s8766_s22  ;;  %v6222_v2 = vrot.slane %v6220_v29, 4  ;;  %v6934_v38 = vshll.u32 %v6562_v5, 16  ;;  %v6927_v36 = vrot.slane %v6925_v9, 4  ;;  %v6938_v46 = vshrl.u32 %v6562_v5, 16  ;;  %v5969_v55 = vpop.permute.xlu0 %5968 }
 0x31c   : > { %v5898_v37 = vrot.slane %v5897_v28, 4  ;;  %v6930_v4 = vrot.slane %v6928_v57, 5  ;;  %v8434_v25 = vcombine.low %v7258_v23, %v7261_v42  ;;  %v5893_v8 = vsel %vm8846_vm5, %v5888_v13, %v5892_v17  ;;  %6009 = vst.msk [vmem:[#allocation4 + $0x40] sm:$0xff] %vm6000_vm15, %v5969_v55 }
 0x31d   : > { %5437 = vrot.lane.b32.xlu1 %v8730_v19, %s8759_s29  ;;  %v6936_v31 = vrot.slane %v6934_v38, 5  ;;  %v6940_v1 = vrot.slane %v6938_v46, 4  ;;  %v6944_v39 = vshll.u32 %v6563_v56, 16  ;;  %6330 = vst.msk [vmem:[#allocation4 + $0x40] sm:$0xff] %vm6321_vm0, %v10990_v63  ;;  %v6221_v32 = vsel %vm8808_vm2, %v8355_v27, %v6220_v29 }
 0x31e   : > { %v5903_v15 = vsel %vm8846_vm5, %v5898_v37, %v5902_v7  ;;  %v6931_v35 = vor.u32 %v6930_v4, %v6927_v36  ;;  %6508 = vst.msk [vmem:[#allocation4 + $0x40] sm:$0xff] %vm6499_vm3, %v10866_v26  ;;  %v6224_v12 = vsel %vm8808_vm2, %v6222_v2, %v6223_v58  ;;  %v7264_v59 = vrot.slane %v7107_v18, 5 }
 0x31f   : > { %7345 = vrot.lane.b32.xlu0 %v8434_v25, %s8765_s21  ;;  %v8339_v11 = vcombine.low %v5893_v8, %v5903_v15  ;;  %v6941_v50 = vor.u32 %v6940_v1, %v6936_v31  ;;  %7053 = vst.msk [vmem:[#allocation4 + $0x40] sm:$0xff] %vm7044_vm4, %v11016_v53  ;;  %v6946_v30 = vrot.slane %v6944_v39, 5  ;;  %v7336_v22 = vpop.permute.xlu0 %7335  ;;  %v8371_v41 = vcombine.low %v6221_v32, %v6224_v12  ;;  %v8732_v53 = vld [vmem:[#allocation3 + $0xcc] sm:$0xff]  }
 0x320   : > { %v7011_v14 = vpop.permute.xlu1 %7010  ;;  %7374 = vst.msk [vmem:[#allocation4 + $0x40] sm:$0xff] %vm11208_vm9, %v10932_v40  ;;  %v6932_v63 = vrot.slane %v6931_v35, 4  ;;  %v8419_v34 = vrot.slane %v7106_v24, 9  ;;  %v7266_v17 = vrot.slane %v7264_v59, 4  ;;  %v7267_v20 = vrot.slane %v7108_v21, 5 }
 0x321   : > { %5982 = vrot.lane.b32.xlu1 %v8339_v11, %s8761_s6  ;;  %7052 = vst.msk [vmem:[#allocation4 + $0x38] sm:$0xff] %vm7044_vm4, %v7011_v14  ;;  %v6942_v26 = vrot.slane %v6941_v50, 4  ;;  %s11151_s6 = scalar_lea.vmem %s11194_s5, %s8459_s26 }
 0x322   : > { %7373 = vst.msk [vmem:[#allocation4 + $0x38] sm:$0xff] %vm11209_vm10, %v10979_v49  ;;  %v6937_v40 = vsel %vm8846_vm5, %v6932_v63, %v6936_v31  ;;  %v7265_v23 = vsel %vm8808_vm2, %v8419_v34, %v7264_v59  ;;  %v7268_v43 = vsel %vm8808_vm2, %v7266_v17, %v7267_v20  ;;  %vm11210_vm2 = vmmov %vm11206_vm1 }
 0x323   : > { %v6947_v44 = vsel %vm8846_vm5, %v6942_v26, %v6946_v30  ;;  %vm11211_vm5 = vmmov %vm11206_vm1 }
 0x324   : > { %v6294_v51 = vpop.permute.xlu0 %6293  ;;  %v8403_v49 = vcombine.low %v6937_v40, %v6947_v44 }
 0x325   : > { %6303 = vrot.lane.b32.xlu1 %v8371_v41, %s8764_s20 }
 0x326   : > { %v4928_v45 = vpop.permute.xlu1 %4927 }
 0x327   : > { %4967 = vst.msk [vmem:[#allocation4 + $0x48] sm:$0xff] %vm4957_vm12, %v4928_v45  ;;  %v7390_v42 = vld [vmem:[#allocation4 + $0x40] sm:$0xff] }
 0x328   : > { %5288 = vst.msk [vmem:[#allocation4 + $0x48] sm:$0xff] %vm5278_vm13, %v10982_v61  ;;  %v8435_v61 = vcombine.low %v7265_v23, %v7268_v43 }
 0x329   : > { %6481 = vrot.lane.b32.xlu1 %v8732_v53, %s8763_s17  ;;  %v7389_v48 = vld [vmem:[#allocation4 + $0x38] sm:$0xff]  ;;  %5465 = vst.msk [vmem:[#allocation4 + $0x48] sm:$0xff] %vm5455_vm14, %v10850_v33 }
 0x32a   : > { %8593 = vmatmul.mubr.msk.bf16.gmra.mrb[12].mxu1 %vm7434_vm7, %v7389_v48  ;;  %6010 = vst.msk [vmem:[#allocation4 + $0x48] sm:$0xff] %vm6000_vm15, %v11010_v60 }
 0x32b   : > { %8596 = vmatprep.mubr.msk.bf16.mxu1 %vm7434_vm7, %v7390_v42  ;;  %6331 = vst.msk [vmem:[#allocation4 + $0x48] sm:$0xff] %vm6321_vm0, %v10969_v47  ;;  %v6296_v47 = vpop.permute.xlu1 %6295 }
 0x32c   : > { %6509 = vst.msk [vmem:[#allocation4 + $0x48] sm:$0xff] %vm6499_vm3, %v11022_v3 }
 0x32d   : > { %7026 = vrot.lane.b32.xlu1 %v8403_v49, %s8766_s22 }
 0x32e   : > { %v5973_v0 = vpop.permute.xlu0 %5972 }
 0x32f   : > { %6011 = vst.msk [vmem:[#allocation4 + $0x50] sm:$0xff] %vm6000_vm15, %v5973_v0  ;;  %v5253_v62 = vpop.permute.xlu1 %5252 }
 0x330   : > { %6332 = vst.msk [vmem:[#allocation4 + $0x50] sm:$0xff] %vm6321_vm0, %v6294_v51 }
 0x331   : > { %7347 = vrot.lane.b32.xlu1 %v8435_v61, %s8765_s21  ;;  %6510 = vst.msk [vmem:[#allocation4 + $0x50] sm:$0xff] %vm6499_vm3, %v11005_v10 }
 0x332   : > { %v7017_v33 = vpop.permute.xlu0 %7016 }
 0x333   : > { %7055 = vst.msk [vmem:[#allocation4 + $0x50] sm:$0xff] %vm7044_vm4, %v7017_v33 }
 0x336   : > { %v7338_v60 = vpop.permute.xlu0 %7337 }
 0x337   : > { %7376 = vst.msk [vmem:[#allocation4 + $0x50] sm:$0xff] %vm11210_vm2, %v7338_v60 }
 0x339   : > { %v5975_v16 = vpop.permute.xlu1 %5974 }
 0x33c   : > { %v7340_v5 = vpop.permute.xlu0 %7339 }
 0x33d   : > { %v6474_v3 = vpop.permute.xlu1 %6473 }
 0x33e   : > { %v7392_v7 = vld [vmem:[#allocation4 + $0x50] sm:$0xff] }
 0x349   : > { %v5255_v6 = vpop.permute.xlu0 %5254 }
 0x34b   : > { %v7015_v52 = vpop.permute.xlu1 %7014 }
 0x34c   : > { %7054 = vst.msk [vmem:[#allocation4 + $0x48] sm:$0xff] %vm7044_vm4, %v7015_v52 }
 0x34d   : > { %7375 = vst.msk [vmem:[#allocation4 + $0x48] sm:$0xff] %vm11211_vm5, %v7336_v22  ;;  %v5432_v10 = vpop.permute.xlu0 %5431 }
 0x350   : > { %v4932_v27 = vpop.permute.xlu1 %4931 }
 0x351   : > { %4969 = vst.msk [vmem:[#allocation4 + $0x58] sm:$0xff] %vm4957_vm12, %v4932_v27 }
 0x352   : > { %5290 = vst.msk [vmem:[#allocation4 + $0x58] sm:$0xff] %vm5278_vm13, %v5253_v62 }
 0x353   : > { %5467 = vst.msk [vmem:[#allocation4 + $0x58] sm:$0xff] %vm5455_vm14, %v10992_v54 }
 0x354   : > { %6012 = vst.msk [vmem:[#allocation4 + $0x58] sm:$0xff] %vm6000_vm15, %v5975_v16  ;;  %v4934_v29 = vpop.permute.xlu1 %4933  ;;  %v7391_v28 = vld [vmem:[#allocation4 + $0x48] sm:$0xff] }
 0x355   : > { %6333 = vst.msk [vmem:[#allocation4 + $0x58] sm:$0xff] %vm6321_vm0, %v6296_v47  ;;  %8597 = vmatmul.mubr.msk.bf16.gmra.mrb[16].mxu1 %vm7434_vm7, %v7391_v28 }
 0x356   : > { %4970 = vst.msk [vmem:[#allocation4 + $0x60] sm:$0xff] %vm4957_vm12, %v4934_v29  ;;  %8600 = vmatprep.mubr.msk.bf16.mxu1 %vm7434_vm7, %v7392_v7 }
 0x357   : > { %5291 = vst.msk [vmem:[#allocation4 + $0x60] sm:$0xff] %vm5278_vm13, %v5255_v6 }
 0x358   : > { %6511 = vst.msk [vmem:[#allocation4 + $0x58] sm:$0xff] %vm6499_vm3, %v6474_v3 }
 0x359   : > { %5468 = vst.msk [vmem:[#allocation4 + $0x60] sm:$0xff] %vm5455_vm14, %v5432_v10  ;;  %v5977_v54 = vpop.permute.xlu0 %5976 }
 0x35a   : > { %6013 = vst.msk [vmem:[#allocation4 + $0x60] sm:$0xff] %vm6000_vm15, %v5977_v54 }
 0x35d   : > { %v6298_v9 = vpop.permute.xlu0 %6297 }
 0x35e   : > { %v7019_v56 = vpop.permute.xlu1 %7018  ;;  %6334 = vst.msk [vmem:[#allocation4 + $0x60] sm:$0xff] %vm6321_vm0, %v6298_v9 }
 0x35f   : > { %7056 = vst.msk [vmem:[#allocation4 + $0x58] sm:$0xff] %vm7044_vm4, %v7019_v56 }
 0x360   : > { %7377 = vst.msk [vmem:[#allocation4 + $0x58] sm:$0xff] %vm11212_vm11, %v7340_v5 }
 0x361   : > { %v6476_v57 = vpop.permute.xlu0 %6475 }
 0x362   : > { %6512 = vst.msk [vmem:[#allocation4 + $0x60] sm:$0xff] %vm6499_vm3, %v6476_v57 }
 0x363   : > { %v4936_v19 = vpop.permute.xlu1 %4935 }
 0x364   : > { %4971 = vst.msk [vmem:[#allocation4 + $0x68] sm:$0xff] %vm4957_vm12, %v4936_v19 }
 0x367   : > { %v7393_v13 = vld [vmem:[#allocation4 + $0x58] sm:$0xff]  ;;  %v5257_v2 = vpop.permute.xlu1 %5256 }
 0x368   : > { %8601 = vmatmul.mubr.msk.bf16.gmra.mrb[20].mxu1 %vm7434_vm7, %v7393_v13  ;;  %5292 = vst.msk [vmem:[#allocation4 + $0x68] sm:$0xff] %vm5278_vm13, %v5257_v2 }
 0x369   : > { %v7021_v58 = vpop.permute.xlu0 %7020 }
 0x36a   : > { %7057 = vst.msk [vmem:[#allocation4 + $0x60] sm:$0xff] %vm7044_vm4, %v7021_v58 }
 0x36b   : > { %v5434_v38 = vpop.permute.xlu1 %5433 }
 0x36c   : > { %5469 = vst.msk [vmem:[#allocation4 + $0x68] sm:$0xff] %vm5455_vm14, %v5434_v38 }
 0x36d   : > { %v7342_v37 = vpop.permute.xlu0 %7341 }
 0x36e   : > { %7378 = vst.msk [vmem:[#allocation4 + $0x60] sm:$0xff] %vm11213_vm6, %v7342_v37 }
 0x36f   : > { %v5979_v36 = vpop.permute.xlu1 %5978 }
 0x370   : > { %6014 = vst.msk [vmem:[#allocation4 + $0x68] sm:$0xff] %vm6000_vm15, %v5979_v36 }
 0x371   : > { %v7344_v4 = vpop.permute.xlu0 %7343 }
 0x373   : > { %v6300_v46 = vpop.permute.xlu1 %6299 }
 0x374   : > { %6335 = vst.msk [vmem:[#allocation4 + $0x68] sm:$0xff] %vm6321_vm0, %v6300_v46 }
 0x375   : > { %v5259_v55 = vpop.permute.xlu0 %5258  ;;  %v7394_v25 = vld [vmem:[#allocation4 + $0x60] sm:$0xff] }
 0x376   : > { %8604 = vmatprep.mubr.msk.bf16.mxu1 %vm7434_vm7, %v7394_v25 }
 0x377   : > { %v6478_v8 = vpop.permute.xlu1 %6477 }
 0x378   : > { %6513 = vst.msk [vmem:[#allocation4 + $0x68] sm:$0xff] %vm6499_vm3, %v6478_v8 }
 0x379   : > { %v5436_v31 = vpop.permute.xlu0 %5435 }
 0x37b   : > { %v7023_v15 = vpop.permute.xlu1 %7022 }
 0x37c   : > { %7058 = vst.msk [vmem:[#allocation4 + $0x68] sm:$0xff] %vm7044_vm4, %v7023_v15 }
 0x37d   : > { %v5981_v35 = vpop.permute.xlu0 %5980  ;;  %7379 = vst.msk [vmem:[#allocation4 + $0x68] sm:$0xff] %vm11206_vm1, %v7344_v4 }
 0x381   : > { %v4938_v1 = vpop.permute.xlu1 %4937  ;;  %v6302_v39 = vpop.permute.xlu0 %6301 }
 0x382   : > { %4972 = vst.msk [vmem:[#allocation4 + $0x70] sm:$0xff] %vm4957_vm12, %v4938_v1 }
 0x383   : > { %5293 = vst.msk [vmem:[#allocation4 + $0x70] sm:$0xff] %vm5278_vm13, %v5259_v55 }
 0x384   : > { %5470 = vst.msk [vmem:[#allocation4 + $0x70] sm:$0xff] %vm5455_vm14, %v5436_v31  ;;  %v7395_v11 = vld [vmem:[#allocation4 + $0x68] sm:$0xff] }
 0x385   : > { %6015 = vst.msk [vmem:[#allocation4 + $0x70] sm:$0xff] %vm6000_vm15, %v5981_v35  ;;  %v6480_v18 = vpop.permute.xlu0 %6479  ;;  %8605 = vmatmul.mubr.msk.bf16.gmra.mrb[24].mxu1 %vm7434_vm7, %v7395_v11 }
 0x386   : > { %6336 = vst.msk [vmem:[#allocation4 + $0x70] sm:$0xff] %vm6321_vm0, %v6302_v39 }
 0x387   : > { %v4940_v32 = vpop.permute.xlu1 %4939  ;;  %6514 = vst.msk [vmem:[#allocation4 + $0x70] sm:$0xff] %vm6499_vm3, %v6480_v18 }
 0x388   : > { %4973 = vst.msk [vmem:[#allocation4 + $0x78] sm:$0xff] %vm4957_vm12, %v4940_v32  ;;  %vm11215_vm12 = vmmov %vm11206_vm1 }
 0x38b   : > { %v5261_v12 = vpop.permute.xlu1 %5260 }
 0x38c   : > { %5294 = vst.msk [vmem:[#allocation4 + $0x78] sm:$0xff] %vm5278_vm13, %v5261_v12 }
 0x38d   : > { %v7025_v50 = vpop.permute.xlu0 %7024 }
 0x38e   : > { %7059 = vst.msk [vmem:[#allocation4 + $0x70] sm:$0xff] %vm7044_vm4, %v7025_v50 }
 0x38f   : > { %v5438_v14 = vpop.permute.xlu1 %5437 }
 0x390   : > { %5471 = vst.msk [vmem:[#allocation4 + $0x78] sm:$0xff] %vm5455_vm14, %v5438_v14 }
 0x391   : > { %v7346_v63 = vpop.permute.xlu0 %7345 }
 0x392   : > { %7380 = vst.msk [vmem:[#allocation4 + $0x70] sm:$0xff] %vm11214_vm8, %v7346_v63 }
 0x393   : > { %v5983_v26 = vpop.permute.xlu1 %5982 }
 0x394   : > { %6016 = vst.msk [vmem:[#allocation4 + $0x78] sm:$0xff] %vm6000_vm15, %v5983_v26 }
 0x397   : > { %v6304_v30 = vpop.permute.xlu1 %6303 }
 0x398   : > { %6337 = vst.msk [vmem:[#allocation4 + $0x78] sm:$0xff] %vm6321_vm0, %v6304_v30 }
 0x399   : > { %v7396_v24 = vld [vmem:[#allocation4 + $0x70] sm:$0xff] }
 0x39a   : > { %8608 = vmatprep.mubr.msk.bf16.mxu1 %vm7434_vm7, %v7396_v24 }
 0x39b   : > { %v6482_v59 = vpop.permute.xlu1 %6481 }
 0x39c   : > { %6515 = vst.msk [vmem:[#allocation4 + $0x78] sm:$0xff] %vm6499_vm3, %v6482_v59 }
 0x39f   : > { %v7027_v22 = vpop.permute.xlu1 %7026 }
 0x3a0   : > { %7060 = vst.msk [vmem:[#allocation4 + $0x78] sm:$0xff] %vm7044_vm4, %v7027_v22 }
 0x3a3   : > { %v7348_v41 = vpop.permute.xlu1 %7347 }
 0x3a4   : > { %7381 = vst.msk [vmem:[#allocation4 + $0x78] sm:$0xff] %vm11215_vm12, %v7348_v41 }
 0x3a6   : > { %v8582_v21 = vpop.f32.mrb[0].mxu1 }
 0x3a7   : > { %7650 = vst [vmem:[%s11151_s6 + $0x10] sm:$0xff] %v8582_v21  ;;  %v7521_v53 = vpop.f32.mrb[1].mxu1 }
 0x3a8   : > { %7648 = vst [vmem:[%s11151_s6] sm:$0xff] %v7521_v53  ;;  %v8583_v34 = vpop.f32.mrb[2].mxu1 }
 0x3a9   : > { %7651 = vst [vmem:[%s11151_s6 + $0x18] sm:$0xff] %v8583_v34  ;;  %v7524_v40 = vpop.f32.mrb[3].mxu1 }
 0x3aa   : > { %7649 = vst [vmem:[%s11151_s6 + $0x8] sm:$0xff] %v7524_v40 }
 0x3ab   : > { %v7397_v44 = vld [vmem:[#allocation4 + $0x78] sm:$0xff] }
 0x3ac   : > { %8609 = vmatmul.mubr.msk.bf16.gmra.mrb[28].mxu1 %vm7434_vm7, %v7397_v44 }
 0x3ae   : > { %v8586_v17 = vpop.f32.mrb[4].mxu1 }
 0x3af   : > { %7654 = vst [vmem:[%s11151_s6 + $0x30] sm:$0xff] %v8586_v17  ;;  %v7537_v20 = vpop.f32.mrb[5].mxu1 }
 0x3b0   : > { %7652 = vst [vmem:[%s11151_s6 + $0x20] sm:$0xff] %v7537_v20  ;;  %v8587_v45 = vpop.f32.mrb[6].mxu1 }
 0x3b1   : > { %7655 = vst [vmem:[%s11151_s6 + $0x38] sm:$0xff] %v8587_v45  ;;  %v7540_v51 = vpop.f32.mrb[7].mxu1 }
 0x3b2   : > { %7653 = vst [vmem:[%s11151_s6 + $0x28] sm:$0xff] %v7540_v51 }
 0x3ce   : > { %v8590_v49 = vpop.f32.mrb[8].mxu1 }
 0x3cf   : > { %7658 = vst [vmem:[%s11151_s6 + $0x50] sm:$0xff] %v8590_v49  ;;  %v7553_v48 = vpop.f32.mrb[9].mxu1 }
 0x3d0   : > { %7656 = vst [vmem:[%s11151_s6 + $0x40] sm:$0xff] %v7553_v48  ;;  %v8591_v23 = vpop.f32.mrb[10].mxu1 }
 0x3d1   : > { %7659 = vst [vmem:[%s11151_s6 + $0x58] sm:$0xff] %v8591_v23  ;;  %v7556_v43 = vpop.f32.mrb[11].mxu1 }
 0x3d2   : > { %7657 = vst [vmem:[%s11151_s6 + $0x48] sm:$0xff] %v7556_v43 }
 0x3fd   : > { %v8594_v42 = vpop.f32.mrb[12].mxu1 }
 0x3fe   : > { %7662 = vst [vmem:[%s11151_s6 + $0x70] sm:$0xff] %v8594_v42  ;;  %v7569_v61 = vpop.f32.mrb[13].mxu1 }
 0x3ff   : > { %7660 = vst [vmem:[%s11151_s6 + $0x60] sm:$0xff] %v7569_v61  ;;  %v8595_v0 = vpop.f32.mrb[14].mxu1 }
 0x400   : > { %7663 = vst [vmem:[%s11151_s6 + $0x78] sm:$0xff] %v8595_v0  ;;  %v7572_v33 = vpop.f32.mrb[15].mxu1 }
 0x401   : > { %7661 = vst [vmem:[%s11151_s6 + $0x68] sm:$0xff] %v7572_v33 }
 0x428   : > { %v8598_v47 = vpop.f32.mrb[16].mxu1 }
 0x429   : > { %7666 = vst [vmem:[%s11151_s6 + $0x90] sm:$0xff] %v8598_v47  ;;  %v7585_v60 = vpop.f32.mrb[17].mxu1 }
 0x42a   : > { %7664 = vst [vmem:[%s11151_s6 + $0x80] sm:$0xff] %v7585_v60  ;;  %v8599_v62 = vpop.f32.mrb[18].mxu1 }
 0x42b   : > { %7667 = vst [vmem:[%s11151_s6 + $0x98] sm:$0xff] %v8599_v62  ;;  %v7588_v16 = vpop.f32.mrb[19].mxu1 }
 0x42c   : > { %7665 = vst [vmem:[%s11151_s6 + $0x88] sm:$0xff] %v7588_v16 }
 0x43b   : > { %v8602_v3 = vpop.f32.mrb[20].mxu1 }
 0x43c   : > { %7670 = vst [vmem:[%s11151_s6 + $0xb0] sm:$0xff] %v8602_v3  ;;  %v7601_v5 = vpop.f32.mrb[21].mxu1 }
 0x43d   : > { %7668 = vst [vmem:[%s11151_s6 + $0xa0] sm:$0xff] %v7601_v5  ;;  %v8603_v52 = vpop.f32.mrb[22].mxu1 }
 0x43e   : > { %7671 = vst [vmem:[%s11151_s6 + $0xb8] sm:$0xff] %v8603_v52  ;;  %v7604_v6 = vpop.f32.mrb[23].mxu1 }
 0x43f   : > { %7669 = vst [vmem:[%s11151_s6 + $0xa8] sm:$0xff] %v7604_v6 }
 0x458   : > { %v8606_v27 = vpop.f32.mrb[24].mxu1 }
 0x459   : > { %7674 = vst [vmem:[%s11151_s6 + $0xd0] sm:$0xff] %v8606_v27  ;;  %v7617_v10 = vpop.f32.mrb[25].mxu1 }
 0x45a   : > { %7672 = vst [vmem:[%s11151_s6 + $0xc0] sm:$0xff] %v7617_v10  ;;  %v8607_v29 = vpop.f32.mrb[26].mxu1 }
 0x45b   : > { %7675 = vst [vmem:[%s11151_s6 + $0xd8] sm:$0xff] %v8607_v29  ;;  %v7620_v28 = vpop.f32.mrb[27].mxu1 }
 0x45c   : > { %7673 = vst [vmem:[%s11151_s6 + $0xc8] sm:$0xff] %v7620_v28 }
 0x47f   : > { %v8610_v7 = vpop.f32.mrb[28].mxu1 }
 0x480   : > { %7678 = vst [vmem:[%s11151_s6 + $0xf0] sm:$0xff] %v8610_v7  ;;  %v7633_v54 = vpop.f32.mrb[29].mxu1 }
 0x481   : > { %7676 = vst [vmem:[%s11151_s6 + $0xe0] sm:$0xff] %v7633_v54  ;;  %v8611_v56 = vpop.f32.mrb[30].mxu1 }
 0x482   : > { %7679 = vst [vmem:[%s11151_s6 + $0xf8] sm:$0xff] %v8611_v56  ;;  %v7636_v9 = vpop.f32.mrb[31].mxu1 }
 0x483   : > { %7677 = vst [vmem:[%s11151_s6 + $0xe8] sm:$0xff] %v7636_v9 }
 0x484 PF: > { %s15_s18 = sadd.s32 1, %s8752_s18  }
 0x485   : > { %p12_p4 = scmp.ge.s32.totalorder %s15_s18, 4  }
 0x487   :  { %14 = sbr.rel (!%p12_p4) target bundleno = 1 (0x1), region = 74 }

</bundles_post_ra>
